<compile_context>
chip_gen: v7x
topology: tpu7x:2x2x1
jax: 0.10.0
libtpu: 0.0.40
codegen_flags: <defaults>
</compile_context>

<pallas_src>
import functools

import jax
import jax.numpy as jnp
import numpy as np
from jax.experimental import pallas as pl
from jax.experimental.pallas import tpu as pltpu


# ---------------------------------------------------------------------------
# Fused Decoder kernel (B batched images per grid step, fully VMEM resident)
# ---------------------------------------------------------------------------

def decoder_kernel(x_ref, rowsel_ref, ctw_ref, ctb_ref,
                   convW_ref, convb_ref, fc1w_ref, fc1b_ref,
                   fc2w_ref, fc2b_ref, pool_ref, poolT_ref,
                   rowpool_ref, rowpoolT_ref, o_ref, *, B, H2, W2, C):
    """Whole Decoder forward for B images stacked along sublanes.

    x_ref      : (B*H, W*Cin)        input rows, lane-dense per image row
    rowsel_ref : (2, B*H2, B*H)      pixel-shuffle row interleave (block-diag)
    ctw_ref    : (W*Cin, 2*W2*C)     packed ConvTranspose weights (kh concat)
    ctb_ref    : (1, W2*C)           ConvTranspose bias tiled over W2
    convW_ref  : (2, 2, 3*W2*C, W2*C) banded 3x3 conv weights, row taps on K
    convb_ref  : (2, 2, 1, W2*C)     conv biases tiled over W2
    fc1w/fc1b  : (2, C, CHP) / (2, 1, CHP)   SE squeeze fc (hidden padded)
    fc2w/fc2b  : (2, CHP, C) / (2, 1, C)     SE excite fc
    pool_ref   : (W2*C, C)           lane-dense -> per-channel pooling
    poolT_ref  : (C, W2*C)           per-channel -> lane-dense broadcast
    rowpool_ref: (B, B*H2)           per-image row pooling
    rowpoolT_ref:(B*H2, B)           per-image row broadcast
    o_ref      : (B*H2, W2*C)        lane-dense output slab
    """
    f32 = jnp.float32
    W2C = W2 * C
    BH2 = B * H2
    inv_hw = 1.0 / (H2 * W2)

    x = x_ref[...]                                              # (B*H, W*Cin)

    # --- ConvTranspose2d(k=2, s=2): one fused matmul + row interleave -------
    ctw = ctw_ref[...].astype(f32)                              # (W*Cin, 2*W2C)
    up = jnp.dot(x, ctw, preferred_element_type=f32)            # (B*H, 2*W2C)
    rs0 = rowsel_ref[0].astype(f32)
    rs1 = rowsel_ref[1].astype(f32)
    z = (jnp.dot(rs0, up[:, :W2C], preferred_element_type=f32)
         + jnp.dot(rs1, up[:, W2C:], preferred_element_type=f32)
         + ctb_ref[...])                                        # (BH2, W2C)

    # --- masks zeroing row taps that would cross an image boundary ----------
    rows = jax.lax.broadcasted_iota(jnp.int32, (BH2, 1), 0)
    mask_up = (rows % H2 != 0).astype(f32)                      # row above exists
    mask_dn = (rows % H2 != H2 - 1).astype(f32)                 # row below exists

    # --- SE helper matrices (hoisted out of the block loop) -----------------
    pool_m = pool_ref[...].astype(f32)                          # (W2C, C)
    poolT_m = poolT_ref[...].astype(f32)                        # (C, W2C)
    rowpool_m = rowpool_ref[...].astype(f32)                    # (B, BH2)
    rowpoolT_m = rowpoolT_ref[...].astype(f32)                  # (BH2, B)

    def conv3x3(v, b_i, c_i):
        # +/-1 row shifts on the XLU (sublane roll), masked at image edges,
        # lane-concatenated so the whole conv is ONE wide-K MXU matmul.
        vu = pltpu.roll(v, 1, 0) * mask_up                      # v[i-1]
        vd = pltpu.roll(v, BH2 - 1, 0) * mask_dn                # v[i+1]
        stk = jnp.concatenate([vu, v, vd], axis=1)              # (BH2, 3*W2C)
        w = convW_ref[b_i, c_i].astype(f32)                     # (3*W2C, W2C)
        return (jnp.dot(stk, w, preferred_element_type=f32)
                + convb_ref[b_i, c_i])                          # (BH2, W2C)

    # --- two SeRes blocks ----------------------------------------------------
    for b_i in range(2):
        h = jnp.maximum(conv3x3(z, b_i, 0), 0.0)
        h = conv3x3(h, b_i, 1)

        # squeeze: per-image global average pool -> (B, C)
        persum = jnp.dot(rowpool_m, h, preferred_element_type=f32)   # (B, W2C)
        s = jnp.dot(persum, pool_m, preferred_element_type=f32) * inv_hw
        # excite
        g = jnp.maximum(jnp.dot(s, fc1w_ref[b_i], preferred_element_type=f32)
                        + fc1b_ref[b_i], 0.0)                   # (B, CHP)
        g = jax.nn.sigmoid(jnp.dot(g, fc2w_ref[b_i], preferred_element_type=f32)
                           + fc2b_ref[b_i])                     # (B, C)
        # broadcast gate back to the lane-dense layout; gate + residual + relu
        gd = jnp.dot(g, poolT_m, preferred_element_type=f32)          # (B, W2C)
        gate = jnp.dot(rowpoolT_m, gd, preferred_element_type=f32)    # (BH2, W2C)
        z = jnp.maximum(h * gate + z, 0.0)

    o_ref[...] = z


# ---------------------------------------------------------------------------
# Host-side weight packing (eager numpy; done once, batch-size independent)
# ---------------------------------------------------------------------------

def pack_decoder_params(params, H, W):
    ct_w = np.asarray(params["ct_w"], np.float32)      # (Cin, C, 2, 2)
    ct_b = np.asarray(params["ct_b"], np.float32)      # (C,)
    Cin, C = ct_w.shape[0], ct_w.shape[1]
    H2, W2 = 2 * H, 2 * W
    W2C = W2 * C
    Ch = np.asarray(params["res1"]["fc1_w"]).shape[1]
    CHP = ((Ch + 127) // 128) * 128                     # pad SE hidden to lanes

    # ConvTranspose weights: block placement so x_row @ ctw yields lane-dense
    # output rows; the two kh taps are concatenated along lanes (one matmul).
    ctw = np.zeros((2, W * Cin, W2C), np.float32)
    for kh in range(2):
        for w in range(W):
            for kw in range(2):
                ctw[kh, w * Cin:(w + 1) * Cin,
                    (2 * w + kw) * C:(2 * w + kw + 1) * C] = ct_w[:, :, kh, kw]
    ctw_cat = np.concatenate([ctw[0], ctw[1]], axis=1)  # (W*Cin, 2*W2C)
    ctb = np.tile(ct_b, W2)[None, :]                    # (1, W2*C)

    # 3x3 conv weights expanded to banded matrices; the three row taps are
    # stacked along K -> (3*W2C, W2C) so each conv is a single matmul.
    convW = np.zeros((2, 2, 3, W2C, W2C), np.float32)
    convb = np.zeros((2, 2, 1, W2C), np.float32)
    fc1w = np.zeros((2, C, CHP), np.float32)
    fc1b = np.zeros((2, 1, CHP), np.float32)
    fc2w = np.zeros((2, CHP, C), np.float32)
    fc2b = np.zeros((2, 1, C), np.float32)
    for b_i, name in enumerate(("res1", "res2")):
        rp = params[name]
        for c_i, (wk, bk) in enumerate((("conv1_w", "conv1_b"),
                                        ("conv2_w", "conv2_b"))):
            w = np.asarray(rp[wk], np.float32)          # (3, 3, C, C) HWIO
            for di in range(3):
                for dj in range(3):
                    for j2 in range(W2):
                        j = j2 + dj - 1
                        if 0 <= j < W2:
                            convW[b_i, c_i, di,
                                  j * C:(j + 1) * C,
                                  j2 * C:(j2 + 1) * C] = w[di, dj]
            convb[b_i, c_i, 0] = np.tile(np.asarray(rp[bk], np.float32), W2)
        fc1w[b_i, :, :Ch] = np.asarray(rp["fc1_w"], np.float32)
        fc1b[b_i, 0, :Ch] = np.asarray(rp["fc1_b"], np.float32)
        fc2w[b_i, :Ch, :] = np.asarray(rp["fc2_w"], np.float32)
        fc2b[b_i, 0, :] = np.asarray(rp["fc2_b"], np.float32)
    convW = convW.reshape(2, 2, 3 * W2C, W2C)

    # Channel pooling / broadcast matrices for the lane-dense layout (0/1).
    pool = np.tile(np.eye(C, dtype=np.float32), (W2, 1))    # (W2*C, C)
    poolT = np.ascontiguousarray(pool.T)                    # (C, W2*C)

    bf = lambda a: jnp.asarray(a, dtype=jnp.bfloat16)       # exact for 0/1;
    f32 = lambda a: jnp.asarray(a, dtype=jnp.float32)       # MXU rounds to
    return {                                                # bf16 anyway.
        "C": C, "Cin": Cin, "CHP": CHP,
        "ctw": bf(ctw_cat), "ctb": f32(ctb),
        "convW": bf(convW), "convb": f32(convb),
        "fc1w": f32(fc1w), "fc1b": f32(fc1b),
        "fc2w": f32(fc2w), "fc2b": f32(fc2b),
        "pool": bf(pool), "poolT": bf(poolT),
    }


def _build_batch_structs(B, H, C):
    """B-dependent 0/1 structural matrices (row interleave / per-image pool)."""
    H2 = 2 * H
    BH, BH2 = B * H, B * H2
    rowsel = np.zeros((2, BH2, BH), np.float32)
    for kh in range(2):
        for b in range(B):
            for h in range(H):
                rowsel[kh, b * H2 + 2 * h + kh, b * H + h] = 1.0
    rowpool = np.zeros((B, BH2), np.float32)
    for b in range(B):
        rowpool[b, b * H2:(b + 1) * H2] = 1.0
    bf = lambda a: jnp.asarray(a, dtype=jnp.bfloat16)
    return bf(rowsel), bf(rowpool), bf(np.ascontiguousarray(rowpool.T))


# ---------------------------------------------------------------------------
# Pallas-call wrapper (NCHW in / NCHW out, like the PyTorch module)
# ---------------------------------------------------------------------------

_TARGET_ROWS = 256   # fill v6e/v7x 256-wide MXU M dim; 2 passes of 128 on v5e


def decoder_forward(x_nchw, pk):
    N, Cin, H, W = x_nchw.shape
    C, CHP = pk["C"], pk["CHP"]
    H2, W2 = 2 * H, 2 * W
    W2C, WCin = W2 * C, W * Cin

    # Batch B images per grid step so the conv matmuls have B*H2 rows
    # (up to _TARGET_ROWS), without padding past the available batch.
    b_max = max(1, _TARGET_ROWS // H2)
    G = -(-N // b_max)
    B = -(-N // G)
    N_pad = G * B
    if G > 1 and (B * H) % 8 != 0:     # keep block sublane dims 8-aligned
        G, B, N_pad = 1, N, N
    BH, BH2 = B * H, B * H2

    rowsel, rowpool, rowpoolT = _build_batch_structs(B, H, C)

    # NCHW -> lane-dense rows (row b*H + h holds image b, input row h)
    x_lane = jnp.transpose(x_nchw, (0, 2, 3, 1)).reshape(N, H, WCin)
    if N_pad != N:
        pad = jnp.zeros((N_pad - N, H, WCin), x_lane.dtype)
        x_lane = jnp.concatenate([x_lane, pad], axis=0)
    x2d = x_lane.reshape(N_pad * H, WCin)

    kern = functools.partial(decoder_kernel, B=B, H2=H2, W2=W2, C=C)

    def build(single_buffer_weights):
        wmode = (pl.Buffered(buffer_count=1) if single_buffer_weights else None)

        def const_spec(shape):
            nd = len(shape)
            idx = lambda g, _nd=nd: (0,) * _nd
            if wmode is None:
                return pl.BlockSpec(shape, idx)
            return pl.BlockSpec(shape, idx, pipeline_mode=wmode)

        return pl.pallas_call(
            kern,
            out_shape=jax.ShapeDtypeStruct((N_pad * H2, W2C), jnp.float32),
            grid=(G,),
            in_specs=[
                pl.BlockSpec((BH, WCin), lambda g: (g, 0)),    # x (per step)
                const_spec((2, BH2, BH)),                      # rowsel
                const_spec((WCin, 2 * W2C)),                   # ctw
                const_spec((1, W2C)),                          # ctb
                const_spec((2, 2, 3 * W2C, W2C)),              # convW
                const_spec((2, 2, 1, W2C)),                    # convb
                const_spec((2, C, CHP)),                       # fc1w
                const_spec((2, 1, CHP)),                       # fc1b
                const_spec((2, CHP, C)),                       # fc2w
                const_spec((2, 1, C)),                         # fc2b
                const_spec((W2C, C)),                          # pool
                const_spec((C, W2C)),                          # poolT
                const_spec((B, BH2)),                          # rowpool
                const_spec((BH2, B)),                          # rowpoolT
            ],
            out_specs=pl.BlockSpec((BH2, W2C), lambda g: (g, 0)),
            compiler_params=pltpu.CompilerParams(
                dimension_semantics=("parallel",),
                vmem_limit_bytes=32 * 1024 * 1024),
        )

    args = (x2d, rowsel, pk["ctw"], pk["ctb"], pk["convW"], pk["convb"],
            pk["fc1w"], pk["fc1b"], pk["fc2w"], pk["fc2b"],
            pk["pool"], pk["poolT"], rowpool, rowpoolT)

    try:
        out2d = build(True)(*args)
    except Exception:
        # pipeline_mode=pl.Buffered(1) unsupported on this JAX build; fall back
        # to default (double) buffering of the constant weights.
        out2d = build(False)(*args)

    out = out2d.reshape(N_pad, H2, W2, C)[:N]
    return jnp.transpose(out, (0, 3, 1, 2))                    # -> NCHW


# ---------------------------------------------------------------------------
# Pure-JAX reference (f32 HIGHEST precision, for correctness check)
# ---------------------------------------------------------------------------

def ref_forward(x_nchw, params):
    HI = jax.lax.Precision.HIGHEST
    x = jnp.transpose(x_nchw, (0, 2, 3, 1))
    N, H, W, Cin = x.shape
    ct_w, ct_b = params["ct_w"], params["ct_b"]
    Cout = ct_w.shape[1]
    # ConvTranspose2d(k=2, s=2): out[n,2h+k,2w+l,o] = sum_c x[n,h,w,c] W[c,o,k,l] + b
    y = jnp.einsum("nhwc,cokl->nhkwlo", x, ct_w,
                   precision=HI).reshape(N, 2 * H, 2 * W, Cout)
    y = y + ct_b

    def conv_ref(z, w, b):
        return jax.lax.conv_general_dilated(
            z, w, window_strides=(1, 1), padding=((1, 1), (1, 1)),
            dimension_numbers=("NHWC", "HWIO", "NHWC"), precision=HI) + b

    def seres_ref(z, p):
        h = jax.nn.relu(conv_ref(z, p["conv1_w"], p["conv1_b"]))
        h = conv_ref(h, p["conv2_w"], p["conv2_b"])
        s = jnp.mean(h, axis=(1, 2))                        # (N, C)
        g = jax.nn.relu(jnp.dot(s, p["fc1_w"], precision=HI) + p["fc1_b"])
        g = jax.nn.sigmoid(jnp.dot(g, p["fc2_w"], precision=HI) + p["fc2_b"])
        return jax.nn.relu(h * g[:, None, None, :] + z)

    y = seres_ref(y, params["res1"])
    y = seres_ref(y, params["res2"])
    return jnp.transpose(y, (0, 3, 1, 2))


# ---------------------------------------------------------------------------
# Deterministic parameter init
# ---------------------------------------------------------------------------

def init_params(key, x1_c, out_c, reduction=8):
    ch = max(out_c // reduction, 1)
    keys = jax.random.split(key, 18)
    ki = iter(keys)

    def nrm(k, shape, scale=0.1):
        return scale * jax.random.normal(k, shape, jnp.float32)

    def res_params():
        return {
            "conv1_w": nrm(next(ki), (3, 3, out_c, out_c)),
            "conv1_b": nrm(next(ki), (out_c,)),
            "conv2_w": nrm(next(ki), (3, 3, out_c, out_c)),
            "conv2_b": nrm(next(ki), (out_c,)),
            "fc1_w": nrm(next(ki), (out_c, ch)),
            "fc1_b": nrm(next(ki), (ch,)),
            "fc2_w": nrm(next(ki), (ch, out_c)),
            "fc2_b": nrm(next(ki), (out_c,)),
        }

    return {
        "ct_w": nrm(next(ki), (x1_c, out_c, 2, 2)),   # PyTorch (in, out, kh, kw)
        "ct_b": nrm(next(ki), (out_c,)),
        "res1": res_params(),
        "res2": res_params(),
    }


# ---------------------------------------------------------------------------
# Main
# ---------------------------------------------------------------------------

if __name__ == "__main__":
    N, X1_C, OUT_C, H, W = 2, 4, 16, 8, 8   # output spatial = 16x16

    key = jax.random.PRNGKey(0)
    kx, kp = jax.random.split(key)
    x = jax.random.normal(kx, (N, X1_C, H, W), jnp.float32)   # NCHW like PyTorch
    params = init_params(kp, X1_C, OUT_C, reduction=8)

    packed = pack_decoder_params(params, H, W)

    out = jax.block_until_ready(decoder_forward(x, packed))
    assert out.shape == (N, OUT_C, 2 * H, 2 * W), out.shape

    ref = jax.block_until_ready(ref_forward(x, params))
    # Kernel runs the MXU at default (bf16-operand) precision with bf16-stored
    # packed weights (per the performance review); reference is f32-HIGHEST,
    # so the comparison uses a bf16-appropriate tolerance.
    np.testing.assert_allclose(np.asarray(out), np.asarray(ref),
                               rtol=3e-2, atol=3e-2)

    print("KERNEL_OK")
</pallas_src>

<mosaic_0001>
module attributes {stable_mosaic.version = 11 : i64} {
  func.func @decoder_kernel(%arg0: i32, %arg1: memref<16x32xf32, #tpu.memory_space<vmem>>, %arg2: memref<2x32x16xbf16, #tpu.memory_space<vmem>>, %arg3: memref<32x512xbf16, #tpu.memory_space<vmem>>, %arg4: memref<1x256xf32, #tpu.memory_space<vmem>>, %arg5: memref<2x2x768x256xbf16, #tpu.memory_space<vmem>>, %arg6: memref<2x2x1x256xf32, #tpu.memory_space<vmem>>, %arg7: memref<2x16x128xf32, #tpu.memory_space<vmem>>, %arg8: memref<2x1x128xf32, #tpu.memory_space<vmem>>, %arg9: memref<2x128x16xf32, #tpu.memory_space<vmem>>, %arg10: memref<2x1x16xf32, #tpu.memory_space<vmem>>, %arg11: memref<256x16xbf16, #tpu.memory_space<vmem>>, %arg12: memref<16x256xbf16, #tpu.memory_space<vmem>>, %arg13: memref<2x32xbf16, #tpu.memory_space<vmem>>, %arg14: memref<32x2xbf16, #tpu.memory_space<vmem>>, %arg15: memref<32x256xf32, #tpu.memory_space<vmem>>) attributes {dimension_semantics = [#tpu.dimension_semantics<parallel>], iteration_bounds = array<i64: 1>, scalar_prefetch = 0 : i64, scratch_operands = 0 : i64, tpu.core_type = #tpu.core_type<tc>, window_params = [{transform_indices = @transform_0, window_bounds = array<i64: 16, 32>}, {pipeline_mode = #tpu.pipeline_mode<synchronous>, transform_indices = @transform_1, window_bounds = array<i64: 2, 32, 16>}, {pipeline_mode = #tpu.pipeline_mode<synchronous>, transform_indices = @transform_2, window_bounds = array<i64: 32, 512>}, {pipeline_mode = #tpu.pipeline_mode<synchronous>, transform_indices = @transform_3, window_bounds = array<i64: 1, 256>}, {pipeline_mode = #tpu.pipeline_mode<synchronous>, transform_indices = @transform_4, window_bounds = array<i64: 2, 2, 768, 256>}, {pipeline_mode = #tpu.pipeline_mode<synchronous>, transform_indices = @transform_5, window_bounds = array<i64: 2, 2, 1, 256>}, {pipeline_mode = #tpu.pipeline_mode<synchronous>, transform_indices = @transform_6, window_bounds = array<i64: 2, 16, 128>}, {pipeline_mode = #tpu.pipeline_mode<synchronous>, transform_indices = @transform_7, window_bounds = array<i64: 2, 1, 128>}, {pipeline_mode = #tpu.pipeline_mode<synchronous>, transform_indices = @transform_8, window_bounds = array<i64: 2, 128, 16>}, {pipeline_mode = #tpu.pipeline_mode<synchronous>, transform_indices = @transform_9, window_bounds = array<i64: 2, 1, 16>}, {pipeline_mode = #tpu.pipeline_mode<synchronous>, transform_indices = @transform_10, window_bounds = array<i64: 256, 16>}, {pipeline_mode = #tpu.pipeline_mode<synchronous>, transform_indices = @transform_11, window_bounds = array<i64: 16, 256>}, {pipeline_mode = #tpu.pipeline_mode<synchronous>, transform_indices = @transform_12, window_bounds = array<i64: 2, 32>}, {pipeline_mode = #tpu.pipeline_mode<synchronous>, transform_indices = @transform_13, window_bounds = array<i64: 32, 2>}, {transform_indices = @transform_14, window_bounds = array<i64: 32, 256>}]} {
    %c0 = arith.constant 0 : index
    %c0_0 = arith.constant 0 : index
    %0 = vector.load %arg1[%c0, %c0_0] : memref<16x32xf32, #tpu.memory_space<vmem>>, vector<16x32xf32>
    %c0_1 = arith.constant 0 : index
    %c0_2 = arith.constant 0 : index
    %1 = vector.load %arg3[%c0_1, %c0_2] : memref<32x512xbf16, #tpu.memory_space<vmem>>, vector<32x512xbf16>
    %2 = arith.extf %1 : vector<32x512xbf16> to vector<32x512xf32>
    %cst = arith.constant dense<0.000000e+00> : vector<16x512xf32>
    %3 = tpu.matmul %0, %2, %cst {dimension_numbers = #tpu.dot_dimension_numbers<[1], [0], [0], [1], [0, 0, 1, 1], [], []>} : vector<16x32xf32>, vector<32x512xf32>, vector<16x512xf32> -> vector<16x512xf32>
    %c0_3 = arith.constant 0 : index
    %c0_4 = arith.constant 0 : index
    %c0_5 = arith.constant 0 : index
    %4 = vector.load %arg2[%c0_3, %c0_4, %c0_5] : memref<2x32x16xbf16, #tpu.memory_space<vmem>>, vector<1x32x16xbf16>
    %5 = vector.shape_cast %4 : vector<1x32x16xbf16> to vector<32x16xbf16>
    %6 = arith.extf %5 : vector<32x16xbf16> to vector<32x16xf32>
    %c1 = arith.constant 1 : index
    %c0_6 = arith.constant 0 : index
    %c0_7 = arith.constant 0 : index
    %7 = vector.load %arg2[%c1, %c0_6, %c0_7] : memref<2x32x16xbf16, #tpu.memory_space<vmem>>, vector<1x32x16xbf16>
    %8 = vector.shape_cast %7 : vector<1x32x16xbf16> to vector<32x16xbf16>
    %9 = arith.extf %8 : vector<32x16xbf16> to vector<32x16xf32>
    %10 = vector.extract_strided_slice %3 {offsets = [0, 0], sizes = [16, 256], strides = [1, 1]} : vector<16x512xf32> to vector<16x256xf32>
    %cst_8 = arith.constant dense<0.000000e+00> : vector<32x256xf32>
    %11 = tpu.matmul %6, %10, %cst_8 {dimension_numbers = #tpu.dot_dimension_numbers<[1], [0], [0], [1], [0, 0, 1, 1], [], []>} : vector<32x16xf32>, vector<16x256xf32>, vector<32x256xf32> -> vector<32x256xf32>
    %12 = vector.extract_strided_slice %3 {offsets = [0, 256], sizes = [16, 256], strides = [1, 1]} : vector<16x512xf32> to vector<16x256xf32>
    %cst_9 = arith.constant dense<0.000000e+00> : vector<32x256xf32>
    %13 = tpu.matmul %9, %12, %cst_9 {dimension_numbers = #tpu.dot_dimension_numbers<[1], [0], [0], [1], [0, 0, 1, 1], [], []>} : vector<32x16xf32>, vector<16x256xf32>, vector<32x256xf32> -> vector<32x256xf32>
    %14 = arith.addf %11, %13 : vector<32x256xf32>
    %c0_10 = arith.constant 0 : index
    %c0_11 = arith.constant 0 : index
    %15 = vector.load %arg4[%c0_10, %c0_11] : memref<1x256xf32, #tpu.memory_space<vmem>>, vector<1x256xf32>
    %16 = vector.broadcast %15 : vector<1x256xf32> to vector<32x256xf32>
    %17 = arith.addf %14, %16 : vector<32x256xf32>
    %18 = tpu.iota {dimensions = array<i32: 0>} : vector<32x1xi32>
    %c16_i32 = arith.constant 16 : i32
    %c0_i32 = arith.constant 0 : i32
    %19 = arith.cmpi eq, %c16_i32, %c0_i32 : i32
    %c1_i32 = arith.constant 1 : i32
    %20 = arith.select %19, %c1_i32, %c16_i32 : i32
    %21 = vector.broadcast %20 : i32 to vector<32x1xi32>
    %22 = arith.remsi %18, %21 : vector<32x1xi32>
    %c0_i32_12 = arith.constant 0 : i32
    %23 = vector.broadcast %c0_i32_12 : i32 to vector<32x1xi32>
    %24 = arith.cmpi ne, %22, %23 : vector<32x1xi32>
    %c0_i32_13 = arith.constant 0 : i32
    %25 = vector.broadcast %c0_i32_13 : i32 to vector<32x1xi32>
    %26 = arith.cmpi slt, %22, %25 : vector<32x1xi32>
    %c0_i32_14 = arith.constant 0 : i32
    %27 = arith.cmpi slt, %20, %c0_i32_14 : i32
    %28 = vector.broadcast %27 : i1 to vector<32x1xi1>
    %29 = vector.broadcast %28 : vector<32x1xi1> to vector<32x1xi1>
    %30 = arith.xori %26, %29 : vector<32x1xi1>
    %31 = arith.andi %30, %24 : vector<32x1xi1>
    %32 = vector.broadcast %20 : i32 to vector<32x1xi32>
    %33 = arith.addi %22, %32 : vector<32x1xi32>
    %34 = arith.select %31, %33, %22 : vector<32x1xi1>, vector<32x1xi32>
    %c0_i32_15 = arith.constant 0 : i32
    %35 = vector.broadcast %c0_i32_15 : i32 to vector<32x1xi32>
    %36 = arith.cmpi ne, %34, %35 : vector<32x1xi32>
    %37 = arith.extui %36 : vector<32x1xi1> to vector<32x1xi32>
    %38 = arith.sitofp %37 : vector<32x1xi32> to vector<32x1xf32>
    %c16_i32_16 = arith.constant 16 : i32
    %c0_i32_17 = arith.constant 0 : i32
    %39 = arith.cmpi eq, %c16_i32_16, %c0_i32_17 : i32
    %c1_i32_18 = arith.constant 1 : i32
    %40 = arith.select %39, %c1_i32_18, %c16_i32_16 : i32
    %41 = vector.broadcast %40 : i32 to vector<32x1xi32>
    %42 = arith.remsi %18, %41 : vector<32x1xi32>
    %c0_i32_19 = arith.constant 0 : i32
    %43 = vector.broadcast %c0_i32_19 : i32 to vector<32x1xi32>
    %44 = arith.cmpi ne, %42, %43 : vector<32x1xi32>
    %c0_i32_20 = arith.constant 0 : i32
    %45 = vector.broadcast %c0_i32_20 : i32 to vector<32x1xi32>
    %46 = arith.cmpi slt, %42, %45 : vector<32x1xi32>
    %c0_i32_21 = arith.constant 0 : i32
    %47 = arith.cmpi slt, %40, %c0_i32_21 : i32
    %48 = vector.broadcast %47 : i1 to vector<32x1xi1>
    %49 = vector.broadcast %48 : vector<32x1xi1> to vector<32x1xi1>
    %50 = arith.xori %46, %49 : vector<32x1xi1>
    %51 = arith.andi %50, %44 : vector<32x1xi1>
    %52 = vector.broadcast %40 : i32 to vector<32x1xi32>
    %53 = arith.addi %42, %52 : vector<32x1xi32>
    %54 = arith.select %51, %53, %42 : vector<32x1xi1>, vector<32x1xi32>
    %c15_i32 = arith.constant 15 : i32
    %55 = vector.broadcast %c15_i32 : i32 to vector<32x1xi32>
    %56 = arith.cmpi ne, %54, %55 : vector<32x1xi32>
    %57 = arith.extui %56 : vector<32x1xi1> to vector<32x1xi32>
    %58 = arith.sitofp %57 : vector<32x1xi32> to vector<32x1xf32>
    %c0_22 = arith.constant 0 : index
    %c0_23 = arith.constant 0 : index
    %59 = vector.load %arg11[%c0_22, %c0_23] : memref<256x16xbf16, #tpu.memory_space<vmem>>, vector<256x16xbf16>
    %60 = arith.extf %59 : vector<256x16xbf16> to vector<256x16xf32>
    %c0_24 = arith.constant 0 : index
    %c0_25 = arith.constant 0 : index
    %61 = vector.load %arg12[%c0_24, %c0_25] : memref<16x256xbf16, #tpu.memory_space<vmem>>, vector<16x256xbf16>
    %62 = arith.extf %61 : vector<16x256xbf16> to vector<16x256xf32>
    %c0_26 = arith.constant 0 : index
    %c0_27 = arith.constant 0 : index
    %63 = vector.load %arg13[%c0_26, %c0_27] : memref<2x32xbf16, #tpu.memory_space<vmem>>, vector<2x32xbf16>
    %64 = arith.extf %63 : vector<2x32xbf16> to vector<2x32xf32>
    %c0_28 = arith.constant 0 : index
    %c0_29 = arith.constant 0 : index
    %65 = vector.load %arg14[%c0_28, %c0_29] : memref<32x2xbf16, #tpu.memory_space<vmem>>, vector<32x2xbf16>
    %66 = arith.extf %65 : vector<32x2xbf16> to vector<32x2xf32>
    %c1_i32_30 = arith.constant 1 : i32
    %67 = tpu.dynamic_rotate %17 by %c1_i32_30 dim 0 : vector<32x256xf32>, i32 -> vector<32x256xf32>
    %68 = vector.broadcast %38 : vector<32x1xf32> to vector<32x256xf32>
    %69 = arith.mulf %67, %68 : vector<32x256xf32>
    %c31_i32 = arith.constant 31 : i32
    %70 = tpu.dynamic_rotate %17 by %c31_i32 dim 0 : vector<32x256xf32>, i32 -> vector<32x256xf32>
    %71 = vector.broadcast %58 : vector<32x1xf32> to vector<32x256xf32>
    %72 = arith.mulf %70, %71 : vector<32x256xf32>
    %73 = tpu.concatenate %69, %17, %72 in 1 : vector<32x256xf32>, vector<32x256xf32>, vector<32x256xf32> -> vector<32x768xf32>
    %c0_31 = arith.constant 0 : index
    %c0_32 = arith.constant 0 : index
    %c0_33 = arith.constant 0 : index
    %c0_34 = arith.constant 0 : index
    %74 = vector.load %arg5[%c0_31, %c0_32, %c0_33, %c0_34] : memref<2x2x768x256xbf16, #tpu.memory_space<vmem>>, vector<1x1x768x256xbf16>
    %75 = vector.shape_cast %74 : vector<1x1x768x256xbf16> to vector<768x256xbf16>
    %76 = arith.extf %75 : vector<768x256xbf16> to vector<768x256xf32>
    %cst_35 = arith.constant dense<0.000000e+00> : vector<32x256xf32>
    %77 = tpu.matmul %73, %76, %cst_35 {dimension_numbers = #tpu.dot_dimension_numbers<[1], [0], [0], [1], [0, 0, 1, 1], [], []>} : vector<32x768xf32>, vector<768x256xf32>, vector<32x256xf32> -> vector<32x256xf32>
    %c0_36 = arith.constant 0 : index
    %c0_37 = arith.constant 0 : index
    %c0_38 = arith.constant 0 : index
    %c0_39 = arith.constant 0 : index
    %78 = vector.load %arg6[%c0_36, %c0_37, %c0_38, %c0_39] : memref<2x2x1x256xf32, #tpu.memory_space<vmem>>, vector<1x1x1x256xf32>
    %79 = vector.shape_cast %78 : vector<1x1x1x256xf32> to vector<1x256xf32>
    %80 = vector.broadcast %79 : vector<1x256xf32> to vector<32x256xf32>
    %81 = arith.addf %77, %80 : vector<32x256xf32>
    %cst_40 = arith.constant 0.000000e+00 : f32
    %82 = vector.broadcast %cst_40 : f32 to vector<32x256xf32>
    %83 = arith.maximumf %81, %82 : vector<32x256xf32>
    %c1_i32_41 = arith.constant 1 : i32
    %84 = tpu.dynamic_rotate %83 by %c1_i32_41 dim 0 : vector<32x256xf32>, i32 -> vector<32x256xf32>
    %85 = vector.broadcast %38 : vector<32x1xf32> to vector<32x256xf32>
    %86 = arith.mulf %84, %85 : vector<32x256xf32>
    %c31_i32_42 = arith.constant 31 : i32
    %87 = tpu.dynamic_rotate %83 by %c31_i32_42 dim 0 : vector<32x256xf32>, i32 -> vector<32x256xf32>
    %88 = vector.broadcast %58 : vector<32x1xf32> to vector<32x256xf32>
    %89 = arith.mulf %87, %88 : vector<32x256xf32>
    %90 = tpu.concatenate %86, %83, %89 in 1 : vector<32x256xf32>, vector<32x256xf32>, vector<32x256xf32> -> vector<32x768xf32>
    %c0_43 = arith.constant 0 : index
    %c1_44 = arith.constant 1 : index
    %c0_45 = arith.constant 0 : index
    %c0_46 = arith.constant 0 : index
    %91 = vector.load %arg5[%c0_43, %c1_44, %c0_45, %c0_46] : memref<2x2x768x256xbf16, #tpu.memory_space<vmem>>, vector<1x1x768x256xbf16>
    %92 = vector.shape_cast %91 : vector<1x1x768x256xbf16> to vector<768x256xbf16>
    %93 = arith.extf %92 : vector<768x256xbf16> to vector<768x256xf32>
    %cst_47 = arith.constant dense<0.000000e+00> : vector<32x256xf32>
    %94 = tpu.matmul %90, %93, %cst_47 {dimension_numbers = #tpu.dot_dimension_numbers<[1], [0], [0], [1], [0, 0, 1, 1], [], []>} : vector<32x768xf32>, vector<768x256xf32>, vector<32x256xf32> -> vector<32x256xf32>
    %c0_48 = arith.constant 0 : index
    %c1_49 = arith.constant 1 : index
    %c0_50 = arith.constant 0 : index
    %c0_51 = arith.constant 0 : index
    %95 = vector.load %arg6[%c0_48, %c1_49, %c0_50, %c0_51] : memref<2x2x1x256xf32, #tpu.memory_space<vmem>>, vector<1x1x1x256xf32>
    %96 = vector.shape_cast %95 : vector<1x1x1x256xf32> to vector<1x256xf32>
    %97 = vector.broadcast %96 : vector<1x256xf32> to vector<32x256xf32>
    %98 = arith.addf %94, %97 : vector<32x256xf32>
    %cst_52 = arith.constant dense<0.000000e+00> : vector<2x256xf32>
    %99 = tpu.matmul %64, %98, %cst_52 {dimension_numbers = #tpu.dot_dimension_numbers<[1], [0], [0], [1], [0, 0, 1, 1], [], []>} : vector<2x32xf32>, vector<32x256xf32>, vector<2x256xf32> -> vector<2x256xf32>
    %cst_53 = arith.constant dense<0.000000e+00> : vector<2x16xf32>
    %100 = tpu.matmul %99, %60, %cst_53 {dimension_numbers = #tpu.dot_dimension_numbers<[1], [0], [0], [1], [0, 0, 1, 1], [], []>} : vector<2x256xf32>, vector<256x16xf32>, vector<2x16xf32> -> vector<2x16xf32>
    %cst_54 = arith.constant 3.906250e-03 : f32
    %101 = vector.broadcast %cst_54 : f32 to vector<2x16xf32>
    %102 = arith.mulf %100, %101 : vector<2x16xf32>
    %c0_55 = arith.constant 0 : index
    %c0_56 = arith.constant 0 : index
    %c0_57 = arith.constant 0 : index
    %103 = vector.load %arg7[%c0_55, %c0_56, %c0_57] : memref<2x16x128xf32, #tpu.memory_space<vmem>>, vector<1x16x128xf32>
    %104 = vector.shape_cast %103 : vector<1x16x128xf32> to vector<16x128xf32>
    %cst_58 = arith.constant dense<0.000000e+00> : vector<2x128xf32>
    %105 = tpu.matmul %102, %104, %cst_58 {dimension_numbers = #tpu.dot_dimension_numbers<[1], [0], [0], [1], [0, 0, 1, 1], [], []>} : vector<2x16xf32>, vector<16x128xf32>, vector<2x128xf32> -> vector<2x128xf32>
    %c0_59 = arith.constant 0 : index
    %c0_60 = arith.constant 0 : index
    %c0_61 = arith.constant 0 : index
    %106 = vector.load %arg8[%c0_59, %c0_60, %c0_61] : memref<2x1x128xf32, #tpu.memory_space<vmem>>, vector<1x1x128xf32>
    %107 = vector.shape_cast %106 : vector<1x1x128xf32> to vector<1x128xf32>
    %108 = vector.broadcast %107 : vector<1x128xf32> to vector<2x128xf32>
    %109 = arith.addf %105, %108 : vector<2x128xf32>
    %cst_62 = arith.constant 0.000000e+00 : f32
    %110 = vector.broadcast %cst_62 : f32 to vector<2x128xf32>
    %111 = arith.maximumf %109, %110 : vector<2x128xf32>
    %c0_63 = arith.constant 0 : index
    %c0_64 = arith.constant 0 : index
    %c0_65 = arith.constant 0 : index
    %112 = vector.load %arg9[%c0_63, %c0_64, %c0_65] : memref<2x128x16xf32, #tpu.memory_space<vmem>>, vector<1x128x16xf32>
    %113 = vector.shape_cast %112 : vector<1x128x16xf32> to vector<128x16xf32>
    %cst_66 = arith.constant dense<0.000000e+00> : vector<2x16xf32>
    %114 = tpu.matmul %111, %113, %cst_66 {dimension_numbers = #tpu.dot_dimension_numbers<[1], [0], [0], [1], [0, 0, 1, 1], [], []>} : vector<2x128xf32>, vector<128x16xf32>, vector<2x16xf32> -> vector<2x16xf32>
    %c0_67 = arith.constant 0 : index
    %c0_68 = arith.constant 0 : index
    %c0_69 = arith.constant 0 : index
    %115 = vector.load %arg10[%c0_67, %c0_68, %c0_69] : memref<2x1x16xf32, #tpu.memory_space<vmem>>, vector<1x1x16xf32>
    %116 = vector.shape_cast %115 : vector<1x1x16xf32> to vector<1x16xf32>
    %117 = vector.broadcast %116 : vector<1x16xf32> to vector<2x16xf32>
    %118 = arith.addf %114, %117 : vector<2x16xf32>
    %119 = arith.negf %118 : vector<2x16xf32>
    %120 = math.exp %119 : vector<2x16xf32>
    %cst_70 = arith.constant 1.000000e+00 : f32
    %121 = vector.broadcast %cst_70 : f32 to vector<2x16xf32>
    %122 = arith.addf %121, %120 : vector<2x16xf32>
    %123 = arith.divf %121, %122 : vector<2x16xf32>
    %cst_71 = arith.constant dense<0.000000e+00> : vector<2x256xf32>
    %124 = tpu.matmul %123, %62, %cst_71 {dimension_numbers = #tpu.dot_dimension_numbers<[1], [0], [0], [1], [0, 0, 1, 1], [], []>} : vector<2x16xf32>, vector<16x256xf32>, vector<2x256xf32> -> vector<2x256xf32>
    %cst_72 = arith.constant dense<0.000000e+00> : vector<32x256xf32>
    %125 = tpu.matmul %66, %124, %cst_72 {dimension_numbers = #tpu.dot_dimension_numbers<[1], [0], [0], [1], [0, 0, 1, 1], [], []>} : vector<32x2xf32>, vector<2x256xf32>, vector<32x256xf32> -> vector<32x256xf32>
    %126 = arith.mulf %98, %125 : vector<32x256xf32>
    %127 = arith.addf %126, %17 : vector<32x256xf32>
    %cst_73 = arith.constant 0.000000e+00 : f32
    %128 = vector.broadcast %cst_73 : f32 to vector<32x256xf32>
    %129 = arith.maximumf %127, %128 : vector<32x256xf32>
    %c1_i32_74 = arith.constant 1 : i32
    %130 = tpu.dynamic_rotate %129 by %c1_i32_74 dim 0 : vector<32x256xf32>, i32 -> vector<32x256xf32>
    %131 = vector.broadcast %38 : vector<32x1xf32> to vector<32x256xf32>
    %132 = arith.mulf %130, %131 : vector<32x256xf32>
    %c31_i32_75 = arith.constant 31 : i32
    %133 = tpu.dynamic_rotate %129 by %c31_i32_75 dim 0 : vector<32x256xf32>, i32 -> vector<32x256xf32>
    %134 = vector.broadcast %58 : vector<32x1xf32> to vector<32x256xf32>
    %135 = arith.mulf %133, %134 : vector<32x256xf32>
    %136 = tpu.concatenate %132, %129, %135 in 1 : vector<32x256xf32>, vector<32x256xf32>, vector<32x256xf32> -> vector<32x768xf32>
    %c1_76 = arith.constant 1 : index
    %c0_77 = arith.constant 0 : index
    %c0_78 = arith.constant 0 : index
    %c0_79 = arith.constant 0 : index
    %137 = vector.load %arg5[%c1_76, %c0_77, %c0_78, %c0_79] : memref<2x2x768x256xbf16, #tpu.memory_space<vmem>>, vector<1x1x768x256xbf16>
    %138 = vector.shape_cast %137 : vector<1x1x768x256xbf16> to vector<768x256xbf16>
    %139 = arith.extf %138 : vector<768x256xbf16> to vector<768x256xf32>
    %cst_80 = arith.constant dense<0.000000e+00> : vector<32x256xf32>
    %140 = tpu.matmul %136, %139, %cst_80 {dimension_numbers = #tpu.dot_dimension_numbers<[1], [0], [0], [1], [0, 0, 1, 1], [], []>} : vector<32x768xf32>, vector<768x256xf32>, vector<32x256xf32> -> vector<32x256xf32>
    %c1_81 = arith.constant 1 : index
    %c0_82 = arith.constant 0 : index
    %c0_83 = arith.constant 0 : index
    %c0_84 = arith.constant 0 : index
    %141 = vector.load %arg6[%c1_81, %c0_82, %c0_83, %c0_84] : memref<2x2x1x256xf32, #tpu.memory_space<vmem>>, vector<1x1x1x256xf32>
    %142 = vector.shape_cast %141 : vector<1x1x1x256xf32> to vector<1x256xf32>
    %143 = vector.broadcast %142 : vector<1x256xf32> to vector<32x256xf32>
    %144 = arith.addf %140, %143 : vector<32x256xf32>
    %cst_85 = arith.constant 0.000000e+00 : f32
    %145 = vector.broadcast %cst_85 : f32 to vector<32x256xf32>
    %146 = arith.maximumf %144, %145 : vector<32x256xf32>
    %c1_i32_86 = arith.constant 1 : i32
    %147 = tpu.dynamic_rotate %146 by %c1_i32_86 dim 0 : vector<32x256xf32>, i32 -> vector<32x256xf32>
    %148 = vector.broadcast %38 : vector<32x1xf32> to vector<32x256xf32>
    %149 = arith.mulf %147, %148 : vector<32x256xf32>
    %c31_i32_87 = arith.constant 31 : i32
    %150 = tpu.dynamic_rotate %146 by %c31_i32_87 dim 0 : vector<32x256xf32>, i32 -> vector<32x256xf32>
    %151 = vector.broadcast %58 : vector<32x1xf32> to vector<32x256xf32>
    %152 = arith.mulf %150, %151 : vector<32x256xf32>
    %153 = tpu.concatenate %149, %146, %152 in 1 : vector<32x256xf32>, vector<32x256xf32>, vector<32x256xf32> -> vector<32x768xf32>
    %c1_88 = arith.constant 1 : index
    %c1_89 = arith.constant 1 : index
    %c0_90 = arith.constant 0 : index
    %c0_91 = arith.constant 0 : index
    %154 = vector.load %arg5[%c1_88, %c1_89, %c0_90, %c0_91] : memref<2x2x768x256xbf16, #tpu.memory_space<vmem>>, vector<1x1x768x256xbf16>
    %155 = vector.shape_cast %154 : vector<1x1x768x256xbf16> to vector<768x256xbf16>
    %156 = arith.extf %155 : vector<768x256xbf16> to vector<768x256xf32>
    %cst_92 = arith.constant dense<0.000000e+00> : vector<32x256xf32>
    %157 = tpu.matmul %153, %156, %cst_92 {dimension_numbers = #tpu.dot_dimension_numbers<[1], [0], [0], [1], [0, 0, 1, 1], [], []>} : vector<32x768xf32>, vector<768x256xf32>, vector<32x256xf32> -> vector<32x256xf32>
    %c1_93 = arith.constant 1 : index
    %c1_94 = arith.constant 1 : index
    %c0_95 = arith.constant 0 : index
    %c0_96 = arith.constant 0 : index
    %158 = vector.load %arg6[%c1_93, %c1_94, %c0_95, %c0_96] : memref<2x2x1x256xf32, #tpu.memory_space<vmem>>, vector<1x1x1x256xf32>
    %159 = vector.shape_cast %158 : vector<1x1x1x256xf32> to vector<1x256xf32>
    %160 = vector.broadcast %159 : vector<1x256xf32> to vector<32x256xf32>
    %161 = arith.addf %157, %160 : vector<32x256xf32>
    %cst_97 = arith.constant dense<0.000000e+00> : vector<2x256xf32>
    %162 = tpu.matmul %64, %161, %cst_97 {dimension_numbers = #tpu.dot_dimension_numbers<[1], [0], [0], [1], [0, 0, 1, 1], [], []>} : vector<2x32xf32>, vector<32x256xf32>, vector<2x256xf32> -> vector<2x256xf32>
    %cst_98 = arith.constant dense<0.000000e+00> : vector<2x16xf32>
    %163 = tpu.matmul %162, %60, %cst_98 {dimension_numbers = #tpu.dot_dimension_numbers<[1], [0], [0], [1], [0, 0, 1, 1], [], []>} : vector<2x256xf32>, vector<256x16xf32>, vector<2x16xf32> -> vector<2x16xf32>
    %cst_99 = arith.constant 3.906250e-03 : f32
    %164 = vector.broadcast %cst_99 : f32 to vector<2x16xf32>
    %165 = arith.mulf %163, %164 : vector<2x16xf32>
    %c1_100 = arith.constant 1 : index
    %c0_101 = arith.constant 0 : index
    %c0_102 = arith.constant 0 : index
    %166 = vector.load %arg7[%c1_100, %c0_101, %c0_102] : memref<2x16x128xf32, #tpu.memory_space<vmem>>, vector<1x16x128xf32>
    %167 = vector.shape_cast %166 : vector<1x16x128xf32> to vector<16x128xf32>
    %cst_103 = arith.constant dense<0.000000e+00> : vector<2x128xf32>
    %168 = tpu.matmul %165, %167, %cst_103 {dimension_numbers = #tpu.dot_dimension_numbers<[1], [0], [0], [1], [0, 0, 1, 1], [], []>} : vector<2x16xf32>, vector<16x128xf32>, vector<2x128xf32> -> vector<2x128xf32>
    %c1_104 = arith.constant 1 : index
    %c0_105 = arith.constant 0 : index
    %c0_106 = arith.constant 0 : index
    %169 = vector.load %arg8[%c1_104, %c0_105, %c0_106] : memref<2x1x128xf32, #tpu.memory_space<vmem>>, vector<1x1x128xf32>
    %170 = vector.shape_cast %169 : vector<1x1x128xf32> to vector<1x128xf32>
    %171 = vector.broadcast %170 : vector<1x128xf32> to vector<2x128xf32>
    %172 = arith.addf %168, %171 : vector<2x128xf32>
    %cst_107 = arith.constant 0.000000e+00 : f32
    %173 = vector.broadcast %cst_107 : f32 to vector<2x128xf32>
    %174 = arith.maximumf %172, %173 : vector<2x128xf32>
    %c1_108 = arith.constant 1 : index
    %c0_109 = arith.constant 0 : index
    %c0_110 = arith.constant 0 : index
    %175 = vector.load %arg9[%c1_108, %c0_109, %c0_110] : memref<2x128x16xf32, #tpu.memory_space<vmem>>, vector<1x128x16xf32>
    %176 = vector.shape_cast %175 : vector<1x128x16xf32> to vector<128x16xf32>
    %cst_111 = arith.constant dense<0.000000e+00> : vector<2x16xf32>
    %177 = tpu.matmul %174, %176, %cst_111 {dimension_numbers = #tpu.dot_dimension_numbers<[1], [0], [0], [1], [0, 0, 1, 1], [], []>} : vector<2x128xf32>, vector<128x16xf32>, vector<2x16xf32> -> vector<2x16xf32>
    %c1_112 = arith.constant 1 : index
    %c0_113 = arith.constant 0 : index
    %c0_114 = arith.constant 0 : index
    %178 = vector.load %arg10[%c1_112, %c0_113, %c0_114] : memref<2x1x16xf32, #tpu.memory_space<vmem>>, vector<1x1x16xf32>
    %179 = vector.shape_cast %178 : vector<1x1x16xf32> to vector<1x16xf32>
    %180 = vector.broadcast %179 : vector<1x16xf32> to vector<2x16xf32>
    %181 = arith.addf %177, %180 : vector<2x16xf32>
    %182 = arith.negf %181 : vector<2x16xf32>
    %183 = math.exp %182 : vector<2x16xf32>
    %cst_115 = arith.constant 1.000000e+00 : f32
    %184 = vector.broadcast %cst_115 : f32 to vector<2x16xf32>
    %185 = arith.addf %184, %183 : vector<2x16xf32>
    %186 = arith.divf %184, %185 : vector<2x16xf32>
    %cst_116 = arith.constant dense<0.000000e+00> : vector<2x256xf32>
    %187 = tpu.matmul %186, %62, %cst_116 {dimension_numbers = #tpu.dot_dimension_numbers<[1], [0], [0], [1], [0, 0, 1, 1], [], []>} : vector<2x16xf32>, vector<16x256xf32>, vector<2x256xf32> -> vector<2x256xf32>
    %cst_117 = arith.constant dense<0.000000e+00> : vector<32x256xf32>
    %188 = tpu.matmul %66, %187, %cst_117 {dimension_numbers = #tpu.dot_dimension_numbers<[1], [0], [0], [1], [0, 0, 1, 1], [], []>} : vector<32x2xf32>, vector<2x256xf32>, vector<32x256xf32> -> vector<32x256xf32>
    %189 = arith.mulf %161, %188 : vector<32x256xf32>
    %190 = arith.addf %189, %129 : vector<32x256xf32>
    %cst_118 = arith.constant 0.000000e+00 : f32
    %191 = vector.broadcast %cst_118 : f32 to vector<32x256xf32>
    %192 = arith.maximumf %190, %191 : vector<32x256xf32>
    %c0_119 = arith.constant 0 : index
    %c0_120 = arith.constant 0 : index
    %193 = vector.load %arg15[%c0_119, %c0_120] : memref<32x256xf32, #tpu.memory_space<vmem>>, vector<32x256xf32>
    tpu.vector_store %arg15[%c0_119, %c0_120], %192 {strides = array<i32>} : memref<32x256xf32, #tpu.memory_space<vmem>>, vector<32x256xf32>,
    return
  }
  func.func @transform_0(%arg0: i32) -> (i32, i32) {
    %c0_i32 = arith.constant 0 : i32
    %c0_i32_0 = arith.constant 0 : i32
    return %arg0, %c0_i32 : i32, i32
  }
  func.func @transform_1(%arg0: i32) -> (i32, i32, i32) {
    %c0_i32 = arith.constant 0 : i32
    %c0_i32_0 = arith.constant 0 : i32
    %c0_i32_1 = arith.constant 0 : i32
    %c0_i32_2 = arith.constant 0 : i32
    return %c0_i32, %c0_i32_0, %c0_i32_1 : i32, i32, i32
  }
  func.func @transform_2(%arg0: i32) -> (i32, i32) {
    %c0_i32 = arith.constant 0 : i32
    %c0_i32_0 = arith.constant 0 : i32
    %c0_i32_1 = arith.constant 0 : i32
    return %c0_i32, %c0_i32_0 : i32, i32
  }
  func.func @transform_3(%arg0: i32) -> (i32, i32) {
    %c0_i32 = arith.constant 0 : i32
    %c0_i32_0 = arith.constant 0 : i32
    %c0_i32_1 = arith.constant 0 : i32
    return %c0_i32, %c0_i32_0 : i32, i32
  }
  func.func @transform_4(%arg0: i32) -> (i32, i32, i32, i32) {
    %c0_i32 = arith.constant 0 : i32
    %c0_i32_0 = arith.constant 0 : i32
    %c0_i32_1 = arith.constant 0 : i32
    %c0_i32_2 = arith.constant 0 : i32
    %c0_i32_3 = arith.constant 0 : i32
    return %c0_i32, %c0_i32_0, %c0_i32_1, %c0_i32_2 : i32, i32, i32, i32
  }
  func.func @transform_5(%arg0: i32) -> (i32, i32, i32, i32) {
    %c0_i32 = arith.constant 0 : i32
    %c0_i32_0 = arith.constant 0 : i32
    %c0_i32_1 = arith.constant 0 : i32
    %c0_i32_2 = arith.constant 0 : i32
    %c0_i32_3 = arith.constant 0 : i32
    return %c0_i32, %c0_i32_0, %c0_i32_1, %c0_i32_2 : i32, i32, i32, i32
  }
  func.func @transform_6(%arg0: i32) -> (i32, i32, i32) {
    %c0_i32 = arith.constant 0 : i32
    %c0_i32_0 = arith.constant 0 : i32
    %c0_i32_1 = arith.constant 0 : i32
    %c0_i32_2 = arith.constant 0 : i32
    return %c0_i32, %c0_i32_0, %c0_i32_1 : i32, i32, i32
  }
  func.func @transform_7(%arg0: i32) -> (i32, i32, i32) {
    %c0_i32 = arith.constant 0 : i32
    %c0_i32_0 = arith.constant 0 : i32
    %c0_i32_1 = arith.constant 0 : i32
    %c0_i32_2 = arith.constant 0 : i32
    return %c0_i32, %c0_i32_0, %c0_i32_1 : i32, i32, i32
  }
  func.func @transform_8(%arg0: i32) -> (i32, i32, i32) {
    %c0_i32 = arith.constant 0 : i32
    %c0_i32_0 = arith.constant 0 : i32
    %c0_i32_1 = arith.constant 0 : i32
    %c0_i32_2 = arith.constant 0 : i32
    return %c0_i32, %c0_i32_0, %c0_i32_1 : i32, i32, i32
  }
  func.func @transform_9(%arg0: i32) -> (i32, i32, i32) {
    %c0_i32 = arith.constant 0 : i32
    %c0_i32_0 = arith.constant 0 : i32
    %c0_i32_1 = arith.constant 0 : i32
    %c0_i32_2 = arith.constant 0 : i32
    return %c0_i32, %c0_i32_0, %c0_i32_1 : i32, i32, i32
  }
  func.func @transform_10(%arg0: i32) -> (i32, i32) {
    %c0_i32 = arith.constant 0 : i32
    %c0_i32_0 = arith.constant 0 : i32
    %c0_i32_1 = arith.constant 0 : i32
    return %c0_i32, %c0_i32_0 : i32, i32
  }
  func.func @transform_11(%arg0: i32) -> (i32, i32) {
    %c0_i32 = arith.constant 0 : i32
    %c0_i32_0 = arith.constant 0 : i32
    %c0_i32_1 = arith.constant 0 : i32
    return %c0_i32, %c0_i32_0 : i32, i32
  }
  func.func @transform_12(%arg0: i32) -> (i32, i32) {
    %c0_i32 = arith.constant 0 : i32
    %c0_i32_0 = arith.constant 0 : i32
    %c0_i32_1 = arith.constant 0 : i32
    return %c0_i32, %c0_i32_0 : i32, i32
  }
  func.func @transform_13(%arg0: i32) -> (i32, i32) {
    %c0_i32 = arith.constant 0 : i32
    %c0_i32_0 = arith.constant 0 : i32
    %c0_i32_1 = arith.constant 0 : i32
    return %c0_i32, %c0_i32_0 : i32, i32
  }
  func.func @transform_14(%arg0: i32) -> (i32, i32) {
    %c0_i32 = arith.constant 0 : i32
    %c0_i32_0 = arith.constant 0 : i32
    return %arg0, %c0_i32 : i32, i32
  }
}

module attributes {stable_mosaic.version = 11 : i64} {
  func.func @decoder_kernel(%arg0: i32, %arg1: memref<16x32xf32, #tpu.memory_space<vmem>>, %arg2: memref<2x32x16xbf16, #tpu.memory_space<vmem>>, %arg3: memref<32x512xbf16, #tpu.memory_space<vmem>>, %arg4: memref<1x256xf32, #tpu.memory_space<vmem>>, %arg5: memref<2x2x768x256xbf16, #tpu.memory_space<vmem>>, %arg6: memref<2x2x1x256xf32, #tpu.memory_space<vmem>>, %arg7: memref<2x16x128xf32, #tpu.memory_space<vmem>>, %arg8: memref<2x1x128xf32, #tpu.memory_space<vmem>>, %arg9: memref<2x128x16xf32, #tpu.memory_space<vmem>>, %arg10: memref<2x1x16xf32, #tpu.memory_space<vmem>>, %arg11: memref<256x16xbf16, #tpu.memory_space<vmem>>, %arg12: memref<16x256xbf16, #tpu.memory_space<vmem>>, %arg13: memref<2x32xbf16, #tpu.memory_space<vmem>>, %arg14: memref<32x2xbf16, #tpu.memory_space<vmem>>, %arg15: memref<32x256xf32, #tpu.memory_space<vmem>>) attributes {dimension_semantics = [#tpu.dimension_semantics<parallel>], iteration_bounds = array<i64: 1>, scalar_prefetch = 0 : i64, scratch_operands = 0 : i64, tpu.core_type = #tpu.core_type<tc>, window_params = [{transform_indices = @transform_0, window_bounds = array<i64: 16, 32>}, {pipeline_mode = #tpu.pipeline_mode<synchronous>, transform_indices = @transform_1, window_bounds = array<i64: 2, 32, 16>}, {pipeline_mode = #tpu.pipeline_mode<synchronous>, transform_indices = @transform_2, window_bounds = array<i64: 32, 512>}, {pipeline_mode = #tpu.pipeline_mode<synchronous>, transform_indices = @transform_3, window_bounds = array<i64: 1, 256>}, {pipeline_mode = #tpu.pipeline_mode<synchronous>, transform_indices = @transform_4, window_bounds = array<i64: 2, 2, 768, 256>}, {pipeline_mode = #tpu.pipeline_mode<synchronous>, transform_indices = @transform_5, window_bounds = array<i64: 2, 2, 1, 256>}, {pipeline_mode = #tpu.pipeline_mode<synchronous>, transform_indices = @transform_6, window_bounds = array<i64: 2, 16, 128>}, {pipeline_mode = #tpu.pipeline_mode<synchronous>, transform_indices = @transform_7, window_bounds = array<i64: 2, 1, 128>}, {pipeline_mode = #tpu.pipeline_mode<synchronous>, transform_indices = @transform_8, window_bounds = array<i64: 2, 128, 16>}, {pipeline_mode = #tpu.pipeline_mode<synchronous>, transform_indices = @transform_9, window_bounds = array<i64: 2, 1, 16>}, {pipeline_mode = #tpu.pipeline_mode<synchronous>, transform_indices = @transform_10, window_bounds = array<i64: 256, 16>}, {pipeline_mode = #tpu.pipeline_mode<synchronous>, transform_indices = @transform_11, window_bounds = array<i64: 16, 256>}, {pipeline_mode = #tpu.pipeline_mode<synchronous>, transform_indices = @transform_12, window_bounds = array<i64: 2, 32>}, {pipeline_mode = #tpu.pipeline_mode<synchronous>, transform_indices = @transform_13, window_bounds = array<i64: 32, 2>}, {transform_indices = @transform_14, window_bounds = array<i64: 32, 256>}]} {
    %c0 = arith.constant 0 : index
    %c0_0 = arith.constant 0 : index
    %0 = vector.load %arg1[%c0, %c0_0] : memref<16x32xf32, #tpu.memory_space<vmem>>, vector<16x32xf32>
    %c0_1 = arith.constant 0 : index
    %c0_2 = arith.constant 0 : index
    %1 = vector.load %arg3[%c0_1, %c0_2] : memref<32x512xbf16, #tpu.memory_space<vmem>>, vector<32x512xbf16>
    %2 = arith.extf %1 : vector<32x512xbf16> to vector<32x512xf32>
    %cst = arith.constant dense<0.000000e+00> : vector<16x512xf32>
    %3 = tpu.matmul %0, %2, %cst {dimension_numbers = #tpu.dot_dimension_numbers<[1], [0], [0], [1], [0, 0, 1, 1], [], []>} : vector<16x32xf32>, vector<32x512xf32>, vector<16x512xf32> -> vector<16x512xf32>
    %c0_3 = arith.constant 0 : index
    %c0_4 = arith.constant 0 : index
    %c0_5 = arith.constant 0 : index
    %4 = vector.load %arg2[%c0_3, %c0_4, %c0_5] : memref<2x32x16xbf16, #tpu.memory_space<vmem>>, vector<1x32x16xbf16>
    %5 = vector.shape_cast %4 : vector<1x32x16xbf16> to vector<32x16xbf16>
    %6 = arith.extf %5 : vector<32x16xbf16> to vector<32x16xf32>
    %c1 = arith.constant 1 : index
    %c0_6 = arith.constant 0 : index
    %c0_7 = arith.constant 0 : index
    %7 = vector.load %arg2[%c1, %c0_6, %c0_7] : memref<2x32x16xbf16, #tpu.memory_space<vmem>>, vector<1x32x16xbf16>
    %8 = vector.shape_cast %7 : vector<1x32x16xbf16> to vector<32x16xbf16>
    %9 = arith.extf %8 : vector<32x16xbf16> to vector<32x16xf32>
    %10 = vector.extract_strided_slice %3 {offsets = [0, 0], sizes = [16, 256], strides = [1, 1]} : vector<16x512xf32> to vector<16x256xf32>
    %cst_8 = arith.constant dense<0.000000e+00> : vector<32x256xf32>
    %11 = tpu.matmul %6, %10, %cst_8 {dimension_numbers = #tpu.dot_dimension_numbers<[1], [0], [0], [1], [0, 0, 1, 1], [], []>} : vector<32x16xf32>, vector<16x256xf32>, vector<32x256xf32> -> vector<32x256xf32>
    %12 = vector.extract_strided_slice %3 {offsets = [0, 256], sizes = [16, 256], strides = [1, 1]} : vector<16x512xf32> to vector<16x256xf32>
    %cst_9 = arith.constant dense<0.000000e+00> : vector<32x256xf32>
    %13 = tpu.matmul %9, %12, %cst_9 {dimension_numbers = #tpu.dot_dimension_numbers<[1], [0], [0], [1], [0, 0, 1, 1], [], []>} : vector<32x16xf32>, vector<16x256xf32>, vector<32x256xf32> -> vector<32x256xf32>
    %14 = arith.addf %11, %13 : vector<32x256xf32>
    %c0_10 = arith.constant 0 : index
    %c0_11 = arith.constant 0 : index
    %15 = vector.load %arg4[%c0_10, %c0_11] : memref<1x256xf32, #tpu.memory_space<vmem>>, vector<1x256xf32>
    %16 = vector.broadcast %15 : vector<1x256xf32> to vector<32x256xf32>
    %17 = arith.addf %14, %16 : vector<32x256xf32>
    %18 = tpu.iota {dimensions = array<i32: 0>} : vector<32x1xi32>
    %c16_i32 = arith.constant 16 : i32
    %c0_i32 = arith.constant 0 : i32
    %19 = arith.cmpi eq, %c16_i32, %c0_i32 : i32
    %c1_i32 = arith.constant 1 : i32
    %20 = arith.select %19, %c1_i32, %c16_i32 : i32
    %21 = vector.broadcast %20 : i32 to vector<32x1xi32>
    %22 = arith.remsi %18, %21 : vector<32x1xi32>
    %c0_i32_12 = arith.constant 0 : i32
    %23 = vector.broadcast %c0_i32_12 : i32 to vector<32x1xi32>
    %24 = arith.cmpi ne, %22, %23 : vector<32x1xi32>
    %c0_i32_13 = arith.constant 0 : i32
    %25 = vector.broadcast %c0_i32_13 : i32 to vector<32x1xi32>
    %26 = arith.cmpi slt, %22, %25 : vector<32x1xi32>
    %c0_i32_14 = arith.constant 0 : i32
    %27 = arith.cmpi slt, %20, %c0_i32_14 : i32
    %28 = vector.broadcast %27 : i1 to vector<32x1xi1>
    %29 = vector.broadcast %28 : vector<32x1xi1> to vector<32x1xi1>
    %30 = arith.xori %26, %29 : vector<32x1xi1>
    %31 = arith.andi %30, %24 : vector<32x1xi1>
    %32 = vector.broadcast %20 : i32 to vector<32x1xi32>
    %33 = arith.addi %22, %32 : vector<32x1xi32>
    %34 = arith.select %31, %33, %22 : vector<32x1xi1>, vector<32x1xi32>
    %c0_i32_15 = arith.constant 0 : i32
    %35 = vector.broadcast %c0_i32_15 : i32 to vector<32x1xi32>
    %36 = arith.cmpi ne, %34, %35 : vector<32x1xi32>
    %37 = arith.extui %36 : vector<32x1xi1> to vector<32x1xi32>
    %38 = arith.sitofp %37 : vector<32x1xi32> to vector<32x1xf32>
    %c16_i32_16 = arith.constant 16 : i32
    %c0_i32_17 = arith.constant 0 : i32
    %39 = arith.cmpi eq, %c16_i32_16, %c0_i32_17 : i32
    %c1_i32_18 = arith.constant 1 : i32
    %40 = arith.select %39, %c1_i32_18, %c16_i32_16 : i32
    %41 = vector.broadcast %40 : i32 to vector<32x1xi32>
    %42 = arith.remsi %18, %41 : vector<32x1xi32>
    %c0_i32_19 = arith.constant 0 : i32
    %43 = vector.broadcast %c0_i32_19 : i32 to vector<32x1xi32>
    %44 = arith.cmpi ne, %42, %43 : vector<32x1xi32>
    %c0_i32_20 = arith.constant 0 : i32
    %45 = vector.broadcast %c0_i32_20 : i32 to vector<32x1xi32>
    %46 = arith.cmpi slt, %42, %45 : vector<32x1xi32>
    %c0_i32_21 = arith.constant 0 : i32
    %47 = arith.cmpi slt, %40, %c0_i32_21 : i32
    %48 = vector.broadcast %47 : i1 to vector<32x1xi1>
    %49 = vector.broadcast %48 : vector<32x1xi1> to vector<32x1xi1>
    %50 = arith.xori %46, %49 : vector<32x1xi1>
    %51 = arith.andi %50, %44 : vector<32x1xi1>
    %52 = vector.broadcast %40 : i32 to vector<32x1xi32>
    %53 = arith.addi %42, %52 : vector<32x1xi32>
    %54 = arith.select %51, %53, %42 : vector<32x1xi1>, vector<32x1xi32>
    %c15_i32 = arith.constant 15 : i32
    %55 = vector.broadcast %c15_i32 : i32 to vector<32x1xi32>
    %56 = arith.cmpi ne, %54, %55 : vector<32x1xi32>
    %57 = arith.extui %56 : vector<32x1xi1> to vector<32x1xi32>
    %58 = arith.sitofp %57 : vector<32x1xi32> to vector<32x1xf32>
    %c0_22 = arith.constant 0 : index
    %c0_23 = arith.constant 0 : index
    %59 = vector.load %arg11[%c0_22, %c0_23] : memref<256x16xbf16, #tpu.memory_space<vmem>>, vector<256x16xbf16>
    %60 = arith.extf %59 : vector<256x16xbf16> to vector<256x16xf32>
    %c0_24 = arith.constant 0 : index
    %c0_25 = arith.constant 0 : index
    %61 = vector.load %arg12[%c0_24, %c0_25] : memref<16x256xbf16, #tpu.memory_space<vmem>>, vector<16x256xbf16>
    %62 = arith.extf %61 : vector<16x256xbf16> to vector<16x256xf32>
    %c0_26 = arith.constant 0 : index
    %c0_27 = arith.constant 0 : index
    %63 = vector.load %arg13[%c0_26, %c0_27] : memref<2x32xbf16, #tpu.memory_space<vmem>>, vector<2x32xbf16>
    %64 = arith.extf %63 : vector<2x32xbf16> to vector<2x32xf32>
    %c0_28 = arith.constant 0 : index
    %c0_29 = arith.constant 0 : index
    %65 = vector.load %arg14[%c0_28, %c0_29] : memref<32x2xbf16, #tpu.memory_space<vmem>>, vector<32x2xbf16>
    %66 = arith.extf %65 : vector<32x2xbf16> to vector<32x2xf32>
    %c1_i32_30 = arith.constant 1 : i32
    %67 = tpu.dynamic_rotate %17 by %c1_i32_30 dim 0 : vector<32x256xf32>, i32 -> vector<32x256xf32>
    %68 = vector.broadcast %38 : vector<32x1xf32> to vector<32x256xf32>
    %69 = arith.mulf %67, %68 : vector<32x256xf32>
    %c31_i32 = arith.constant 31 : i32
    %70 = tpu.dynamic_rotate %17 by %c31_i32 dim 0 : vector<32x256xf32>, i32 -> vector<32x256xf32>
    %71 = vector.broadcast %58 : vector<32x1xf32> to vector<32x256xf32>
    %72 = arith.mulf %70, %71 : vector<32x256xf32>
    %73 = tpu.concatenate %69, %17, %72 in 1 : vector<32x256xf32>, vector<32x256xf32>, vector<32x256xf32> -> vector<32x768xf32>
    %c0_31 = arith.constant 0 : index
    %c0_32 = arith.constant 0 : index
    %c0_33 = arith.constant 0 : index
    %c0_34 = arith.constant 0 : index
    %74 = vector.load %arg5[%c0_31, %c0_32, %c0_33, %c0_34] : memref<2x2x768x256xbf16, #tpu.memory_space<vmem>>, vector<1x1x768x256xbf16>
    %75 = vector.shape_cast %74 : vector<1x1x768x256xbf16> to vector<768x256xbf16>
    %76 = arith.extf %75 : vector<768x256xbf16> to vector<768x256xf32>
    %cst_35 = arith.constant dense<0.000000e+00> : vector<32x256xf32>
    %77 = tpu.matmul %73, %76, %cst_35 {dimension_numbers = #tpu.dot_dimension_numbers<[1], [0], [0], [1], [0, 0, 1, 1], [], []>} : vector<32x768xf32>, vector<768x256xf32>, vector<32x256xf32> -> vector<32x256xf32>
    %c0_36 = arith.constant 0 : index
    %c0_37 = arith.constant 0 : index
    %c0_38 = arith.constant 0 : index
    %c0_39 = arith.constant 0 : index
    %78 = vector.load %arg6[%c0_36, %c0_37, %c0_38, %c0_39] : memref<2x2x1x256xf32, #tpu.memory_space<vmem>>, vector<1x1x1x256xf32>
    %79 = vector.shape_cast %78 : vector<1x1x1x256xf32> to vector<1x256xf32>
    %80 = vector.broadcast %79 : vector<1x256xf32> to vector<32x256xf32>
    %81 = arith.addf %77, %80 : vector<32x256xf32>
    %cst_40 = arith.constant 0.000000e+00 : f32
    %82 = vector.broadcast %cst_40 : f32 to vector<32x256xf32>
    %83 = arith.maximumf %81, %82 : vector<32x256xf32>
    %c1_i32_41 = arith.constant 1 : i32
    %84 = tpu.dynamic_rotate %83 by %c1_i32_41 dim 0 : vector<32x256xf32>, i32 -> vector<32x256xf32>
    %85 = vector.broadcast %38 : vector<32x1xf32> to vector<32x256xf32>
    %86 = arith.mulf %84, %85 : vector<32x256xf32>
    %c31_i32_42 = arith.constant 31 : i32
    %87 = tpu.dynamic_rotate %83 by %c31_i32_42 dim 0 : vector<32x256xf32>, i32 -> vector<32x256xf32>
    %88 = vector.broadcast %58 : vector<32x1xf32> to vector<32x256xf32>
    %89 = arith.mulf %87, %88 : vector<32x256xf32>
    %90 = tpu.concatenate %86, %83, %89 in 1 : vector<32x256xf32>, vector<32x256xf32>, vector<32x256xf32> -> vector<32x768xf32>
    %c0_43 = arith.constant 0 : index
    %c1_44 = arith.constant 1 : index
    %c0_45 = arith.constant 0 : index
    %c0_46 = arith.constant 0 : index
    %91 = vector.load %arg5[%c0_43, %c1_44, %c0_45, %c0_46] : memref<2x2x768x256xbf16, #tpu.memory_space<vmem>>, vector<1x1x768x256xbf16>
    %92 = vector.shape_cast %91 : vector<1x1x768x256xbf16> to vector<768x256xbf16>
    %93 = arith.extf %92 : vector<768x256xbf16> to vector<768x256xf32>
    %cst_47 = arith.constant dense<0.000000e+00> : vector<32x256xf32>
    %94 = tpu.matmul %90, %93, %cst_47 {dimension_numbers = #tpu.dot_dimension_numbers<[1], [0], [0], [1], [0, 0, 1, 1], [], []>} : vector<32x768xf32>, vector<768x256xf32>, vector<32x256xf32> -> vector<32x256xf32>
    %c0_48 = arith.constant 0 : index
    %c1_49 = arith.constant 1 : index
    %c0_50 = arith.constant 0 : index
    %c0_51 = arith.constant 0 : index
    %95 = vector.load %arg6[%c0_48, %c1_49, %c0_50, %c0_51] : memref<2x2x1x256xf32, #tpu.memory_space<vmem>>, vector<1x1x1x256xf32>
    %96 = vector.shape_cast %95 : vector<1x1x1x256xf32> to vector<1x256xf32>
    %97 = vector.broadcast %96 : vector<1x256xf32> to vector<32x256xf32>
    %98 = arith.addf %94, %97 : vector<32x256xf32>
    %cst_52 = arith.constant dense<0.000000e+00> : vector<2x256xf32>
    %99 = tpu.matmul %64, %98, %cst_52 {dimension_numbers = #tpu.dot_dimension_numbers<[1], [0], [0], [1], [0, 0, 1, 1], [], []>} : vector<2x32xf32>, vector<32x256xf32>, vector<2x256xf32> -> vector<2x256xf32>
    %cst_53 = arith.constant dense<0.000000e+00> : vector<2x16xf32>
    %100 = tpu.matmul %99, %60, %cst_53 {dimension_numbers = #tpu.dot_dimension_numbers<[1], [0], [0], [1], [0, 0, 1, 1], [], []>} : vector<2x256xf32>, vector<256x16xf32>, vector<2x16xf32> -> vector<2x16xf32>
    %cst_54 = arith.constant 3.906250e-03 : f32
    %101 = vector.broadcast %cst_54 : f32 to vector<2x16xf32>
    %102 = arith.mulf %100, %101 : vector<2x16xf32>
    %c0_55 = arith.constant 0 : index
    %c0_56 = arith.constant 0 : index
    %c0_57 = arith.constant 0 : index
    %103 = vector.load %arg7[%c0_55, %c0_56, %c0_57] : memref<2x16x128xf32, #tpu.memory_space<vmem>>, vector<1x16x128xf32>
    %104 = vector.shape_cast %103 : vector<1x16x128xf32> to vector<16x128xf32>
    %cst_58 = arith.constant dense<0.000000e+00> : vector<2x128xf32>
    %105 = tpu.matmul %102, %104, %cst_58 {dimension_numbers = #tpu.dot_dimension_numbers<[1], [0], [0], [1], [0, 0, 1, 1], [], []>} : vector<2x16xf32>, vector<16x128xf32>, vector<2x128xf32> -> vector<2x128xf32>
    %c0_59 = arith.constant 0 : index
    %c0_60 = arith.constant 0 : index
    %c0_61 = arith.constant 0 : index
    %106 = vector.load %arg8[%c0_59, %c0_60, %c0_61] : memref<2x1x128xf32, #tpu.memory_space<vmem>>, vector<1x1x128xf32>
    %107 = vector.shape_cast %106 : vector<1x1x128xf32> to vector<1x128xf32>
    %108 = vector.broadcast %107 : vector<1x128xf32> to vector<2x128xf32>
    %109 = arith.addf %105, %108 : vector<2x128xf32>
    %cst_62 = arith.constant 0.000000e+00 : f32
    %110 = vector.broadcast %cst_62 : f32 to vector<2x128xf32>
    %111 = arith.maximumf %109, %110 : vector<2x128xf32>
    %c0_63 = arith.constant 0 : index
    %c0_64 = arith.constant 0 : index
    %c0_65 = arith.constant 0 : index
    %112 = vector.load %arg9[%c0_63, %c0_64, %c0_65] : memref<2x128x16xf32, #tpu.memory_space<vmem>>, vector<1x128x16xf32>
    %113 = vector.shape_cast %112 : vector<1x128x16xf32> to vector<128x16xf32>
    %cst_66 = arith.constant dense<0.000000e+00> : vector<2x16xf32>
    %114 = tpu.matmul %111, %113, %cst_66 {dimension_numbers = #tpu.dot_dimension_numbers<[1], [0], [0], [1], [0, 0, 1, 1], [], []>} : vector<2x128xf32>, vector<128x16xf32>, vector<2x16xf32> -> vector<2x16xf32>
    %c0_67 = arith.constant 0 : index
    %c0_68 = arith.constant 0 : index
    %c0_69 = arith.constant 0 : index
    %115 = vector.load %arg10[%c0_67, %c0_68, %c0_69] : memref<2x1x16xf32, #tpu.memory_space<vmem>>, vector<1x1x16xf32>
    %116 = vector.shape_cast %115 : vector<1x1x16xf32> to vector<1x16xf32>
    %117 = vector.broadcast %116 : vector<1x16xf32> to vector<2x16xf32>
    %118 = arith.addf %114, %117 : vector<2x16xf32>
    %119 = arith.negf %118 : vector<2x16xf32>
    %120 = math.exp %119 : vector<2x16xf32>
    %cst_70 = arith.constant 1.000000e+00 : f32
    %121 = vector.broadcast %cst_70 : f32 to vector<2x16xf32>
    %122 = arith.addf %121, %120 : vector<2x16xf32>
    %123 = arith.divf %121, %122 : vector<2x16xf32>
    %cst_71 = arith.constant dense<0.000000e+00> : vector<2x256xf32>
    %124 = tpu.matmul %123, %62, %cst_71 {dimension_numbers = #tpu.dot_dimension_numbers<[1], [0], [0], [1], [0, 0, 1, 1], [], []>} : vector<2x16xf32>, vector<16x256xf32>, vector<2x256xf32> -> vector<2x256xf32>
    %cst_72 = arith.constant dense<0.000000e+00> : vector<32x256xf32>
    %125 = tpu.matmul %66, %124, %cst_72 {dimension_numbers = #tpu.dot_dimension_numbers<[1], [0], [0], [1], [0, 0, 1, 1], [], []>} : vector<32x2xf32>, vector<2x256xf32>, vector<32x256xf32> -> vector<32x256xf32>
    %126 = arith.mulf %98, %125 : vector<32x256xf32>
    %127 = arith.addf %126, %17 : vector<32x256xf32>
    %cst_73 = arith.constant 0.000000e+00 : f32
    %128 = vector.broadcast %cst_73 : f32 to vector<32x256xf32>
    %129 = arith.maximumf %127, %128 : vector<32x256xf32>
    %c1_i32_74 = arith.constant 1 : i32
    %130 = tpu.dynamic_rotate %129 by %c1_i32_74 dim 0 : vector<32x256xf32>, i32 -> vector<32x256xf32>
    %131 = vector.broadcast %38 : vector<32x1xf32> to vector<32x256xf32>
    %132 = arith.mulf %130, %131 : vector<32x256xf32>
    %c31_i32_75 = arith.constant 31 : i32
    %133 = tpu.dynamic_rotate %129 by %c31_i32_75 dim 0 : vector<32x256xf32>, i32 -> vector<32x256xf32>
    %134 = vector.broadcast %58 : vector<32x1xf32> to vector<32x256xf32>
    %135 = arith.mulf %133, %134 : vector<32x256xf32>
    %136 = tpu.concatenate %132, %129, %135 in 1 : vector<32x256xf32>, vector<32x256xf32>, vector<32x256xf32> -> vector<32x768xf32>
    %c1_76 = arith.constant 1 : index
    %c0_77 = arith.constant 0 : index
    %c0_78 = arith.constant 0 : index
    %c0_79 = arith.constant 0 : index
    %137 = vector.load %arg5[%c1_76, %c0_77, %c0_78, %c0_79] : memref<2x2x768x256xbf16, #tpu.memory_space<vmem>>, vector<1x1x768x256xbf16>
    %138 = vector.shape_cast %137 : vector<1x1x768x256xbf16> to vector<768x256xbf16>
    %139 = arith.extf %138 : vector<768x256xbf16> to vector<768x256xf32>
    %cst_80 = arith.constant dense<0.000000e+00> : vector<32x256xf32>
    %140 = tpu.matmul %136, %139, %cst_80 {dimension_numbers = #tpu.dot_dimension_numbers<[1], [0], [0], [1], [0, 0, 1, 1], [], []>} : vector<32x768xf32>, vector<768x256xf32>, vector<32x256xf32> -> vector<32x256xf32>
    %c1_81 = arith.constant 1 : index
    %c0_82 = arith.constant 0 : index
    %c0_83 = arith.constant 0 : index
    %c0_84 = arith.constant 0 : index
    %141 = vector.load %arg6[%c1_81, %c0_82, %c0_83, %c0_84] : memref<2x2x1x256xf32, #tpu.memory_space<vmem>>, vector<1x1x1x256xf32>
    %142 = vector.shape_cast %141 : vector<1x1x1x256xf32> to vector<1x256xf32>
    %143 = vector.broadcast %142 : vector<1x256xf32> to vector<32x256xf32>
    %144 = arith.addf %140, %143 : vector<32x256xf32>
    %cst_85 = arith.constant 0.000000e+00 : f32
    %145 = vector.broadcast %cst_85 : f32 to vector<32x256xf32>
    %146 = arith.maximumf %144, %145 : vector<32x256xf32>
    %c1_i32_86 = arith.constant 1 : i32
    %147 = tpu.dynamic_rotate %146 by %c1_i32_86 dim 0 : vector<32x256xf32>, i32 -> vector<32x256xf32>
    %148 = vector.broadcast %38 : vector<32x1xf32> to vector<32x256xf32>
    %149 = arith.mulf %147, %148 : vector<32x256xf32>
    %c31_i32_87 = arith.constant 31 : i32
    %150 = tpu.dynamic_rotate %146 by %c31_i32_87 dim 0 : vector<32x256xf32>, i32 -> vector<32x256xf32>
    %151 = vector.broadcast %58 : vector<32x1xf32> to vector<32x256xf32>
    %152 = arith.mulf %150, %151 : vector<32x256xf32>
    %153 = tpu.concatenate %149, %146, %152 in 1 : vector<32x256xf32>, vector<32x256xf32>, vector<32x256xf32> -> vector<32x768xf32>
    %c1_88 = arith.constant 1 : index
    %c1_89 = arith.constant 1 : index
    %c0_90 = arith.constant 0 : index
    %c0_91 = arith.constant 0 : index
    %154 = vector.load %arg5[%c1_88, %c1_89, %c0_90, %c0_91] : memref<2x2x768x256xbf16, #tpu.memory_space<vmem>>, vector<1x1x768x256xbf16>
    %155 = vector.shape_cast %154 : vector<1x1x768x256xbf16> to vector<768x256xbf16>
    %156 = arith.extf %155 : vector<768x256xbf16> to vector<768x256xf32>
    %cst_92 = arith.constant dense<0.000000e+00> : vector<32x256xf32>
    %157 = tpu.matmul %153, %156, %cst_92 {dimension_numbers = #tpu.dot_dimension_numbers<[1], [0], [0], [1], [0, 0, 1, 1], [], []>} : vector<32x768xf32>, vector<768x256xf32>, vector<32x256xf32> -> vector<32x256xf32>
    %c1_93 = arith.constant 1 : index
    %c1_94 = arith.constant 1 : index
    %c0_95 = arith.constant 0 : index
    %c0_96 = arith.constant 0 : index
    %158 = vector.load %arg6[%c1_93, %c1_94, %c0_95, %c0_96] : memref<2x2x1x256xf32, #tpu.memory_space<vmem>>, vector<1x1x1x256xf32>
    %159 = vector.shape_cast %158 : vector<1x1x1x256xf32> to vector<1x256xf32>
    %160 = vector.broadcast %159 : vector<1x256xf32> to vector<32x256xf32>
    %161 = arith.addf %157, %160 : vector<32x256xf32>
    %cst_97 = arith.constant dense<0.000000e+00> : vector<2x256xf32>
    %162 = tpu.matmul %64, %161, %cst_97 {dimension_numbers = #tpu.dot_dimension_numbers<[1], [0], [0], [1], [0, 0, 1, 1], [], []>} : vector<2x32xf32>, vector<32x256xf32>, vector<2x256xf32> -> vector<2x256xf32>
    %cst_98 = arith.constant dense<0.000000e+00> : vector<2x16xf32>
    %163 = tpu.matmul %162, %60, %cst_98 {dimension_numbers = #tpu.dot_dimension_numbers<[1], [0], [0], [1], [0, 0, 1, 1], [], []>} : vector<2x256xf32>, vector<256x16xf32>, vector<2x16xf32> -> vector<2x16xf32>
    %cst_99 = arith.constant 3.906250e-03 : f32
    %164 = vector.broadcast %cst_99 : f32 to vector<2x16xf32>
    %165 = arith.mulf %163, %164 : vector<2x16xf32>
    %c1_100 = arith.constant 1 : index
    %c0_101 = arith.constant 0 : index
    %c0_102 = arith.constant 0 : index
    %166 = vector.load %arg7[%c1_100, %c0_101, %c0_102] : memref<2x16x128xf32, #tpu.memory_space<vmem>>, vector<1x16x128xf32>
    %167 = vector.shape_cast %166 : vector<1x16x128xf32> to vector<16x128xf32>
    %cst_103 = arith.constant dense<0.000000e+00> : vector<2x128xf32>
    %168 = tpu.matmul %165, %167, %cst_103 {dimension_numbers = #tpu.dot_dimension_numbers<[1], [0], [0], [1], [0, 0, 1, 1], [], []>} : vector<2x16xf32>, vector<16x128xf32>, vector<2x128xf32> -> vector<2x128xf32>
    %c1_104 = arith.constant 1 : index
    %c0_105 = arith.constant 0 : index
    %c0_106 = arith.constant 0 : index
    %169 = vector.load %arg8[%c1_104, %c0_105, %c0_106] : memref<2x1x128xf32, #tpu.memory_space<vmem>>, vector<1x1x128xf32>
    %170 = vector.shape_cast %169 : vector<1x1x128xf32> to vector<1x128xf32>
    %171 = vector.broadcast %170 : vector<1x128xf32> to vector<2x128xf32>
    %172 = arith.addf %168, %171 : vector<2x128xf32>
    %cst_107 = arith.constant 0.000000e+00 : f32
    %173 = vector.broadcast %cst_107 : f32 to vector<2x128xf32>
    %174 = arith.maximumf %172, %173 : vector<2x128xf32>
    %c1_108 = arith.constant 1 : index
    %c0_109 = arith.constant 0 : index
    %c0_110 = arith.constant 0 : index
    %175 = vector.load %arg9[%c1_108, %c0_109, %c0_110] : memref<2x128x16xf32, #tpu.memory_space<vmem>>, vector<1x128x16xf32>
    %176 = vector.shape_cast %175 : vector<1x128x16xf32> to vector<128x16xf32>
    %cst_111 = arith.constant dense<0.000000e+00> : vector<2x16xf32>
    %177 = tpu.matmul %174, %176, %cst_111 {dimension_numbers = #tpu.dot_dimension_numbers<[1], [0], [0], [1], [0, 0, 1, 1], [], []>} : vector<2x128xf32>, vector<128x16xf32>, vector<2x16xf32> -> vector<2x16xf32>
    %c1_112 = arith.constant 1 : index
    %c0_113 = arith.constant 0 : index
    %c0_114 = arith.constant 0 : index
    %178 = vector.load %arg10[%c1_112, %c0_113, %c0_114] : memref<2x1x16xf32, #tpu.memory_space<vmem>>, vector<1x1x16xf32>
    %179 = vector.shape_cast %178 : vector<1x1x16xf32> to vector<1x16xf32>
    %180 = vector.broadcast %179 : vector<1x16xf32> to vector<2x16xf32>
    %181 = arith.addf %177, %180 : vector<2x16xf32>
    %182 = arith.negf %181 : vector<2x16xf32>
    %183 = math.exp %182 : vector<2x16xf32>
    %cst_115 = arith.constant 1.000000e+00 : f32
    %184 = vector.broadcast %cst_115 : f32 to vector<2x16xf32>
    %185 = arith.addf %184, %183 : vector<2x16xf32>
    %186 = arith.divf %184, %185 : vector<2x16xf32>
    %cst_116 = arith.constant dense<0.000000e+00> : vector<2x256xf32>
    %187 = tpu.matmul %186, %62, %cst_116 {dimension_numbers = #tpu.dot_dimension_numbers<[1], [0], [0], [1], [0, 0, 1, 1], [], []>} : vector<2x16xf32>, vector<16x256xf32>, vector<2x256xf32> -> vector<2x256xf32>
    %cst_117 = arith.constant dense<0.000000e+00> : vector<32x256xf32>
    %188 = tpu.matmul %66, %187, %cst_117 {dimension_numbers = #tpu.dot_dimension_numbers<[1], [0], [0], [1], [0, 0, 1, 1], [], []>} : vector<32x2xf32>, vector<2x256xf32>, vector<32x256xf32> -> vector<32x256xf32>
    %189 = arith.mulf %161, %188 : vector<32x256xf32>
    %190 = arith.addf %189, %129 : vector<32x256xf32>
    %cst_118 = arith.constant 0.000000e+00 : f32
    %191 = vector.broadcast %cst_118 : f32 to vector<32x256xf32>
    %192 = arith.maximumf %190, %191 : vector<32x256xf32>
    %c0_119 = arith.constant 0 : index
    %c0_120 = arith.constant 0 : index
    %193 = vector.load %arg15[%c0_119, %c0_120] : memref<32x256xf32, #tpu.memory_space<vmem>>, vector<32x256xf32>
    tpu.vector_store %arg15[%c0_119, %c0_120], %192 {strides = array<i32>} : memref<32x256xf32, #tpu.memory_space<vmem>>, vector<32x256xf32>,
    return
  }
  func.func @transform_0(%arg0: i32) -> (i32, i32) {
    %c0_i32 = arith.constant 0 : i32
    %c0_i32_0 = arith.constant 0 : i32
    return %arg0, %c0_i32 : i32, i32
  }
  func.func @transform_1(%arg0: i32) -> (i32, i32, i32) {
    %c0_i32 = arith.constant 0 : i32
    %c0_i32_0 = arith.constant 0 : i32
    %c0_i32_1 = arith.constant 0 : i32
    %c0_i32_2 = arith.constant 0 : i32
    return %c0_i32, %c0_i32_0, %c0_i32_1 : i32, i32, i32
  }
  func.func @transform_2(%arg0: i32) -> (i32, i32) {
    %c0_i32 = arith.constant 0 : i32
    %c0_i32_0 = arith.constant 0 : i32
    %c0_i32_1 = arith.constant 0 : i32
    return %c0_i32, %c0_i32_0 : i32, i32
  }
  func.func @transform_3(%arg0: i32) -> (i32, i32) {
    %c0_i32 = arith.constant 0 : i32
    %c0_i32_0 = arith.constant 0 : i32
    %c0_i32_1 = arith.constant 0 : i32
    return %c0_i32, %c0_i32_0 : i32, i32
  }
  func.func @transform_4(%arg0: i32) -> (i32, i32, i32, i32) {
    %c0_i32 = arith.constant 0 : i32
    %c0_i32_0 = arith.constant 0 : i32
    %c0_i32_1 = arith.constant 0 : i32
    %c0_i32_2 = arith.constant 0 : i32
    %c0_i32_3 = arith.constant 0 : i32
    return %c0_i32, %c0_i32_0, %c0_i32_1, %c0_i32_2 : i32, i32, i32, i32
  }
  func.func @transform_5(%arg0: i32) -> (i32, i32, i32, i32) {
    %c0_i32 = arith.constant 0 : i32
    %c0_i32_0 = arith.constant 0 : i32
    %c0_i32_1 = arith.constant 0 : i32
    %c0_i32_2 = arith.constant 0 : i32
    %c0_i32_3 = arith.constant 0 : i32
    return %c0_i32, %c0_i32_0, %c0_i32_1, %c0_i32_2 : i32, i32, i32, i32
  }
  func.func @transform_6(%arg0: i32) -> (i32, i32, i32) {
    %c0_i32 = arith.constant 0 : i32
    %c0_i32_0 = arith.constant 0 : i32
    %c0_i32_1 = arith.constant 0 : i32
    %c0_i32_2 = arith.constant 0 : i32
    return %c0_i32, %c0_i32_0, %c0_i32_1 : i32, i32, i32
  }
  func.func @transform_7(%arg0: i32) -> (i32, i32, i32) {
    %c0_i32 = arith.constant 0 : i32
    %c0_i32_0 = arith.constant 0 : i32
    %c0_i32_1 = arith.constant 0 : i32
    %c0_i32_2 = arith.constant 0 : i32
    return %c0_i32, %c0_i32_0, %c0_i32_1 : i32, i32, i32
  }
  func.func @transform_8(%arg0: i32) -> (i32, i32, i32) {
    %c0_i32 = arith.constant 0 : i32
    %c0_i32_0 = arith.constant 0 : i32
    %c0_i32_1 = arith.constant 0 : i32
    %c0_i32_2 = arith.constant 0 : i32
    return %c0_i32, %c0_i32_0, %c0_i32_1 : i32, i32, i32
  }
  func.func @transform_9(%arg0: i32) -> (i32, i32, i32) {
    %c0_i32 = arith.constant 0 : i32
    %c0_i32_0 = arith.constant 0 : i32
    %c0_i32_1 = arith.constant 0 : i32
    %c0_i32_2 = arith.constant 0 : i32
    return %c0_i32, %c0_i32_0, %c0_i32_1 : i32, i32, i32
  }
  func.func @transform_10(%arg0: i32) -> (i32, i32) {
    %c0_i32 = arith.constant 0 : i32
    %c0_i32_0 = arith.constant 0 : i32
    %c0_i32_1 = arith.constant 0 : i32
    return %c0_i32, %c0_i32_0 : i32, i32
  }
  func.func @transform_11(%arg0: i32) -> (i32, i32) {
    %c0_i32 = arith.constant 0 : i32
    %c0_i32_0 = arith.constant 0 : i32
    %c0_i32_1 = arith.constant 0 : i32
    return %c0_i32, %c0_i32_0 : i32, i32
  }
  func.func @transform_12(%arg0: i32) -> (i32, i32) {
    %c0_i32 = arith.constant 0 : i32
    %c0_i32_0 = arith.constant 0 : i32
    %c0_i32_1 = arith.constant 0 : i32
    return %c0_i32, %c0_i32_0 : i32, i32
  }
  func.func @transform_13(%arg0: i32) -> (i32, i32) {
    %c0_i32 = arith.constant 0 : i32
    %c0_i32_0 = arith.constant 0 : i32
    %c0_i32_1 = arith.constant 0 : i32
    return %c0_i32, %c0_i32_0 : i32, i32
  }
  func.func @transform_14(%arg0: i32) -> (i32, i32) {
    %c0_i32 = arith.constant 0 : i32
    %c0_i32_0 = arith.constant 0 : i32
    return %arg0, %c0_i32 : i32, i32
  }
}

</mosaic_0001>

<bundles_post_ra>
// kernel: tpu_custom_call.1
= control target key start
LH: loop header
LB: loop body
LE: loop exit
PB: predicated region body
PF: predicated region fallthrough
CT: control target
= control target key end

     0   :  { %19 = vsyncpa [#allocation3], 0  ;;  %s8072_s0 = inlined_call_operand.hbm [shape: f32[16,32], index: 0, kind: input, shape index: {}]   ;;  %s8073_s1 = inlined_call_operand.vmem [shape: bf16[2,32,16], index: 1, kind: input, shape index: {}]   ;;  %s8074_s2 = inlined_call_operand.hbm [shape: bf16[32,512], index: 2, kind: input, shape index: {}]   ;;  %s8075_s3 = inlined_call_operand.hbm [shape: f32[1,256], index: 3, kind: input, shape index: {}]   ;;  %s8076_s4 = inlined_call_operand.hbm [shape: bf16[2,2,768,256], index: 4, kind: input, shape index: {}]   ;;  %s8077_s5 = inlined_call_operand.hbm [shape: f32[2,2,1,256], index: 5, kind: input, shape index: {}]   ;;  %s8078_s6 = inlined_call_operand.hbm [shape: f32[2,16,128], index: 6, kind: input, shape index: {}]   ;;  %s8079_s7 = inlined_call_operand.hbm [shape: f32[2,1,128], index: 7, kind: input, shape index: {}]   ;;  %s8080_s8 = inlined_call_operand.vmem [shape: f32[2,128,16], index: 8, kind: input, shape index: {}]   ;;  %s8081_s9 = inlined_call_operand.hbm [shape: f32[2,1,16], index: 9, kind: input, shape index: {}]   ;;  %s8082_s10 = inlined_call_operand.vmem [shape: bf16[256,16], index: 10, kind: input, shape index: {}]   ;;  %s8083_s11 = inlined_call_operand.hbm [shape: bf16[16,256], index: 11, kind: input, shape index: {}]   ;;  %s8084_s12 = inlined_call_operand.hbm [shape: bf16[2,32], index: 12, kind: input, shape index: {}]   ;;  %s8085_s13 = inlined_call_operand.vmem [shape: bf16[32,2], index: 13, kind: input, shape index: {}]   ;;  %s8086_s14 = inlined_call_operand.hbm [shape: f32[32,256], index: 14, kind: output, shape index: {}]  }
   0x1   :  { %20 = vsyncpa [#allocation6], 0 }
   0x2   :  { %21 = vsyncpa [#allocation9], 0 }
   0x3   :  { %22 = vsyncpa [#allocation12], 0 }
   0x4   :  { %23 = vsyncpa [#allocation15], 0 }
   0x5   :  { %24 = vsyncpa [#allocation18], 0 }
   0x6   :  { %25 = vsyncpa [#allocation4], 0  ;;  %s7022_s29 = smov [#allocation5]   ;;  %s6766_s17 = scalar_lea.hbm %s8074_s2, 1024 }
   0x7   :  { %s45_s30 = sshll.u32 %s7022_s29, 4  ;;  %p6767_p0 = scmp.ne.s32.totalorder %s8074_s2, %s6766_s17  ;;  %s46_s30 = int_to_ptr.vmem [resolvable:$true] %s45_s30 }
   0x8   :  { %p6770_p1 = scmp.lt.u32.totalorder %s6766_s17, %s8074_s2 }
   0xa   :  { %p6772_p2 = pnand %p6770_p1, %p6767_p0 }
   0xc   :  { %6775 = shalt.err (!%p6772_p2)
}
   0xd   :  { %s6776_s22 = scalar_lea.vmem %s46_s30, 1024  ;;  %p6781_p4 = scmp.lt.s32.totalorder %s46_s30, %s46_s30 }
   0xe   :  { %p6777_p3 = scmp.ne.s32.totalorder %s46_s30, %s6776_s22  ;;  %p6782_p5 = scmp.lt.s32.totalorder %s6776_s22, %s6776_s22 }
  0x10   :  { %p6783_p6 = por %p6782_p5, %p6781_p4 }
  0x12   :  { %p6784_p7 = pnand %p6783_p6, %p6777_p3 }
  0x14   :  { %6787 = shalt.err (!%p6784_p7)
}
  0x15   :  { %s7023_s23 = smov 256   ;;  %s7024_s24 = smov 16  }
  0x16   :  { %51 = dma.hbm_to_vmem [thread:$0]  %s8074_s2, 1024, %s46_s30, [#allocation6], %s7023_s23, %s7023_s23, %s7024_s24  }
  0x17   :  { %s7025_s27 = smov [#allocation8]   ;;  %s7026_s29 = smov [#allocation11]  }
  0x18   :  { %s67_s28 = sshll.u32 %s7025_s27, 4  ;;  %s91_s15 = sshll.u32 %s7026_s29, 4  ;;  %s68_s28 = int_to_ptr.vmem [resolvable:$true] %s67_s28  ;;  %s92_s15 = int_to_ptr.vmem [resolvable:$true] %s91_s15 }
  0x19   :  { %s6788_s18 = scalar_lea.hbm %s8076_s4, 49152 }
  0x1a   :  { %p6789_p8 = scmp.ne.s32.totalorder %s8076_s4, %s6788_s18  ;;  %p6792_p9 = scmp.lt.u32.totalorder %s6788_s18, %s8076_s4 }
  0x1c   :  { %p6794_p10 = pnand %p6792_p9, %p6789_p8 }
  0x1e   :  { %6797 = shalt.err (!%p6794_p10)
}
  0x1f   :  { %s6798_s2 = scalar_lea.vmem %s68_s28, 49152  ;;  %p6803_p12 = scmp.lt.s32.totalorder %s68_s28, %s68_s28 }
  0x20   :  { %p6799_p11 = scmp.ne.s32.totalorder %s68_s28, %s6798_s2  ;;  %p6804_p13 = scmp.lt.s32.totalorder %s6798_s2, %s6798_s2 }
  0x22   :  { %p6805_p0 = por %p6804_p13, %p6803_p12 }
  0x24   :  { %p6806_p1 = pnand %p6805_p0, %p6799_p11 }
  0x26   :  { %6809 = shalt.err (!%p6806_p1)
}
  0x27   :  { %s7027_s30 = smov 128   ;;  %s7028_s25 = smov 8  }
  0x28   :  { %73 = dma.hbm_to_vmem [thread:$0]  %s8076_s4, 49152, %s68_s28, [#allocation9], %s7027_s30, %s7027_s30, %s7028_s25  }
  0x29   :  { %s6810_s17 = scalar_lea.hbm %s8078_s6, 512 }
  0x2a   :  { %p6811_p2 = scmp.ne.s32.totalorder %s8078_s6, %s6810_s17  ;;  %p6814_p3 = scmp.lt.u32.totalorder %s6810_s17, %s8078_s6 }
  0x2c   :  { %p6816_p4 = pnand %p6814_p3, %p6811_p2 }
  0x2e   :  { %6819 = shalt.err (!%p6816_p4)
}
  0x2f   :  { %s6820_s22 = scalar_lea.vmem %s92_s15, 512  ;;  %p6825_p6 = scmp.lt.s32.totalorder %s92_s15, %s92_s15 }
  0x30   :  { %p6821_p5 = scmp.ne.s32.totalorder %s92_s15, %s6820_s22  ;;  %p6826_p7 = scmp.lt.s32.totalorder %s6820_s22, %s6820_s22 }
  0x32   :  { %p6827_p8 = por %p6826_p7, %p6825_p6 }
  0x34   :  { %p6828_p9 = pnand %p6827_p8, %p6821_p5 }
  0x36   :  { %6831 = shalt.err (!%p6828_p9)
}
  0x37   :  { %97 = dma.hbm_to_vmem [thread:$0]  %s8078_s6, 512, %s92_s15, [#allocation12], %s7027_s30, %s7027_s30, %s7028_s25  }
  0x38   :  { %s7029_s2 = smov [#allocation14]   ;;  %s7030_s27 = smov [#allocation2]  }
  0x39   :  { %s117_s26 = sshll.u32 %s7029_s2, 4  ;;  %s31_s29 = sshll.u32 %s7030_s27, 4  ;;  %s118_s26 = int_to_ptr.vmem [resolvable:$true] %s117_s26  ;;  %s7163_s29 = int_to_ptr.vmem [resolvable:$true] %s31_s29 }
  0x3a   :  { %s6832_s18 = scalar_lea.hbm %s8081_s9, 32 }
  0x3b   :  { %p6833_p10 = scmp.ne.s32.totalorder %s8081_s9, %s6832_s18  ;;  %p6836_p11 = scmp.lt.u32.totalorder %s6832_s18, %s8081_s9 }
  0x3d   :  { %p6838_p12 = pnand %p6836_p11, %p6833_p10 }
  0x3f   :  { %6841 = shalt.err (!%p6838_p12)
}
  0x40   :  { %s6842_s6 = scalar_lea.vmem %s118_s26, 32  ;;  %p6847_p0 = scmp.lt.s32.totalorder %s118_s26, %s118_s26 }
  0x41   :  { %p6843_p13 = scmp.ne.s32.totalorder %s118_s26, %s6842_s6  ;;  %p6848_p1 = scmp.lt.s32.totalorder %s6842_s6, %s6842_s6 }
  0x43   :  { %p6849_p2 = por %p6848_p1, %p6847_p0 }
  0x45   :  { %p6850_p3 = pnand %p6849_p2, %p6843_p13 }
  0x47   :  { %6853 = shalt.err (!%p6850_p3)
}
  0x48   :  { %s7031_s15 = smov 1   ;;  %s6854_s16 = scalar_lea.hbm %s8072_s0, 256 }
  0x49   :  { %123 = dma.hbm_to_vmem [thread:$0]  %s8081_s9, 32, %s118_s26, [#allocation15], %s7024_s24, %s7024_s24, %s7031_s15  }
  0x4a   :  { %p6855_p4 = scmp.ne.s32.totalorder %s8072_s0, %s6854_s16  ;;  %p6858_p5 = scmp.lt.u32.totalorder %s6854_s16, %s8072_s0 }
  0x4c   :  { %p6860_p6 = pnand %p6858_p5, %p6855_p4 }
  0x4e   :  { %6863 = shalt.err (!%p6860_p6)
}
  0x4f   :  { %s6864_s21 = scalar_lea.vmem %s7163_s29, 256  ;;  %p6869_p8 = scmp.lt.s32.totalorder %s7163_s29, %s7163_s29 }
  0x50   :  { %p6865_p7 = scmp.ne.s32.totalorder %s7163_s29, %s6864_s21  ;;  %p6870_p9 = scmp.lt.s32.totalorder %s6864_s21, %s6864_s21 }
  0x52   :  { %p6871_p10 = por %p6870_p9, %p6869_p8 }
  0x54   :  { %p6872_p11 = pnand %p6871_p10, %p6865_p7 }
  0x56   :  { %6875 = shalt.err (!%p6872_p11)
}
  0x57   :  { %37 = dma.hbm_to_vmem [thread:$0]  %s8072_s0, 256, %s7163_s29, [#allocation3], %s7027_s30, %s7027_s30, %s7028_s25  }
  0x58   :  { %s7032_s22 = smov [#allocation7]   ;;  %s7033_s4 = smov [#allocation10]  }
  0x59   :  { %s58_s6 = sshll.u32 %s7032_s22, 4  ;;  %s79_s28 = sshll.u32 %s7033_s4, 4  ;;  %s59_s6 = int_to_ptr.vmem [resolvable:$true] %s58_s6  ;;  %s7200_s28 = int_to_ptr.vmem [resolvable:$true] %s79_s28 }
  0x5a   :  { %s6876_s16 = scalar_lea.hbm %s8075_s3, 32 }
  0x5b   :  { %p6877_p12 = scmp.ne.s32.totalorder %s8075_s3, %s6876_s16  ;;  %p6880_p13 = scmp.lt.u32.totalorder %s6876_s16, %s8075_s3 }
  0x5d   :  { %p6882_p0 = pnand %p6880_p13, %p6877_p12 }
  0x5f   :  { %6885 = shalt.err (!%p6882_p0)
}
  0x60   :  { %s6886_s0 = scalar_lea.vmem %s59_s6, 32  ;;  %p6891_p2 = scmp.lt.s32.totalorder %s59_s6, %s59_s6 }
  0x61   :  { %p6887_p1 = scmp.ne.s32.totalorder %s59_s6, %s6886_s0  ;;  %p6892_p3 = scmp.lt.s32.totalorder %s6886_s0, %s6886_s0 }
  0x63   :  { %p6893_p4 = por %p6892_p3, %p6891_p2 }
  0x65   :  { %p6894_p5 = pnand %p6893_p4, %p6887_p1 }
  0x67   :  { %6897 = shalt.err (!%p6894_p5)
}
  0x68   :  { %61 = dma.hbm_to_vmem [thread:$0]  %s8075_s3, 32, %s59_s6, [#allocation6]  }
  0x69   :  { %s6898_s22 = scalar_lea.hbm %s8077_s5, 128 }
  0x6a   :  { %p6899_p6 = scmp.ne.s32.totalorder %s8077_s5, %s6898_s22  ;;  %p6902_p7 = scmp.lt.u32.totalorder %s6898_s22, %s8077_s5 }
  0x6c   :  { %p6904_p8 = pnand %p6902_p7, %p6899_p6 }
  0x6e   :  { %6907 = shalt.err (!%p6904_p8)
}
  0x6f   :  { %s6908_s17 = scalar_lea.vmem %s7200_s28, 128  ;;  %p6913_p10 = scmp.lt.s32.totalorder %s7200_s28, %s7200_s28 }
  0x70   :  { %p6909_p9 = scmp.ne.s32.totalorder %s7200_s28, %s6908_s17  ;;  %p6914_p11 = scmp.lt.s32.totalorder %s6908_s17, %s6908_s17 }
  0x72   :  { %p6915_p12 = por %p6914_p11, %p6913_p10 }
  0x74   :  { %p6916_p13 = pnand %p6915_p12, %p6909_p9 }
  0x76   :  { %6919 = shalt.err (!%p6916_p13)
}
  0x77   :  { %s7034_s3 = smov 32   ;;  %s7035_s6 = smov 2  }
  0x78   :  { %85 = dma.hbm_to_vmem [thread:$0]  %s8077_s5, 128, %s7200_s28, [#allocation9], %s7034_s3, %s7034_s3, %s7035_s6  }
  0x79   :  { %s7036_s20 = smov [#allocation13]   ;;  %s7037_s29 = smov [#allocation16]  }
  0x7a   :  { %s103_s0 = sshll.u32 %s7036_s20, 4  ;;  %s131_s21 = sshll.u32 %s7037_s29, 4  ;;  %s104_s0 = int_to_ptr.vmem [resolvable:$true] %s103_s0  ;;  %s7231_s21 = int_to_ptr.vmem [resolvable:$true] %s131_s21 }
  0x7b   :  { %s6920_s22 = scalar_lea.hbm %s8079_s7, 32 }
  0x7c   :  { %p6921_p0 = scmp.ne.s32.totalorder %s8079_s7, %s6920_s22  ;;  %p6924_p1 = scmp.lt.u32.totalorder %s6920_s22, %s8079_s7 }
  0x7e   :  { %p6926_p2 = pnand %p6924_p1, %p6921_p0 }
  0x80   :  { %6929 = shalt.err (!%p6926_p2)
}
  0x81   :  { %s6930_s5 = scalar_lea.vmem %s104_s0, 32  ;;  %p6935_p4 = scmp.lt.s32.totalorder %s104_s0, %s104_s0 }
  0x82   :  { %p6931_p3 = scmp.ne.s32.totalorder %s104_s0, %s6930_s5  ;;  %p6936_p5 = scmp.lt.s32.totalorder %s6930_s5, %s6930_s5 }
  0x84   :  { %p6937_p6 = por %p6936_p5, %p6935_p4 }
  0x86   :  { %p6938_p7 = pnand %p6937_p6, %p6931_p3 }
  0x88   :  { %6941 = shalt.err (!%p6938_p7)
}
  0x89   :  { %109 = dma.hbm_to_vmem [thread:$0]  %s8079_s7, 32, %s104_s0, [#allocation12], %s7024_s24, %s7024_s24, %s7031_s15  }
  0x8a   :  { %s6942_s18 = scalar_lea.hbm %s8083_s11, 256 }
  0x8b   :  { %p6943_p8 = scmp.ne.s32.totalorder %s8083_s11, %s6942_s18  ;;  %p6946_p9 = scmp.lt.u32.totalorder %s6942_s18, %s8083_s11 }
  0x8d   :  { %p6948_p10 = pnand %p6946_p9, %p6943_p8 }
  0x8f   :  { %6951 = shalt.err (!%p6948_p10)
}
  0x90   :  { %s6952_s26 = scalar_lea.vmem %s7231_s21, 256  ;;  %p6957_p12 = scmp.lt.s32.totalorder %s7231_s21, %s7231_s21 }
  0x91   :  { %p6953_p11 = scmp.ne.s32.totalorder %s7231_s21, %s6952_s26  ;;  %p6958_p13 = scmp.lt.s32.totalorder %s6952_s26, %s6952_s26 }
  0x93   :  { %p6959_p0 = por %p6958_p13, %p6957_p12 }
  0x95   :  { %p6960_p1 = pnand %p6959_p0, %p6953_p11 }
  0x97   :  { %6963 = shalt.err (!%p6960_p1)
}
  0x98   :  { %137 = dma.hbm_to_vmem [thread:$0]  %s8083_s11, 256, %s7231_s21, [#allocation15], %s7027_s30, %s7027_s30, %s7028_s25  }
  0x99   :  { %s7038_s0 = smov [#allocation17]   ;;  %s6964_s27 = scalar_lea.hbm %s8084_s12, 16 }
  0x9a   :  { %s144_s22 = sshll.u32 %s7038_s0, 4  ;;  %p6965_p2 = scmp.ne.s32.totalorder %s8084_s12, %s6964_s27  ;;  %s145_s22 = int_to_ptr.vmem [resolvable:$true] %s144_s22 }
  0x9b   :  { %p6968_p3 = scmp.lt.u32.totalorder %s6964_s27, %s8084_s12 }
  0x9d   :  { %p6970_p4 = pnand %p6968_p3, %p6965_p2 }
  0x9f   :  { %6973 = shalt.err (!%p6970_p4)
}
  0xa0   :  { %s6974_s3 = scalar_lea.vmem %s145_s22, 16  ;;  %s6978_s11 = scalar_lea.vmem %s145_s22, 32 }
  0xa1   :  { %p6975_p5 = scmp.ne.s32.totalorder %s145_s22, %s6974_s3  ;;  %p6979_p6 = scmp.lt.s32.totalorder %s145_s22, %s145_s22 }
  0xa2   :  { %p6980_p7 = scmp.lt.s32.totalorder %s6978_s11, %s6974_s3 }
  0xa4   :  { %p6981_p8 = por %p6980_p7, %p6979_p6 }
  0xa6   :  { %p6982_p9 = pnand %p6981_p8, %p6975_p5 }
  0xa8   :  { %6985 = shalt.err (!%p6982_p9)
}
  0xa9   :  { %147 = dma.hbm_to_vmem [thread:$0]  %s8084_s12, 16, %s145_s22, [#allocation18]  }
  0xaa   :  { %7008 = dma.done.wait [#allocation3], 256  }
  0xab   :  { %7009 = vsyncadd [#allocation3], 4294967040 }
  0xac   :  { %7010 = dma.done.wait [#allocation6], 1056  }
  0xad   :  { %7011 = vsyncadd [#allocation6], 4294966240 }
  0xae   :  { %7012 = dma.done.wait [#allocation9], 49280  }
  0xaf   :  { %7013 = vsyncadd [#allocation9], 4294918016 }
  0xb0   :  { %7014 = dma.done.wait [#allocation12], 544  }
  0xb1   :  { %7015 = vsyncadd [#allocation12], 4294966752 }
  0xb2   :  { %7016 = dma.done.wait [#allocation15], 288  }
  0xb3   :  { %7017 = vsyncadd [#allocation15], 4294967008 }
  0xb4   :  { %7018 = dma.done.wait [#allocation18], 16  }
  0xb5   :  { %7019 = vsyncadd [#allocation18], 4294967280  ;;  %v7039_v0 = vmov 0.0   ;;  %v6149_v1 = vld [vmem:[#allocation5 + $0xc] ss:$16 sps:$4 sm:$0xff]   ;;  %v180_v9 = vld [vmem:[#allocation2] sm:$0xff] }
  0xb6   :  { %354 = vmatprep.mubr.f32.mxu1 %v7039_v0  ;;  %277 = vmatprep.mubr.f32.mxu0 %v7039_v0  ;;  %v6151_v2 = vld [vmem:[#allocation5 + $0x8] ss:$16 sps:$4 sm:$0xff]   ;;  %v6152_v3 = vld [vmem:[#allocation5 + $0x4] ss:$16 sps:$4 sm:$0xff]   ;;  %v6154_v4 = vld [vmem:[#allocation5] ss:$16 sps:$4 sm:$0xff]  }
  0xb7   :  { %4703 = vmatprep.subr.bf16.mxu1 %v6149_v1  ;;  %v6155_v5 = vld [vmem:[#allocation5 + $0x2c] ss:$16 sps:$4 sm:$0xff]   ;;  %v6157_v6 = vld [vmem:[#allocation5 + $0x28] ss:$16 sps:$4 sm:$0xff]   ;;  %4695 = vmatprep.subr.bf16.mxu0 %v6152_v3  ;;  %v6158_v7 = vld [vmem:[#allocation5 + $0x24] ss:$16 sps:$4 sm:$0xff]  }
  0xb8   :  { %4705 = vmatpush1.bf16.msra.mxu1 %v6151_v2  ;;  %4697 = vmatpush1.bf16.msra.mxu0 %v6154_v4  ;;  %v6160_v8 = vld [vmem:[#allocation5 + $0x20] ss:$16 sps:$4 sm:$0xff]   ;;  %vm206_vm0 = vcmask 261120   ;;  %v181_v10 = vld [vmem:[#allocation2 + $0x8] sm:$0xff]  ;;  %vm384_vm1 = vcmask 130048   ;;  %v4483_v48 = vld [vmem:[%s8073_s1 + $0x18] sm:$0xff]  }
  0xb9   :  { %4707 = vmatprep.subr.bf16.mxu1 %v6155_v5  ;;  %4699 = vmatprep.subr.bf16.mxu0 %v6158_v7  ;;  %v6161_v11 = vld [vmem:[#allocation8 + $0x4] ss:$8 sps:$4 sm:$0xff]   ;;  %v6163_v12 = vld [vmem:[#allocation8] ss:$8 sps:$4 sm:$0xff]   ;;  %v6164_v13 = vld [vmem:[#allocation8 + $0x14] ss:$8 sps:$4 sm:$0xff]   ;;  %v4407_v49 = vunpack.c.l.bf16 %v4483_v48  ;;  %v4408_v50 = vunpack.c.h.bf16 %v4483_v48  ;;  %v589_v5 = vlaneseq }
  0xba   :  { %v6166_v14 = vld [vmem:[#allocation8 + $0x10] ss:$8 sps:$4 sm:$0xff]   ;;  %v6167_v15 = vld [vmem:[#allocation8 + $0x24] ss:$8 sps:$4 sm:$0xff]   ;;  %v6169_v16 = vld [vmem:[#allocation8 + $0x20] ss:$8 sps:$4 sm:$0xff]  }
  0xbb   :  { %v6170_v17 = vld [vmem:[#allocation8 + $0x34] ss:$8 sps:$4 sm:$0xff]   ;;  %v6172_v18 = vld [vmem:[#allocation8 + $0x30] ss:$8 sps:$4 sm:$0xff]   ;;  %v6173_v19 = vld [vmem:[#allocation8 + $0x44] ss:$8 sps:$4 sm:$0xff]  }
  0xbc   :  { %4709 = vmatpush1.bf16.msra.mxu1 %v6157_v6  ;;  %4701 = vmatpush1.bf16.msra.mxu0 %v6160_v8  ;;  %v6175_v20 = vld [vmem:[#allocation8 + $0x40] ss:$8 sps:$4 sm:$0xff]   ;;  %v6176_v21 = vld [vmem:[#allocation8 + $0x54] ss:$8 sps:$4 sm:$0xff]   ;;  %v6178_v22 = vld [vmem:[#allocation8 + $0x50] ss:$8 sps:$4 sm:$0xff]  }
  0xbd   :  { %4719 = vmatprep.subr.bf16.mxu1 %v6161_v11  ;;  %v6179_v23 = vld [vmem:[#allocation8 + $0x64] ss:$8 sps:$4 sm:$0xff]   ;;  %v6181_v24 = vld [vmem:[#allocation8 + $0x60] ss:$8 sps:$4 sm:$0xff]   ;;  %v6182_v25 = vld [vmem:[#allocation8 + $0x74] ss:$8 sps:$4 sm:$0xff]  }
  0xbe   :  { %v6184_v26 = vld [vmem:[#allocation8 + $0x70] ss:$8 sps:$4 sm:$0xff]   ;;  %v6185_v27 = vld [vmem:[#allocation8 + $0x84] ss:$8 sps:$4 sm:$0xff]   ;;  %v6187_v28 = vld [vmem:[#allocation8 + $0x80] ss:$8 sps:$4 sm:$0xff]  }
  0xbf   :  { %4335 = vmatmul.mubr.msk.f32.vlgmr.msra.gmra.mrb[0].mxu1 %vm206_vm0, %v180_v9  ;;  %4333 = vmatmul.mubr.msk.f32.vlgmr.msra.gmra.mrb[0].mxu0 %vm206_vm0, %v180_v9  ;;  %v6188_v29 = vld [vmem:[#allocation8 + $0x94] ss:$8 sps:$4 sm:$0xff]   ;;  %v6190_v30 = vld [vmem:[#allocation8 + $0x90] ss:$8 sps:$4 sm:$0xff]   ;;  %v6191_v31 = vld [vmem:[#allocation8 + $0xa4] ss:$8 sps:$4 sm:$0xff]  }
  0xc0   :  { %360 = vmatprep.mubr.f32.mxu1 %v7039_v0  ;;  %283 = vmatprep.mubr.f32.mxu0 %v7039_v0  ;;  %v6193_v32 = vld [vmem:[#allocation8 + $0xa0] ss:$8 sps:$4 sm:$0xff]   ;;  %v4394_v51 = vld [vmem:[%s8073_s1] sm:$0xff]   ;;  %v4481_v54 = vld [vmem:[%s8073_s1 + $0x8] sm:$0xff]   ;;  %v7316_v6 = vshrl.u32 %v589_v5, 7  ;;  %vm7041_vm8 = vmmov 0  }
  0xc1   :  { %4721 = vmatpush1.bf16.msra.mxu1 %v6163_v12  ;;  %v4482_v40 = vld [vmem:[%s8073_s1 + $0x10] sm:$0xff]   ;;  %v4395_v52 = vunpack.c.l.bf16 %v4394_v51  ;;  %v4396_v53 = vunpack.c.h.bf16 %v4394_v51  ;;  %v4399_v55 = vunpack.c.l.bf16 %v4481_v54  ;;  %v4400_v56 = vunpack.c.h.bf16 %v4481_v54  ;;  %v6196_v58 = vld [vmem:[#allocation8 + $0xb0] ss:$8 sps:$4 sm:$0xff]  }
  0xc2   :  { %4723 = vmatprep.subr.bf16.mxu1 %v6164_v13  ;;  %v4403_v46 = vunpack.c.l.bf16 %v4482_v40  ;;  %v4404_v47 = vunpack.c.h.bf16 %v4482_v40  ;;  %v6194_v57 = vld [vmem:[#allocation8 + $0xb4] ss:$8 sps:$4 sm:$0xff]   ;;  %v6197_v59 = vld [vmem:[#allocation8 + $0xc4] ss:$8 sps:$4 sm:$0xff]   ;;  %v6199_v60 = vld [vmem:[#allocation8 + $0xc0] ss:$8 sps:$4 sm:$0xff]  }
  0xc3   :  { %4336 = vmatmul.mubr.msk.f32.gmra.mrb[2].mxu1 %vm206_vm0, %v181_v10  ;;  %4334 = vmatmul.mubr.msk.f32.gmra.mrb[2].mxu0 %vm206_vm0, %v181_v10  ;;  %v6200_v61 = vld [vmem:[#allocation8 + $0xd4] ss:$8 sps:$4 sm:$0xff]   ;;  %v6202_v62 = vld [vmem:[#allocation8 + $0xd0] ss:$8 sps:$4 sm:$0xff]   ;;  %v6203_v63 = vld [vmem:[#allocation8 + $0xe4] ss:$8 sps:$4 sm:$0xff]  }
  0xc4   :  { %461 = vmatprep.mubr.f32.mxu0 %v7039_v0  ;;  %v6205_v1 = vld [vmem:[#allocation8 + $0xe0] ss:$8 sps:$4 sm:$0xff]   ;;  %v6206_v2 = vld [vmem:[#allocation8 + $0xf4] ss:$8 sps:$4 sm:$0xff]   ;;  %v6208_v3 = vld [vmem:[#allocation8 + $0xf0] ss:$8 sps:$4 sm:$0xff]  }
  0xc5   :  { %4725 = vmatpush1.bf16.msra.mxu1 %v6166_v14  ;;  %v6209_v4 = vld [vmem:[#allocation8 + $0x104] ss:$8 sps:$4 sm:$0xff]   ;;  %v7319_v9 = vsub.s32 0, %v7316_v6  ;;  %v587_v10 = vld [vmem:[#allocation7] sm:$0x3]  ;;  %v7322_v11 = vsub.s32 1, %v7316_v6 }
  0xc6   :  { %4727 = vmatprep.subr.bf16.mxu1 %v6167_v15  ;;  %vm772_vm3 = vcmp.lt.s32.totalorder %v7316_v6, 1  ;;  %v6217_v54 = vld [vmem:[#allocation8 + $0x120] ss:$8 sps:$4 sm:$0xff]   ;;  %v6226_v5 = vld [vmem:[#allocation8 + $0x150] ss:$8 sps:$4 sm:$0xff]   ;;  %vm797_vm5 = vcmp.lt.s32.totalorder %v7316_v6, 7 }
  0xc7   :  { %v592_v14 = vrot.slane %v587_v10, %v7319_v9  ;;  %v596_v15 = vrot.slane %v587_v10, %v7322_v11  ;;  %v6314_v10 = vld [vmem:[#allocation8 + $0x334] ss:$8 sps:$4 sm:$0xff]   ;;  %vm2420_vm9 = vcmask 1041408   ;;  %vm2407_vm10 = vcmask 15360  }
  0xc9   :  { %4729 = vmatpush1.bf16.msra.mxu1 %v6169_v16 }
  0xca   :  { %4731 = vmatprep.subr.bf16.mxu1 %v6170_v17 }
  0xcd   :  { %4733 = vmatpush1.bf16.msra.mxu1 %v6172_v18  ;;  %v616_v18 = vand.u32 15, %v7316_v6 }
  0xce   :  { %4735 = vmatprep.subr.bf16.mxu1 %v6173_v19 }
  0xcf   :  { %vm660_vm2 = vcmp.ne.s32.totalorder %v616_v18, 0  ;;  %v6319_v18 = vld [vmem:[#allocation8 + $0x340] ss:$8 sps:$4 sm:$0xff]  }
  0xd1   :  { %4737 = vmatpush1.bf16.msra.mxu1 %v6175_v20  ;;  %v610_v20 = vadd.s32 16, %v7316_v6 }
  0xd2   :  { %4739 = vmatprep.subr.bf16.mxu1 %v6176_v21 }
  0xd5   :  { %4741 = vmatpush1.bf16.msra.mxu1 %v6178_v22 }
  0xd6   :  { %4743 = vmatprep.subr.bf16.mxu1 %v6179_v23 }
  0xd9   :  { %4745 = vmatpush1.bf16.msra.mxu1 %v6181_v24 }
  0xda   :  { %4747 = vmatprep.subr.bf16.mxu1 %v6182_v25 }
  0xdd   :  { %4749 = vmatpush1.bf16.msra.mxu1 %v6184_v26 }
  0xde   :  { %4751 = vmatprep.subr.bf16.mxu1 %v6185_v27 }
  0xe1   :  { %4753 = vmatpush1.bf16.msra.mxu1 %v6187_v28 }
  0xe2   :  { %4755 = vmatprep.subr.bf16.mxu1 %v6188_v29 }
  0xe5   :  { %4757 = vmatpush1.bf16.msra.mxu1 %v6190_v30  ;;  %v630_v30 = vand.u32 15, %v610_v20  ;;  %v6320_v20 = vld [vmem:[#allocation8 + $0x354] ss:$8 sps:$4 sm:$0xff]  }
  0xe6   :  { %4759 = vmatprep.subr.bf16.mxu1 %v6191_v31 }
  0xe7   :  { %vm662_vm4 = vcmp.ne.s32.totalorder %v630_v30, 0  ;;  %v6238_v30 = vld [vmem:[#allocation8 + $0x190] ss:$8 sps:$4 sm:$0xff]  }
  0xe9   :  { %4761 = vmatpush1.bf16.msra.mxu1 %v6193_v32 }
  0xea   :  { %4763 = vmatprep.subr.bf16.mxu1 %v6194_v57 }
  0xed   :  { %4765 = vmatpush1.bf16.msra.mxu1 %v6196_v58  ;;  %v6220_v58 = vld [vmem:[#allocation8 + $0x130] ss:$8 sps:$4 sm:$0xff]  }
  0xee   :  { %4767 = vmatprep.subr.bf16.mxu1 %v6197_v59  ;;  %v6221_v59 = vld [vmem:[#allocation8 + $0x144] ss:$8 sps:$4 sm:$0xff]  }
  0xf1   :  { %4769 = vmatpush1.bf16.msra.mxu1 %v6199_v60 }
  0xf2   :  { %4771 = vmatprep.subr.bf16.mxu1 %v6200_v61  ;;  %v6305_v61 = vld [vmem:[#allocation8 + $0x304] ss:$8 sps:$4 sm:$0xff]  }
  0xf5   :  { %4773 = vmatpush1.bf16.msra.mxu1 %v6202_v62  ;;  %v6307_v62 = vld [vmem:[#allocation8 + $0x300] ss:$8 sps:$4 sm:$0xff]  }
  0xf6   :  { %4775 = vmatprep.subr.bf16.mxu1 %v6203_v63  ;;  %v6308_v63 = vld [vmem:[#allocation8 + $0x314] ss:$8 sps:$4 sm:$0xff]  }
  0xf9   :  { %4777 = vmatpush1.bf16.msra.mxu1 %v6205_v1  ;;  %v6223_v1 = vld [vmem:[#allocation8 + $0x140] ss:$8 sps:$4 sm:$0xff]  }
  0xfa   :  { %4779 = vmatprep.subr.bf16.mxu1 %v6206_v2  ;;  %v6224_v2 = vld [vmem:[#allocation8 + $0x154] ss:$8 sps:$4 sm:$0xff]  }
  0xfd   :  { %4781 = vmatpush1.bf16.msra.mxu1 %v6208_v3  ;;  %v6310_v3 = vld [vmem:[#allocation8 + $0x310] ss:$8 sps:$4 sm:$0xff]  }
  0xfe   :  { %4783 = vmatprep.subr.bf16.mxu1 %v6209_v4  ;;  %v6311_v4 = vld [vmem:[#allocation8 + $0x324] ss:$8 sps:$4 sm:$0xff]  }
 0x192   :  { %v356_v33 = vpop.f32.mrb[0].mxu1  ;;  %v279_v35 = vpop.f32.mrb[0].mxu0 }
 0x193   :  { %v358_v34 = vpop.f32.mrb[1].mxu1  ;;  %v281_v36 = vpop.f32.mrb[1].mxu0 }
 0x196   :  { %v362_v37 = vpop.f32.mrb[2].mxu1  ;;  %v285_v42 = vpop.f32.mrb[2].mxu0 }
 0x197   :  { %v4712_v38 = vpack.c.bf16 %v362_v37, %v356_v33  ;;  %v364_v39 = vpop.f32.mrb[3].mxu1  ;;  %v4716_v43 = vpack.c.bf16 %v285_v42, %v279_v35  ;;  %v287_v44 = vpop.f32.mrb[3].mxu0  ;;  %v7346_v33 = vsel %vm660_vm2, 1.0, %v7039_v0 }
 0x198   :  { %v4710_v41 = vpack.c.bf16 %v364_v39, %v358_v34  ;;  %v4714_v45 = vpack.c.bf16 %v287_v44, %v281_v36 }
 0x19a   :  { %4711 = vmatprep.subr.bf16.mxu0 %v4710_v41  ;;  %v6211_v41 = vld [vmem:[#allocation8 + $0x100] ss:$8 sps:$4 sm:$0xff]  }
 0x19b   :  { %4713 = vmatpush1.bf16.msra.mxu0 %v4712_v38 }
 0x19c   :  { %4715 = vmatprep.subr.bf16.mxu0 %v4714_v45 }
 0x19e   :  { %4341 = vmatmul.mubr.msk.f32.vlgmr.msra.gmra.mrb[4].mxu0 %vm384_vm1, %v4403_v46 }
 0x19f   :  { %4717 = vmatpush1.bf16.msra.mxu0 %v4716_v43  ;;  %467 = vmatprep.mubr.f32.mxu0 %v7039_v0  ;;  %v6212_v43 = vld [vmem:[#allocation8 + $0x114] ss:$8 sps:$4 sm:$0xff]  }
 0x1a0   :  { %4911 = vmatprep.subr.bf16.mxu0 %v6305_v61  ;;  %v6265_v61 = vld [vmem:[#allocation8 + $0x220] ss:$8 sps:$4 sm:$0xff]  }
 0x1a2   :  { %4342 = vmatmul.mubr.msk.f32.gmra.mrb[6].mxu0 %vm384_vm1, %v4404_v47  ;;  %v7365_v47 = vsel %vm662_vm4, 1.0, %v7039_v0 }
 0x1a3   :  { %473 = vmatprep.mubr.f32.mxu0 %v7039_v0 }
 0x1a6   :  { %4343 = vmatmul.mubr.msk.f32.gmra.mrb[8].mxu0 %vm384_vm1, %v4407_v49  ;;  %v6214_v49 = vld [vmem:[#allocation8 + $0x110] ss:$8 sps:$4 sm:$0xff]  }
 0x1a7   :  { %479 = vmatprep.mubr.f32.mxu0 %v7039_v0 }
 0x1aa   :  { %4344 = vmatmul.mubr.msk.f32.gmra.mrb[10].mxu0 %vm384_vm1, %v4408_v50  ;;  %v6215_v50 = vld [vmem:[#allocation8 + $0x124] ss:$8 sps:$4 sm:$0xff]  }
 0x1ab   :  { %562 = vmatprep.mubr.f32.mxu0 %v7039_v0 }
 0x1ae   :  { %4345 = vmatmul.mubr.msk.f32.vlgmr.msra.gmra.mrb[4].mxu0 %vm384_vm1, %v4395_v52 }
 0x1af   :  { %568 = vmatprep.mubr.f32.mxu0 %v7039_v0  ;;  %4913 = vmatpush1.bf16.msra.mxu0 %v6307_v62  ;;  %v6266_v62 = vld [vmem:[#allocation8 + $0x234] ss:$8 sps:$4 sm:$0xff]  }
 0x1b0   :  { %4915 = vmatprep.subr.bf16.mxu0 %v6308_v63 }
 0x1b2   :  { %4346 = vmatmul.mubr.msk.f32.gmra.mrb[6].mxu0 %vm384_vm1, %v4396_v53 }
 0x1b3   :  { %574 = vmatprep.mubr.f32.mxu0 %v7039_v0  ;;  %4917 = vmatpush1.bf16.msra.mxu0 %v6310_v3  ;;  %v6269_v3 = vld [vmem:[#allocation8 + $0x244] ss:$8 sps:$4 sm:$0xff]  }
 0x1b4   :  { %4919 = vmatprep.subr.bf16.mxu0 %v6311_v4 }
 0x1b6   :  { %4347 = vmatmul.mubr.msk.f32.gmra.mrb[8].mxu0 %vm384_vm1, %v4399_v55 }
 0x1b7   :  { %580 = vmatprep.mubr.f32.mxu0 %v7039_v0 }
 0x1ba   :  { %4348 = vmatmul.mubr.msk.f32.gmra.mrb[10].mxu0 %vm384_vm1, %v4400_v56  ;;  %v6218_v56 = vld [vmem:[#allocation8 + $0x134] ss:$8 sps:$4 sm:$0xff]  }
 0x281   :  { %v564_v7 = vpop.f32.mrb[4].mxu0 }
 0x282   :  { %v566_v8 = vpop.f32.mrb[5].mxu0  ;;  %v7327_v19 = vadd.f32 %v592_v14, %v564_v7  ;;  %v6227_v7 = vld [vmem:[#allocation8 + $0x164] ss:$8 sps:$4 sm:$0xff]  }
 0x283   :  { %v7330_v21 = vadd.f32 %v596_v15, %v566_v8  ;;  %v6313_v8 = vld [vmem:[#allocation8 + $0x320] ss:$8 sps:$4 sm:$0xff]  }
 0x284   :  { %v764_v28 = vrot.slane %v7327_v19, 7  ;;  %4921 = vmatpush1.bf16.msra.mxu0 %v6313_v8  ;;  %v6274_v8 = vld [vmem:[#allocation8 + $0x250] ss:$8 sps:$4 sm:$0xff]  }
 0x285   :  { %v570_v12 = vpop.f32.mrb[6].mxu0  ;;  %v765_v31 = vrot.slane %v7330_v21, 7  ;;  %4923 = vmatprep.subr.bf16.mxu0 %v6314_v10  ;;  %v6275_v10 = vld [vmem:[#allocation8 + $0x264] ss:$8 sps:$4 sm:$0xff]  }
 0x286   :  { %v572_v13 = vpop.f32.mrb[7].mxu0  ;;  %v7348_v34 = vadd.f32 %v592_v14, %v570_v12  ;;  %v6229_v12 = vld [vmem:[#allocation8 + $0x160] ss:$8 sps:$4 sm:$0xff]  }
 0x287   :  { %v7334_v25 = vadd.f32 %v596_v15, %v572_v13  ;;  %v6230_v13 = vld [vmem:[#allocation8 + $0x174] ss:$8 sps:$4 sm:$0xff]  }
 0x288   :  { %v766_v45 = vrot.slane %v7348_v34, 7 }
 0x289   :  { %v576_v16 = vpop.f32.mrb[8].mxu0  ;;  %v767_v39 = vrot.slane %v7334_v25, 7  ;;  %v792_v63 = vrot.slane %v7334_v25, 1 }
 0x28a   :  { %v578_v17 = vpop.f32.mrb[9].mxu0  ;;  %v7350_v35 = vadd.f32 %v592_v14, %v576_v16  ;;  %v777_v51 = vsel %vm772_vm3, %v764_v28, %v766_v45  ;;  %v6232_v16 = vld [vmem:[#allocation8 + $0x170] ss:$8 sps:$4 sm:$0xff]  }
 0x28b   :  { %v7336_v26 = vadd.f32 %v596_v15, %v578_v17  ;;  %v778_v46 = vsel %vm772_vm3, %v765_v31, %v767_v39  ;;  %v6233_v17 = vld [vmem:[#allocation8 + $0x184] ss:$8 sps:$4 sm:$0xff]  }
 0x28c   :  { %v768_v44 = vrot.slane %v7350_v35, 7 }
 0x28d   :  { %v582_v22 = vpop.f32.mrb[10].mxu0  ;;  %v769_v37 = vrot.slane %v7336_v26, 7 }
 0x28e   :  { %v7332_v23 = vadd.f32 %v592_v14, %v582_v22  ;;  %v584_v24 = vpop.f32.mrb[11].mxu0  ;;  %v775_v53 = vsel %vm772_vm3, %v766_v45, %v768_v44  ;;  %v6316_v14 = vld [vmem:[#allocation8 + $0x330] ss:$8 sps:$4 sm:$0xff]   ;;  %v6235_v22 = vld [vmem:[#allocation8 + $0x180] ss:$8 sps:$4 sm:$0xff]  }
 0x28f   :  { %v7338_v27 = vadd.f32 %v596_v15, %v584_v24  ;;  %v776_v48 = vsel %vm772_vm3, %v767_v39, %v769_v37  ;;  %v785_v55 = vmul.f32 %v7365_v47, %v775_v53  ;;  %v6317_v15 = vld [vmem:[#allocation8 + $0x344] ss:$8 sps:$4 sm:$0xff]   ;;  %4925 = vmatpush1.bf16.msra.mxu0 %v6316_v14  ;;  %v6236_v24 = vld [vmem:[#allocation8 + $0x194] ss:$8 sps:$4 sm:$0xff]   ;;  %v6328_v39 = vld [vmem:[#allocation8 + $0x370] ss:$8 sps:$4 sm:$0xff]  }
 0x290   :  { %v770_v29 = vrot.slane %v7332_v23, 7  ;;  %v786_v52 = vmul.f32 %v7365_v47, %v776_v48  ;;  %4927 = vmatprep.subr.bf16.mxu0 %v6317_v15  ;;  %v6247_v45 = vld [vmem:[#allocation8 + $0x1c0] ss:$8 sps:$4 sm:$0xff]   ;;  %v6334_v48 = vld [vmem:[#allocation8 + $0x390] ss:$8 sps:$4 sm:$0xff]  }
 0x291   :  { %v771_v32 = vrot.slane %v7338_v27, 7  ;;  %v6253_v53 = vld [vmem:[#allocation8 + $0x1e0] ss:$8 sps:$4 sm:$0xff]   ;;  %v6280_v14 = vld [vmem:[#allocation8 + $0x270] ss:$8 sps:$4 sm:$0xff]  }
 0x292   :  { %v779_v36 = vsel %vm772_vm3, %v770_v29, %v764_v28  ;;  %v773_v60 = vsel %vm772_vm3, %v768_v44, %v770_v29  ;;  %v6322_v28 = vld [vmem:[#allocation8 + $0x350] ss:$8 sps:$4 sm:$0xff]   ;;  %v6323_v29 = vld [vmem:[#allocation8 + $0x364] ss:$8 sps:$4 sm:$0xff]   ;;  %v6332_v44 = vld [vmem:[#allocation8 + $0x394] ss:$8 sps:$4 sm:$0xff]  }
 0x293   :  { %v780_v38 = vsel %vm772_vm3, %v771_v32, %v765_v31  ;;  %v781_v42 = vmul.f32 %v7346_v33, %v779_v36  ;;  %v774_v57 = vsel %vm772_vm3, %v769_v37, %v771_v32  ;;  %4929 = vmatpush1.bf16.msra.mxu0 %v6319_v18  ;;  %v6239_v31 = vld [vmem:[#allocation8 + $0x1a4] ss:$8 sps:$4 sm:$0xff]   ;;  %v6325_v32 = vld [vmem:[#allocation8 + $0x360] ss:$8 sps:$4 sm:$0xff]   ;;  %v6326_v36 = vld [vmem:[#allocation8 + $0x374] ss:$8 sps:$4 sm:$0xff]  }
 0x294   :  { %v782_v40 = vmul.f32 %v7346_v33, %v780_v38  ;;  %4931 = vmatprep.subr.bf16.mxu0 %v6320_v20  ;;  %v6241_v37 = vld [vmem:[#allocation8 + $0x1a0] ss:$8 sps:$4 sm:$0xff]   ;;  %v6242_v38 = vld [vmem:[#allocation8 + $0x1b4] ss:$8 sps:$4 sm:$0xff]   ;;  %v6281_v15 = vld [vmem:[#allocation8 + $0x284] ss:$8 sps:$4 sm:$0xff]  }
 0x295   :  { %v6286_v18 = vld [vmem:[#allocation8 + $0x290] ss:$8 sps:$4 sm:$0xff]   ;;  %v6287_v20 = vld [vmem:[#allocation8 + $0x2a4] ss:$8 sps:$4 sm:$0xff]  }
 0x296   :  { %1178 = vmatprep.mubr.f32.mxu1 %v782_v40  ;;  %v6329_v40 = vld [vmem:[#allocation8 + $0x384] ss:$8 sps:$4 sm:$0xff]  }
 0x297   :  { %1179 = vmatmul.mubr.f32.vlgmr.msra.gmra.mrb[4].mxu1 %v781_v42  ;;  %4933 = vmatpush1.bf16.msra.mxu0 %v6322_v28  ;;  %v6245_v42 = vld [vmem:[#allocation8 + $0x1c4] ss:$8 sps:$4 sm:$0xff]   ;;  %v6292_v28 = vld [vmem:[#allocation8 + $0x2b0] ss:$8 sps:$4 sm:$0xff]  }
 0x298   :  { %4785 = vmatpush1.bf16.msra.mxu1 %v6211_v41  ;;  %1184 = vmatprep.mubr.f32.mxu1 %v778_v46  ;;  %v6244_v41 = vld [vmem:[#allocation8 + $0x1b0] ss:$8 sps:$4 sm:$0xff]   ;;  %v6248_v46 = vld [vmem:[#allocation8 + $0x1d4] ss:$8 sps:$4 sm:$0xff]  }
 0x299   :  { %4787 = vmatprep.subr.bf16.mxu1 %v6212_v43  ;;  %4935 = vmatprep.subr.bf16.mxu0 %v6323_v29  ;;  %v6331_v43 = vld [vmem:[#allocation8 + $0x380] ss:$8 sps:$4 sm:$0xff]   ;;  %v6293_v29 = vld [vmem:[#allocation8 + $0x2c4] ss:$8 sps:$4 sm:$0xff]  }
 0x29b   :  { %1185 = vmatmul.mubr.f32.gmra.mrb[6].mxu1 %v777_v51  ;;  %4937 = vmatpush1.bf16.msra.mxu0 %v6325_v32  ;;  %v6251_v51 = vld [vmem:[#allocation8 + $0x1e4] ss:$8 sps:$4 sm:$0xff]   ;;  %v6298_v32 = vld [vmem:[#allocation8 + $0x2d0] ss:$8 sps:$4 sm:$0xff]  }
 0x29c   :  { %4789 = vmatpush1.bf16.msra.mxu1 %v6214_v49  ;;  %1190 = vmatprep.mubr.f32.mxu1 %v786_v52  ;;  %v6335_v49 = vld [vmem:[#allocation8 + $0x3a4] ss:$8 sps:$4 sm:$0xff]   ;;  %v6337_v52 = vld [vmem:[#allocation8 + $0x3a0] ss:$8 sps:$4 sm:$0xff]  }
 0x29d   :  { %4791 = vmatprep.subr.bf16.mxu1 %v6215_v50  ;;  %4939 = vmatprep.subr.bf16.mxu0 %v6326_v36  ;;  %v6250_v50 = vld [vmem:[#allocation8 + $0x1d0] ss:$8 sps:$4 sm:$0xff]   ;;  %v609_v36 = vadd.s32 8, %v7316_v6 }
 0x29f   :  { %1191 = vmatmul.mubr.f32.gmra.mrb[8].mxu1 %v785_v55  ;;  %4941 = vmatpush1.bf16.msra.mxu0 %v6328_v39  ;;  %v6256_v55 = vld [vmem:[#allocation8 + $0x1f0] ss:$8 sps:$4 sm:$0xff]   ;;  %v623_v39 = vand.u32 15, %v609_v36 }
 0x2a0   :  { %4793 = vmatpush1.bf16.msra.mxu1 %v6217_v54  ;;  %1196 = vmatprep.mubr.f32.mxu1 %v774_v57  ;;  %v6254_v54 = vld [vmem:[#allocation8 + $0x1f4] ss:$8 sps:$4 sm:$0xff]   ;;  %v6259_v57 = vld [vmem:[#allocation8 + $0x200] ss:$8 sps:$4 sm:$0xff]  }
 0x2a1   :  { %4795 = vmatprep.subr.bf16.mxu1 %v6218_v56  ;;  %4943 = vmatprep.subr.bf16.mxu0 %v6329_v40  ;;  %v6257_v56 = vld [vmem:[#allocation8 + $0x204] ss:$8 sps:$4 sm:$0xff]   ;;  %v6302_v40 = vld [vmem:[#allocation8 + $0x2f4] ss:$8 sps:$4 sm:$0xff]   ;;  %vm673_vm6 = vcmp.ne.s32.totalorder %v623_v39, 15 }
 0x2a3   :  { %1197 = vmatmul.mubr.f32.gmra.mrb[10].mxu1 %v773_v60  ;;  %4945 = vmatpush1.bf16.msra.mxu0 %v6331_v43  ;;  %v6263_v60 = vld [vmem:[#allocation8 + $0x224] ss:$8 sps:$4 sm:$0xff]   ;;  %v611_v43 = vadd.s32 24, %v7316_v6 }
 0x2a4   :  { %4797 = vmatpush1.bf16.msra.mxu1 %v6220_v58  ;;  %1267 = vmatprep.mubr.f32.mxu1 %v7330_v21  ;;  %v6260_v58 = vld [vmem:[#allocation8 + $0x214] ss:$8 sps:$4 sm:$0xff]   ;;  %v6755_v6 = vld [vmem:[%s8082_s10 + $0x18] sm:$0xff]  }
 0x2a5   :  { %4799 = vmatprep.subr.bf16.mxu1 %v6221_v59  ;;  %4947 = vmatprep.subr.bf16.mxu0 %v6332_v44  ;;  %v6262_v59 = vld [vmem:[#allocation8 + $0x210] ss:$8 sps:$4 sm:$0xff]   ;;  %v791_v44 = vrot.slane %v7348_v34, 1 }
 0x2a7   :  { %4949 = vmatpush1.bf16.msra.mxu0 %v6334_v48 }
 0x2a8   :  { %4801 = vmatpush1.bf16.msra.mxu1 %v6223_v1  ;;  %4951 = vmatprep.subr.bf16.mxu0 %v6335_v49  ;;  %v6268_v1 = vld [vmem:[#allocation8 + $0x230] ss:$8 sps:$4 sm:$0xff]   ;;  %v789_v49 = vrot.slane %v7327_v19, 1 }
 0x2a9   :  { %4803 = vmatprep.subr.bf16.mxu1 %v6224_v2  ;;  %v790_v2 = vrot.slane %v7330_v21, 1 }
 0x2ab   :  { %4953 = vmatpush1.bf16.msra.mxu0 %v6337_v52  ;;  %v803_v4 = vsel %vm797_vm5, %v790_v2, %v792_v63 }
 0x2ac   :  { %4805 = vmatpush1.bf16.msra.mxu1 %v6226_v5  ;;  %v6271_v5 = vld [vmem:[#allocation8 + $0x240] ss:$8 sps:$4 sm:$0xff]  }
 0x2ad   :  { %4807 = vmatprep.subr.bf16.mxu1 %v6227_v7  ;;  %v6272_v7 = vld [vmem:[#allocation8 + $0x254] ss:$8 sps:$4 sm:$0xff]  }
 0x2b0   :  { %4809 = vmatpush1.bf16.msra.mxu1 %v6229_v12  ;;  %v6277_v12 = vld [vmem:[#allocation8 + $0x260] ss:$8 sps:$4 sm:$0xff]  }
 0x2b1   :  { %4811 = vmatprep.subr.bf16.mxu1 %v6230_v13  ;;  %v6278_v13 = vld [vmem:[#allocation8 + $0x274] ss:$8 sps:$4 sm:$0xff]  }
 0x2b4   :  { %4813 = vmatpush1.bf16.msra.mxu1 %v6232_v16  ;;  %v6283_v16 = vld [vmem:[#allocation8 + $0x280] ss:$8 sps:$4 sm:$0xff]  }
 0x2b5   :  { %4815 = vmatprep.subr.bf16.mxu1 %v6233_v17  ;;  %v6284_v17 = vld [vmem:[#allocation8 + $0x294] ss:$8 sps:$4 sm:$0xff]  }
 0x2b8   :  { %4817 = vmatpush1.bf16.msra.mxu1 %v6235_v22  ;;  %v6289_v22 = vld [vmem:[#allocation8 + $0x2a0] ss:$8 sps:$4 sm:$0xff]  }
 0x2b9   :  { %4819 = vmatprep.subr.bf16.mxu1 %v6236_v24  ;;  %v6290_v24 = vld [vmem:[#allocation8 + $0x2b4] ss:$8 sps:$4 sm:$0xff]  }
 0x2bc   :  { %4821 = vmatpush1.bf16.msra.mxu1 %v6238_v30  ;;  %v6295_v30 = vld [vmem:[#allocation8 + $0x2c0] ss:$8 sps:$4 sm:$0xff]  }
 0x2bd   :  { %4823 = vmatprep.subr.bf16.mxu1 %v6239_v31  ;;  %v6296_v31 = vld [vmem:[#allocation8 + $0x2d4] ss:$8 sps:$4 sm:$0xff]  }
 0x2c0   :  { %4825 = vmatpush1.bf16.msra.mxu1 %v6241_v37  ;;  %v6299_v37 = vld [vmem:[#allocation8 + $0x2e4] ss:$8 sps:$4 sm:$0xff]  }
 0x2c1   :  { %4827 = vmatprep.subr.bf16.mxu1 %v6242_v38  ;;  %v6301_v38 = vld [vmem:[#allocation8 + $0x2e0] ss:$8 sps:$4 sm:$0xff]  }
 0x2c4   :  { %4829 = vmatpush1.bf16.msra.mxu1 %v6244_v41  ;;  %v794_v41 = vrot.slane %v7336_v26, 1 }
 0x2c5   :  { %4831 = vmatprep.subr.bf16.mxu1 %v6245_v42  ;;  %v6304_v42 = vld [vmem:[#allocation8 + $0x2f0] ss:$8 sps:$4 sm:$0xff]  }
 0x2c6   :  { %v801_v48 = vsel %vm797_vm5, %v792_v63, %v794_v41 }
 0x2c8   :  { %4833 = vmatpush1.bf16.msra.mxu1 %v6247_v45  ;;  %v793_v45 = vrot.slane %v7350_v35, 1 }
 0x2c9   :  { %4835 = vmatprep.subr.bf16.mxu1 %v6248_v46  ;;  %v7402_v46 = vsel %vm673_vm6, 1.0, %v7039_v0 }
 0x2ca   :  { %v809_v52 = vmul.f32 %v7402_v46, %v801_v48 }
 0x2cc   :  { %4837 = vmatpush1.bf16.msra.mxu1 %v6250_v50  ;;  %v637_v50 = vand.u32 15, %v611_v43 }
 0x2cd   :  { %4839 = vmatprep.subr.bf16.mxu1 %v6251_v51  ;;  %v802_v51 = vsel %vm797_vm5, %v789_v49, %v791_v44 }
 0x2ce   :  { %vm675_vm7 = vcmp.ne.s32.totalorder %v637_v50, 15 }
 0x2d0   :  { %4841 = vmatpush1.bf16.msra.mxu1 %v6253_v53  ;;  %v800_v53 = vsel %vm797_vm5, %v791_v44, %v793_v45 }
 0x2d1   :  { %4843 = vmatprep.subr.bf16.mxu1 %v6254_v54  ;;  %v796_v54 = vrot.slane %v7338_v27, 1 }
 0x2d4   :  { %4845 = vmatpush1.bf16.msra.mxu1 %v6256_v55  ;;  %v808_v55 = vmul.f32 %v7402_v46, %v800_v53 }
 0x2d5   :  { %4847 = vmatprep.subr.bf16.mxu1 %v6257_v56  ;;  %v795_v56 = vrot.slane %v7332_v23, 1 }
 0x2d7   :  { %1268 = vmatmul.mubr.f32.vlgmr.msra.gmra.mrb[4].mxu1 %v7327_v19 }
 0x2d8   :  { %1273 = vmatprep.mubr.f32.mxu1 %v7334_v25  ;;  %4849 = vmatpush1.bf16.msra.mxu1 %v6259_v57  ;;  %v799_v57 = vsel %vm797_vm5, %v794_v41, %v796_v54 }
 0x2d9   :  { %4851 = vmatprep.subr.bf16.mxu1 %v6260_v58  ;;  %v7420_v58 = vsel %vm675_vm7, 1.0, %v7039_v0 }
 0x2db   :  { %1274 = vmatmul.mubr.f32.gmra.mrb[6].mxu1 %v7348_v34 }
 0x2dc   :  { %1279 = vmatprep.mubr.f32.mxu1 %v7336_v26  ;;  %4853 = vmatpush1.bf16.msra.mxu1 %v6262_v59  ;;  %v805_v59 = vsel %vm797_vm5, %v796_v54, %v790_v2  ;;  %v6341_v2 = vld [vmem:[#allocation8 + $0x3c4] ss:$8 sps:$4 sm:$0xff]  }
 0x2dd   :  { %4855 = vmatprep.subr.bf16.mxu1 %v6263_v60  ;;  %v798_v60 = vsel %vm797_vm5, %v793_v45, %v795_v56 }
 0x2df   :  { %1280 = vmatmul.mubr.f32.gmra.mrb[8].mxu1 %v7350_v35 }
 0x2e0   :  { %1285 = vmatprep.mubr.f32.mxu1 %v7338_v27  ;;  %4857 = vmatpush1.bf16.msra.mxu1 %v6265_v61  ;;  %v813_v61 = vmul.f32 %v7420_v58, %v805_v59 }
 0x2e1   :  { %4859 = vmatprep.subr.bf16.mxu1 %v6266_v62  ;;  %v804_v62 = vsel %vm797_vm5, %v795_v56, %v789_v49 }
 0x2e2   :  { %v812_v63 = vmul.f32 %v7420_v58, %v804_v62 }
 0x2e3   :  { %1286 = vmatmul.mubr.f32.gmra.mrb[10].mxu1 %v7332_v23 }
 0x2e4   :  { %4861 = vmatpush1.bf16.msra.mxu1 %v6268_v1  ;;  %1356 = vmatprep.mubr.f32.mxu1 %v803_v4  ;;  %v6338_v1 = vld [vmem:[#allocation8 + $0x3b4] ss:$8 sps:$4 sm:$0xff]   ;;  %v6343_v4 = vld [vmem:[#allocation8 + $0x3c0] ss:$8 sps:$4 sm:$0xff]  }
 0x2e5   :  { %4863 = vmatprep.subr.bf16.mxu1 %v6269_v3  ;;  %v6340_v3 = vld [vmem:[#allocation8 + $0x3b0] ss:$8 sps:$4 sm:$0xff]   ;;  %4955 = vmatprep.subr.bf16.mxu0 %v6338_v1 }
 0x2e6   :  { %4957 = vmatpush1.bf16.msra.mxu0 %v6340_v3  ;;  %v6356_v3 = vld [vmem:[#allocation8 + $0x414] ss:$8 sps:$4 sm:$0xff]  }
 0x2e7   :  { %4959 = vmatprep.subr.bf16.mxu0 %v6341_v2 }
 0x2e8   :  { %4865 = vmatpush1.bf16.msra.mxu1 %v6271_v5  ;;  %v6344_v5 = vld [vmem:[#allocation8 + $0x3d4] ss:$8 sps:$4 sm:$0xff]  }
 0x2e9   :  { %4867 = vmatprep.subr.bf16.mxu1 %v6272_v7  ;;  %v6346_v7 = vld [vmem:[#allocation8 + $0x3d0] ss:$8 sps:$4 sm:$0xff]  }
 0x2ea   :  { %4961 = vmatpush1.bf16.msra.mxu0 %v6343_v4 }
 0x2eb   :  { %4963 = vmatprep.subr.bf16.mxu0 %v6344_v5 }
 0x2ec   :  { %4869 = vmatpush1.bf16.msra.mxu1 %v6274_v8  ;;  %v6347_v8 = vld [vmem:[#allocation8 + $0x3e4] ss:$8 sps:$4 sm:$0xff]  }
 0x2ed   :  { %4871 = vmatprep.subr.bf16.mxu1 %v6275_v10  ;;  %v6349_v10 = vld [vmem:[#allocation8 + $0x3e0] ss:$8 sps:$4 sm:$0xff]  }
 0x2ee   :  { %4965 = vmatpush1.bf16.msra.mxu0 %v6346_v7 }
 0x2ef   :  { %4967 = vmatprep.subr.bf16.mxu0 %v6347_v8  ;;  %v6358_v8 = vld [vmem:[#allocation8 + $0x410] ss:$8 sps:$4 sm:$0xff]  }
 0x2f0   :  { %4873 = vmatpush1.bf16.msra.mxu1 %v6277_v12  ;;  %v6350_v12 = vld [vmem:[#allocation8 + $0x3f4] ss:$8 sps:$4 sm:$0xff]  }
 0x2f1   :  { %4875 = vmatprep.subr.bf16.mxu1 %v6278_v13  ;;  %v6352_v13 = vld [vmem:[#allocation8 + $0x3f0] ss:$8 sps:$4 sm:$0xff]  }
 0x2f2   :  { %4969 = vmatpush1.bf16.msra.mxu0 %v6349_v10  ;;  %v6359_v10 = vld [vmem:[#allocation8 + $0x424] ss:$8 sps:$4 sm:$0xff]  }
 0x2f3   :  { %4971 = vmatprep.subr.bf16.mxu0 %v6350_v12 }
 0x2f4   :  { %4877 = vmatpush1.bf16.msra.mxu1 %v6280_v14  ;;  %v6353_v14 = vld [vmem:[#allocation8 + $0x404] ss:$8 sps:$4 sm:$0xff]  }
 0x2f5   :  { %4879 = vmatprep.subr.bf16.mxu1 %v6281_v15 }
 0x2f6   :  { %4973 = vmatpush1.bf16.msra.mxu0 %v6352_v13 }
 0x2f7   :  { %4975 = vmatprep.subr.bf16.mxu0 %v6353_v14 }
 0x2f8   :  { %4881 = vmatpush1.bf16.msra.mxu1 %v6283_v16 }
 0x2f9   :  { %4883 = vmatprep.subr.bf16.mxu1 %v6284_v17  ;;  %v1102_v17 = vld [vmem:[#allocation10] sm:$0x3] }
 0x2fc   :  { %4885 = vmatpush1.bf16.msra.mxu1 %v6286_v18 }
 0x2fd   :  { %4887 = vmatprep.subr.bf16.mxu1 %v6287_v20  ;;  %v1107_v20 = vrot.slane %v1102_v17, %v7319_v9 }
 0x300   :  { %4889 = vmatpush1.bf16.msra.mxu1 %v6289_v22 }
 0x301   :  { %4891 = vmatprep.subr.bf16.mxu1 %v6290_v24  ;;  %v1111_v24 = vrot.slane %v1102_v17, %v7322_v11  ;;  %v6362_v17 = vld [vmem:[#allocation8 + $0x434] ss:$8 sps:$4 sm:$0xff]  }
 0x304   :  { %4893 = vmatpush1.bf16.msra.mxu1 %v6292_v28 }
 0x305   :  { %4895 = vmatprep.subr.bf16.mxu1 %v6293_v29 }
 0x308   :  { %4897 = vmatpush1.bf16.msra.mxu1 %v6295_v30 }
 0x309   :  { %4899 = vmatprep.subr.bf16.mxu1 %v6296_v31 }
 0x30c   :  { %4901 = vmatpush1.bf16.msra.mxu1 %v6298_v32 }
 0x30d   :  { %4903 = vmatprep.subr.bf16.mxu1 %v6299_v37 }
 0x310   :  { %4905 = vmatpush1.bf16.msra.mxu1 %v6301_v38 }
 0x311   :  { %4907 = vmatprep.subr.bf16.mxu1 %v6302_v40 }
 0x314   :  { %4909 = vmatpush1.bf16.msra.mxu1 %v6304_v42 }
 0x317   :  { %1357 = vmatmul.mubr.f32.vlgmr.msra.gmra.mrb[4].mxu1 %v802_v51 }
 0x318   :  { %1362 = vmatprep.mubr.f32.mxu1 %v809_v52 }
 0x31b   :  { %1363 = vmatmul.mubr.f32.gmra.mrb[6].mxu1 %v808_v55 }
 0x31c   :  { %1368 = vmatprep.mubr.f32.mxu1 %v799_v57 }
 0x31f   :  { %1369 = vmatmul.mubr.f32.gmra.mrb[8].mxu1 %v798_v60 }
 0x320   :  { %1374 = vmatprep.mubr.f32.mxu1 %v813_v61 }
 0x323   :  { %1375 = vmatmul.mubr.f32.gmra.mrb[10].mxu1 %v812_v63  ;;  %v6355_v63 = vld [vmem:[#allocation8 + $0x400] ss:$8 sps:$4 sm:$0xff]  }
 0x324   :  { %2073 = vmatprep.mubr.f32.mxu1 %v7039_v0 }
 0x3ea   :  { %v1358_v15 = vpop.f32.mrb[4].mxu1 }
 0x3eb   :  { %v1360_v16 = vpop.f32.mrb[5].mxu1  ;;  %v5628_v29 = vadd.f32 %v1358_v15, %v1107_v20  ;;  %v6361_v15 = vld [vmem:[#allocation8 + $0x420] ss:$8 sps:$4 sm:$0xff]  }
 0x3ec   :  { %v5629_v31 = vadd.f32 %v1360_v16, %v1111_v24 }
 0x3ed   :  { %v7435_v38 = vmax.f32 %v5628_v29, 0.0  ;;  %v6368_v29 = vld [vmem:[#allocation8 + $0x454] ss:$8 sps:$4 sm:$0xff]  }
 0x3ee   :  { %v1364_v18 = vpop.f32.mrb[6].mxu1  ;;  %v7437_v41 = vmax.f32 %v5629_v31, 0.0  ;;  %v6371_v31 = vld [vmem:[#allocation8 + $0x464] ss:$8 sps:$4 sm:$0xff]  }
 0x3ef   :  { %v1366_v22 = vpop.f32.mrb[7].mxu1  ;;  %v5630_v43 = vadd.f32 %v1364_v18, %v1107_v20  ;;  %v1389_v51 = vrot.slane %v7435_v38, 7 }
 0x3f0   :  { %v5631_v32 = vadd.f32 %v1366_v22, %v1111_v24  ;;  %v1390_v53 = vrot.slane %v7437_v41, 7  ;;  %v6365_v22 = vld [vmem:[#allocation8 + $0x444] ss:$8 sps:$4 sm:$0xff]  }
 0x3f1   :  { %v7451_v55 = vmax.f32 %v5630_v43, 0.0  ;;  %v6382_v43 = vld [vmem:[#allocation8 + $0x490] ss:$8 sps:$4 sm:$0xff]  }
 0x3f2   :  { %v1370_v28 = vpop.f32.mrb[8].mxu1  ;;  %v7441_v48 = vmax.f32 %v5631_v32, 0.0  ;;  %v6373_v32 = vld [vmem:[#allocation8 + $0x460] ss:$8 sps:$4 sm:$0xff]  }
 0x3f3   :  { %v1372_v30 = vpop.f32.mrb[9].mxu1  ;;  %v5632_v44 = vadd.f32 %v1370_v28, %v1107_v20  ;;  %v1391_v2 = vrot.slane %v7451_v55, 7  ;;  %v6367_v28 = vld [vmem:[#allocation8 + $0x440] ss:$8 sps:$4 sm:$0xff]  }
 0x3f4   :  { %v5633_v36 = vadd.f32 %v1372_v30, %v1111_v24  ;;  %v1392_v59 = vrot.slane %v7441_v48, 7  ;;  %v6370_v30 = vld [vmem:[#allocation8 + $0x450] ss:$8 sps:$4 sm:$0xff]  }
 0x3f5   :  { %v7453_v56 = vmax.f32 %v5632_v44, 0.0  ;;  %v1401_v12 = vsel %vm772_vm3, %v1389_v51, %v1391_v2  ;;  %v6383_v44 = vld [vmem:[#allocation8 + $0x4a4] ss:$8 sps:$4 sm:$0xff]  }
 0x3f6   :  { %v1376_v37 = vpop.f32.mrb[10].mxu1  ;;  %v7443_v49 = vmax.f32 %v5633_v36, 0.0  ;;  %v1402_v5 = vsel %vm772_vm3, %v1390_v53, %v1392_v59  ;;  %v6374_v36 = vld [vmem:[#allocation8 + $0x474] ss:$8 sps:$4 sm:$0xff]  }
 0x3f7   :  { %v5634_v39 = vadd.f32 %v1376_v37, %v1107_v20  ;;  %v1378_v40 = vpop.f32.mrb[11].mxu1  ;;  %v1393_v4 = vrot.slane %v7453_v56, 7  ;;  %v6364_v20 = vld [vmem:[#allocation8 + $0x430] ss:$8 sps:$4 sm:$0xff]  }
 0x3f8   :  { %v5635_v42 = vadd.f32 %v1378_v40, %v1111_v24  ;;  %v1394_v60 = vrot.slane %v7443_v49, 7  ;;  %v6376_v37 = vld [vmem:[#allocation8 + $0x470] ss:$8 sps:$4 sm:$0xff]   ;;  %v6379_v40 = vld [vmem:[#allocation8 + $0x480] ss:$8 sps:$4 sm:$0xff]  }
 0x3f9   :  { %v7439_v45 = vmax.f32 %v5634_v39, 0.0  ;;  %v1399_v14 = vsel %vm772_vm3, %v1391_v2, %v1393_v4  ;;  %v6377_v39 = vld [vmem:[#allocation8 + $0x484] ss:$8 sps:$4 sm:$0xff]   ;;  %v6403_v2 = vld [vmem:[#allocation8 + $0x500] ss:$8 sps:$4 sm:$0xff]  }
 0x3fa   :  { %v7445_v50 = vmax.f32 %v5635_v42, 0.0  ;;  %v1400_v7 = vsel %vm772_vm3, %v1392_v59, %v1394_v60  ;;  %v1409_v16 = vmul.f32 %v7365_v47, %v1399_v14  ;;  %v6380_v42 = vld [vmem:[#allocation8 + $0x494] ss:$8 sps:$4 sm:$0xff]   ;;  %v1414_v14 = vrot.slane %v7437_v41, 1 }
 0x3fb   :  { %v1395_v52 = vrot.slane %v7439_v45, 7  ;;  %v1410_v13 = vmul.f32 %v7365_v47, %v1400_v7  ;;  %v6392_v59 = vld [vmem:[#allocation8 + $0x4d4] ss:$8 sps:$4 sm:$0xff]   ;;  %v6407_v7 = vld [vmem:[#allocation8 + $0x524] ss:$8 sps:$4 sm:$0xff]  }
 0x3fc   :  { %v1396_v54 = vrot.slane %v7445_v50, 7 }
 0x3fd   :  { %v1403_v57 = vsel %vm772_vm3, %v1395_v52, %v1389_v51  ;;  %v1397_v24 = vsel %vm772_vm3, %v1393_v4, %v1395_v52  ;;  %v6385_v51 = vld [vmem:[#allocation8 + $0x4a0] ss:$8 sps:$4 sm:$0xff]   ;;  %v6386_v52 = vld [vmem:[#allocation8 + $0x4b4] ss:$8 sps:$4 sm:$0xff]  }
 0x3fe   :  { %v1404_v61 = vsel %vm772_vm3, %v1396_v54, %v1390_v53  ;;  %v1405_v1 = vmul.f32 %v7346_v33, %v1403_v57  ;;  %v1398_v18 = vsel %vm772_vm3, %v1394_v60, %v1396_v54  ;;  %v6388_v53 = vld [vmem:[#allocation8 + $0x4b0] ss:$8 sps:$4 sm:$0xff]   ;;  %v6389_v54 = vld [vmem:[#allocation8 + $0x4c4] ss:$8 sps:$4 sm:$0xff]   ;;  %v6391_v57 = vld [vmem:[#allocation8 + $0x4c0] ss:$8 sps:$4 sm:$0xff]  }
 0x3ff   :  { %v1406_v62 = vmul.f32 %v7346_v33, %v1404_v61  ;;  %v6394_v60 = vld [vmem:[#allocation8 + $0x4d0] ss:$8 sps:$4 sm:$0xff]   ;;  %v6395_v61 = vld [vmem:[#allocation8 + $0x4e4] ss:$8 sps:$4 sm:$0xff]   ;;  %v6404_v4 = vld [vmem:[#allocation8 + $0x514] ss:$8 sps:$4 sm:$0xff]  }
 0x401   :  { %1803 = vmatprep.mubr.f32.mxu0 %v1406_v62  ;;  %v6397_v62 = vld [vmem:[#allocation8 + $0x4e0] ss:$8 sps:$4 sm:$0xff]  }
 0x402   :  { %1804 = vmatmul.mubr.f32.vlgmr.msra.gmra.mrb[12].mxu0 %v1405_v1  ;;  %v6400_v1 = vld [vmem:[#allocation8 + $0x4f0] ss:$8 sps:$4 sm:$0xff]  }
 0x403   :  { %4977 = vmatpush1.bf16.msra.mxu0 %v6355_v63  ;;  %1809 = vmatprep.mubr.f32.mxu0 %v1402_v5  ;;  %v6398_v63 = vld [vmem:[#allocation8 + $0x4f4] ss:$8 sps:$4 sm:$0xff]   ;;  %v6406_v5 = vld [vmem:[#allocation8 + $0x510] ss:$8 sps:$4 sm:$0xff]  }
 0x404   :  { %4979 = vmatprep.subr.bf16.mxu0 %v6356_v3  ;;  %v6401_v3 = vld [vmem:[#allocation8 + $0x504] ss:$8 sps:$4 sm:$0xff]  }
 0x406   :  { %1810 = vmatmul.mubr.f32.gmra.mrb[14].mxu0 %v1401_v12  ;;  %v1416_v12 = vrot.slane %v7441_v48, 1 }
 0x407   :  { %4981 = vmatpush1.bf16.msra.mxu0 %v6358_v8  ;;  %1815 = vmatprep.mubr.f32.mxu0 %v1410_v13  ;;  %v6409_v8 = vld [vmem:[#allocation8 + $0x520] ss:$8 sps:$4 sm:$0xff]   ;;  %v6412_v13 = vld [vmem:[#allocation8 + $0x530] ss:$8 sps:$4 sm:$0xff]  }
 0x408   :  { %4983 = vmatprep.subr.bf16.mxu0 %v6359_v10  ;;  %v6410_v10 = vld [vmem:[#allocation8 + $0x534] ss:$8 sps:$4 sm:$0xff]  }
 0x40a   :  { %1816 = vmatmul.mubr.f32.gmra.mrb[16].mxu0 %v1409_v16  ;;  %v1426_v16 = vsel %vm797_vm5, %v1414_v14, %v1416_v12 }
 0x40b   :  { %4985 = vmatpush1.bf16.msra.mxu0 %v6361_v15  ;;  %1821 = vmatprep.mubr.f32.mxu0 %v1398_v18  ;;  %v6413_v15 = vld [vmem:[#allocation8 + $0x544] ss:$8 sps:$4 sm:$0xff]   ;;  %v6418_v18 = vld [vmem:[#allocation8 + $0x550] ss:$8 sps:$4 sm:$0xff]  }
 0x40c   :  { %4987 = vmatprep.subr.bf16.mxu0 %v6362_v17  ;;  %v6416_v17 = vld [vmem:[#allocation8 + $0x554] ss:$8 sps:$4 sm:$0xff]  }
 0x40e   :  { %1822 = vmatmul.mubr.f32.gmra.mrb[18].mxu0 %v1397_v24  ;;  %v6422_v24 = vld [vmem:[#allocation8 + $0x574] ss:$8 sps:$4 sm:$0xff]  }
 0x40f   :  { %4989 = vmatpush1.bf16.msra.mxu0 %v6364_v20  ;;  %1892 = vmatprep.mubr.f32.mxu0 %v7437_v41  ;;  %v6419_v20 = vld [vmem:[#allocation8 + $0x564] ss:$8 sps:$4 sm:$0xff]  }
 0x410   :  { %4991 = vmatprep.subr.bf16.mxu0 %v6365_v22  ;;  %v6421_v22 = vld [vmem:[#allocation8 + $0x560] ss:$8 sps:$4 sm:$0xff]  }
 0x413   :  { %4993 = vmatpush1.bf16.msra.mxu0 %v6367_v28  ;;  %v6424_v28 = vld [vmem:[#allocation8 + $0x570] ss:$8 sps:$4 sm:$0xff]  }
 0x414   :  { %4995 = vmatprep.subr.bf16.mxu0 %v6368_v29  ;;  %v6425_v29 = vld [vmem:[#allocation8 + $0x584] ss:$8 sps:$4 sm:$0xff]  }
 0x417   :  { %4997 = vmatpush1.bf16.msra.mxu0 %v6370_v30  ;;  %v6427_v30 = vld [vmem:[#allocation8 + $0x580] ss:$8 sps:$4 sm:$0xff]  }
 0x418   :  { %4999 = vmatprep.subr.bf16.mxu0 %v6371_v31  ;;  %v6428_v31 = vld [vmem:[#allocation8 + $0x594] ss:$8 sps:$4 sm:$0xff]  }
 0x41b   :  { %5001 = vmatpush1.bf16.msra.mxu0 %v6373_v32  ;;  %v6430_v32 = vld [vmem:[#allocation8 + $0x590] ss:$8 sps:$4 sm:$0xff]  }
 0x41c   :  { %5003 = vmatprep.subr.bf16.mxu0 %v6374_v36  ;;  %v6431_v36 = vld [vmem:[#allocation8 + $0x5a4] ss:$8 sps:$4 sm:$0xff]  }
 0x41f   :  { %5005 = vmatpush1.bf16.msra.mxu0 %v6376_v37  ;;  %v6433_v37 = vld [vmem:[#allocation8 + $0x5a0] ss:$8 sps:$4 sm:$0xff]  }
 0x420   :  { %5007 = vmatprep.subr.bf16.mxu0 %v6377_v39  ;;  %v6434_v39 = vld [vmem:[#allocation8 + $0x5b4] ss:$8 sps:$4 sm:$0xff]  }
 0x423   :  { %5009 = vmatpush1.bf16.msra.mxu0 %v6379_v40  ;;  %v6436_v40 = vld [vmem:[#allocation8 + $0x5b0] ss:$8 sps:$4 sm:$0xff]  }
 0x424   :  { %5011 = vmatprep.subr.bf16.mxu0 %v6380_v42  ;;  %v6437_v42 = vld [vmem:[#allocation8 + $0x5c4] ss:$8 sps:$4 sm:$0xff]  }
 0x427   :  { %5013 = vmatpush1.bf16.msra.mxu0 %v6382_v43  ;;  %v6439_v43 = vld [vmem:[#allocation8 + $0x5c0] ss:$8 sps:$4 sm:$0xff]  }
 0x428   :  { %5015 = vmatprep.subr.bf16.mxu0 %v6383_v44  ;;  %v6440_v44 = vld [vmem:[#allocation8 + $0x5d4] ss:$8 sps:$4 sm:$0xff]  }
 0x42b   :  { %5017 = vmatpush1.bf16.msra.mxu0 %v6385_v51  ;;  %v6442_v51 = vld [vmem:[#allocation8 + $0x5d0] ss:$8 sps:$4 sm:$0xff]  }
 0x42c   :  { %5019 = vmatprep.subr.bf16.mxu0 %v6386_v52  ;;  %v6443_v52 = vld [vmem:[#allocation8 + $0x5e4] ss:$8 sps:$4 sm:$0xff]  }
 0x42f   :  { %5021 = vmatpush1.bf16.msra.mxu0 %v6388_v53  ;;  %v6445_v53 = vld [vmem:[#allocation8 + $0x5e0] ss:$8 sps:$4 sm:$0xff]  }
 0x430   :  { %5023 = vmatprep.subr.bf16.mxu0 %v6389_v54  ;;  %v6446_v54 = vld [vmem:[#allocation8 + $0x5f4] ss:$8 sps:$4 sm:$0xff]  }
 0x433   :  { %5025 = vmatpush1.bf16.msra.mxu0 %v6391_v57  ;;  %v1418_v57 = vrot.slane %v7443_v49, 1 }
 0x434   :  { %5027 = vmatprep.subr.bf16.mxu0 %v6392_v59  ;;  %v6448_v59 = vld [vmem:[#allocation8 + $0x5f0] ss:$8 sps:$4 sm:$0xff]  }
 0x437   :  { %5029 = vmatpush1.bf16.msra.mxu0 %v6394_v60  ;;  %v1415_v60 = vrot.slane %v7451_v55, 1 }
 0x438   :  { %5031 = vmatprep.subr.bf16.mxu0 %v6395_v61  ;;  %v1417_v61 = vrot.slane %v7453_v56, 1 }
 0x43b   :  { %5033 = vmatpush1.bf16.msra.mxu0 %v6397_v62  ;;  %v1424_v62 = vsel %vm797_vm5, %v1416_v12, %v1418_v57 }
 0x43c   :  { %5035 = vmatprep.subr.bf16.mxu0 %v6398_v63  ;;  %v1413_v63 = vrot.slane %v7435_v38, 1 }
 0x43f   :  { %5037 = vmatpush1.bf16.msra.mxu0 %v6400_v1  ;;  %v1425_v1 = vsel %vm797_vm5, %v1413_v63, %v1415_v60 }
 0x440   :  { %5039 = vmatprep.subr.bf16.mxu0 %v6401_v3  ;;  %v1432_v3 = vmul.f32 %v7402_v46, %v1424_v62  ;;  %v4487_v62 = vld [vmem:[%s8082_s10 + $0x20] sm:$0xff]  }
 0x442   :  { %1893 = vmatmul.mubr.f32.vlgmr.msra.gmra.mrb[12].mxu0 %v7435_v38 }
 0x443   :  { %1898 = vmatprep.mubr.f32.mxu0 %v7441_v48  ;;  %5041 = vmatpush1.bf16.msra.mxu0 %v6403_v2  ;;  %v6415_v48 = vld [vmem:[#allocation8 + $0x540] ss:$8 sps:$4 sm:$0xff]   ;;  %v1420_v2 = vrot.slane %v7445_v50, 1 }
 0x444   :  { %5043 = vmatprep.subr.bf16.mxu0 %v6404_v4 }
 0x445   :  { %v1422_v38 = vsel %vm797_vm5, %v1418_v57, %v1420_v2  ;;  %v1428_v4 = vsel %vm797_vm5, %v1420_v2, %v1414_v14  ;;  %v4485_v57 = vld [vmem:[%s8082_s10 + $0x10] sm:$0xff]   ;;  %v4498_v2 = vld [vmem:[%s8082_s10 + $0x78] sm:$0xff]  }
 0x446   :  { %1899 = vmatmul.mubr.f32.gmra.mrb[14].mxu0 %v7451_v55 }
 0x447   :  { %1904 = vmatprep.mubr.f32.mxu0 %v7443_v49  ;;  %5045 = vmatpush1.bf16.msra.mxu0 %v6406_v5  ;;  %v1423_v49 = vsel %vm797_vm5, %v1415_v60, %v1417_v61  ;;  %v4486_v60 = vld [vmem:[%s8082_s10 + $0x18] sm:$0xff]  }
 0x448   :  { %5047 = vmatprep.subr.bf16.mxu0 %v6407_v7  ;;  %v1431_v55 = vmul.f32 %v7402_v46, %v1423_v49  ;;  %v4489_v49 = vld [vmem:[%s8082_s10 + $0x30] sm:$0xff]  }
 0x44a   :  { %1905 = vmatmul.mubr.f32.gmra.mrb[16].mxu0 %v7453_v56  ;;  %v1419_v56 = vrot.slane %v7439_v45, 1 }
 0x44b   :  { %1910 = vmatprep.mubr.f32.mxu0 %v7445_v50  ;;  %5049 = vmatpush1.bf16.msra.mxu0 %v6409_v8  ;;  %v1436_v50 = vmul.f32 %v7420_v58, %v1428_v4  ;;  %v1727_v8 = vld [vmem:[#allocation10 + $0x2] sm:$0x3]  ;;  %v2151_v4 = vld [vmem:[#allocation11] sm:$0xff] }
 0x44c   :  { %5051 = vmatprep.subr.bf16.mxu0 %v6410_v10  ;;  %v1421_v5 = vsel %vm797_vm5, %v1417_v61, %v1419_v56  ;;  %v1427_v7 = vsel %vm797_vm5, %v1419_v56, %v1413_v63  ;;  %v1736_v12 = vrot.slane %v1727_v8, %v7322_v11  ;;  %v4495_v61 = vld [vmem:[%s8082_s10 + $0x60] sm:$0xff]   ;;  %v4496_v63 = vld [vmem:[%s8082_s10 + $0x68] sm:$0xff]  }
 0x44e   :  { %1911 = vmatmul.mubr.f32.gmra.mrb[18].mxu0 %v7439_v45  ;;  %v1435_v45 = vmul.f32 %v7420_v58, %v1427_v7  ;;  %v7040_v7 = vmov 0.0|0.0  }
 0x44f   :  { %5053 = vmatpush1.bf16.msra.mxu0 %v6412_v13  ;;  %1981 = vmatprep.mubr.f32.mxu0 %v1426_v16  ;;  %v1732_v13 = vrot.slane %v1727_v8, %v7319_v9  ;;  %v2235_v8 = vld [vmem:[%s8080_s8 + $0x8] sm:$0xff] }
 0x450   :  { %5055 = vmatprep.subr.bf16.mxu0 %v6413_v15 }
 0x453   :  { %5057 = vmatpush1.bf16.msra.mxu0 %v6415_v48 }
 0x454   :  { %5059 = vmatprep.subr.bf16.mxu0 %v6416_v17 }
 0x457   :  { %5061 = vmatpush1.bf16.msra.mxu0 %v6418_v18 }
 0x458   :  { %5063 = vmatprep.subr.bf16.mxu0 %v6419_v20 }
 0x45b   :  { %5065 = vmatpush1.bf16.msra.mxu0 %v6421_v22 }
 0x45c   :  { %5067 = vmatprep.subr.bf16.mxu0 %v6422_v24 }
 0x45f   :  { %5069 = vmatpush1.bf16.msra.mxu0 %v6424_v28 }
 0x460   :  { %5071 = vmatprep.subr.bf16.mxu0 %v6425_v29 }
 0x463   :  { %5073 = vmatpush1.bf16.msra.mxu0 %v6427_v30 }
 0x464   :  { %5075 = vmatprep.subr.bf16.mxu0 %v6428_v31 }
 0x467   :  { %5077 = vmatpush1.bf16.msra.mxu0 %v6430_v32 }
 0x468   :  { %5079 = vmatprep.subr.bf16.mxu0 %v6431_v36 }
 0x46b   :  { %5081 = vmatpush1.bf16.msra.mxu0 %v6433_v37 }
 0x46c   :  { %5083 = vmatprep.subr.bf16.mxu0 %v6434_v39  ;;  %v7541_v39 = vld [vmem:[#allocation17] sm:$0x1] }
 0x46f   :  { %5085 = vmatpush1.bf16.msra.mxu0 %v6436_v40 }
 0x470   :  { %5087 = vmatprep.subr.bf16.mxu0 %v6437_v42 }
 0x473   :  { %5089 = vmatpush1.bf16.msra.mxu0 %v6439_v43  ;;  %v4491_v43 = vld [vmem:[%s8082_s10 + $0x40] sm:$0xff]  }
 0x474   :  { %5091 = vmatprep.subr.bf16.mxu0 %v6440_v44  ;;  %v755_v44 = vunpack.c.l.bf16 %v7541_v39 }
 0x477   :  { %5093 = vmatpush1.bf16.msra.mxu0 %v6442_v51  ;;  %v4410_v51 = vld [vmem:[%s8082_s10] sm:$0xff]  }
 0x478   :  { %5095 = vmatprep.subr.bf16.mxu0 %v6443_v52  ;;  %v4492_v52 = vld [vmem:[%s8082_s10 + $0x48] sm:$0xff]  }
 0x47b   :  { %5097 = vmatpush1.bf16.msra.mxu0 %v6445_v53  ;;  %v4484_v53 = vld [vmem:[%s8082_s10 + $0x8] sm:$0xff]  }
 0x47c   :  { %5099 = vmatprep.subr.bf16.mxu0 %v6446_v54  ;;  %v4493_v54 = vld [vmem:[%s8082_s10 + $0x50] sm:$0xff]  }
 0x47f   :  { %5101 = vmatpush1.bf16.msra.mxu0 %v6448_v59  ;;  %v4494_v59 = vld [vmem:[%s8082_s10 + $0x58] sm:$0xff]  }
 0x480   :  { %5145 = vmatprep.subr.bf16.mxu0 %v7040_v7 }
 0x482   :  { %1982 = vmatmul.mubr.f32.vlgmr.msra.gmra.mrb[12].mxu0 %v1425_v1  ;;  %v4488_v1 = vld [vmem:[%s8082_s10 + $0x28] sm:$0xff]  }
 0x483   :  { %1987 = vmatprep.mubr.f32.mxu0 %v1432_v3  ;;  %v4497_v3 = vld [vmem:[%s8082_s10 + $0x70] sm:$0xff]  }
 0x486   :  { %1988 = vmatmul.mubr.f32.gmra.mrb[14].mxu0 %v1431_v55  ;;  %v4490_v55 = vld [vmem:[%s8082_s10 + $0x38] sm:$0xff]  }
 0x487   :  { %1993 = vmatprep.mubr.f32.mxu0 %v1422_v38 }
 0x48a   :  { %1994 = vmatmul.mubr.f32.gmra.mrb[16].mxu0 %v1421_v5  ;;  %v2152_v5 = vld [vmem:[#allocation11 + $0x8] sm:$0xff] }
 0x48b   :  { %1999 = vmatprep.mubr.f32.mxu0 %v1436_v50  ;;  %v5143_v50 = vpack.c.bf16 %v2152_v5, %v2151_v4  ;;  %v6451_v4 = vld [vmem:[#allocation16] ss:$8 sps:$4 sm:$0xff]   ;;  %v4356_v5 = vld [vmem:[#allocation14] ss:$0 sm:$0xff] }
 0x48e   :  { %2000 = vmatmul.mubr.f32.gmra.mrb[18].mxu0 %v1435_v45  ;;  %v2234_v45 = vld [vmem:[%s8080_s8] sm:$0xff] }
 0x48f   :  { %4649 = vmatprep.mubr.msk.f32.mxu0 %vm7041_vm8, %v7039_v0 }
 0x555   :  { %v1983_v10 = vpop.f32.mrb[12].mxu0 }
 0x556   :  { %v1985_v41 = vpop.f32.mrb[13].mxu0  ;;  %v7527_v18 = vadd.f32 %v1983_v10, %v1732_v13  ;;  %v2236_v10 = vld [vmem:[%s8080_s8 + $0x10] sm:$0xff] }
 0x557   :  { %v7523_v48 = vadd.f32 %v1985_v41, %v1736_v12  ;;  %v5146_v41 = vpack.c.bf16 %v2235_v8, %v2234_v45 }
 0x559   :  { %v1989_v14 = vpop.f32.mrb[14].mxu0  ;;  %5147 = vmatpush3.bf16.msra.mxu0 %v5146_v41 }
 0x55a   :  { %v7521_v15 = vadd.f32 %v1989_v14, %v1732_v13  ;;  %v1991_v16 = vpop.f32.mrb[15].mxu0  ;;  %5148 = vmatprep.subr.bf16.mxu0 %v7040_v7  ;;  %v2238_v14 = vld [vmem:[%s8080_s8 + $0x20] sm:$0xff] }
 0x55b   :  { %v7525_v17 = vadd.f32 %v1991_v16, %v1736_v12  ;;  %v2239_v16 = vld [vmem:[%s8080_s8 + $0x28] sm:$0xff] }
 0x55c   :  { %v5104_v24 = vpack.c.bf16 %v7521_v15, %v7527_v18 }
 0x55d   :  { %v5102_v20 = vpack.c.bf16 %v7525_v17, %v7523_v48  ;;  %v1995_v22 = vpop.f32.mrb[16].mxu0 }
 0x55e   :  { %v1997_v28 = vpop.f32.mrb[17].mxu0  ;;  %v7539_v37 = vadd.f32 %v1995_v22, %v1732_v13  ;;  %v2240_v22 = vld [vmem:[%s8080_s8 + $0x30] sm:$0xff] }
 0x55f   :  { %5103 = vmatprep.subr.bf16.mxu1 %v5102_v20  ;;  %v7535_v32 = vadd.f32 %v1997_v28, %v1736_v12  ;;  %v5152_v20 = vpack.c.bf16 %v2239_v16, %v2238_v14  ;;  %v7667_v14 = vld [vmem:[%s8085_s13] sm:$0xff]  }
 0x560   :  { %5105 = vmatpush1.bf16.msra.mxu1 %v5104_v24  ;;  %v2241_v24 = vld [vmem:[%s8080_s8 + $0x38] sm:$0xff] }
 0x561   :  { %v2001_v29 = vpop.f32.mrb[18].mxu0  ;;  %v5155_v28 = vpack.c.bf16 %v2241_v24, %v2240_v22  ;;  %v6452_v22 = vld [vmem:[#allocation8 + $0x604] ss:$8 sps:$4 sm:$0xff]  }
 0x562   :  { %v7533_v30 = vadd.f32 %v2001_v29, %v1732_v13  ;;  %v2003_v31 = vpop.f32.mrb[19].mxu0  ;;  %v2242_v29 = vld [vmem:[%s8080_s8 + $0x40] sm:$0xff] }
 0x563   :  { %v7537_v36 = vadd.f32 %v2003_v31, %v1736_v12  ;;  %v2237_v12 = vld [vmem:[%s8080_s8 + $0x18] sm:$0xff]  ;;  %v2243_v31 = vld [vmem:[%s8080_s8 + $0x48] sm:$0xff] }
 0x564   :  { %v5108_v42 = vpack.c.bf16 %v7533_v30, %v7539_v37  ;;  %v5149_v13 = vpack.c.bf16 %v2237_v12, %v2236_v10 }
 0x565   :  { %v5106_v40 = vpack.c.bf16 %v7537_v36, %v7535_v32 }
 0x566   :  { %5150 = vmatpush3.bf16.msra.mxu0 %v5149_v13 }
 0x567   :  { %5107 = vmatprep.subr.bf16.mxu1 %v5106_v40  ;;  %5151 = vmatprep.subr.bf16.mxu0 %v7040_v7  ;;  %v5158_v40 = vpack.c.bf16 %v2243_v31, %v2242_v29  ;;  %v6455_v29 = vld [vmem:[#allocation8 + $0x614] ss:$8 sps:$4 sm:$0xff]   ;;  %v4476_v31 = vunpack.c.h.bf16 %v7667_v14 }
 0x568   :  { %5109 = vmatpush1.bf16.msra.mxu1 %v5108_v42  ;;  %v2244_v42 = vld [vmem:[%s8080_s8 + $0x50] sm:$0xff] }
 0x569   :  { %5111 = vmatprep.subr.bf16.mxu1 %v4491_v43  ;;  %v2245_v43 = vld [vmem:[%s8080_s8 + $0x58] sm:$0xff] }
 0x56a   :  { %5153 = vmatpush3.bf16.msra.mxu0 %v5152_v20  ;;  %v4475_v20 = vunpack.c.l.bf16 %v7667_v14 }
 0x56b   :  { %4353 = vmatmul.mubr.msk.f32.vlgmr.msra.gmra.mrb[12].mxu1 %vm206_vm0, %v755_v44  ;;  %5154 = vmatprep.subr.bf16.mxu0 %v7040_v7 }
 0x56c   :  { %5113 = vmatpush3.bf16.msra.mxu1 %v4410_v51  ;;  %v5161_v51 = vpack.c.bf16 %v2245_v43, %v2244_v42  ;;  %v6457_v42 = vld [vmem:[#allocation8 + $0x610] ss:$8 sps:$4 sm:$0xff]   ;;  %v6458_v43 = vld [vmem:[#allocation8 + $0x624] ss:$8 sps:$4 sm:$0xff]  }
 0x56d   :  { %5115 = vmatprep.subr.bf16.mxu1 %v4492_v52  ;;  %v2246_v52 = vld [vmem:[%s8080_s8 + $0x60] sm:$0xff] }
 0x56e   :  { %5156 = vmatpush3.bf16.msra.mxu0 %v5155_v28  ;;  %v6454_v28 = vld [vmem:[#allocation8 + $0x600] ss:$8 sps:$4 sm:$0xff]  }
 0x56f   :  { %5157 = vmatprep.subr.bf16.mxu0 %v7040_v7 }
 0x570   :  { %5117 = vmatpush3.bf16.msra.mxu1 %v4484_v53  ;;  %v2247_v53 = vld [vmem:[%s8080_s8 + $0x68] sm:$0xff] }
 0x571   :  { %5119 = vmatprep.subr.bf16.mxu1 %v4493_v54  ;;  %v5164_v54 = vpack.c.bf16 %v2247_v53, %v2246_v52  ;;  %v6460_v52 = vld [vmem:[#allocation8 + $0x620] ss:$8 sps:$4 sm:$0xff]   ;;  %v6461_v53 = vld [vmem:[#allocation8 + $0x634] ss:$8 sps:$4 sm:$0xff]  }
 0x572   :  { %5159 = vmatpush3.bf16.msra.mxu0 %v5158_v40  ;;  %v7680_v40 = vld [vmem:[%s8085_s13 + $0x8] sm:$0xff]  }
 0x573   :  { %5160 = vmatprep.subr.bf16.mxu0 %v7040_v7 }
 0x574   :  { %5121 = vmatpush3.bf16.msra.mxu1 %v4485_v57 }
 0x575   :  { %5123 = vmatprep.subr.bf16.mxu1 %v4494_v59 }
 0x576   :  { %5162 = vmatpush3.bf16.msra.mxu0 %v5161_v51  ;;  %v4479_v51 = vunpack.c.l.bf16 %v7680_v40 }
 0x577   :  { %5163 = vmatprep.subr.bf16.mxu0 %v7040_v7 }
 0x578   :  { %5125 = vmatpush3.bf16.msra.mxu1 %v4486_v60 }
 0x579   :  { %5127 = vmatprep.subr.bf16.mxu1 %v4495_v61 }
 0x57a   :  { %5165 = vmatpush3.bf16.msra.mxu0 %v5164_v54  ;;  %v4480_v54 = vunpack.c.h.bf16 %v7680_v40 }
 0x57b   :  { %5166 = vmatprep.subr.bf16.mxu0 %v7040_v7 }
 0x57c   :  { %5129 = vmatpush3.bf16.msra.mxu1 %v4487_v62  ;;  %v2248_v62 = vld [vmem:[%s8080_s8 + $0x70] sm:$0xff] }
 0x57d   :  { %5131 = vmatprep.subr.bf16.mxu1 %v4496_v63  ;;  %v2249_v63 = vld [vmem:[%s8080_s8 + $0x78] sm:$0xff] }
 0x580   :  { %5133 = vmatpush3.bf16.msra.mxu1 %v4488_v1  ;;  %v5167_v1 = vpack.c.bf16 %v2249_v63, %v2248_v62  ;;  %v6469_v62 = vld [vmem:[#allocation8 + $0x650] ss:$8 sps:$4 sm:$0xff]   ;;  %v6470_v63 = vld [vmem:[#allocation8 + $0x664] ss:$8 sps:$4 sm:$0xff]  }
 0x581   :  { %5135 = vmatprep.subr.bf16.mxu1 %v4497_v3  ;;  %v4354_v3 = vld [vmem:[#allocation13] ss:$0 sm:$0xff] }
 0x582   :  { %5168 = vmatpush3.bf16.msra.mxu0 %v5167_v1  ;;  %v6472_v1 = vld [vmem:[#allocation8 + $0x660] ss:$8 sps:$4 sm:$0xff]  }
 0x584   :  { %5137 = vmatpush3.bf16.msra.mxu1 %v4489_v49 }
 0x585   :  { %5139 = vmatprep.subr.bf16.mxu1 %v4498_v2 }
 0x588   :  { %5141 = vmatpush3.bf16.msra.mxu1 %v4490_v55 }
 0x589   :  { %5142 = vmatprep.subr.bf16.mxu1 %v7040_v7 }
 0x63e   :  { %v2075_v56 = vpop.f32.mrb[12].mxu1 }
 0x63f   :  { %v2077_v38 = vpop.f32.mrb[13].mxu1 }
 0x640   :  { %2144 = vmatprep.mubr.f32.mxu1 %v2077_v38  ;;  %v6449_v38 = vld [vmem:[#allocation16 + $0x4] ss:$8 sps:$4 sm:$0xff]  }
 0x641   :  { %2145 = vmatmul.mubr.f32.vlgmr.msra.gmra.mrb[14].mxu1 %v2075_v56 }
 0x642   :  { %5144 = vmatpush3.bf16.msra.mxu1 %v5143_v50  ;;  %4614 = vmatprep.mubr.msk.f32.mxu1 %vm7041_vm8, %v7039_v0 }
 0x643   :  { %5170 = vmatprep.subr.bf16.mxu1 %v6449_v38  ;;  %v6481_v38 = vld [vmem:[#allocation8 + $0x690] ss:$8 sps:$4 sm:$0xff]  }
 0x714   :  { %v4532_v57 = vpop.f32.mrb[14].mxu1 }
 0x715   :  { %v4533_v59 = vpop.f32.mrb[15].mxu1 }
 0x716   :  { %v4534_v60 = vadd.f32 %v4533_v59, %v4532_v57  ;;  %v6463_v57 = vld [vmem:[#allocation8 + $0x630] ss:$8 sps:$4 sm:$0xff]   ;;  %v6464_v59 = vld [vmem:[#allocation8 + $0x644] ss:$8 sps:$4 sm:$0xff]  }
 0x718   :  { %v2150_v61 = vmul.f32 0.00390625, %v4534_v60  ;;  %v6466_v60 = vld [vmem:[#allocation8 + $0x640] ss:$8 sps:$4 sm:$0xff]  }
 0x71a   :  { %4615 = vmatmul.mubr.msk.f32.vlgmr.msra.gmra.mrb[16].mxu1 %vm384_vm1, %v2150_v61  ;;  %v6467_v61 = vld [vmem:[#allocation8 + $0x654] ss:$8 sps:$4 sm:$0xff]  }
 0x71b   :  { %2400 = vmatprep.mubr.f32.mxu1 %v7039_v0  ;;  %5172 = vmatpush1.bf16.msra.mxu1 %v6451_v4  ;;  %v6482_v4 = vld [vmem:[#allocation8 + $0x6a4] ss:$8 sps:$4 sm:$0xff]  }
 0x7ed   :  { %v2229_v49 = vpop.f32.mrb[16].mxu1 }
 0x7ee   :  { %v2230_v2 = vadd.f32 %v4354_v3, %v2229_v49  ;;  %v4616_v55 = vpop.f32.mrb[17].mxu1  ;;  %v6473_v3 = vld [vmem:[#allocation8 + $0x674] ss:$8 sps:$4 sm:$0xff]   ;;  %v6475_v49 = vld [vmem:[#allocation8 + $0x670] ss:$8 sps:$4 sm:$0xff]  }
 0x7ef   :  { %v6478_v55 = vld [vmem:[#allocation8 + $0x680] ss:$8 sps:$4 sm:$0xff]  }
 0x7f0   :  { %v2233_v56 = vmax.f32 %v2230_v2, 0.0  ;;  %v6476_v2 = vld [vmem:[#allocation8 + $0x684] ss:$8 sps:$4 sm:$0xff]  }
 0x7f2   :  { %4650 = vmatmul.mubr.f32.vlgmr.msra.gmra.mrb[20].mxu0 %v2233_v56  ;;  %v6479_v56 = vld [vmem:[#allocation8 + $0x694] ss:$8 sps:$4 sm:$0xff]  }
 0x8c5   :  { %v2323_v50 = vpop.f32.mrb[20].mxu0 }
 0x8c6   :  { %v2324_v45 = vadd.f32 %v4356_v5, %v2323_v50  ;;  %v4651_v8 = vpop.f32.mrb[21].mxu0  ;;  %v6484_v5 = vld [vmem:[#allocation8 + $0x6a0] ss:$8 sps:$4 sm:$0xff]   ;;  %v6485_v50 = vld [vmem:[#allocation8 + $0x6b4] ss:$8 sps:$4 sm:$0xff]  }
 0x8c7   :  { %v6488_v8 = vld [vmem:[#allocation8 + $0x6c4] ss:$8 sps:$4 sm:$0xff]  }
 0x8c8   :  { %v4357_v10 = vmul.f32 -1.442695, %v2324_v45  ;;  %v6487_v45 = vld [vmem:[#allocation8 + $0x6b0] ss:$8 sps:$4 sm:$0xff]  }
 0x8ca   :  { %6740 = vpow2.f32 %v4357_v10  ;;  %v6490_v10 = vld [vmem:[#allocation8 + $0x6c0] ss:$8 sps:$4 sm:$0xff]  }
 0x8d4   :  { %v6741_v41 = vpop.eup %6740 }
 0x8d5   :  { %v2330_v12 = vadd.f32 1.0, %v6741_v41  ;;  %v6491_v41 = vld [vmem:[#allocation8 + $0x6d4] ss:$8 sps:$4 sm:$0xff]  }
 0x8d7   :  { %6742 = vrcp.f32 %v2330_v12  ;;  %v6493_v12 = vld [vmem:[#allocation8 + $0x6d0] ss:$8 sps:$4 sm:$0xff]  }
 0x8e1   :  { %v6743_v13 = vpop.eup %6742 }
 0x8e2   :  { %4358 = vmatmul.mubr.msk.f32.vlgmr.msra.gmra.mrb[18].mxu1 %vm384_vm1, %v6743_v13  ;;  %v6494_v13 = vld [vmem:[#allocation8 + $0x6e4] ss:$8 sps:$4 sm:$0xff]  }
 0x8e3   :  { %2491 = vmatprep.mubr.f32.mxu1 %v7039_v0 }
 0x9b5   :  { %v2402_v16 = vpop.f32.mrb[18].mxu1 }
 0x9b6   :  { %v2404_v24 = vpop.f32.mrb[19].mxu1 }
 0x9b7   :  { %4359 = vmatprep.subr.msk.mxu1 %vm2420_vm9, %v2404_v24  ;;  %v6499_v24 = vld [vmem:[#allocation8 + $0x6f0] ss:$8 sps:$4 sm:$0xff]  }
 0x9b8   :  { %4360 = vmatpush1.msk.msra.mxu1 %vm2420_vm9, %v2402_v16  ;;  %v6496_v16 = vld [vmem:[#allocation8 + $0x6e0] ss:$8 sps:$4 sm:$0xff]  }
 0x9b9   :  { %4361 = vmatmul.mubr.msk.f32.vlgmr.msra.gmra.mrb[20].mxu1 %vm2407_vm10, %v4475_v20  ;;  %5174 = vmatprep.subr.bf16.mxu1 %v6452_v22  ;;  %v6497_v22 = vld [vmem:[#allocation8 + $0x6f4] ss:$8 sps:$4 sm:$0xff]  }
 0x9ba   :  { %2497 = vmatprep.mubr.f32.mxu1 %v7039_v0  ;;  %5176 = vmatpush1.bf16.msra.mxu1 %v6454_v28  ;;  %v6500_v28 = vld [vmem:[#allocation8 + $0x704] ss:$8 sps:$4 sm:$0xff]  }
 0x9bb   :  { %5178 = vmatprep.subr.bf16.mxu1 %v6455_v29 }
 0x9bd   :  { %4362 = vmatmul.mubr.msk.f32.gmra.mrb[22].mxu1 %vm2407_vm10, %v4476_v31 }
 0x9be   :  { %2503 = vmatprep.mubr.f32.mxu1 %v7039_v0  ;;  %5180 = vmatpush1.bf16.msra.mxu1 %v6457_v42 }
 0x9bf   :  { %5182 = vmatprep.subr.bf16.mxu1 %v6458_v43 }
 0x9c1   :  { %4363 = vmatmul.mubr.msk.f32.gmra.mrb[24].mxu1 %vm2407_vm10, %v4479_v51 }
 0x9c2   :  { %2509 = vmatprep.mubr.f32.mxu1 %v7039_v0  ;;  %5184 = vmatpush1.bf16.msra.mxu1 %v6460_v52 }
 0x9c3   :  { %5186 = vmatprep.subr.bf16.mxu1 %v6461_v53 }
 0x9c5   :  { %4364 = vmatmul.mubr.msk.f32.gmra.mrb[26].mxu1 %vm2407_vm10, %v4480_v54 }
 0x9c6   :  { %5188 = vmatpush1.bf16.msra.mxu1 %v6463_v57 }
 0x9c7   :  { %5190 = vmatprep.subr.bf16.mxu1 %v6464_v59 }
 0x9ca   :  { %5192 = vmatpush1.bf16.msra.mxu1 %v6466_v60 }
 0x9cb   :  { %5194 = vmatprep.subr.bf16.mxu1 %v6467_v61 }
 0x9ce   :  { %5196 = vmatpush1.bf16.msra.mxu1 %v6469_v62 }
 0x9cf   :  { %5198 = vmatprep.subr.bf16.mxu1 %v6470_v63 }
 0x9d2   :  { %5200 = vmatpush1.bf16.msra.mxu1 %v6472_v1 }
 0x9d3   :  { %5202 = vmatprep.subr.bf16.mxu1 %v6473_v3 }
 0x9d6   :  { %5204 = vmatpush1.bf16.msra.mxu1 %v6475_v49 }
 0x9d7   :  { %5206 = vmatprep.subr.bf16.mxu1 %v6476_v2 }
 0x9da   :  { %5208 = vmatpush1.bf16.msra.mxu1 %v6478_v55 }
 0x9db   :  { %5210 = vmatprep.subr.bf16.mxu1 %v6479_v56 }
 0x9de   :  { %5212 = vmatpush1.bf16.msra.mxu1 %v6481_v38 }
 0x9df   :  { %5214 = vmatprep.subr.bf16.mxu1 %v6482_v4 }
 0x9e2   :  { %5216 = vmatpush1.bf16.msra.mxu1 %v6484_v5 }
 0x9e3   :  { %5218 = vmatprep.subr.bf16.mxu1 %v6485_v50 }
 0x9e6   :  { %5220 = vmatpush1.bf16.msra.mxu1 %v6487_v45 }
 0x9e7   :  { %5222 = vmatprep.subr.bf16.mxu1 %v6488_v8 }
 0x9ea   :  { %5224 = vmatpush1.bf16.msra.mxu1 %v6490_v10 }
 0x9eb   :  { %5226 = vmatprep.subr.bf16.mxu1 %v6491_v41 }
 0x9ee   :  { %5228 = vmatpush1.bf16.msra.mxu1 %v6493_v12  ;;  %v6502_v12 = vld [vmem:[#allocation8 + $0x700] ss:$8 sps:$4 sm:$0xff]  }
 0x9ef   :  { %5230 = vmatprep.subr.bf16.mxu1 %v6494_v13 }
 0x9f2   :  { %5232 = vmatpush1.bf16.msra.mxu1 %v6496_v16  ;;  %v6503_v16 = vld [vmem:[#allocation8 + $0x714] ss:$8 sps:$4 sm:$0xff]  }
 0x9f3   :  { %5234 = vmatprep.subr.bf16.mxu1 %v6497_v22 }
 0x9f6   :  { %5236 = vmatpush1.bf16.msra.mxu1 %v6499_v24 }
 0x9f7   :  { %5238 = vmatprep.subr.bf16.mxu1 %v6500_v28 }
 0xa8c   :  { %v2493_v29 = vpop.f32.mrb[20].mxu1 }
 0xa8d   :  { %v2495_v42 = vpop.f32.mrb[21].mxu1  ;;  %v2516_v53 = vmul.f32 %v7527_v18, %v2493_v29 }
 0xa8e   :  { %v2517_v57 = vmul.f32 %v7523_v48, %v2495_v42  ;;  %v6505_v42 = vld [vmem:[#allocation8 + $0x710] ss:$8 sps:$4 sm:$0xff]  }
 0xa8f   :  { %v2524_v63 = vadd.f32 %v2516_v53, %v7327_v19 }
 0xa90   :  { %v2499_v43 = vpop.f32.mrb[22].mxu1  ;;  %v2525_v1 = vadd.f32 %v2517_v57, %v7330_v21 }
 0xa91   :  { %v2501_v52 = vpop.f32.mrb[23].mxu1  ;;  %v2518_v49 = vmul.f32 %v7521_v15, %v2499_v43  ;;  %v7707_v38 = vmax.f32 %v2524_v63, 0.0  ;;  %v6506_v43 = vld [vmem:[#allocation8 + $0x724] ss:$8 sps:$4 sm:$0xff]   ;;  %v6511_v63 = vld [vmem:[#allocation8 + $0x730] ss:$8 sps:$4 sm:$0xff]  }
 0xa92   :  { %v2519_v61 = vmul.f32 %v7525_v17, %v2501_v52 }
 0xa93   :  { %v2526_v15 = vadd.f32 %v2518_v49, %v7348_v34  ;;  %v6596_v49 = vld [vmem:[#allocation8 + $0x904] ss:$8 sps:$4 sm:$0xff]  }
 0xa94   :  { %v2505_v59 = vpop.f32.mrb[24].mxu1  ;;  %v2527_v48 = vadd.f32 %v2519_v61, %v7334_v25  ;;  %v6509_v61 = vld [vmem:[#allocation8 + $0x734] ss:$8 sps:$4 sm:$0xff]   ;;  %5366 = vmatprep.subr.bf16.mxu0 %v6596_v49  ;;  %v6541_v49 = vld [vmem:[#allocation8 + $0x7d0] ss:$8 sps:$4 sm:$0xff]  }
 0xa95   :  { %v2507_v60 = vpop.f32.mrb[25].mxu1  ;;  %v2520_v2 = vmul.f32 %v7539_v37, %v2505_v59  ;;  %v7727_v50 = vmax.f32 %v2526_v15, 0.0  ;;  %v6508_v59 = vld [vmem:[#allocation8 + $0x720] ss:$8 sps:$4 sm:$0xff]  }
 0xa96   :  { %v2521_v62 = vmul.f32 %v7535_v32, %v2507_v60  ;;  %v7710_v32 = vmax.f32 %v2525_v1, 0.0  ;;  %v7717_v4 = vmax.f32 %v2527_v48, 0.0  ;;  %v6512_v1 = vld [vmem:[#allocation8 + $0x744] ss:$8 sps:$4 sm:$0xff]   ;;  %v6515_v48 = vld [vmem:[#allocation8 + $0x754] ss:$8 sps:$4 sm:$0xff]  }
 0xa97   :  { %v2528_v37 = vadd.f32 %v2520_v2, %v7350_v35  ;;  %v2542_v22 = vrot.slane %v7727_v50, 7  ;;  %v6598_v2 = vld [vmem:[#allocation8 + $0x900] ss:$8 sps:$4 sm:$0xff]  }
 0xa98   :  { %v2511_v3 = vpop.f32.mrb[26].mxu1  ;;  %v2529_v56 = vadd.f32 %v2521_v62, %v7336_v26  ;;  %v2541_v5 = vrot.slane %v7710_v32, 7  ;;  %v2543_v8 = vrot.slane %v7717_v4, 7  ;;  %5368 = vmatpush1.bf16.msra.mxu0 %v6598_v2  ;;  %v6604_v15 = vld [vmem:[#allocation8 + $0x920] ss:$8 sps:$4 sm:$0xff]  }
 0xa99   :  { %v2522_v55 = vmul.f32 %v7533_v30, %v2511_v3  ;;  %v2513_v18 = vpop.f32.mrb[27].mxu1  ;;  %v7729_v34 = vmax.f32 %v2528_v37, 0.0  ;;  %v6605_v37 = vld [vmem:[#allocation8 + $0x934] ss:$8 sps:$4 sm:$0xff]   ;;  %v6542_v2 = vld [vmem:[#allocation8 + $0x7e4] ss:$8 sps:$4 sm:$0xff]  }
 0xa9a   :  { %v2523_v17 = vmul.f32 %v7537_v36, %v2513_v18  ;;  %v7719_v25 = vmax.f32 %v2529_v56, 0.0  ;;  %v2540_v36 = vrot.slane %v7707_v38, 7  ;;  %v2553_v28 = vsel %vm772_vm3, %v2541_v5, %v2543_v8  ;;  %v6514_v18 = vld [vmem:[#allocation8 + $0x740] ss:$8 sps:$4 sm:$0xff]   ;;  %v6601_v56 = vld [vmem:[#allocation8 + $0x910] ss:$8 sps:$4 sm:$0xff]  }
 0xa9b   :  { %v2530_v19 = vadd.f32 %v2522_v55, %v7332_v23  ;;  %v2544_v24 = vrot.slane %v7729_v34, 7  ;;  %v6599_v55 = vld [vmem:[#allocation8 + $0x914] ss:$8 sps:$4 sm:$0xff]  }
 0xa9c   :  { %v2531_v21 = vadd.f32 %v2523_v17, %v7338_v27  ;;  %v2545_v10 = vrot.slane %v7719_v25, 7  ;;  %v2552_v52 = vsel %vm772_vm3, %v2540_v36, %v2542_v22  ;;  %5370 = vmatprep.subr.bf16.mxu0 %v6599_v55  ;;  %v6602_v17 = vld [vmem:[#allocation8 + $0x924] ss:$8 sps:$4 sm:$0xff]   ;;  %v6628_v55 = vld [vmem:[#allocation8 + $0x9a0] ss:$8 sps:$4 sm:$0xff]  }
 0xa9d   :  { %v7715_v30 = vmax.f32 %v2530_v19, 0.0  ;;  %v2550_v57 = vsel %vm772_vm3, %v2542_v22, %v2544_v24  ;;  %v6517_v19 = vld [vmem:[#allocation8 + $0x750] ss:$8 sps:$4 sm:$0xff]   ;;  %5372 = vmatpush1.bf16.msra.mxu0 %v6601_v56 }
 0xa9e   :  { %v7721_v26 = vmax.f32 %v2531_v21, 0.0  ;;  %v2551_v29 = vsel %vm772_vm3, %v2543_v8, %v2545_v10  ;;  %v2560_v60 = vmul.f32 %v7365_v47, %v2550_v57  ;;  %v6518_v21 = vld [vmem:[#allocation8 + $0x764] ss:$8 sps:$4 sm:$0xff]   ;;  %5374 = vmatprep.subr.bf16.mxu0 %v6602_v17  ;;  %v6610_v8 = vld [vmem:[#allocation8 + $0x940] ss:$8 sps:$4 sm:$0xff]  }
 0xa9f   :  { %v2546_v23 = vrot.slane %v7715_v30, 7  ;;  %v2561_v53 = vmul.f32 %v7365_v47, %v2551_v29  ;;  %v6529_v22 = vld [vmem:[#allocation8 + $0x790] ss:$8 sps:$4 sm:$0xff]   ;;  %v6617_v29 = vld [vmem:[#allocation8 + $0x974] ss:$8 sps:$4 sm:$0xff]  }
 0xaa0   :  { %v2547_v27 = vrot.slane %v7721_v26, 7  ;;  %v6535_v57 = vld [vmem:[#allocation8 + $0x7b0] ss:$8 sps:$4 sm:$0xff]   ;;  %v6548_v17 = vld [vmem:[#allocation8 + $0x804] ss:$8 sps:$4 sm:$0xff]  }
 0xaa1   :  { %v2554_v35 = vsel %vm772_vm3, %v2546_v23, %v2540_v36  ;;  %v2548_v3 = vsel %vm772_vm3, %v2544_v24, %v2546_v23  ;;  %v6520_v36 = vld [vmem:[#allocation8 + $0x760] ss:$8 sps:$4 sm:$0xff]   ;;  %v6521_v23 = vld [vmem:[#allocation8 + $0x774] ss:$8 sps:$4 sm:$0xff]   ;;  %5376 = vmatpush1.bf16.msra.mxu0 %v6604_v15  ;;  %v6530_v24 = vld [vmem:[#allocation8 + $0x7a4] ss:$8 sps:$4 sm:$0xff]  }
 0xaa2   :  { %v2555_v45 = vsel %vm772_vm3, %v2547_v27, %v2541_v5  ;;  %v2556_v13 = vmul.f32 %v7346_v33, %v2554_v35  ;;  %v2549_v62 = vsel %vm772_vm3, %v2545_v10, %v2547_v27  ;;  %v6607_v5 = vld [vmem:[#allocation8 + $0x930] ss:$8 sps:$4 sm:$0xff]   ;;  %5378 = vmatprep.subr.bf16.mxu0 %v6605_v37  ;;  %v6608_v27 = vld [vmem:[#allocation8 + $0x944] ss:$8 sps:$4 sm:$0xff]   ;;  %v6611_v10 = vld [vmem:[#allocation8 + $0x954] ss:$8 sps:$4 sm:$0xff]  }
 0xaa3   :  { %v2557_v41 = vmul.f32 %v7346_v33, %v2555_v45  ;;  %v6523_v35 = vld [vmem:[#allocation8 + $0x770] ss:$8 sps:$4 sm:$0xff]   ;;  %v6524_v45 = vld [vmem:[#allocation8 + $0x784] ss:$8 sps:$4 sm:$0xff]  }
 0xaa4   :  { %v6547_v56 = vld [vmem:[#allocation8 + $0x7f0] ss:$8 sps:$4 sm:$0xff]   ;;  %v6554_v37 = vld [vmem:[#allocation8 + $0x824] ss:$8 sps:$4 sm:$0xff]  }
 0xaa5   :  { %2954 = vmatprep.mubr.f32.mxu1 %v2557_v41  ;;  %5380 = vmatpush1.bf16.msra.mxu0 %v6607_v5  ;;  %v6526_v41 = vld [vmem:[#allocation8 + $0x780] ss:$8 sps:$4 sm:$0xff]   ;;  %v6553_v15 = vld [vmem:[#allocation8 + $0x810] ss:$8 sps:$4 sm:$0xff]   ;;  %v2567_v5 = vrot.slane %v7717_v4, 1 }
 0xaa6   :  { %2955 = vmatmul.mubr.f32.vlgmr.msra.gmra.mrb[28].mxu1 %v2556_v13  ;;  %5382 = vmatprep.subr.bf16.mxu0 %v6608_v27  ;;  %v6613_v13 = vld [vmem:[#allocation8 + $0x950] ss:$8 sps:$4 sm:$0xff]  }
 0xaa7   :  { %5240 = vmatpush1.bf16.msra.mxu1 %v6502_v12  ;;  %2960 = vmatprep.mubr.f32.mxu1 %v2553_v28  ;;  %v6527_v12 = vld [vmem:[#allocation8 + $0x794] ss:$8 sps:$4 sm:$0xff]   ;;  %v6616_v28 = vld [vmem:[#allocation8 + $0x960] ss:$8 sps:$4 sm:$0xff]   ;;  %v6559_v27 = vld [vmem:[#allocation8 + $0x830] ss:$8 sps:$4 sm:$0xff]  }
 0xaa8   :  { %5242 = vmatprep.subr.bf16.mxu1 %v6503_v16  ;;  %v6614_v16 = vld [vmem:[#allocation8 + $0x964] ss:$8 sps:$4 sm:$0xff]  }
 0xaa9   :  { %5384 = vmatpush1.bf16.msra.mxu0 %v6610_v8 }
 0xaaa   :  { %2961 = vmatmul.mubr.f32.gmra.mrb[30].mxu1 %v2552_v52  ;;  %5386 = vmatprep.subr.bf16.mxu0 %v6611_v10  ;;  %v6619_v52 = vld [vmem:[#allocation8 + $0x970] ss:$8 sps:$4 sm:$0xff]   ;;  %v6562_v10 = vld [vmem:[#allocation8 + $0x840] ss:$8 sps:$4 sm:$0xff]  }
 0xaab   :  { %5244 = vmatpush1.bf16.msra.mxu1 %v6505_v42  ;;  %2966 = vmatprep.mubr.f32.mxu1 %v2561_v53  ;;  %v6532_v42 = vld [vmem:[#allocation8 + $0x7a0] ss:$8 sps:$4 sm:$0xff]   ;;  %v6620_v53 = vld [vmem:[#allocation8 + $0x984] ss:$8 sps:$4 sm:$0xff]  }
 0xaac   :  { %5246 = vmatprep.subr.bf16.mxu1 %v6506_v43  ;;  %v6533_v43 = vld [vmem:[#allocation8 + $0x7b4] ss:$8 sps:$4 sm:$0xff]  }
 0xaad   :  { %5388 = vmatpush1.bf16.msra.mxu0 %v6613_v13  ;;  %v6566_v13 = vld [vmem:[#allocation8 + $0x864] ss:$8 sps:$4 sm:$0xff]  }
 0xaae   :  { %2967 = vmatmul.mubr.f32.gmra.mrb[32].mxu1 %v2560_v60  ;;  %5390 = vmatprep.subr.bf16.mxu0 %v6614_v16  ;;  %v6622_v60 = vld [vmem:[#allocation8 + $0x980] ss:$8 sps:$4 sm:$0xff]  }
 0xaaf   :  { %5248 = vmatpush1.bf16.msra.mxu1 %v6508_v59  ;;  %2972 = vmatprep.mubr.f32.mxu1 %v2549_v62  ;;  %v6536_v59 = vld [vmem:[#allocation8 + $0x7c4] ss:$8 sps:$4 sm:$0xff]   ;;  %v6538_v62 = vld [vmem:[#allocation8 + $0x7c0] ss:$8 sps:$4 sm:$0xff]  }
 0xab0   :  { %5250 = vmatprep.subr.bf16.mxu1 %v6509_v61  ;;  %v6623_v61 = vld [vmem:[#allocation8 + $0x994] ss:$8 sps:$4 sm:$0xff]   ;;  %v6568_v16 = vld [vmem:[#allocation8 + $0x860] ss:$8 sps:$4 sm:$0xff]  }
 0xab1   :  { %5392 = vmatpush1.bf16.msra.mxu0 %v6616_v28  ;;  %v6572_v28 = vld [vmem:[#allocation8 + $0x884] ss:$8 sps:$4 sm:$0xff]  }
 0xab2   :  { %2973 = vmatmul.mubr.f32.gmra.mrb[34].mxu1 %v2548_v3  ;;  %5394 = vmatprep.subr.bf16.mxu0 %v6617_v29  ;;  %v6626_v3 = vld [vmem:[#allocation8 + $0x9a4] ss:$8 sps:$4 sm:$0xff]   ;;  %v6574_v29 = vld [vmem:[#allocation8 + $0x880] ss:$8 sps:$4 sm:$0xff]  }
 0xab3   :  { %5252 = vmatpush1.bf16.msra.mxu1 %v6511_v63  ;;  %3043 = vmatprep.mubr.f32.mxu1 %v7710_v32  ;;  %v6539_v63 = vld [vmem:[#allocation8 + $0x7d4] ss:$8 sps:$4 sm:$0xff]  }
 0xab4   :  { %5254 = vmatprep.subr.bf16.mxu1 %v6512_v1  ;;  %v6625_v1 = vld [vmem:[#allocation8 + $0x990] ss:$8 sps:$4 sm:$0xff]  }
 0xab5   :  { %5396 = vmatpush1.bf16.msra.mxu0 %v6619_v52  ;;  %v6578_v52 = vld [vmem:[#allocation8 + $0x8a4] ss:$8 sps:$4 sm:$0xff]  }
 0xab6   :  { %5398 = vmatprep.subr.bf16.mxu0 %v6620_v53  ;;  %v6580_v53 = vld [vmem:[#allocation8 + $0x8a0] ss:$8 sps:$4 sm:$0xff]  }
 0xab7   :  { %5256 = vmatpush1.bf16.msra.mxu1 %v6514_v18  ;;  %v6544_v18 = vld [vmem:[#allocation8 + $0x7e0] ss:$8 sps:$4 sm:$0xff]  }
 0xab8   :  { %5258 = vmatprep.subr.bf16.mxu1 %v6515_v48  ;;  %v6545_v48 = vld [vmem:[#allocation8 + $0x7f4] ss:$8 sps:$4 sm:$0xff]  }
 0xab9   :  { %5400 = vmatpush1.bf16.msra.mxu0 %v6622_v60  ;;  %v6584_v60 = vld [vmem:[#allocation8 + $0x8c4] ss:$8 sps:$4 sm:$0xff]  }
 0xaba   :  { %5402 = vmatprep.subr.bf16.mxu0 %v6623_v61  ;;  %v6586_v61 = vld [vmem:[#allocation8 + $0x8c0] ss:$8 sps:$4 sm:$0xff]  }
 0xabb   :  { %5260 = vmatpush1.bf16.msra.mxu1 %v6517_v19  ;;  %v6550_v19 = vld [vmem:[#allocation8 + $0x800] ss:$8 sps:$4 sm:$0xff]  }
 0xabc   :  { %5262 = vmatprep.subr.bf16.mxu1 %v6518_v21  ;;  %v6551_v21 = vld [vmem:[#allocation8 + $0x814] ss:$8 sps:$4 sm:$0xff]  }
 0xabd   :  { %5404 = vmatpush1.bf16.msra.mxu0 %v6625_v1  ;;  %v6590_v1 = vld [vmem:[#allocation8 + $0x8e4] ss:$8 sps:$4 sm:$0xff]  }
 0xabe   :  { %5406 = vmatprep.subr.bf16.mxu0 %v6626_v3  ;;  %v6592_v3 = vld [vmem:[#allocation8 + $0x8e0] ss:$8 sps:$4 sm:$0xff]  }
 0xabf   :  { %5264 = vmatpush1.bf16.msra.mxu1 %v6520_v36  ;;  %v6556_v36 = vld [vmem:[#allocation8 + $0x820] ss:$8 sps:$4 sm:$0xff]  }
 0xac0   :  { %5266 = vmatprep.subr.bf16.mxu1 %v6521_v23  ;;  %v6557_v23 = vld [vmem:[#allocation8 + $0x834] ss:$8 sps:$4 sm:$0xff]  }
 0xac1   :  { %5408 = vmatpush1.bf16.msra.mxu0 %v6628_v55  ;;  %v6595_v55 = vld [vmem:[#allocation8 + $0x8f0] ss:$8 sps:$4 sm:$0xff]  }
 0xac3   :  { %5268 = vmatpush1.bf16.msra.mxu1 %v6523_v35  ;;  %v2565_v35 = vrot.slane %v7710_v32, 1 }
 0xac4   :  { %5270 = vmatprep.subr.bf16.mxu1 %v6524_v45  ;;  %v6560_v45 = vld [vmem:[#allocation8 + $0x844] ss:$8 sps:$4 sm:$0xff]  }
 0xac5   :  { %v2577_v8 = vsel %vm797_vm5, %v2565_v35, %v2567_v5 }
 0xac7   :  { %5272 = vmatpush1.bf16.msra.mxu1 %v6526_v41  ;;  %v6563_v41 = vld [vmem:[#allocation8 + $0x854] ss:$8 sps:$4 sm:$0xff]  }
 0xac8   :  { %5274 = vmatprep.subr.bf16.mxu1 %v6527_v12  ;;  %v6565_v12 = vld [vmem:[#allocation8 + $0x850] ss:$8 sps:$4 sm:$0xff]  }
 0xacb   :  { %5276 = vmatpush1.bf16.msra.mxu1 %v6529_v22  ;;  %v6569_v22 = vld [vmem:[#allocation8 + $0x874] ss:$8 sps:$4 sm:$0xff]  }
 0xacc   :  { %5278 = vmatprep.subr.bf16.mxu1 %v6530_v24  ;;  %v6571_v24 = vld [vmem:[#allocation8 + $0x870] ss:$8 sps:$4 sm:$0xff]  }
 0xacf   :  { %5280 = vmatpush1.bf16.msra.mxu1 %v6532_v42  ;;  %v6575_v42 = vld [vmem:[#allocation8 + $0x894] ss:$8 sps:$4 sm:$0xff]  }
 0xad0   :  { %5282 = vmatprep.subr.bf16.mxu1 %v6533_v43  ;;  %v6577_v43 = vld [vmem:[#allocation8 + $0x890] ss:$8 sps:$4 sm:$0xff]  }
 0xad3   :  { %5284 = vmatpush1.bf16.msra.mxu1 %v6535_v57  ;;  %v6581_v57 = vld [vmem:[#allocation8 + $0x8b4] ss:$8 sps:$4 sm:$0xff]  }
 0xad4   :  { %5286 = vmatprep.subr.bf16.mxu1 %v6536_v59  ;;  %v6583_v59 = vld [vmem:[#allocation8 + $0x8b0] ss:$8 sps:$4 sm:$0xff]  }
 0xad7   :  { %5288 = vmatpush1.bf16.msra.mxu1 %v6538_v62  ;;  %v6587_v62 = vld [vmem:[#allocation8 + $0x8d4] ss:$8 sps:$4 sm:$0xff]  }
 0xad8   :  { %5290 = vmatprep.subr.bf16.mxu1 %v6539_v63  ;;  %v6589_v63 = vld [vmem:[#allocation8 + $0x8d0] ss:$8 sps:$4 sm:$0xff]  }
 0xadb   :  { %5292 = vmatpush1.bf16.msra.mxu1 %v6541_v49  ;;  %v6593_v49 = vld [vmem:[#allocation8 + $0x8f4] ss:$8 sps:$4 sm:$0xff]  }
 0xadc   :  { %5294 = vmatprep.subr.bf16.mxu1 %v6542_v2  ;;  %v2569_v2 = vrot.slane %v7719_v25, 1 }
 0xadf   :  { %5296 = vmatpush1.bf16.msra.mxu1 %v6544_v18  ;;  %v2566_v18 = vrot.slane %v7727_v50, 1 }
 0xae0   :  { %5298 = vmatprep.subr.bf16.mxu1 %v6545_v48  ;;  %v2568_v48 = vrot.slane %v7729_v34, 1 }
 0xae3   :  { %5300 = vmatpush1.bf16.msra.mxu1 %v6547_v56  ;;  %v2575_v56 = vsel %vm797_vm5, %v2567_v5, %v2569_v2 }
 0xae4   :  { %5302 = vmatprep.subr.bf16.mxu1 %v6548_v17  ;;  %v2564_v17 = vrot.slane %v7707_v38, 1 }
 0xae6   :  { %3044 = vmatmul.mubr.f32.vlgmr.msra.gmra.mrb[28].mxu1 %v7707_v38 }
 0xae7   :  { %3049 = vmatprep.mubr.f32.mxu1 %v7717_v4  ;;  %5304 = vmatpush1.bf16.msra.mxu1 %v6550_v19  ;;  %v2576_v19 = vsel %vm797_vm5, %v2564_v17, %v2566_v18 }
 0xae8   :  { %5306 = vmatprep.subr.bf16.mxu1 %v6551_v21  ;;  %v2583_v21 = vmul.f32 %v7402_v46, %v2575_v56 }
 0xaea   :  { %3050 = vmatmul.mubr.f32.gmra.mrb[30].mxu1 %v7727_v50 }
 0xaeb   :  { %3055 = vmatprep.mubr.f32.mxu1 %v7719_v25  ;;  %5308 = vmatpush1.bf16.msra.mxu1 %v6553_v15  ;;  %v2574_v15 = vsel %vm797_vm5, %v2566_v18, %v2568_v48 }
 0xaec   :  { %5310 = vmatprep.subr.bf16.mxu1 %v6554_v37  ;;  %v2571_v37 = vrot.slane %v7721_v26, 1 }
 0xaee   :  { %3056 = vmatmul.mubr.f32.gmra.mrb[32].mxu1 %v7729_v34  ;;  %v2573_v5 = vsel %vm797_vm5, %v2569_v2, %v2571_v37 }
 0xaef   :  { %3061 = vmatprep.mubr.f32.mxu1 %v7721_v26  ;;  %5312 = vmatpush1.bf16.msra.mxu1 %v6556_v36  ;;  %v2582_v36 = vmul.f32 %v7402_v46, %v2574_v15 }
 0xaf0   :  { %5314 = vmatprep.subr.bf16.mxu1 %v6557_v23  ;;  %v2570_v23 = vrot.slane %v7715_v30, 1 }
 0xaf2   :  { %3062 = vmatmul.mubr.f32.gmra.mrb[34].mxu1 %v7715_v30 }
 0xaf3   :  { %5316 = vmatpush1.bf16.msra.mxu1 %v6559_v27  ;;  %3132 = vmatprep.mubr.f32.mxu1 %v2577_v8  ;;  %v2579_v27 = vsel %vm797_vm5, %v2571_v37, %v2565_v35  ;;  %v6632_v35 = vld [vmem:[#allocation8 + $0x9c4] ss:$8 sps:$4 sm:$0xff]  }
 0xaf4   :  { %5318 = vmatprep.subr.bf16.mxu1 %v6560_v45  ;;  %v2572_v45 = vsel %vm797_vm5, %v2568_v48, %v2570_v23  ;;  %v2587_v8 = vmul.f32 %v7420_v58, %v2579_v27 }
 0xaf7   :  { %5320 = vmatpush1.bf16.msra.mxu1 %v6562_v10  ;;  %v2578_v10 = vsel %vm797_vm5, %v2570_v23, %v2564_v17 }
 0xaf8   :  { %5322 = vmatprep.subr.bf16.mxu1 %v6563_v41  ;;  %v2586_v41 = vmul.f32 %v7420_v58, %v2578_v10 }
 0xafb   :  { %5324 = vmatpush1.bf16.msra.mxu1 %v6565_v12  ;;  %v6629_v12 = vld [vmem:[#allocation8 + $0x9b4] ss:$8 sps:$4 sm:$0xff]  }
 0xafc   :  { %5326 = vmatprep.subr.bf16.mxu1 %v6566_v13  ;;  %v6631_v13 = vld [vmem:[#allocation8 + $0x9b0] ss:$8 sps:$4 sm:$0xff]   ;;  %5410 = vmatprep.subr.bf16.mxu0 %v6629_v12 }
 0xafd   :  { %5412 = vmatpush1.bf16.msra.mxu0 %v6631_v13 }
 0xafe   :  { %5414 = vmatprep.subr.bf16.mxu0 %v6632_v35 }
 0xaff   :  { %5328 = vmatpush1.bf16.msra.mxu1 %v6568_v16  ;;  %v6634_v16 = vld [vmem:[#allocation8 + $0x9c0] ss:$8 sps:$4 sm:$0xff]  }
 0xb00   :  { %5330 = vmatprep.subr.bf16.mxu1 %v6569_v22  ;;  %v6635_v22 = vld [vmem:[#allocation8 + $0x9d4] ss:$8 sps:$4 sm:$0xff]  }
 0xb01   :  { %5416 = vmatpush1.bf16.msra.mxu0 %v6634_v16 }
 0xb02   :  { %5418 = vmatprep.subr.bf16.mxu0 %v6635_v22 }
 0xb03   :  { %5332 = vmatpush1.bf16.msra.mxu1 %v6571_v24  ;;  %v6637_v24 = vld [vmem:[#allocation8 + $0x9d0] ss:$8 sps:$4 sm:$0xff]  }
 0xb04   :  { %5334 = vmatprep.subr.bf16.mxu1 %v6572_v28  ;;  %v6638_v28 = vld [vmem:[#allocation8 + $0x9e4] ss:$8 sps:$4 sm:$0xff]  }
 0xb05   :  { %5420 = vmatpush1.bf16.msra.mxu0 %v6637_v24 }
 0xb06   :  { %5422 = vmatprep.subr.bf16.mxu0 %v6638_v28 }
 0xb07   :  { %5336 = vmatpush1.bf16.msra.mxu1 %v6574_v29  ;;  %v6640_v29 = vld [vmem:[#allocation8 + $0x9e0] ss:$8 sps:$4 sm:$0xff]  }
 0xb08   :  { %5338 = vmatprep.subr.bf16.mxu1 %v6575_v42  ;;  %v6641_v42 = vld [vmem:[#allocation8 + $0x9f4] ss:$8 sps:$4 sm:$0xff]  }
 0xb09   :  { %5424 = vmatpush1.bf16.msra.mxu0 %v6640_v29 }
 0xb0a   :  { %5426 = vmatprep.subr.bf16.mxu0 %v6641_v42  ;;  %v6646_v42 = vld [vmem:[#allocation8 + $0xa00] ss:$8 sps:$4 sm:$0xff]  }
 0xb0b   :  { %5340 = vmatpush1.bf16.msra.mxu1 %v6577_v43  ;;  %v6643_v43 = vld [vmem:[#allocation8 + $0x9f0] ss:$8 sps:$4 sm:$0xff]  }
 0xb0c   :  { %5342 = vmatprep.subr.bf16.mxu1 %v6578_v52  ;;  %v6644_v52 = vld [vmem:[#allocation8 + $0xa04] ss:$8 sps:$4 sm:$0xff]  }
 0xb0d   :  { %5428 = vmatpush1.bf16.msra.mxu0 %v6643_v43 }
 0xb0e   :  { %5430 = vmatprep.subr.bf16.mxu0 %v6644_v52  ;;  %v6647_v52 = vld [vmem:[#allocation8 + $0xa14] ss:$8 sps:$4 sm:$0xff]  }
 0xb0f   :  { %5344 = vmatpush1.bf16.msra.mxu1 %v6580_v53 }
 0xb10   :  { %5346 = vmatprep.subr.bf16.mxu1 %v6581_v57 }
 0xb13   :  { %5348 = vmatpush1.bf16.msra.mxu1 %v6583_v59  ;;  %v2878_v59 = vld [vmem:[#allocation10 + $0x4] sm:$0x3] }
 0xb14   :  { %5350 = vmatprep.subr.bf16.mxu1 %v6584_v60 }
 0xb17   :  { %5352 = vmatpush1.bf16.msra.mxu1 %v6586_v61  ;;  %v2883_v61 = vrot.slane %v2878_v59, %v7319_v9 }
 0xb18   :  { %5354 = vmatprep.subr.bf16.mxu1 %v6587_v62 }
 0xb1b   :  { %5356 = vmatpush1.bf16.msra.mxu1 %v6589_v63  ;;  %v2887_v63 = vrot.slane %v2878_v59, %v7322_v11 }
 0xb1c   :  { %5358 = vmatprep.subr.bf16.mxu1 %v6590_v1 }
 0xb1f   :  { %5360 = vmatpush1.bf16.msra.mxu1 %v6592_v3 }
 0xb20   :  { %5362 = vmatprep.subr.bf16.mxu1 %v6593_v49 }
 0xb23   :  { %5364 = vmatpush1.bf16.msra.mxu1 %v6595_v55 }
 0xb26   :  { %3133 = vmatmul.mubr.f32.vlgmr.msra.gmra.mrb[28].mxu1 %v2576_v19 }
 0xb27   :  { %3138 = vmatprep.mubr.f32.mxu1 %v2583_v21 }
 0xb2a   :  { %3139 = vmatmul.mubr.f32.gmra.mrb[30].mxu1 %v2582_v36 }
 0xb2b   :  { %3144 = vmatprep.mubr.f32.mxu1 %v2573_v5 }
 0xb2e   :  { %3145 = vmatmul.mubr.f32.gmra.mrb[32].mxu1 %v2572_v45 }
 0xb2f   :  { %3150 = vmatprep.mubr.f32.mxu1 %v2587_v8 }
 0xb32   :  { %3151 = vmatmul.mubr.f32.gmra.mrb[34].mxu1 %v2586_v41 }
 0xb33   :  { %3846 = vmatprep.mubr.f32.mxu1 %v7039_v0 }
 0xbf9   :  { %v3134_v53 = vpop.f32.mrb[28].mxu1 }
 0xbfa   :  { %v3136_v57 = vpop.f32.mrb[29].mxu1  ;;  %v5644_v3 = vadd.f32 %v3134_v53, %v2883_v61 }
 0xbfb   :  { %v5645_v2 = vadd.f32 %v3136_v57, %v2887_v63 }
 0xbfc   :  { %v7798_v56 = vmax.f32 %v5644_v3, 0.0  ;;  %v6652_v3 = vld [vmem:[#allocation8 + $0xa20] ss:$8 sps:$4 sm:$0xff]  }
 0xbfd   :  { %v3140_v60 = vpop.f32.mrb[30].mxu1  ;;  %v7800_v21 = vmax.f32 %v5645_v2, 0.0  ;;  %v6653_v2 = vld [vmem:[#allocation8 + $0xa34] ss:$8 sps:$4 sm:$0xff]  }
 0xbfe   :  { %v3142_v62 = vpop.f32.mrb[31].mxu1  ;;  %v5646_v37 = vadd.f32 %v3140_v60, %v2883_v61  ;;  %v3165_v8 = vrot.slane %v7798_v56, 7 }
 0xbff   :  { %v5647_v55 = vadd.f32 %v3142_v62, %v2887_v63  ;;  %v3166_v41 = vrot.slane %v7800_v21, 7  ;;  %v6650_v62 = vld [vmem:[#allocation8 + $0xa24] ss:$8 sps:$4 sm:$0xff]  }
 0xc00   :  { %v7814_v13 = vmax.f32 %v5646_v37, 0.0  ;;  %v6662_v37 = vld [vmem:[#allocation8 + $0xa64] ss:$8 sps:$4 sm:$0xff]  }
 0xc01   :  { %v3146_v1 = vpop.f32.mrb[32].mxu1  ;;  %v7804_v5 = vmax.f32 %v5647_v55, 0.0 }
 0xc02   :  { %v3148_v49 = vpop.f32.mrb[33].mxu1  ;;  %v5648_v36 = vadd.f32 %v3146_v1, %v2883_v61  ;;  %v3167_v53 = vrot.slane %v7814_v13, 7 }
 0xc03   :  { %v5649_v18 = vadd.f32 %v3148_v49, %v2887_v63  ;;  %v3168_v22 = vrot.slane %v7804_v5, 7 }
 0xc04   :  { %v7816_v35 = vmax.f32 %v5648_v36, 0.0  ;;  %v6664_v36 = vld [vmem:[#allocation8 + $0xa60] ss:$8 sps:$4 sm:$0xff]  }
 0xc05   :  { %v3152_v48 = vpop.f32.mrb[34].mxu1  ;;  %v7806_v27 = vmax.f32 %v5649_v18, 0.0  ;;  %v3178_v59 = vsel %vm772_vm3, %v3166_v41, %v3168_v22  ;;  %v6655_v18 = vld [vmem:[#allocation8 + $0xa30] ss:$8 sps:$4 sm:$0xff]  }
 0xc06   :  { %v5650_v17 = vadd.f32 %v3152_v48, %v2883_v61  ;;  %v3154_v19 = vpop.f32.mrb[35].mxu1  ;;  %v3169_v57 = vrot.slane %v7816_v35, 7  ;;  %v6649_v61 = vld [vmem:[#allocation8 + $0xa10] ss:$8 sps:$4 sm:$0xff]   ;;  %v6656_v48 = vld [vmem:[#allocation8 + $0xa44] ss:$8 sps:$4 sm:$0xff]  }
 0xc07   :  { %v5651_v15 = vadd.f32 %v3154_v19, %v2887_v63  ;;  %v3170_v24 = vrot.slane %v7806_v27, 7  ;;  %v6658_v19 = vld [vmem:[#allocation8 + $0xa40] ss:$8 sps:$4 sm:$0xff]  }
 0xc08   :  { %v7802_v23 = vmax.f32 %v5650_v17, 0.0  ;;  %v3175_v1 = vsel %vm772_vm3, %v3167_v53, %v3169_v57 }
 0xc09   :  { %v7808_v45 = vmax.f32 %v5651_v15, 0.0  ;;  %v3176_v60 = vsel %vm772_vm3, %v3168_v22, %v3170_v24  ;;  %v3185_v49 = vmul.f32 %v7365_v47, %v3175_v1  ;;  %v6661_v15 = vld [vmem:[#allocation8 + $0xa50] ss:$8 sps:$4 sm:$0xff]   ;;  %v6695_v1 = vld [vmem:[#allocation8 + $0xb14] ss:$8 sps:$4 sm:$0xff]  }
 0xc0a   :  { %v3171_v10 = vrot.slane %v7802_v23, 7  ;;  %v3186_v63 = vmul.f32 %v7365_v47, %v3176_v60  ;;  %v6659_v47 = vld [vmem:[#allocation8 + $0xa54] ss:$8 sps:$4 sm:$0xff]   ;;  %v6673_v22 = vld [vmem:[#allocation8 + $0xa90] ss:$8 sps:$4 sm:$0xff]  }
 0xc0b   :  { %v3172_v12 = vrot.slane %v7808_v45, 7  ;;  %v6688_v60 = vld [vmem:[#allocation8 + $0xae0] ss:$8 sps:$4 sm:$0xff]  }
 0xc0c   :  { %v3179_v16 = vsel %vm772_vm3, %v3171_v10, %v3165_v8  ;;  %v3173_v17 = vsel %vm772_vm3, %v3169_v57, %v3171_v10  ;;  %v6670_v10 = vld [vmem:[#allocation8 + $0xa80] ss:$8 sps:$4 sm:$0xff]   ;;  %v6685_v57 = vld [vmem:[#allocation8 + $0xad0] ss:$8 sps:$4 sm:$0xff]  }
 0xc0d   :  { %v3180_v28 = vsel %vm772_vm3, %v3172_v12, %v3166_v41  ;;  %v3181_v43 = vmul.f32 %v7346_v33, %v3179_v16  ;;  %v3174_v55 = vsel %vm772_vm3, %v3170_v24, %v3172_v12  ;;  %v6667_v41 = vld [vmem:[#allocation8 + $0xa70] ss:$8 sps:$4 sm:$0xff]   ;;  %v6668_v12 = vld [vmem:[#allocation8 + $0xa84] ss:$8 sps:$4 sm:$0xff]   ;;  %v6671_v16 = vld [vmem:[#allocation8 + $0xa94] ss:$8 sps:$4 sm:$0xff]  }
 0xc0e   :  { %v3182_v29 = vmul.f32 %v7346_v33, %v3180_v28  ;;  %v3177_v33 = vsel %vm772_vm3, %v3165_v8, %v3167_v53  ;;  %v6665_v8 = vld [vmem:[#allocation8 + $0xa74] ss:$8 sps:$4 sm:$0xff]   ;;  %v6674_v24 = vld [vmem:[#allocation8 + $0xaa4] ss:$8 sps:$4 sm:$0xff]   ;;  %v6676_v28 = vld [vmem:[#allocation8 + $0xaa0] ss:$8 sps:$4 sm:$0xff]  }
 0xc0f   :  { %v6683_v53 = vld [vmem:[#allocation8 + $0xad4] ss:$8 sps:$4 sm:$0xff]  }
 0xc10   :  { %3579 = vmatprep.mubr.f32.mxu0 %v3182_v29  ;;  %v6677_v29 = vld [vmem:[#allocation8 + $0xab4] ss:$8 sps:$4 sm:$0xff]  }
 0xc11   :  { %3580 = vmatmul.mubr.f32.vlgmr.msra.gmra.mrb[22].mxu0 %v3181_v43  ;;  %v6680_v43 = vld [vmem:[#allocation8 + $0xac4] ss:$8 sps:$4 sm:$0xff]  }
 0xc12   :  { %5432 = vmatpush1.bf16.msra.mxu0 %v6646_v42  ;;  %3585 = vmatprep.mubr.f32.mxu0 %v3178_v59  ;;  %v6679_v42 = vld [vmem:[#allocation8 + $0xab0] ss:$8 sps:$4 sm:$0xff]   ;;  %v6686_v59 = vld [vmem:[#allocation8 + $0xae4] ss:$8 sps:$4 sm:$0xff]  }
 0xc13   :  { %5434 = vmatprep.subr.bf16.mxu0 %v6647_v52  ;;  %v6682_v52 = vld [vmem:[#allocation8 + $0xac0] ss:$8 sps:$4 sm:$0xff]  }
 0xc15   :  { %3586 = vmatmul.mubr.f32.gmra.mrb[24].mxu0 %v3177_v33  ;;  %v6692_v33 = vld [vmem:[#allocation8 + $0xb04] ss:$8 sps:$4 sm:$0xff]  }
 0xc16   :  { %5436 = vmatpush1.bf16.msra.mxu0 %v6649_v61  ;;  %3591 = vmatprep.mubr.f32.mxu0 %v3186_v63  ;;  %v6689_v61 = vld [vmem:[#allocation8 + $0xaf4] ss:$8 sps:$4 sm:$0xff]   ;;  %v6694_v63 = vld [vmem:[#allocation8 + $0xb00] ss:$8 sps:$4 sm:$0xff]  }
 0xc17   :  { %5438 = vmatprep.subr.bf16.mxu0 %v6650_v62  ;;  %v6691_v62 = vld [vmem:[#allocation8 + $0xaf0] ss:$8 sps:$4 sm:$0xff]  }
 0xc19   :  { %3592 = vmatmul.mubr.f32.gmra.mrb[26].mxu0 %v3185_v49  ;;  %v6698_v49 = vld [vmem:[#allocation8 + $0xb24] ss:$8 sps:$4 sm:$0xff]  }
 0xc1a   :  { %5440 = vmatpush1.bf16.msra.mxu0 %v6652_v3  ;;  %3597 = vmatprep.mubr.f32.mxu0 %v3174_v55  ;;  %v6697_v3 = vld [vmem:[#allocation8 + $0xb10] ss:$8 sps:$4 sm:$0xff]   ;;  %v6701_v55 = vld [vmem:[#allocation8 + $0xb34] ss:$8 sps:$4 sm:$0xff]  }
 0xc1b   :  { %5442 = vmatprep.subr.bf16.mxu0 %v6653_v2  ;;  %v6700_v2 = vld [vmem:[#allocation8 + $0xb20] ss:$8 sps:$4 sm:$0xff]  }
 0xc1d   :  { %3598 = vmatmul.mubr.f32.gmra.mrb[28].mxu0 %v3173_v17  ;;  %v3190_v17 = vrot.slane %v7800_v21, 1 }
 0xc1e   :  { %5444 = vmatpush1.bf16.msra.mxu0 %v6655_v18  ;;  %3668 = vmatprep.mubr.f32.mxu0 %v7800_v21  ;;  %v3192_v18 = vrot.slane %v7804_v5, 1 }
 0xc1f   :  { %5446 = vmatprep.subr.bf16.mxu0 %v6656_v48  ;;  %v6703_v48 = vld [vmem:[#allocation8 + $0xb30] ss:$8 sps:$4 sm:$0xff]  }
 0xc22   :  { %5448 = vmatpush1.bf16.msra.mxu0 %v6658_v19  ;;  %v6704_v19 = vld [vmem:[#allocation8 + $0xb44] ss:$8 sps:$4 sm:$0xff]  }
 0xc23   :  { %5450 = vmatprep.subr.bf16.mxu0 %v6659_v47  ;;  %v3202_v47 = vsel %vm797_vm5, %v3190_v17, %v3192_v18 }
 0xc26   :  { %5452 = vmatpush1.bf16.msra.mxu0 %v6661_v15  ;;  %v6707_v15 = vld [vmem:[#allocation8 + $0xb54] ss:$8 sps:$4 sm:$0xff]  }
 0xc27   :  { %5454 = vmatprep.subr.bf16.mxu0 %v6662_v37  ;;  %v6709_v37 = vld [vmem:[#allocation8 + $0xb50] ss:$8 sps:$4 sm:$0xff]  }
 0xc2a   :  { %5456 = vmatpush1.bf16.msra.mxu0 %v6664_v36  ;;  %v6710_v36 = vld [vmem:[#allocation8 + $0xb64] ss:$8 sps:$4 sm:$0xff]  }
 0xc2b   :  { %5458 = vmatprep.subr.bf16.mxu0 %v6665_v8  ;;  %v6712_v8 = vld [vmem:[#allocation8 + $0xb60] ss:$8 sps:$4 sm:$0xff]  }
 0xc2e   :  { %5460 = vmatpush1.bf16.msra.mxu0 %v6667_v41  ;;  %v6713_v41 = vld [vmem:[#allocation8 + $0xb74] ss:$8 sps:$4 sm:$0xff]  }
 0xc2f   :  { %5462 = vmatprep.subr.bf16.mxu0 %v6668_v12  ;;  %v6715_v12 = vld [vmem:[#allocation8 + $0xb70] ss:$8 sps:$4 sm:$0xff]  }
 0xc32   :  { %5464 = vmatpush1.bf16.msra.mxu0 %v6670_v10  ;;  %v6716_v10 = vld [vmem:[#allocation8 + $0xb84] ss:$8 sps:$4 sm:$0xff]  }
 0xc33   :  { %5466 = vmatprep.subr.bf16.mxu0 %v6671_v16  ;;  %v6718_v16 = vld [vmem:[#allocation8 + $0xb80] ss:$8 sps:$4 sm:$0xff]  }
 0xc36   :  { %5468 = vmatpush1.bf16.msra.mxu0 %v6673_v22  ;;  %v6719_v22 = vld [vmem:[#allocation8 + $0xb94] ss:$8 sps:$4 sm:$0xff]  }
 0xc37   :  { %5470 = vmatprep.subr.bf16.mxu0 %v6674_v24  ;;  %v6721_v24 = vld [vmem:[#allocation8 + $0xb90] ss:$8 sps:$4 sm:$0xff]  }
 0xc3a   :  { %5472 = vmatpush1.bf16.msra.mxu0 %v6676_v28  ;;  %v6722_v28 = vld [vmem:[#allocation8 + $0xba4] ss:$8 sps:$4 sm:$0xff]  }
 0xc3b   :  { %5474 = vmatprep.subr.bf16.mxu0 %v6677_v29  ;;  %v6724_v29 = vld [vmem:[#allocation8 + $0xba0] ss:$8 sps:$4 sm:$0xff]  }
 0xc3e   :  { %5476 = vmatpush1.bf16.msra.mxu0 %v6679_v42  ;;  %v6725_v42 = vld [vmem:[#allocation8 + $0xbb4] ss:$8 sps:$4 sm:$0xff]  }
 0xc3f   :  { %5478 = vmatprep.subr.bf16.mxu0 %v6680_v43  ;;  %v6727_v43 = vld [vmem:[#allocation8 + $0xbb0] ss:$8 sps:$4 sm:$0xff]  }
 0xc42   :  { %5480 = vmatpush1.bf16.msra.mxu0 %v6682_v52  ;;  %v6728_v52 = vld [vmem:[#allocation8 + $0xbc4] ss:$8 sps:$4 sm:$0xff]  }
 0xc43   :  { %5482 = vmatprep.subr.bf16.mxu0 %v6683_v53  ;;  %v6730_v53 = vld [vmem:[#allocation8 + $0xbc0] ss:$8 sps:$4 sm:$0xff]  }
 0xc46   :  { %5484 = vmatpush1.bf16.msra.mxu0 %v6685_v57  ;;  %v6731_v57 = vld [vmem:[#allocation8 + $0xbd4] ss:$8 sps:$4 sm:$0xff]  }
 0xc47   :  { %5486 = vmatprep.subr.bf16.mxu0 %v6686_v59  ;;  %v6733_v59 = vld [vmem:[#allocation8 + $0xbd0] ss:$8 sps:$4 sm:$0xff]  }
 0xc4a   :  { %5488 = vmatpush1.bf16.msra.mxu0 %v6688_v60  ;;  %v6734_v60 = vld [vmem:[#allocation8 + $0xbe4] ss:$8 sps:$4 sm:$0xff]  }
 0xc4b   :  { %5490 = vmatprep.subr.bf16.mxu0 %v6689_v61  ;;  %v6736_v61 = vld [vmem:[#allocation8 + $0xbe0] ss:$8 sps:$4 sm:$0xff]  }
 0xc4e   :  { %5492 = vmatpush1.bf16.msra.mxu0 %v6691_v62  ;;  %v6737_v62 = vld [vmem:[#allocation8 + $0xbf4] ss:$8 sps:$4 sm:$0xff]  }
 0xc4f   :  { %5494 = vmatprep.subr.bf16.mxu0 %v6692_v33  ;;  %v3194_v33 = vrot.slane %v7806_v27, 1 }
 0xc51   :  { %3669 = vmatmul.mubr.f32.vlgmr.msra.gmra.mrb[22].mxu0 %v7798_v56 }
 0xc52   :  { %3674 = vmatprep.mubr.f32.mxu0 %v7804_v5  ;;  %5496 = vmatpush1.bf16.msra.mxu0 %v6694_v63  ;;  %v6706_v5 = vld [vmem:[#allocation8 + $0xb40] ss:$8 sps:$4 sm:$0xff]   ;;  %v6739_v63 = vld [vmem:[#allocation8 + $0xbf0] ss:$8 sps:$4 sm:$0xff]  }
 0xc53   :  { %5498 = vmatprep.subr.bf16.mxu0 %v6695_v1  ;;  %v3191_v1 = vrot.slane %v7814_v13, 1 }
 0xc55   :  { %3675 = vmatmul.mubr.f32.gmra.mrb[24].mxu0 %v7814_v13 }
 0xc56   :  { %3680 = vmatprep.mubr.f32.mxu0 %v7806_v27  ;;  %5500 = vmatpush1.bf16.msra.mxu0 %v6697_v3  ;;  %v3193_v3 = vrot.slane %v7816_v35, 1 }
 0xc57   :  { %5502 = vmatprep.subr.bf16.mxu0 %v6698_v49  ;;  %v3200_v49 = vsel %vm797_vm5, %v3192_v18, %v3194_v33 }
 0xc58   :  { %v3199_v13 = vsel %vm797_vm5, %v3191_v1, %v3193_v3 }
 0xc59   :  { %3681 = vmatmul.mubr.f32.gmra.mrb[26].mxu0 %v7816_v35  ;;  %v3196_v35 = vrot.slane %v7808_v45, 1  ;;  %v3207_v18 = vmul.f32 %v7402_v46, %v3199_v13 }
 0xc5a   :  { %3686 = vmatprep.mubr.f32.mxu0 %v7808_v45  ;;  %5504 = vmatpush1.bf16.msra.mxu0 %v6700_v2  ;;  %v3189_v2 = vrot.slane %v7798_v56, 1  ;;  %v6749_v56 = vld [vmem:[%s8082_s10] sm:$0xff]  }
 0xc5b   :  { %5506 = vmatprep.subr.bf16.mxu0 %v6701_v55  ;;  %v6748_v55 = vld [vmem:[%s8082_s10 + $0x40] sm:$0xff]   ;;  %v3198_v45 = vsel %vm797_vm5, %v3194_v33, %v3196_v35 }
 0xc5c   :  { %v3201_v27 = vsel %vm797_vm5, %v3189_v2, %v3191_v1 }
 0xc5d   :  { %3687 = vmatmul.mubr.f32.gmra.mrb[28].mxu0 %v7802_v23 }
 0xc5e   :  { %5508 = vmatpush1.bf16.msra.mxu0 %v6703_v48  ;;  %3757 = vmatprep.mubr.f32.mxu0 %v3202_v47  ;;  %v3208_v48 = vmul.f32 %v7402_v46, %v3200_v49  ;;  %v3195_v47 = vrot.slane %v7802_v23, 1  ;;  %v6751_v46 = vld [vmem:[%s8082_s10 + $0x8] sm:$0xff]  }
 0xc5f   :  { %5510 = vmatprep.subr.bf16.mxu0 %v6704_v19  ;;  %v6750_v19 = vld [vmem:[%s8082_s10 + $0x48] sm:$0xff]  }
 0xc60   :  { %v3197_v23 = vsel %vm797_vm5, %v3193_v3, %v3195_v47  ;;  %v3203_v21 = vsel %vm797_vm5, %v3195_v47, %v3189_v2  ;;  %v6765_v47 = vld [vmem:[#allocation16] ss:$8 sps:$4 sm:$0xff]  }
 0xc62   :  { %5512 = vmatpush1.bf16.msra.mxu0 %v6706_v5  ;;  %v3204_v5 = vsel %vm797_vm5, %v3196_v35, %v3190_v17  ;;  %v6753_v17 = vld [vmem:[%s8082_s10 + $0x10] sm:$0xff]  }
 0xc63   :  { %5514 = vmatprep.subr.bf16.mxu0 %v6707_v15  ;;  %v6752_v15 = vld [vmem:[%s8082_s10 + $0x50] sm:$0xff]  }
 0xc66   :  { %5516 = vmatpush1.bf16.msra.mxu0 %v6709_v37  ;;  %v3212_v37 = vmul.f32 %v7420_v58, %v3204_v5  ;;  %v3926_v5 = vld [vmem:[#allocation11 + $0x18] sm:$0xff] }
 0xc67   :  { %5518 = vmatprep.subr.bf16.mxu0 %v6710_v36  ;;  %v3211_v36 = vmul.f32 %v7420_v58, %v3203_v21  ;;  %v6757_v58 = vld [vmem:[%s8082_s10 + $0x20] sm:$0xff]  }
 0xc6a   :  { %5520 = vmatpush1.bf16.msra.mxu0 %v6712_v8  ;;  %v6754_v8 = vld [vmem:[%s8082_s10 + $0x58] sm:$0xff]  }
 0xc6b   :  { %5522 = vmatprep.subr.bf16.mxu0 %v6713_v41  ;;  %v6756_v41 = vld [vmem:[%s8082_s10 + $0x60] sm:$0xff]  }
 0xc6e   :  { %5524 = vmatpush1.bf16.msra.mxu0 %v6715_v12  ;;  %v6758_v12 = vld [vmem:[%s8082_s10 + $0x68] sm:$0xff]  }
 0xc6f   :  { %5526 = vmatprep.subr.bf16.mxu0 %v6716_v10  ;;  %v6759_v10 = vld [vmem:[%s8082_s10 + $0x28] sm:$0xff]  }
 0xc72   :  { %5528 = vmatpush1.bf16.msra.mxu0 %v6718_v16  ;;  %v6760_v16 = vld [vmem:[%s8082_s10 + $0x70] sm:$0xff]  }
 0xc73   :  { %5530 = vmatprep.subr.bf16.mxu0 %v6719_v22  ;;  %v6761_v22 = vld [vmem:[%s8082_s10 + $0x30] sm:$0xff]  }
 0xc76   :  { %5532 = vmatpush1.bf16.msra.mxu0 %v6721_v24  ;;  %v6762_v24 = vld [vmem:[%s8082_s10 + $0x78] sm:$0xff]  }
 0xc77   :  { %5534 = vmatprep.subr.bf16.mxu0 %v6722_v28  ;;  %v6763_v28 = vld [vmem:[%s8082_s10 + $0x38] sm:$0xff]  }
 0xc7a   :  { %5536 = vmatpush1.bf16.msra.mxu0 %v6724_v29  ;;  %v6764_v29 = vld [vmem:[#allocation16 + $0x4] ss:$8 sps:$4 sm:$0xff]  }
 0xc7b   :  { %5538 = vmatprep.subr.bf16.mxu0 %v6725_v42  ;;  %v3503_v42 = vld [vmem:[#allocation10 + $0x6] sm:$0x3] }
 0xc7e   :  { %5540 = vmatpush1.bf16.msra.mxu0 %v6727_v43 }
 0xc7f   :  { %5542 = vmatprep.subr.bf16.mxu0 %v6728_v52 }
 0xc82   :  { %5544 = vmatpush1.bf16.msra.mxu0 %v6730_v53  ;;  %v3512_v53 = vrot.slane %v3503_v42, %v7322_v11 }
 0xc83   :  { %5546 = vmatprep.subr.bf16.mxu0 %v6731_v57  ;;  %v3508_v57 = vrot.slane %v3503_v42, %v7319_v9  ;;  %v4378_v42 = vld [vmem:[%s8080_s8 + $0xd0] sm:$0xff] }
 0xc86   :  { %5548 = vmatpush1.bf16.msra.mxu0 %v6733_v59 }
 0xc87   :  { %5550 = vmatprep.subr.bf16.mxu0 %v6734_v60 }
 0xc8a   :  { %5552 = vmatpush1.bf16.msra.mxu0 %v6736_v61 }
 0xc8b   :  { %5554 = vmatprep.subr.bf16.mxu0 %v6737_v62 }
 0xc8e   :  { %5556 = vmatpush1.bf16.msra.mxu0 %v6739_v63 }
 0xc8f   :  { %5566 = vmatprep.subr.bf16.mxu0 %v6748_v55 }
 0xc91   :  { %3758 = vmatmul.mubr.f32.vlgmr.msra.gmra.mrb[22].mxu0 %v3201_v27 }
 0xc92   :  { %3763 = vmatprep.mubr.f32.mxu0 %v3208_v48  ;;  %5568 = vmatpush3.bf16.msra.mxu0 %v6749_v56 }
 0xc93   :  { %5570 = vmatprep.subr.bf16.mxu0 %v6750_v19 }
 0xc95   :  { %3764 = vmatmul.mubr.f32.gmra.mrb[24].mxu0 %v3207_v18 }
 0xc96   :  { %3769 = vmatprep.mubr.f32.mxu0 %v3198_v45  ;;  %5572 = vmatpush3.bf16.msra.mxu0 %v6751_v46  ;;  %v3925_v45 = vld [vmem:[#allocation11 + $0x10] sm:$0xff] }
 0xc97   :  { %5574 = vmatprep.subr.bf16.mxu0 %v6752_v15  ;;  %v5598_v46 = vpack.c.bf16 %v3926_v5, %v3925_v45  ;;  %v4369_v15 = vld [vmem:[%s8080_s8 + $0x88] sm:$0xff] }
 0xc99   :  { %3770 = vmatmul.mubr.f32.gmra.mrb[26].mxu0 %v3197_v23 }
 0xc9a   :  { %3775 = vmatprep.mubr.f32.mxu0 %v3212_v37  ;;  %5576 = vmatpush3.bf16.msra.mxu0 %v6753_v17 }
 0xc9b   :  { %5578 = vmatprep.subr.bf16.mxu0 %v6754_v8  ;;  %v4371_v8 = vld [vmem:[%s8080_s8 + $0x98] sm:$0xff] }
 0xc9d   :  { %3776 = vmatmul.mubr.f32.gmra.mrb[28].mxu0 %v3211_v36  ;;  %v4370_v36 = vld [vmem:[%s8080_s8 + $0x90] sm:$0xff] }
 0xc9e   :  { %5580 = vmatpush3.bf16.msra.mxu0 %v6755_v6  ;;  %v5604_v6 = vpack.c.bf16 %v4371_v8, %v4370_v36 }
 0xc9f   :  { %5582 = vmatprep.subr.bf16.mxu0 %v6756_v41  ;;  %v4372_v41 = vld [vmem:[%s8080_s8 + $0xa0] sm:$0xff] }
 0xca2   :  { %5584 = vmatpush3.bf16.msra.mxu0 %v6757_v58  ;;  %v4373_v58 = vld [vmem:[%s8080_s8 + $0xa8] sm:$0xff] }
 0xca3   :  { %5586 = vmatprep.subr.bf16.mxu0 %v6758_v12  ;;  %v5607_v12 = vpack.c.bf16 %v4373_v58, %v4372_v41 }
 0xca6   :  { %5588 = vmatpush3.bf16.msra.mxu0 %v6759_v10  ;;  %v4374_v10 = vld [vmem:[%s8080_s8 + $0xb0] sm:$0xff] }
 0xca7   :  { %5590 = vmatprep.subr.bf16.mxu0 %v6760_v16  ;;  %v4375_v16 = vld [vmem:[%s8080_s8 + $0xb8] sm:$0xff] }
 0xcaa   :  { %5592 = vmatpush3.bf16.msra.mxu0 %v6761_v22  ;;  %v5610_v22 = vpack.c.bf16 %v4375_v16, %v4374_v10 }
 0xcab   :  { %5594 = vmatprep.subr.bf16.mxu0 %v6762_v24  ;;  %v4376_v24 = vld [vmem:[%s8080_s8 + $0xc0] sm:$0xff] }
 0xcae   :  { %5596 = vmatpush3.bf16.msra.mxu0 %v6763_v28  ;;  %v4377_v28 = vld [vmem:[%s8080_s8 + $0xc8] sm:$0xff] }
 0xcaf   :  { %5625 = vmatprep.subr.bf16.mxu0 %v6764_v29  ;;  %v5613_v29 = vpack.c.bf16 %v4377_v28, %v4376_v24 }
 0xd64   :  { %v3759_v43 = vpop.f32.mrb[22].mxu0 }
 0xd65   :  { %v3761_v52 = vpop.f32.mrb[23].mxu0  ;;  %v7938_v63 = vadd.f32 %v3759_v43, %v3508_v57  ;;  %v4379_v43 = vld [vmem:[%s8080_s8 + $0xd8] sm:$0xff] }
 0xd66   :  { %v7934_v62 = vadd.f32 %v3761_v52, %v3512_v53  ;;  %v5616_v52 = vpack.c.bf16 %v4379_v43, %v4378_v42 }
 0xd68   :  { %v3765_v59 = vpop.f32.mrb[24].mxu0 }
 0xd69   :  { %v7932_v60 = vadd.f32 %v3765_v59, %v3508_v57  ;;  %v3767_v61 = vpop.f32.mrb[25].mxu0 }
 0xd6a   :  { %v7936_v33 = vadd.f32 %v3767_v61, %v3512_v53  ;;  %v4382_v61 = vld [vmem:[%s8080_s8 + $0xf0] sm:$0xff] }
 0xd6b   :  { %v5559_v49 = vpack.c.bf16 %v7932_v60, %v7938_v63 }
 0xd6c   :  { %v5557_v1 = vpack.c.bf16 %v7936_v33, %v7934_v62  ;;  %v3771_v3 = vpop.f32.mrb[26].mxu0 }
 0xd6d   :  { %v3773_v11 = vpop.f32.mrb[27].mxu0  ;;  %v7950_v13 = vadd.f32 %v3771_v3, %v3508_v57 }
 0xd6e   :  { %5558 = vmatprep.subr.bf16.mxu1 %v5557_v1  ;;  %v7946_v27 = vadd.f32 %v3773_v11, %v3512_v53  ;;  %v4383_v1 = vld [vmem:[%s8080_s8 + $0xf8] sm:$0xff] }
 0xd6f   :  { %5560 = vmatpush1.bf16.msra.mxu1 %v5559_v49  ;;  %v5622_v3 = vpack.c.bf16 %v4383_v1, %v4382_v61  ;;  %v4366_v49 = vld [vmem:[#allocation13 + $0x1] ss:$0 sm:$0xff] }
 0xd70   :  { %v3777_v9 = vpop.f32.mrb[28].mxu0 }
 0xd71   :  { %v7944_v2 = vadd.f32 %v3777_v9, %v3508_v57  ;;  %v3779_v55 = vpop.f32.mrb[29].mxu0  ;;  %v4381_v57 = vld [vmem:[%s8080_s8 + $0xe8] sm:$0xff] }
 0xd72   :  { %v7948_v48 = vadd.f32 %v3779_v55, %v3512_v53  ;;  %v4380_v53 = vld [vmem:[%s8080_s8 + $0xe0] sm:$0xff] }
 0xd73   :  { %v5563_v56 = vpack.c.bf16 %v7944_v2, %v7950_v13  ;;  %v5619_v59 = vpack.c.bf16 %v4381_v57, %v4380_v53 }
 0xd74   :  { %v5561_v35 = vpack.c.bf16 %v7948_v48, %v7946_v27 }
 0xd76   :  { %5562 = vmatprep.subr.bf16.mxu1 %v5561_v35 }
 0xd77   :  { %5564 = vmatpush1.bf16.msra.mxu1 %v5563_v56  ;;  %v4384_v56 = vld [vmem:[#allocation14 + $0x1] ss:$0 sm:$0xff] }
 0xd78   :  { %5597 = vmatprep.subr.bf16.mxu1 %v7040_v7 }
 0xd7a   :  { %4365 = vmatmul.mubr.msk.f32.vlgmr.msra.gmra.mrb[36].mxu1 %vm206_vm0, %v755_v44  ;;  %v4368_v44 = vld [vmem:[%s8080_s8 + $0x80] sm:$0xff]  ;;  %s7042_s8 = smov [#allocation19]  }
 0xd7b   :  { %4656 = vmatprep.mubr.msk.f32.mxu1 %vm7041_vm8, %v7039_v0  ;;  %5599 = vmatpush3.bf16.msra.mxu1 %v5598_v46  ;;  %v5601_v21 = vpack.c.bf16 %v4369_v15, %v4368_v44  ;;  %s4316_s7 = sshll.u32 %s7042_s8, 4  ;;  %s4317_s7 = int_to_ptr.vmem [resolvable:$true] %s4316_s7 }
 0xd7c   :  { %5600 = vmatprep.subr.bf16.mxu1 %v7040_v7  ;;  %s6986_s15 = scalar_lea.vmem %s4317_s7, 1024  ;;  %p6991_p11 = scmp.lt.s32.totalorder %s4317_s7, %s4317_s7 }
 0xd7d   :  { %p6987_p10 = scmp.ne.s32.totalorder %s4317_s7, %s6986_s15  ;;  %p6992_p12 = scmp.lt.s32.totalorder %s6986_s15, %s6986_s15 }
 0xd7f   :  { %p6993_p13 = por %p6992_p12, %p6991_p11 }
 0xd81   :  { %p6994_p0 = pnand %p6993_p13, %p6987_p10 }
 0xe4d   :  { %v3848_v18 = vpop.f32.mrb[36].mxu1 }
 0xe4e   :  { %v3850_v19 = vpop.f32.mrb[37].mxu1 }
 0xe4f   :  { %3917 = vmatprep.mubr.f32.mxu0 %v3850_v19 }
 0xe50   :  { %3918 = vmatmul.mubr.f32.vlgmr.msra.gmra.mrb[30].mxu0 %v3848_v18 }
 0xe51   :  { %5627 = vmatpush1.bf16.msra.mxu0 %v6765_v47  ;;  %4177 = vmatprep.mubr.f32.mxu0 %v7039_v0 }
 0xf23   :  { %v4587_v39 = vpop.f32.mrb[30].mxu0 }
 0xf24   :  { %v4588_v23 = vpop.f32.mrb[31].mxu0 }
 0xf25   :  { %v4589_v37 = vadd.f32 %v4588_v23, %v4587_v39 }
 0xf27   :  { %v3923_v17 = vmul.f32 0.00390625, %v4589_v37 }
 0xf29   :  { %4657 = vmatmul.mubr.msk.f32.vlgmr.msra.gmra.mrb[38].mxu1 %vm384_vm1, %v3923_v17 }
 0xf2a   :  { %5602 = vmatpush3.bf16.msra.mxu1 %v5601_v21  ;;  %4691 = vmatprep.mubr.msk.f32.mxu1 %vm7041_vm8, %v7039_v0 }
 0xf2b   :  { %5603 = vmatprep.subr.bf16.mxu1 %v7040_v7 }
 0xf2e   :  { %5605 = vmatpush3.bf16.msra.mxu1 %v5604_v6 }
 0xf2f   :  { %5606 = vmatprep.subr.bf16.mxu1 %v7040_v7 }
 0xf32   :  { %5608 = vmatpush3.bf16.msra.mxu1 %v5607_v12 }
 0xf33   :  { %5609 = vmatprep.subr.bf16.mxu1 %v7040_v7 }
 0xf36   :  { %5611 = vmatpush3.bf16.msra.mxu1 %v5610_v22 }
 0xf37   :  { %5612 = vmatprep.subr.bf16.mxu1 %v7040_v7 }
 0xf3a   :  { %5614 = vmatpush3.bf16.msra.mxu1 %v5613_v29 }
 0xf3b   :  { %5615 = vmatprep.subr.bf16.mxu1 %v7040_v7 }
 0xf3e   :  { %5617 = vmatpush3.bf16.msra.mxu1 %v5616_v52 }
 0xf3f   :  { %5618 = vmatprep.subr.bf16.mxu1 %v7040_v7 }
 0xf42   :  { %5620 = vmatpush3.bf16.msra.mxu1 %v5619_v59 }
 0xf43   :  { %5621 = vmatprep.subr.bf16.mxu1 %v7040_v7 }
 0xf46   :  { %5623 = vmatpush3.bf16.msra.mxu1 %v5622_v3 }
 0xffc   :  { %v4004_v11 = vpop.f32.mrb[38].mxu1 }
 0xffd   :  { %v4005_v9 = vadd.f32 %v4366_v49, %v4004_v11  ;;  %v4658_v55 = vpop.f32.mrb[39].mxu1 }
 0xfff   :  { %v4008_v35 = vmax.f32 %v4005_v9, 0.0 }
0x1001   :  { %4692 = vmatmul.mubr.f32.vlgmr.msra.gmra.mrb[40].mxu1 %v4008_v35 }
0x10d4   :  { %v4100_v18 = vpop.f32.mrb[40].mxu1 }
0x10d5   :  { %v4101_v19 = vadd.f32 %v4384_v56, %v4100_v18  ;;  %v4693_v7 = vpop.f32.mrb[41].mxu1 }
0x10d7   :  { %v4385_v47 = vmul.f32 -1.442695, %v4101_v19 }
0x10d9   :  { %6744 = vpow2.f32 %v4385_v47 }
0x10e3   :  { %v6745_v45 = vpop.eup %6744 }
0x10e4   :  { %v4107_v5 = vadd.f32 1.0, %v6745_v45 }
0x10e6   :  { %6746 = vrcp.f32 %v4107_v5 }
0x10f0   :  { %v6747_v46 = vpop.eup %6746 }
0x10f1   :  { %4386 = vmatmul.mubr.msk.f32.vlgmr.msra.gmra.mrb[32].mxu0 %vm384_vm1, %v6747_v46 }
0x10f2   :  { %4254 = vmatprep.mubr.f32.mxu0 %v7039_v0 }
0x11c4   :  { %v4179_v39 = vpop.f32.mrb[32].mxu0 }
0x11c5   :  { %v4181_v44 = vpop.f32.mrb[33].mxu0 }
0x11c6   :  { %4387 = vmatprep.subr.msk.mxu0 %vm2420_vm9, %v4181_v44 }
0x11c7   :  { %4388 = vmatpush1.msk.msra.mxu0 %vm2420_vm9, %v4179_v39 }
0x11c8   :  { %4389 = vmatmul.mubr.msk.f32.vlgmr.msra.gmra.mrb[34].mxu0 %vm2407_vm10, %v4475_v20 }
0x11c9   :  { %4260 = vmatprep.mubr.f32.mxu0 %v7039_v0 }
0x11cc   :  { %4390 = vmatmul.mubr.msk.f32.gmra.mrb[36].mxu0 %vm2407_vm10, %v4476_v31 }
0x11cd   :  { %4266 = vmatprep.mubr.f32.mxu0 %v7039_v0 }
0x11d0   :  { %4391 = vmatmul.mubr.msk.f32.gmra.mrb[38].mxu0 %vm2407_vm10, %v4479_v51 }
0x11d1   :  { %4272 = vmatprep.mubr.f32.mxu0 %v7039_v0 }
0x11d4   :  { %4392 = vmatmul.mubr.msk.f32.gmra.mrb[40].mxu0 %vm2407_vm10, %v4480_v54 }
0x129b   :  { %v4256_v15 = vpop.f32.mrb[34].mxu0 }
0x129c   :  { %v4279_v20 = vmul.f32 %v7938_v63, %v4256_v15  ;;  %v4258_v23 = vpop.f32.mrb[35].mxu0 }
0x129d   :  { %v4280_v14 = vmul.f32 %v7934_v62, %v4258_v23 }
0x129e   :  { %v4287_v31 = vadd.f32 %v4279_v20, %v7707_v38 }
0x129f   :  { %v4288_v37 = vadd.f32 %v4280_v14, %v7710_v32  ;;  %v4262_v21 = vpop.f32.mrb[36].mxu0 }
0x12a0   :  { %v4295_v17 = vmax.f32 %v4287_v31, 0.0  ;;  %v4281_v51 = vmul.f32 %v7932_v60, %v4262_v21  ;;  %v4264_v36 = vpop.f32.mrb[37].mxu0 }
0x12a1   :  { %v4296_v0 = vmax.f32 %v4288_v37, 0.0  ;;  %v4282_v40 = vmul.f32 %v7936_v33, %v4264_v36 }
0x12a2   :  { %4303 = vst [vmem:[#allocation19] sm:$0xff] %v4295_v17  ;;  %v4289_v54 = vadd.f32 %v4281_v51, %v7727_v50 }
0x12a3   :  { %4304 = vst [vmem:[#allocation19 + $0x8] sm:$0xff] %v4296_v0  ;;  %v4290_v63 = vadd.f32 %v4282_v40, %v7717_v4  ;;  %v4268_v8 = vpop.f32.mrb[38].mxu0 }
0x12a4   :  { %v4297_v62 = vmax.f32 %v4289_v54, 0.0  ;;  %v4283_v38 = vmul.f32 %v7950_v13, %v4268_v8  ;;  %v4270_v6 = vpop.f32.mrb[39].mxu0 }
0x12a5   :  { %v4298_v32 = vmax.f32 %v4290_v63, 0.0  ;;  %v4284_v41 = vmul.f32 %v7946_v27, %v4270_v6 }
0x12a6   :  { %4305 = vst [vmem:[#allocation19 + $0x10] sm:$0xff] %v4297_v62  ;;  %v4291_v60 = vadd.f32 %v4283_v38, %v7729_v34 }
0x12a7   :  { %4306 = vst [vmem:[#allocation19 + $0x18] sm:$0xff] %v4298_v32  ;;  %v4292_v33 = vadd.f32 %v4284_v41, %v7719_v25  ;;  %v4274_v58 = vpop.f32.mrb[40].mxu0 }
0x12a8   :  { %v4299_v12 = vmax.f32 %v4291_v60, 0.0  ;;  %v4285_v50 = vmul.f32 %v7944_v2, %v4274_v58  ;;  %v4276_v10 = vpop.f32.mrb[41].mxu0 }
0x12a9   :  { %v4300_v4 = vmax.f32 %v4292_v33, 0.0  ;;  %v4286_v16 = vmul.f32 %v7948_v48, %v4276_v10 }
0x12aa   :  { %4307 = vst [vmem:[#allocation19 + $0x20] sm:$0xff] %v4299_v12  ;;  %v4293_v13 = vadd.f32 %v4285_v50, %v7715_v30 }
0x12ab   :  { %4308 = vst [vmem:[#allocation19 + $0x28] sm:$0xff] %v4300_v4  ;;  %v4294_v27 = vadd.f32 %v4286_v16, %v7721_v26 }
0x12ac   :  { %v4301_v34 = vmax.f32 %v4293_v13, 0.0 }
0x12ad   :  { %v4302_v22 = vmax.f32 %v4294_v27, 0.0 }
0x12ae   :  { %4309 = vst [vmem:[#allocation19 + $0x30] sm:$0xff] %v4301_v34 }
0x12af   :  { %4310 = vst [vmem:[#allocation19 + $0x38] sm:$0xff] %v4302_v22 }
0x12b0   :  { %6997 = shalt.err (!%p6994_p0)
}
0x12b1   :  { %s6998_s4 = scalar_lea.hbm %s8086_s14, 1024 }
0x12b2   :  { %p6999_p1 = scmp.ne.s32.totalorder %s8086_s14, %s6998_s4  ;;  %p7002_p2 = scmp.lt.u32.totalorder %s6998_s4, %s8086_s14 }
0x12b4   :  { %p7004_p3 = pnand %p7002_p2, %p6999_p1 }
0x12b6   :  { %7007 = shalt.err (!%p7004_p3)
}
0x12b7   :  { %4322 = dma.vmem_to_hbm [thread:$0]  %s4317_s7, 1024, %s8086_s14, [#allocation4], %s7023_s23, %s7023_s23, %s7024_s24  }
0x12b8   :  { %7020 = dma.done.wait [#allocation4], 1024  }
0x12b9   :  { %7021 = vsyncadd [#allocation4], 4294966272 }
0x12ba   :  { %4326 = vsyncpa [#allocation3], 1 }
0x12bb   :  { %4327 = vsyncpa [#allocation6], 1 }
0x12bc   :  { %4328 = vsyncpa [#allocation9], 1 }
0x12bd   :  { %4329 = vsyncpa [#allocation12], 1 }
0x12be   :  { %4330 = vsyncpa [#allocation15], 1 }
0x12bf   :  { %4331 = vsyncpa [#allocation18], 1 }
0x12c0   :  { %4332 = vsyncpa [#allocation4], 1 }

// kernel: tpu_custom_call.1
= control target key start
LH: loop header
LB: loop body
LE: loop exit
PB: predicated region body
PF: predicated region fallthrough
CT: control target
= control target key end

     0   :  { %19 = vsyncpa [#allocation3], 0  ;;  %s8072_s0 = inlined_call_operand.hbm [shape: f32[16,32], index: 0, kind: input, shape index: {}]   ;;  %s8073_s1 = inlined_call_operand.vmem [shape: bf16[2,32,16], index: 1, kind: input, shape index: {}]   ;;  %s8074_s2 = inlined_call_operand.hbm [shape: bf16[32,512], index: 2, kind: input, shape index: {}]   ;;  %s8075_s3 = inlined_call_operand.hbm [shape: f32[1,256], index: 3, kind: input, shape index: {}]   ;;  %s8076_s4 = inlined_call_operand.hbm [shape: bf16[2,2,768,256], index: 4, kind: input, shape index: {}]   ;;  %s8077_s5 = inlined_call_operand.hbm [shape: f32[2,2,1,256], index: 5, kind: input, shape index: {}]   ;;  %s8078_s6 = inlined_call_operand.hbm [shape: f32[2,16,128], index: 6, kind: input, shape index: {}]   ;;  %s8079_s7 = inlined_call_operand.hbm [shape: f32[2,1,128], index: 7, kind: input, shape index: {}]   ;;  %s8080_s8 = inlined_call_operand.vmem [shape: f32[2,128,16], index: 8, kind: input, shape index: {}]   ;;  %s8081_s9 = inlined_call_operand.hbm [shape: f32[2,1,16], index: 9, kind: input, shape index: {}]   ;;  %s8082_s10 = inlined_call_operand.vmem [shape: bf16[256,16], index: 10, kind: input, shape index: {}]   ;;  %s8083_s11 = inlined_call_operand.hbm [shape: bf16[16,256], index: 11, kind: input, shape index: {}]   ;;  %s8084_s12 = inlined_call_operand.hbm [shape: bf16[2,32], index: 12, kind: input, shape index: {}]   ;;  %s8085_s13 = inlined_call_operand.vmem [shape: bf16[32,2], index: 13, kind: input, shape index: {}]   ;;  %s8086_s14 = inlined_call_operand.hbm [shape: f32[32,256], index: 14, kind: output, shape index: {}]  }
   0x1   :  { %20 = vsyncpa [#allocation6], 0 }
   0x2   :  { %21 = vsyncpa [#allocation9], 0 }
   0x3   :  { %22 = vsyncpa [#allocation12], 0 }
   0x4   :  { %23 = vsyncpa [#allocation15], 0 }
   0x5   :  { %24 = vsyncpa [#allocation18], 0 }
   0x6   :  { %25 = vsyncpa [#allocation4], 0  ;;  %s7022_s29 = smov [#allocation5]   ;;  %s6766_s17 = scalar_lea.hbm %s8074_s2, 1024 }
   0x7   :  { %s45_s30 = sshll.u32 %s7022_s29, 4  ;;  %p6767_p0 = scmp.ne.s32.totalorder %s8074_s2, %s6766_s17  ;;  %s46_s30 = int_to_ptr.vmem [resolvable:$true] %s45_s30 }
   0x8   :  { %p6770_p1 = scmp.lt.u32.totalorder %s6766_s17, %s8074_s2 }
   0xa   :  { %p6772_p2 = pnand %p6770_p1, %p6767_p0 }
   0xc   :  { %6775 = shalt.err (!%p6772_p2)
}
   0xd   :  { %s6776_s22 = scalar_lea.vmem %s46_s30, 1024  ;;  %p6781_p4 = scmp.lt.s32.totalorder %s46_s30, %s46_s30 }
   0xe   :  { %p6777_p3 = scmp.ne.s32.totalorder %s46_s30, %s6776_s22  ;;  %p6782_p5 = scmp.lt.s32.totalorder %s6776_s22, %s6776_s22 }
  0x10   :  { %p6783_p6 = por %p6782_p5, %p6781_p4 }
  0x12   :  { %p6784_p7 = pnand %p6783_p6, %p6777_p3 }
  0x14   :  { %6787 = shalt.err (!%p6784_p7)
}
  0x15   :  { %s7023_s23 = smov 256   ;;  %s7024_s24 = smov 16  }
  0x16   :  { %51 = dma.hbm_to_vmem [thread:$0]  %s8074_s2, 1024, %s46_s30, [#allocation6], %s7023_s23, %s7023_s23, %s7024_s24  }
  0x17   :  { %s7025_s27 = smov [#allocation8]   ;;  %s7026_s29 = smov [#allocation11]  }
  0x18   :  { %s67_s28 = sshll.u32 %s7025_s27, 4  ;;  %s91_s15 = sshll.u32 %s7026_s29, 4  ;;  %s68_s28 = int_to_ptr.vmem [resolvable:$true] %s67_s28  ;;  %s92_s15 = int_to_ptr.vmem [resolvable:$true] %s91_s15 }
  0x19   :  { %s6788_s18 = scalar_lea.hbm %s8076_s4, 49152 }
  0x1a   :  { %p6789_p8 = scmp.ne.s32.totalorder %s8076_s4, %s6788_s18  ;;  %p6792_p9 = scmp.lt.u32.totalorder %s6788_s18, %s8076_s4 }
  0x1c   :  { %p6794_p10 = pnand %p6792_p9, %p6789_p8 }
  0x1e   :  { %6797 = shalt.err (!%p6794_p10)
}
  0x1f   :  { %s6798_s2 = scalar_lea.vmem %s68_s28, 49152  ;;  %p6803_p12 = scmp.lt.s32.totalorder %s68_s28, %s68_s28 }
  0x20   :  { %p6799_p11 = scmp.ne.s32.totalorder %s68_s28, %s6798_s2  ;;  %p6804_p13 = scmp.lt.s32.totalorder %s6798_s2, %s6798_s2 }
  0x22   :  { %p6805_p0 = por %p6804_p13, %p6803_p12 }
  0x24   :  { %p6806_p1 = pnand %p6805_p0, %p6799_p11 }
  0x26   :  { %6809 = shalt.err (!%p6806_p1)
}
  0x27   :  { %s7027_s30 = smov 128   ;;  %s7028_s25 = smov 8  }
  0x28   :  { %73 = dma.hbm_to_vmem [thread:$0]  %s8076_s4, 49152, %s68_s28, [#allocation9], %s7027_s30, %s7027_s30, %s7028_s25  }
  0x29   :  { %s6810_s17 = scalar_lea.hbm %s8078_s6, 512 }
  0x2a   :  { %p6811_p2 = scmp.ne.s32.totalorder %s8078_s6, %s6810_s17  ;;  %p6814_p3 = scmp.lt.u32.totalorder %s6810_s17, %s8078_s6 }
  0x2c   :  { %p6816_p4 = pnand %p6814_p3, %p6811_p2 }
  0x2e   :  { %6819 = shalt.err (!%p6816_p4)
}
  0x2f   :  { %s6820_s22 = scalar_lea.vmem %s92_s15, 512  ;;  %p6825_p6 = scmp.lt.s32.totalorder %s92_s15, %s92_s15 }
  0x30   :  { %p6821_p5 = scmp.ne.s32.totalorder %s92_s15, %s6820_s22  ;;  %p6826_p7 = scmp.lt.s32.totalorder %s6820_s22, %s6820_s22 }
  0x32   :  { %p6827_p8 = por %p6826_p7, %p6825_p6 }
  0x34   :  { %p6828_p9 = pnand %p6827_p8, %p6821_p5 }
  0x36   :  { %6831 = shalt.err (!%p6828_p9)
}
  0x37   :  { %97 = dma.hbm_to_vmem [thread:$0]  %s8078_s6, 512, %s92_s15, [#allocation12], %s7027_s30, %s7027_s30, %s7028_s25  }
  0x38   :  { %s7029_s2 = smov [#allocation14]   ;;  %s7030_s27 = smov [#allocation2]  }
  0x39   :  { %s117_s26 = sshll.u32 %s7029_s2, 4  ;;  %s31_s29 = sshll.u32 %s7030_s27, 4  ;;  %s118_s26 = int_to_ptr.vmem [resolvable:$true] %s117_s26  ;;  %s7163_s29 = int_to_ptr.vmem [resolvable:$true] %s31_s29 }
  0x3a   :  { %s6832_s18 = scalar_lea.hbm %s8081_s9, 32 }
  0x3b   :  { %p6833_p10 = scmp.ne.s32.totalorder %s8081_s9, %s6832_s18  ;;  %p6836_p11 = scmp.lt.u32.totalorder %s6832_s18, %s8081_s9 }
  0x3d   :  { %p6838_p12 = pnand %p6836_p11, %p6833_p10 }
  0x3f   :  { %6841 = shalt.err (!%p6838_p12)
}
  0x40   :  { %s6842_s6 = scalar_lea.vmem %s118_s26, 32  ;;  %p6847_p0 = scmp.lt.s32.totalorder %s118_s26, %s118_s26 }
  0x41   :  { %p6843_p13 = scmp.ne.s32.totalorder %s118_s26, %s6842_s6  ;;  %p6848_p1 = scmp.lt.s32.totalorder %s6842_s6, %s6842_s6 }
  0x43   :  { %p6849_p2 = por %p6848_p1, %p6847_p0 }
  0x45   :  { %p6850_p3 = pnand %p6849_p2, %p6843_p13 }
  0x47   :  { %6853 = shalt.err (!%p6850_p3)
}
  0x48   :  { %s7031_s15 = smov 1   ;;  %s6854_s16 = scalar_lea.hbm %s8072_s0, 256 }
  0x49   :  { %123 = dma.hbm_to_vmem [thread:$0]  %s8081_s9, 32, %s118_s26, [#allocation15], %s7024_s24, %s7024_s24, %s7031_s15  }
  0x4a   :  { %p6855_p4 = scmp.ne.s32.totalorder %s8072_s0, %s6854_s16  ;;  %p6858_p5 = scmp.lt.u32.totalorder %s6854_s16, %s8072_s0 }
  0x4c   :  { %p6860_p6 = pnand %p6858_p5, %p6855_p4 }
  0x4e   :  { %6863 = shalt.err (!%p6860_p6)
}
  0x4f   :  { %s6864_s21 = scalar_lea.vmem %s7163_s29, 256  ;;  %p6869_p8 = scmp.lt.s32.totalorder %s7163_s29, %s7163_s29 }
  0x50   :  { %p6865_p7 = scmp.ne.s32.totalorder %s7163_s29, %s6864_s21  ;;  %p6870_p9 = scmp.lt.s32.totalorder %s6864_s21, %s6864_s21 }
  0x52   :  { %p6871_p10 = por %p6870_p9, %p6869_p8 }
  0x54   :  { %p6872_p11 = pnand %p6871_p10, %p6865_p7 }
  0x56   :  { %6875 = shalt.err (!%p6872_p11)
}
  0x57   :  { %37 = dma.hbm_to_vmem [thread:$0]  %s8072_s0, 256, %s7163_s29, [#allocation3], %s7027_s30, %s7027_s30, %s7028_s25  }
  0x58   :  { %s7032_s22 = smov [#allocation7]   ;;  %s7033_s4 = smov [#allocation10]  }
  0x59   :  { %s58_s6 = sshll.u32 %s7032_s22, 4  ;;  %s79_s28 = sshll.u32 %s7033_s4, 4  ;;  %s59_s6 = int_to_ptr.vmem [resolvable:$true] %s58_s6  ;;  %s7200_s28 = int_to_ptr.vmem [resolvable:$true] %s79_s28 }
  0x5a   :  { %s6876_s16 = scalar_lea.hbm %s8075_s3, 32 }
  0x5b   :  { %p6877_p12 = scmp.ne.s32.totalorder %s8075_s3, %s6876_s16  ;;  %p6880_p13 = scmp.lt.u32.totalorder %s6876_s16, %s8075_s3 }
  0x5d   :  { %p6882_p0 = pnand %p6880_p13, %p6877_p12 }
  0x5f   :  { %6885 = shalt.err (!%p6882_p0)
}
  0x60   :  { %s6886_s0 = scalar_lea.vmem %s59_s6, 32  ;;  %p6891_p2 = scmp.lt.s32.totalorder %s59_s6, %s59_s6 }
  0x61   :  { %p6887_p1 = scmp.ne.s32.totalorder %s59_s6, %s6886_s0  ;;  %p6892_p3 = scmp.lt.s32.totalorder %s6886_s0, %s6886_s0 }
  0x63   :  { %p6893_p4 = por %p6892_p3, %p6891_p2 }
  0x65   :  { %p6894_p5 = pnand %p6893_p4, %p6887_p1 }
  0x67   :  { %6897 = shalt.err (!%p6894_p5)
}
  0x68   :  { %61 = dma.hbm_to_vmem [thread:$0]  %s8075_s3, 32, %s59_s6, [#allocation6]  }
  0x69   :  { %s6898_s22 = scalar_lea.hbm %s8077_s5, 128 }
  0x6a   :  { %p6899_p6 = scmp.ne.s32.totalorder %s8077_s5, %s6898_s22  ;;  %p6902_p7 = scmp.lt.u32.totalorder %s6898_s22, %s8077_s5 }
  0x6c   :  { %p6904_p8 = pnand %p6902_p7, %p6899_p6 }
  0x6e   :  { %6907 = shalt.err (!%p6904_p8)
}
  0x6f   :  { %s6908_s17 = scalar_lea.vmem %s7200_s28, 128  ;;  %p6913_p10 = scmp.lt.s32.totalorder %s7200_s28, %s7200_s28 }
  0x70   :  { %p6909_p9 = scmp.ne.s32.totalorder %s7200_s28, %s6908_s17  ;;  %p6914_p11 = scmp.lt.s32.totalorder %s6908_s17, %s6908_s17 }
  0x72   :  { %p6915_p12 = por %p6914_p11, %p6913_p10 }
  0x74   :  { %p6916_p13 = pnand %p6915_p12, %p6909_p9 }
  0x76   :  { %6919 = shalt.err (!%p6916_p13)
}
  0x77   :  { %s7034_s3 = smov 32   ;;  %s7035_s6 = smov 2  }
  0x78   :  { %85 = dma.hbm_to_vmem [thread:$0]  %s8077_s5, 128, %s7200_s28, [#allocation9], %s7034_s3, %s7034_s3, %s7035_s6  }
  0x79   :  { %s7036_s20 = smov [#allocation13]   ;;  %s7037_s29 = smov [#allocation16]  }
  0x7a   :  { %s103_s0 = sshll.u32 %s7036_s20, 4  ;;  %s131_s21 = sshll.u32 %s7037_s29, 4  ;;  %s104_s0 = int_to_ptr.vmem [resolvable:$true] %s103_s0  ;;  %s7231_s21 = int_to_ptr.vmem [resolvable:$true] %s131_s21 }
  0x7b   :  { %s6920_s22 = scalar_lea.hbm %s8079_s7, 32 }
  0x7c   :  { %p6921_p0 = scmp.ne.s32.totalorder %s8079_s7, %s6920_s22  ;;  %p6924_p1 = scmp.lt.u32.totalorder %s6920_s22, %s8079_s7 }
  0x7e   :  { %p6926_p2 = pnand %p6924_p1, %p6921_p0 }
  0x80   :  { %6929 = shalt.err (!%p6926_p2)
}
  0x81   :  { %s6930_s5 = scalar_lea.vmem %s104_s0, 32  ;;  %p6935_p4 = scmp.lt.s32.totalorder %s104_s0, %s104_s0 }
  0x82   :  { %p6931_p3 = scmp.ne.s32.totalorder %s104_s0, %s6930_s5  ;;  %p6936_p5 = scmp.lt.s32.totalorder %s6930_s5, %s6930_s5 }
  0x84   :  { %p6937_p6 = por %p6936_p5, %p6935_p4 }
  0x86   :  { %p6938_p7 = pnand %p6937_p6, %p6931_p3 }
  0x88   :  { %6941 = shalt.err (!%p6938_p7)
}
  0x89   :  { %109 = dma.hbm_to_vmem [thread:$0]  %s8079_s7, 32, %s104_s0, [#allocation12], %s7024_s24, %s7024_s24, %s7031_s15  }
  0x8a   :  { %s6942_s18 = scalar_lea.hbm %s8083_s11, 256 }
  0x8b   :  { %p6943_p8 = scmp.ne.s32.totalorder %s8083_s11, %s6942_s18  ;;  %p6946_p9 = scmp.lt.u32.totalorder %s6942_s18, %s8083_s11 }
  0x8d   :  { %p6948_p10 = pnand %p6946_p9, %p6943_p8 }
  0x8f   :  { %6951 = shalt.err (!%p6948_p10)
}
  0x90   :  { %s6952_s26 = scalar_lea.vmem %s7231_s21, 256  ;;  %p6957_p12 = scmp.lt.s32.totalorder %s7231_s21, %s7231_s21 }
  0x91   :  { %p6953_p11 = scmp.ne.s32.totalorder %s7231_s21, %s6952_s26  ;;  %p6958_p13 = scmp.lt.s32.totalorder %s6952_s26, %s6952_s26 }
  0x93   :  { %p6959_p0 = por %p6958_p13, %p6957_p12 }
  0x95   :  { %p6960_p1 = pnand %p6959_p0, %p6953_p11 }
  0x97   :  { %6963 = shalt.err (!%p6960_p1)
}
  0x98   :  { %137 = dma.hbm_to_vmem [thread:$0]  %s8083_s11, 256, %s7231_s21, [#allocation15], %s7027_s30, %s7027_s30, %s7028_s25  }
  0x99   :  { %s7038_s0 = smov [#allocation17]   ;;  %s6964_s27 = scalar_lea.hbm %s8084_s12, 16 }
  0x9a   :  { %s144_s22 = sshll.u32 %s7038_s0, 4  ;;  %p6965_p2 = scmp.ne.s32.totalorder %s8084_s12, %s6964_s27  ;;  %s145_s22 = int_to_ptr.vmem [resolvable:$true] %s144_s22 }
  0x9b   :  { %p6968_p3 = scmp.lt.u32.totalorder %s6964_s27, %s8084_s12 }
  0x9d   :  { %p6970_p4 = pnand %p6968_p3, %p6965_p2 }
  0x9f   :  { %6973 = shalt.err (!%p6970_p4)
}
  0xa0   :  { %s6974_s3 = scalar_lea.vmem %s145_s22, 16  ;;  %s6978_s11 = scalar_lea.vmem %s145_s22, 32 }
  0xa1   :  { %p6975_p5 = scmp.ne.s32.totalorder %s145_s22, %s6974_s3  ;;  %p6979_p6 = scmp.lt.s32.totalorder %s145_s22, %s145_s22 }
  0xa2   :  { %p6980_p7 = scmp.lt.s32.totalorder %s6978_s11, %s6974_s3 }
  0xa4   :  { %p6981_p8 = por %p6980_p7, %p6979_p6 }
  0xa6   :  { %p6982_p9 = pnand %p6981_p8, %p6975_p5 }
  0xa8   :  { %6985 = shalt.err (!%p6982_p9)
}
  0xa9   :  { %147 = dma.hbm_to_vmem [thread:$0]  %s8084_s12, 16, %s145_s22, [#allocation18]  }
  0xaa   :  { %7008 = dma.done.wait [#allocation3], 256  }
  0xab   :  { %7009 = vsyncadd [#allocation3], 4294967040 }
  0xac   :  { %7010 = dma.done.wait [#allocation6], 1056  }
  0xad   :  { %7011 = vsyncadd [#allocation6], 4294966240 }
  0xae   :  { %7012 = dma.done.wait [#allocation9], 49280  }
  0xaf   :  { %7013 = vsyncadd [#allocation9], 4294918016 }
  0xb0   :  { %7014 = dma.done.wait [#allocation12], 544  }
  0xb1   :  { %7015 = vsyncadd [#allocation12], 4294966752 }
  0xb2   :  { %7016 = dma.done.wait [#allocation15], 288  }
  0xb3   :  { %7017 = vsyncadd [#allocation15], 4294967008 }
  0xb4   :  { %7018 = dma.done.wait [#allocation18], 16  }
  0xb5   :  { %7019 = vsyncadd [#allocation18], 4294967280  ;;  %v7039_v0 = vmov 0.0   ;;  %v6149_v1 = vld [vmem:[#allocation5 + $0xc] ss:$16 sps:$4 sm:$0xff]   ;;  %v180_v9 = vld [vmem:[#allocation2] sm:$0xff] }
  0xb6   :  { %354 = vmatprep.mubr.f32.mxu1 %v7039_v0  ;;  %277 = vmatprep.mubr.f32.mxu0 %v7039_v0  ;;  %v6151_v2 = vld [vmem:[#allocation5 + $0x8] ss:$16 sps:$4 sm:$0xff]   ;;  %v6152_v3 = vld [vmem:[#allocation5 + $0x4] ss:$16 sps:$4 sm:$0xff]   ;;  %v6154_v4 = vld [vmem:[#allocation5] ss:$16 sps:$4 sm:$0xff]  }
  0xb7   :  { %4703 = vmatprep.subr.bf16.mxu1 %v6149_v1  ;;  %v6155_v5 = vld [vmem:[#allocation5 + $0x2c] ss:$16 sps:$4 sm:$0xff]   ;;  %v6157_v6 = vld [vmem:[#allocation5 + $0x28] ss:$16 sps:$4 sm:$0xff]   ;;  %4695 = vmatprep.subr.bf16.mxu0 %v6152_v3  ;;  %v6158_v7 = vld [vmem:[#allocation5 + $0x24] ss:$16 sps:$4 sm:$0xff]  }
  0xb8   :  { %4705 = vmatpush1.bf16.msra.mxu1 %v6151_v2  ;;  %4697 = vmatpush1.bf16.msra.mxu0 %v6154_v4  ;;  %v6160_v8 = vld [vmem:[#allocation5 + $0x20] ss:$16 sps:$4 sm:$0xff]   ;;  %vm206_vm0 = vcmask 261120   ;;  %v181_v10 = vld [vmem:[#allocation2 + $0x8] sm:$0xff]  ;;  %vm384_vm1 = vcmask 130048   ;;  %v4483_v48 = vld [vmem:[%s8073_s1 + $0x18] sm:$0xff]  }
  0xb9   :  { %4707 = vmatprep.subr.bf16.mxu1 %v6155_v5  ;;  %4699 = vmatprep.subr.bf16.mxu0 %v6158_v7  ;;  %v6161_v11 = vld [vmem:[#allocation8 + $0x4] ss:$8 sps:$4 sm:$0xff]   ;;  %v6163_v12 = vld [vmem:[#allocation8] ss:$8 sps:$4 sm:$0xff]   ;;  %v6164_v13 = vld [vmem:[#allocation8 + $0x14] ss:$8 sps:$4 sm:$0xff]   ;;  %v4407_v49 = vunpack.c.l.bf16 %v4483_v48  ;;  %v4408_v50 = vunpack.c.h.bf16 %v4483_v48  ;;  %v589_v5 = vlaneseq }
  0xba   :  { %v6166_v14 = vld [vmem:[#allocation8 + $0x10] ss:$8 sps:$4 sm:$0xff]   ;;  %v6167_v15 = vld [vmem:[#allocation8 + $0x24] ss:$8 sps:$4 sm:$0xff]   ;;  %v6169_v16 = vld [vmem:[#allocation8 + $0x20] ss:$8 sps:$4 sm:$0xff]  }
  0xbb   :  { %v6170_v17 = vld [vmem:[#allocation8 + $0x34] ss:$8 sps:$4 sm:$0xff]   ;;  %v6172_v18 = vld [vmem:[#allocation8 + $0x30] ss:$8 sps:$4 sm:$0xff]   ;;  %v6173_v19 = vld [vmem:[#allocation8 + $0x44] ss:$8 sps:$4 sm:$0xff]  }
  0xbc   :  { %4709 = vmatpush1.bf16.msra.mxu1 %v6157_v6  ;;  %4701 = vmatpush1.bf16.msra.mxu0 %v6160_v8  ;;  %v6175_v20 = vld [vmem:[#allocation8 + $0x40] ss:$8 sps:$4 sm:$0xff]   ;;  %v6176_v21 = vld [vmem:[#allocation8 + $0x54] ss:$8 sps:$4 sm:$0xff]   ;;  %v6178_v22 = vld [vmem:[#allocation8 + $0x50] ss:$8 sps:$4 sm:$0xff]  }
  0xbd   :  { %4719 = vmatprep.subr.bf16.mxu1 %v6161_v11  ;;  %v6179_v23 = vld [vmem:[#allocation8 + $0x64] ss:$8 sps:$4 sm:$0xff]   ;;  %v6181_v24 = vld [vmem:[#allocation8 + $0x60] ss:$8 sps:$4 sm:$0xff]   ;;  %v6182_v25 = vld [vmem:[#allocation8 + $0x74] ss:$8 sps:$4 sm:$0xff]  }
  0xbe   :  { %v6184_v26 = vld [vmem:[#allocation8 + $0x70] ss:$8 sps:$4 sm:$0xff]   ;;  %v6185_v27 = vld [vmem:[#allocation8 + $0x84] ss:$8 sps:$4 sm:$0xff]   ;;  %v6187_v28 = vld [vmem:[#allocation8 + $0x80] ss:$8 sps:$4 sm:$0xff]  }
  0xbf   :  { %4335 = vmatmul.mubr.msk.f32.vlgmr.msra.gmra.mrb[0].mxu1 %vm206_vm0, %v180_v9  ;;  %4333 = vmatmul.mubr.msk.f32.vlgmr.msra.gmra.mrb[0].mxu0 %vm206_vm0, %v180_v9  ;;  %v6188_v29 = vld [vmem:[#allocation8 + $0x94] ss:$8 sps:$4 sm:$0xff]   ;;  %v6190_v30 = vld [vmem:[#allocation8 + $0x90] ss:$8 sps:$4 sm:$0xff]   ;;  %v6191_v31 = vld [vmem:[#allocation8 + $0xa4] ss:$8 sps:$4 sm:$0xff]  }
  0xc0   :  { %360 = vmatprep.mubr.f32.mxu1 %v7039_v0  ;;  %283 = vmatprep.mubr.f32.mxu0 %v7039_v0  ;;  %v6193_v32 = vld [vmem:[#allocation8 + $0xa0] ss:$8 sps:$4 sm:$0xff]   ;;  %v4394_v51 = vld [vmem:[%s8073_s1] sm:$0xff]   ;;  %v4481_v54 = vld [vmem:[%s8073_s1 + $0x8] sm:$0xff]   ;;  %v7316_v6 = vshrl.u32 %v589_v5, 7  ;;  %vm7041_vm8 = vmmov 0  }
  0xc1   :  { %4721 = vmatpush1.bf16.msra.mxu1 %v6163_v12  ;;  %v4482_v40 = vld [vmem:[%s8073_s1 + $0x10] sm:$0xff]   ;;  %v4395_v52 = vunpack.c.l.bf16 %v4394_v51  ;;  %v4396_v53 = vunpack.c.h.bf16 %v4394_v51  ;;  %v4399_v55 = vunpack.c.l.bf16 %v4481_v54  ;;  %v4400_v56 = vunpack.c.h.bf16 %v4481_v54  ;;  %v6196_v58 = vld [vmem:[#allocation8 + $0xb0] ss:$8 sps:$4 sm:$0xff]  }
  0xc2   :  { %4723 = vmatprep.subr.bf16.mxu1 %v6164_v13  ;;  %v4403_v46 = vunpack.c.l.bf16 %v4482_v40  ;;  %v4404_v47 = vunpack.c.h.bf16 %v4482_v40  ;;  %v6194_v57 = vld [vmem:[#allocation8 + $0xb4] ss:$8 sps:$4 sm:$0xff]   ;;  %v6197_v59 = vld [vmem:[#allocation8 + $0xc4] ss:$8 sps:$4 sm:$0xff]   ;;  %v6199_v60 = vld [vmem:[#allocation8 + $0xc0] ss:$8 sps:$4 sm:$0xff]  }
  0xc3   :  { %4336 = vmatmul.mubr.msk.f32.gmra.mrb[2].mxu1 %vm206_vm0, %v181_v10  ;;  %4334 = vmatmul.mubr.msk.f32.gmra.mrb[2].mxu0 %vm206_vm0, %v181_v10  ;;  %v6200_v61 = vld [vmem:[#allocation8 + $0xd4] ss:$8 sps:$4 sm:$0xff]   ;;  %v6202_v62 = vld [vmem:[#allocation8 + $0xd0] ss:$8 sps:$4 sm:$0xff]   ;;  %v6203_v63 = vld [vmem:[#allocation8 + $0xe4] ss:$8 sps:$4 sm:$0xff]  }
  0xc4   :  { %461 = vmatprep.mubr.f32.mxu0 %v7039_v0  ;;  %v6205_v1 = vld [vmem:[#allocation8 + $0xe0] ss:$8 sps:$4 sm:$0xff]   ;;  %v6206_v2 = vld [vmem:[#allocation8 + $0xf4] ss:$8 sps:$4 sm:$0xff]   ;;  %v6208_v3 = vld [vmem:[#allocation8 + $0xf0] ss:$8 sps:$4 sm:$0xff]  }
  0xc5   :  { %4725 = vmatpush1.bf16.msra.mxu1 %v6166_v14  ;;  %v6209_v4 = vld [vmem:[#allocation8 + $0x104] ss:$8 sps:$4 sm:$0xff]   ;;  %v7319_v9 = vsub.s32 0, %v7316_v6  ;;  %v587_v10 = vld [vmem:[#allocation7] sm:$0x3]  ;;  %v7322_v11 = vsub.s32 1, %v7316_v6 }
  0xc6   :  { %4727 = vmatprep.subr.bf16.mxu1 %v6167_v15  ;;  %vm772_vm3 = vcmp.lt.s32.totalorder %v7316_v6, 1  ;;  %v6217_v54 = vld [vmem:[#allocation8 + $0x120] ss:$8 sps:$4 sm:$0xff]   ;;  %v6226_v5 = vld [vmem:[#allocation8 + $0x150] ss:$8 sps:$4 sm:$0xff]   ;;  %vm797_vm5 = vcmp.lt.s32.totalorder %v7316_v6, 7 }
  0xc7   :  { %v592_v14 = vrot.slane %v587_v10, %v7319_v9  ;;  %v596_v15 = vrot.slane %v587_v10, %v7322_v11  ;;  %v6314_v10 = vld [vmem:[#allocation8 + $0x334] ss:$8 sps:$4 sm:$0xff]   ;;  %vm2420_vm9 = vcmask 1041408   ;;  %vm2407_vm10 = vcmask 15360  }
  0xc9   :  { %4729 = vmatpush1.bf16.msra.mxu1 %v6169_v16 }
  0xca   :  { %4731 = vmatprep.subr.bf16.mxu1 %v6170_v17 }
  0xcd   :  { %4733 = vmatpush1.bf16.msra.mxu1 %v6172_v18  ;;  %v616_v18 = vand.u32 15, %v7316_v6 }
  0xce   :  { %4735 = vmatprep.subr.bf16.mxu1 %v6173_v19 }
  0xcf   :  { %vm660_vm2 = vcmp.ne.s32.totalorder %v616_v18, 0  ;;  %v6319_v18 = vld [vmem:[#allocation8 + $0x340] ss:$8 sps:$4 sm:$0xff]  }
  0xd1   :  { %4737 = vmatpush1.bf16.msra.mxu1 %v6175_v20  ;;  %v610_v20 = vadd.s32 16, %v7316_v6 }
  0xd2   :  { %4739 = vmatprep.subr.bf16.mxu1 %v6176_v21 }
  0xd5   :  { %4741 = vmatpush1.bf16.msra.mxu1 %v6178_v22 }
  0xd6   :  { %4743 = vmatprep.subr.bf16.mxu1 %v6179_v23 }
  0xd9   :  { %4745 = vmatpush1.bf16.msra.mxu1 %v6181_v24 }
  0xda   :  { %4747 = vmatprep.subr.bf16.mxu1 %v6182_v25 }
  0xdd   :  { %4749 = vmatpush1.bf16.msra.mxu1 %v6184_v26 }
  0xde   :  { %4751 = vmatprep.subr.bf16.mxu1 %v6185_v27 }
  0xe1   :  { %4753 = vmatpush1.bf16.msra.mxu1 %v6187_v28 }
  0xe2   :  { %4755 = vmatprep.subr.bf16.mxu1 %v6188_v29 }
  0xe5   :  { %4757 = vmatpush1.bf16.msra.mxu1 %v6190_v30  ;;  %v630_v30 = vand.u32 15, %v610_v20  ;;  %v6320_v20 = vld [vmem:[#allocation8 + $0x354] ss:$8 sps:$4 sm:$0xff]  }
  0xe6   :  { %4759 = vmatprep.subr.bf16.mxu1 %v6191_v31 }
  0xe7   :  { %vm662_vm4 = vcmp.ne.s32.totalorder %v630_v30, 0  ;;  %v6238_v30 = vld [vmem:[#allocation8 + $0x190] ss:$8 sps:$4 sm:$0xff]  }
  0xe9   :  { %4761 = vmatpush1.bf16.msra.mxu1 %v6193_v32 }
  0xea   :  { %4763 = vmatprep.subr.bf16.mxu1 %v6194_v57 }
  0xed   :  { %4765 = vmatpush1.bf16.msra.mxu1 %v6196_v58  ;;  %v6220_v58 = vld [vmem:[#allocation8 + $0x130] ss:$8 sps:$4 sm:$0xff]  }
  0xee   :  { %4767 = vmatprep.subr.bf16.mxu1 %v6197_v59  ;;  %v6221_v59 = vld [vmem:[#allocation8 + $0x144] ss:$8 sps:$4 sm:$0xff]  }
  0xf1   :  { %4769 = vmatpush1.bf16.msra.mxu1 %v6199_v60 }
  0xf2   :  { %4771 = vmatprep.subr.bf16.mxu1 %v6200_v61  ;;  %v6305_v61 = vld [vmem:[#allocation8 + $0x304] ss:$8 sps:$4 sm:$0xff]  }
  0xf5   :  { %4773 = vmatpush1.bf16.msra.mxu1 %v6202_v62  ;;  %v6307_v62 = vld [vmem:[#allocation8 + $0x300] ss:$8 sps:$4 sm:$0xff]  }
  0xf6   :  { %4775 = vmatprep.subr.bf16.mxu1 %v6203_v63  ;;  %v6308_v63 = vld [vmem:[#allocation8 + $0x314] ss:$8 sps:$4 sm:$0xff]  }
  0xf9   :  { %4777 = vmatpush1.bf16.msra.mxu1 %v6205_v1  ;;  %v6223_v1 = vld [vmem:[#allocation8 + $0x140] ss:$8 sps:$4 sm:$0xff]  }
  0xfa   :  { %4779 = vmatprep.subr.bf16.mxu1 %v6206_v2  ;;  %v6224_v2 = vld [vmem:[#allocation8 + $0x154] ss:$8 sps:$4 sm:$0xff]  }
  0xfd   :  { %4781 = vmatpush1.bf16.msra.mxu1 %v6208_v3  ;;  %v6310_v3 = vld [vmem:[#allocation8 + $0x310] ss:$8 sps:$4 sm:$0xff]  }
  0xfe   :  { %4783 = vmatprep.subr.bf16.mxu1 %v6209_v4  ;;  %v6311_v4 = vld [vmem:[#allocation8 + $0x324] ss:$8 sps:$4 sm:$0xff]  }
 0x192   :  { %v356_v33 = vpop.f32.mrb[0].mxu1  ;;  %v279_v35 = vpop.f32.mrb[0].mxu0 }
 0x193   :  { %v358_v34 = vpop.f32.mrb[1].mxu1  ;;  %v281_v36 = vpop.f32.mrb[1].mxu0 }
 0x196   :  { %v362_v37 = vpop.f32.mrb[2].mxu1  ;;  %v285_v42 = vpop.f32.mrb[2].mxu0 }
 0x197   :  { %v4712_v38 = vpack.c.bf16 %v362_v37, %v356_v33  ;;  %v364_v39 = vpop.f32.mrb[3].mxu1  ;;  %v4716_v43 = vpack.c.bf16 %v285_v42, %v279_v35  ;;  %v287_v44 = vpop.f32.mrb[3].mxu0  ;;  %v7346_v33 = vsel %vm660_vm2, 1.0, %v7039_v0 }
 0x198   :  { %v4710_v41 = vpack.c.bf16 %v364_v39, %v358_v34  ;;  %v4714_v45 = vpack.c.bf16 %v287_v44, %v281_v36 }
 0x19a   :  { %4711 = vmatprep.subr.bf16.mxu0 %v4710_v41  ;;  %v6211_v41 = vld [vmem:[#allocation8 + $0x100] ss:$8 sps:$4 sm:$0xff]  }
 0x19b   :  { %4713 = vmatpush1.bf16.msra.mxu0 %v4712_v38 }
 0x19c   :  { %4715 = vmatprep.subr.bf16.mxu0 %v4714_v45 }
 0x19e   :  { %4341 = vmatmul.mubr.msk.f32.vlgmr.msra.gmra.mrb[4].mxu0 %vm384_vm1, %v4403_v46 }
 0x19f   :  { %4717 = vmatpush1.bf16.msra.mxu0 %v4716_v43  ;;  %467 = vmatprep.mubr.f32.mxu0 %v7039_v0  ;;  %v6212_v43 = vld [vmem:[#allocation8 + $0x114] ss:$8 sps:$4 sm:$0xff]  }
 0x1a0   :  { %4911 = vmatprep.subr.bf16.mxu0 %v6305_v61  ;;  %v6265_v61 = vld [vmem:[#allocation8 + $0x220] ss:$8 sps:$4 sm:$0xff]  }
 0x1a2   :  { %4342 = vmatmul.mubr.msk.f32.gmra.mrb[6].mxu0 %vm384_vm1, %v4404_v47  ;;  %v7365_v47 = vsel %vm662_vm4, 1.0, %v7039_v0 }
 0x1a3   :  { %473 = vmatprep.mubr.f32.mxu0 %v7039_v0 }
 0x1a6   :  { %4343 = vmatmul.mubr.msk.f32.gmra.mrb[8].mxu0 %vm384_vm1, %v4407_v49  ;;  %v6214_v49 = vld [vmem:[#allocation8 + $0x110] ss:$8 sps:$4 sm:$0xff]  }
 0x1a7   :  { %479 = vmatprep.mubr.f32.mxu0 %v7039_v0 }
 0x1aa   :  { %4344 = vmatmul.mubr.msk.f32.gmra.mrb[10].mxu0 %vm384_vm1, %v4408_v50  ;;  %v6215_v50 = vld [vmem:[#allocation8 + $0x124] ss:$8 sps:$4 sm:$0xff]  }
 0x1ab   :  { %562 = vmatprep.mubr.f32.mxu0 %v7039_v0 }
 0x1ae   :  { %4345 = vmatmul.mubr.msk.f32.vlgmr.msra.gmra.mrb[4].mxu0 %vm384_vm1, %v4395_v52 }
 0x1af   :  { %568 = vmatprep.mubr.f32.mxu0 %v7039_v0  ;;  %4913 = vmatpush1.bf16.msra.mxu0 %v6307_v62  ;;  %v6266_v62 = vld [vmem:[#allocation8 + $0x234] ss:$8 sps:$4 sm:$0xff]  }
 0x1b0   :  { %4915 = vmatprep.subr.bf16.mxu0 %v6308_v63 }
 0x1b2   :  { %4346 = vmatmul.mubr.msk.f32.gmra.mrb[6].mxu0 %vm384_vm1, %v4396_v53 }
 0x1b3   :  { %574 = vmatprep.mubr.f32.mxu0 %v7039_v0  ;;  %4917 = vmatpush1.bf16.msra.mxu0 %v6310_v3  ;;  %v6269_v3 = vld [vmem:[#allocation8 + $0x244] ss:$8 sps:$4 sm:$0xff]  }
 0x1b4   :  { %4919 = vmatprep.subr.bf16.mxu0 %v6311_v4 }
 0x1b6   :  { %4347 = vmatmul.mubr.msk.f32.gmra.mrb[8].mxu0 %vm384_vm1, %v4399_v55 }
 0x1b7   :  { %580 = vmatprep.mubr.f32.mxu0 %v7039_v0 }
 0x1ba   :  { %4348 = vmatmul.mubr.msk.f32.gmra.mrb[10].mxu0 %vm384_vm1, %v4400_v56  ;;  %v6218_v56 = vld [vmem:[#allocation8 + $0x134] ss:$8 sps:$4 sm:$0xff]  }
 0x281   :  { %v564_v7 = vpop.f32.mrb[4].mxu0 }
 0x282   :  { %v566_v8 = vpop.f32.mrb[5].mxu0  ;;  %v7327_v19 = vadd.f32 %v592_v14, %v564_v7  ;;  %v6227_v7 = vld [vmem:[#allocation8 + $0x164] ss:$8 sps:$4 sm:$0xff]  }
 0x283   :  { %v7330_v21 = vadd.f32 %v596_v15, %v566_v8  ;;  %v6313_v8 = vld [vmem:[#allocation8 + $0x320] ss:$8 sps:$4 sm:$0xff]  }
 0x284   :  { %v764_v28 = vrot.slane %v7327_v19, 7  ;;  %4921 = vmatpush1.bf16.msra.mxu0 %v6313_v8  ;;  %v6274_v8 = vld [vmem:[#allocation8 + $0x250] ss:$8 sps:$4 sm:$0xff]  }
 0x285   :  { %v570_v12 = vpop.f32.mrb[6].mxu0  ;;  %v765_v31 = vrot.slane %v7330_v21, 7  ;;  %4923 = vmatprep.subr.bf16.mxu0 %v6314_v10  ;;  %v6275_v10 = vld [vmem:[#allocation8 + $0x264] ss:$8 sps:$4 sm:$0xff]  }
 0x286   :  { %v572_v13 = vpop.f32.mrb[7].mxu0  ;;  %v7348_v34 = vadd.f32 %v592_v14, %v570_v12  ;;  %v6229_v12 = vld [vmem:[#allocation8 + $0x160] ss:$8 sps:$4 sm:$0xff]  }
 0x287   :  { %v7334_v25 = vadd.f32 %v596_v15, %v572_v13  ;;  %v6230_v13 = vld [vmem:[#allocation8 + $0x174] ss:$8 sps:$4 sm:$0xff]  }
 0x288   :  { %v766_v45 = vrot.slane %v7348_v34, 7 }
 0x289   :  { %v576_v16 = vpop.f32.mrb[8].mxu0  ;;  %v767_v39 = vrot.slane %v7334_v25, 7  ;;  %v792_v63 = vrot.slane %v7334_v25, 1 }
 0x28a   :  { %v578_v17 = vpop.f32.mrb[9].mxu0  ;;  %v7350_v35 = vadd.f32 %v592_v14, %v576_v16  ;;  %v777_v51 = vsel %vm772_vm3, %v764_v28, %v766_v45  ;;  %v6232_v16 = vld [vmem:[#allocation8 + $0x170] ss:$8 sps:$4 sm:$0xff]  }
 0x28b   :  { %v7336_v26 = vadd.f32 %v596_v15, %v578_v17  ;;  %v778_v46 = vsel %vm772_vm3, %v765_v31, %v767_v39  ;;  %v6233_v17 = vld [vmem:[#allocation8 + $0x184] ss:$8 sps:$4 sm:$0xff]  }
 0x28c   :  { %v768_v44 = vrot.slane %v7350_v35, 7 }
 0x28d   :  { %v582_v22 = vpop.f32.mrb[10].mxu0  ;;  %v769_v37 = vrot.slane %v7336_v26, 7 }
 0x28e   :  { %v7332_v23 = vadd.f32 %v592_v14, %v582_v22  ;;  %v584_v24 = vpop.f32.mrb[11].mxu0  ;;  %v775_v53 = vsel %vm772_vm3, %v766_v45, %v768_v44  ;;  %v6316_v14 = vld [vmem:[#allocation8 + $0x330] ss:$8 sps:$4 sm:$0xff]   ;;  %v6235_v22 = vld [vmem:[#allocation8 + $0x180] ss:$8 sps:$4 sm:$0xff]  }
 0x28f   :  { %v7338_v27 = vadd.f32 %v596_v15, %v584_v24  ;;  %v776_v48 = vsel %vm772_vm3, %v767_v39, %v769_v37  ;;  %v785_v55 = vmul.f32 %v7365_v47, %v775_v53  ;;  %v6317_v15 = vld [vmem:[#allocation8 + $0x344] ss:$8 sps:$4 sm:$0xff]   ;;  %4925 = vmatpush1.bf16.msra.mxu0 %v6316_v14  ;;  %v6236_v24 = vld [vmem:[#allocation8 + $0x194] ss:$8 sps:$4 sm:$0xff]   ;;  %v6328_v39 = vld [vmem:[#allocation8 + $0x370] ss:$8 sps:$4 sm:$0xff]  }
 0x290   :  { %v770_v29 = vrot.slane %v7332_v23, 7  ;;  %v786_v52 = vmul.f32 %v7365_v47, %v776_v48  ;;  %4927 = vmatprep.subr.bf16.mxu0 %v6317_v15  ;;  %v6247_v45 = vld [vmem:[#allocation8 + $0x1c0] ss:$8 sps:$4 sm:$0xff]   ;;  %v6334_v48 = vld [vmem:[#allocation8 + $0x390] ss:$8 sps:$4 sm:$0xff]  }
 0x291   :  { %v771_v32 = vrot.slane %v7338_v27, 7  ;;  %v6253_v53 = vld [vmem:[#allocation8 + $0x1e0] ss:$8 sps:$4 sm:$0xff]   ;;  %v6280_v14 = vld [vmem:[#allocation8 + $0x270] ss:$8 sps:$4 sm:$0xff]  }
 0x292   :  { %v779_v36 = vsel %vm772_vm3, %v770_v29, %v764_v28  ;;  %v773_v60 = vsel %vm772_vm3, %v768_v44, %v770_v29  ;;  %v6322_v28 = vld [vmem:[#allocation8 + $0x350] ss:$8 sps:$4 sm:$0xff]   ;;  %v6323_v29 = vld [vmem:[#allocation8 + $0x364] ss:$8 sps:$4 sm:$0xff]   ;;  %v6332_v44 = vld [vmem:[#allocation8 + $0x394] ss:$8 sps:$4 sm:$0xff]  }
 0x293   :  { %v780_v38 = vsel %vm772_vm3, %v771_v32, %v765_v31  ;;  %v781_v42 = vmul.f32 %v7346_v33, %v779_v36  ;;  %v774_v57 = vsel %vm772_vm3, %v769_v37, %v771_v32  ;;  %4929 = vmatpush1.bf16.msra.mxu0 %v6319_v18  ;;  %v6239_v31 = vld [vmem:[#allocation8 + $0x1a4] ss:$8 sps:$4 sm:$0xff]   ;;  %v6325_v32 = vld [vmem:[#allocation8 + $0x360] ss:$8 sps:$4 sm:$0xff]   ;;  %v6326_v36 = vld [vmem:[#allocation8 + $0x374] ss:$8 sps:$4 sm:$0xff]  }
 0x294   :  { %v782_v40 = vmul.f32 %v7346_v33, %v780_v38  ;;  %4931 = vmatprep.subr.bf16.mxu0 %v6320_v20  ;;  %v6241_v37 = vld [vmem:[#allocation8 + $0x1a0] ss:$8 sps:$4 sm:$0xff]   ;;  %v6242_v38 = vld [vmem:[#allocation8 + $0x1b4] ss:$8 sps:$4 sm:$0xff]   ;;  %v6281_v15 = vld [vmem:[#allocation8 + $0x284] ss:$8 sps:$4 sm:$0xff]  }
 0x295   :  { %v6286_v18 = vld [vmem:[#allocation8 + $0x290] ss:$8 sps:$4 sm:$0xff]   ;;  %v6287_v20 = vld [vmem:[#allocation8 + $0x2a4] ss:$8 sps:$4 sm:$0xff]  }
 0x296   :  { %1178 = vmatprep.mubr.f32.mxu1 %v782_v40  ;;  %v6329_v40 = vld [vmem:[#allocation8 + $0x384] ss:$8 sps:$4 sm:$0xff]  }
 0x297   :  { %1179 = vmatmul.mubr.f32.vlgmr.msra.gmra.mrb[4].mxu1 %v781_v42  ;;  %4933 = vmatpush1.bf16.msra.mxu0 %v6322_v28  ;;  %v6245_v42 = vld [vmem:[#allocation8 + $0x1c4] ss:$8 sps:$4 sm:$0xff]   ;;  %v6292_v28 = vld [vmem:[#allocation8 + $0x2b0] ss:$8 sps:$4 sm:$0xff]  }
 0x298   :  { %4785 = vmatpush1.bf16.msra.mxu1 %v6211_v41  ;;  %1184 = vmatprep.mubr.f32.mxu1 %v778_v46  ;;  %v6244_v41 = vld [vmem:[#allocation8 + $0x1b0] ss:$8 sps:$4 sm:$0xff]   ;;  %v6248_v46 = vld [vmem:[#allocation8 + $0x1d4] ss:$8 sps:$4 sm:$0xff]  }
 0x299   :  { %4787 = vmatprep.subr.bf16.mxu1 %v6212_v43  ;;  %4935 = vmatprep.subr.bf16.mxu0 %v6323_v29  ;;  %v6331_v43 = vld [vmem:[#allocation8 + $0x380] ss:$8 sps:$4 sm:$0xff]   ;;  %v6293_v29 = vld [vmem:[#allocation8 + $0x2c4] ss:$8 sps:$4 sm:$0xff]  }
 0x29b   :  { %1185 = vmatmul.mubr.f32.gmra.mrb[6].mxu1 %v777_v51  ;;  %4937 = vmatpush1.bf16.msra.mxu0 %v6325_v32  ;;  %v6251_v51 = vld [vmem:[#allocation8 + $0x1e4] ss:$8 sps:$4 sm:$0xff]   ;;  %v6298_v32 = vld [vmem:[#allocation8 + $0x2d0] ss:$8 sps:$4 sm:$0xff]  }
 0x29c   :  { %4789 = vmatpush1.bf16.msra.mxu1 %v6214_v49  ;;  %1190 = vmatprep.mubr.f32.mxu1 %v786_v52  ;;  %v6335_v49 = vld [vmem:[#allocation8 + $0x3a4] ss:$8 sps:$4 sm:$0xff]   ;;  %v6337_v52 = vld [vmem:[#allocation8 + $0x3a0] ss:$8 sps:$4 sm:$0xff]  }
 0x29d   :  { %4791 = vmatprep.subr.bf16.mxu1 %v6215_v50  ;;  %4939 = vmatprep.subr.bf16.mxu0 %v6326_v36  ;;  %v6250_v50 = vld [vmem:[#allocation8 + $0x1d0] ss:$8 sps:$4 sm:$0xff]   ;;  %v609_v36 = vadd.s32 8, %v7316_v6 }
 0x29f   :  { %1191 = vmatmul.mubr.f32.gmra.mrb[8].mxu1 %v785_v55  ;;  %4941 = vmatpush1.bf16.msra.mxu0 %v6328_v39  ;;  %v6256_v55 = vld [vmem:[#allocation8 + $0x1f0] ss:$8 sps:$4 sm:$0xff]   ;;  %v623_v39 = vand.u32 15, %v609_v36 }
 0x2a0   :  { %4793 = vmatpush1.bf16.msra.mxu1 %v6217_v54  ;;  %1196 = vmatprep.mubr.f32.mxu1 %v774_v57  ;;  %v6254_v54 = vld [vmem:[#allocation8 + $0x1f4] ss:$8 sps:$4 sm:$0xff]   ;;  %v6259_v57 = vld [vmem:[#allocation8 + $0x200] ss:$8 sps:$4 sm:$0xff]  }
 0x2a1   :  { %4795 = vmatprep.subr.bf16.mxu1 %v6218_v56  ;;  %4943 = vmatprep.subr.bf16.mxu0 %v6329_v40  ;;  %v6257_v56 = vld [vmem:[#allocation8 + $0x204] ss:$8 sps:$4 sm:$0xff]   ;;  %v6302_v40 = vld [vmem:[#allocation8 + $0x2f4] ss:$8 sps:$4 sm:$0xff]   ;;  %vm673_vm6 = vcmp.ne.s32.totalorder %v623_v39, 15 }
 0x2a3   :  { %1197 = vmatmul.mubr.f32.gmra.mrb[10].mxu1 %v773_v60  ;;  %4945 = vmatpush1.bf16.msra.mxu0 %v6331_v43  ;;  %v6263_v60 = vld [vmem:[#allocation8 + $0x224] ss:$8 sps:$4 sm:$0xff]   ;;  %v611_v43 = vadd.s32 24, %v7316_v6 }
 0x2a4   :  { %4797 = vmatpush1.bf16.msra.mxu1 %v6220_v58  ;;  %1267 = vmatprep.mubr.f32.mxu1 %v7330_v21  ;;  %v6260_v58 = vld [vmem:[#allocation8 + $0x214] ss:$8 sps:$4 sm:$0xff]   ;;  %v6755_v6 = vld [vmem:[%s8082_s10 + $0x18] sm:$0xff]  }
 0x2a5   :  { %4799 = vmatprep.subr.bf16.mxu1 %v6221_v59  ;;  %4947 = vmatprep.subr.bf16.mxu0 %v6332_v44  ;;  %v6262_v59 = vld [vmem:[#allocation8 + $0x210] ss:$8 sps:$4 sm:$0xff]   ;;  %v791_v44 = vrot.slane %v7348_v34, 1 }
 0x2a7   :  { %4949 = vmatpush1.bf16.msra.mxu0 %v6334_v48 }
 0x2a8   :  { %4801 = vmatpush1.bf16.msra.mxu1 %v6223_v1  ;;  %4951 = vmatprep.subr.bf16.mxu0 %v6335_v49  ;;  %v6268_v1 = vld [vmem:[#allocation8 + $0x230] ss:$8 sps:$4 sm:$0xff]   ;;  %v789_v49 = vrot.slane %v7327_v19, 1 }
 0x2a9   :  { %4803 = vmatprep.subr.bf16.mxu1 %v6224_v2  ;;  %v790_v2 = vrot.slane %v7330_v21, 1 }
 0x2ab   :  { %4953 = vmatpush1.bf16.msra.mxu0 %v6337_v52  ;;  %v803_v4 = vsel %vm797_vm5, %v790_v2, %v792_v63 }
 0x2ac   :  { %4805 = vmatpush1.bf16.msra.mxu1 %v6226_v5  ;;  %v6271_v5 = vld [vmem:[#allocation8 + $0x240] ss:$8 sps:$4 sm:$0xff]  }
 0x2ad   :  { %4807 = vmatprep.subr.bf16.mxu1 %v6227_v7  ;;  %v6272_v7 = vld [vmem:[#allocation8 + $0x254] ss:$8 sps:$4 sm:$0xff]  }
 0x2b0   :  { %4809 = vmatpush1.bf16.msra.mxu1 %v6229_v12  ;;  %v6277_v12 = vld [vmem:[#allocation8 + $0x260] ss:$8 sps:$4 sm:$0xff]  }
 0x2b1   :  { %4811 = vmatprep.subr.bf16.mxu1 %v6230_v13  ;;  %v6278_v13 = vld [vmem:[#allocation8 + $0x274] ss:$8 sps:$4 sm:$0xff]  }
 0x2b4   :  { %4813 = vmatpush1.bf16.msra.mxu1 %v6232_v16  ;;  %v6283_v16 = vld [vmem:[#allocation8 + $0x280] ss:$8 sps:$4 sm:$0xff]  }
 0x2b5   :  { %4815 = vmatprep.subr.bf16.mxu1 %v6233_v17  ;;  %v6284_v17 = vld [vmem:[#allocation8 + $0x294] ss:$8 sps:$4 sm:$0xff]  }
 0x2b8   :  { %4817 = vmatpush1.bf16.msra.mxu1 %v6235_v22  ;;  %v6289_v22 = vld [vmem:[#allocation8 + $0x2a0] ss:$8 sps:$4 sm:$0xff]  }
 0x2b9   :  { %4819 = vmatprep.subr.bf16.mxu1 %v6236_v24  ;;  %v6290_v24 = vld [vmem:[#allocation8 + $0x2b4] ss:$8 sps:$4 sm:$0xff]  }
 0x2bc   :  { %4821 = vmatpush1.bf16.msra.mxu1 %v6238_v30  ;;  %v6295_v30 = vld [vmem:[#allocation8 + $0x2c0] ss:$8 sps:$4 sm:$0xff]  }
 0x2bd   :  { %4823 = vmatprep.subr.bf16.mxu1 %v6239_v31  ;;  %v6296_v31 = vld [vmem:[#allocation8 + $0x2d4] ss:$8 sps:$4 sm:$0xff]  }
 0x2c0   :  { %4825 = vmatpush1.bf16.msra.mxu1 %v6241_v37  ;;  %v6299_v37 = vld [vmem:[#allocation8 + $0x2e4] ss:$8 sps:$4 sm:$0xff]  }
 0x2c1   :  { %4827 = vmatprep.subr.bf16.mxu1 %v6242_v38  ;;  %v6301_v38 = vld [vmem:[#allocation8 + $0x2e0] ss:$8 sps:$4 sm:$0xff]  }
 0x2c4   :  { %4829 = vmatpush1.bf16.msra.mxu1 %v6244_v41  ;;  %v794_v41 = vrot.slane %v7336_v26, 1 }
 0x2c5   :  { %4831 = vmatprep.subr.bf16.mxu1 %v6245_v42  ;;  %v6304_v42 = vld [vmem:[#allocation8 + $0x2f0] ss:$8 sps:$4 sm:$0xff]  }
 0x2c6   :  { %v801_v48 = vsel %vm797_vm5, %v792_v63, %v794_v41 }
 0x2c8   :  { %4833 = vmatpush1.bf16.msra.mxu1 %v6247_v45  ;;  %v793_v45 = vrot.slane %v7350_v35, 1 }
 0x2c9   :  { %4835 = vmatprep.subr.bf16.mxu1 %v6248_v46  ;;  %v7402_v46 = vsel %vm673_vm6, 1.0, %v7039_v0 }
 0x2ca   :  { %v809_v52 = vmul.f32 %v7402_v46, %v801_v48 }
 0x2cc   :  { %4837 = vmatpush1.bf16.msra.mxu1 %v6250_v50  ;;  %v637_v50 = vand.u32 15, %v611_v43 }
 0x2cd   :  { %4839 = vmatprep.subr.bf16.mxu1 %v6251_v51  ;;  %v802_v51 = vsel %vm797_vm5, %v789_v49, %v791_v44 }
 0x2ce   :  { %vm675_vm7 = vcmp.ne.s32.totalorder %v637_v50, 15 }
 0x2d0   :  { %4841 = vmatpush1.bf16.msra.mxu1 %v6253_v53  ;;  %v800_v53 = vsel %vm797_vm5, %v791_v44, %v793_v45 }
 0x2d1   :  { %4843 = vmatprep.subr.bf16.mxu1 %v6254_v54  ;;  %v796_v54 = vrot.slane %v7338_v27, 1 }
 0x2d4   :  { %4845 = vmatpush1.bf16.msra.mxu1 %v6256_v55  ;;  %v808_v55 = vmul.f32 %v7402_v46, %v800_v53 }
 0x2d5   :  { %4847 = vmatprep.subr.bf16.mxu1 %v6257_v56  ;;  %v795_v56 = vrot.slane %v7332_v23, 1 }
 0x2d7   :  { %1268 = vmatmul.mubr.f32.vlgmr.msra.gmra.mrb[4].mxu1 %v7327_v19 }
 0x2d8   :  { %1273 = vmatprep.mubr.f32.mxu1 %v7334_v25  ;;  %4849 = vmatpush1.bf16.msra.mxu1 %v6259_v57  ;;  %v799_v57 = vsel %vm797_vm5, %v794_v41, %v796_v54 }
 0x2d9   :  { %4851 = vmatprep.subr.bf16.mxu1 %v6260_v58  ;;  %v7420_v58 = vsel %vm675_vm7, 1.0, %v7039_v0 }
 0x2db   :  { %1274 = vmatmul.mubr.f32.gmra.mrb[6].mxu1 %v7348_v34 }
 0x2dc   :  { %1279 = vmatprep.mubr.f32.mxu1 %v7336_v26  ;;  %4853 = vmatpush1.bf16.msra.mxu1 %v6262_v59  ;;  %v805_v59 = vsel %vm797_vm5, %v796_v54, %v790_v2  ;;  %v6341_v2 = vld [vmem:[#allocation8 + $0x3c4] ss:$8 sps:$4 sm:$0xff]  }
 0x2dd   :  { %4855 = vmatprep.subr.bf16.mxu1 %v6263_v60  ;;  %v798_v60 = vsel %vm797_vm5, %v793_v45, %v795_v56 }
 0x2df   :  { %1280 = vmatmul.mubr.f32.gmra.mrb[8].mxu1 %v7350_v35 }
 0x2e0   :  { %1285 = vmatprep.mubr.f32.mxu1 %v7338_v27  ;;  %4857 = vmatpush1.bf16.msra.mxu1 %v6265_v61  ;;  %v813_v61 = vmul.f32 %v7420_v58, %v805_v59 }
 0x2e1   :  { %4859 = vmatprep.subr.bf16.mxu1 %v6266_v62  ;;  %v804_v62 = vsel %vm797_vm5, %v795_v56, %v789_v49 }
 0x2e2   :  { %v812_v63 = vmul.f32 %v7420_v58, %v804_v62 }
 0x2e3   :  { %1286 = vmatmul.mubr.f32.gmra.mrb[10].mxu1 %v7332_v23 }
 0x2e4   :  { %4861 = vmatpush1.bf16.msra.mxu1 %v6268_v1  ;;  %1356 = vmatprep.mubr.f32.mxu1 %v803_v4  ;;  %v6338_v1 = vld [vmem:[#allocation8 + $0x3b4] ss:$8 sps:$4 sm:$0xff]   ;;  %v6343_v4 = vld [vmem:[#allocation8 + $0x3c0] ss:$8 sps:$4 sm:$0xff]  }
 0x2e5   :  { %4863 = vmatprep.subr.bf16.mxu1 %v6269_v3  ;;  %v6340_v3 = vld [vmem:[#allocation8 + $0x3b0] ss:$8 sps:$4 sm:$0xff]   ;;  %4955 = vmatprep.subr.bf16.mxu0 %v6338_v1 }
 0x2e6   :  { %4957 = vmatpush1.bf16.msra.mxu0 %v6340_v3  ;;  %v6356_v3 = vld [vmem:[#allocation8 + $0x414] ss:$8 sps:$4 sm:$0xff]  }
 0x2e7   :  { %4959 = vmatprep.subr.bf16.mxu0 %v6341_v2 }
 0x2e8   :  { %4865 = vmatpush1.bf16.msra.mxu1 %v6271_v5  ;;  %v6344_v5 = vld [vmem:[#allocation8 + $0x3d4] ss:$8 sps:$4 sm:$0xff]  }
 0x2e9   :  { %4867 = vmatprep.subr.bf16.mxu1 %v6272_v7  ;;  %v6346_v7 = vld [vmem:[#allocation8 + $0x3d0] ss:$8 sps:$4 sm:$0xff]  }
 0x2ea   :  { %4961 = vmatpush1.bf16.msra.mxu0 %v6343_v4 }
 0x2eb   :  { %4963 = vmatprep.subr.bf16.mxu0 %v6344_v5 }
 0x2ec   :  { %4869 = vmatpush1.bf16.msra.mxu1 %v6274_v8  ;;  %v6347_v8 = vld [vmem:[#allocation8 + $0x3e4] ss:$8 sps:$4 sm:$0xff]  }
 0x2ed   :  { %4871 = vmatprep.subr.bf16.mxu1 %v6275_v10  ;;  %v6349_v10 = vld [vmem:[#allocation8 + $0x3e0] ss:$8 sps:$4 sm:$0xff]  }
 0x2ee   :  { %4965 = vmatpush1.bf16.msra.mxu0 %v6346_v7 }
 0x2ef   :  { %4967 = vmatprep.subr.bf16.mxu0 %v6347_v8  ;;  %v6358_v8 = vld [vmem:[#allocation8 + $0x410] ss:$8 sps:$4 sm:$0xff]  }
 0x2f0   :  { %4873 = vmatpush1.bf16.msra.mxu1 %v6277_v12  ;;  %v6350_v12 = vld [vmem:[#allocation8 + $0x3f4] ss:$8 sps:$4 sm:$0xff]  }
 0x2f1   :  { %4875 = vmatprep.subr.bf16.mxu1 %v6278_v13  ;;  %v6352_v13 = vld [vmem:[#allocation8 + $0x3f0] ss:$8 sps:$4 sm:$0xff]  }
 0x2f2   :  { %4969 = vmatpush1.bf16.msra.mxu0 %v6349_v10  ;;  %v6359_v10 = vld [vmem:[#allocation8 + $0x424] ss:$8 sps:$4 sm:$0xff]  }
 0x2f3   :  { %4971 = vmatprep.subr.bf16.mxu0 %v6350_v12 }
 0x2f4   :  { %4877 = vmatpush1.bf16.msra.mxu1 %v6280_v14  ;;  %v6353_v14 = vld [vmem:[#allocation8 + $0x404] ss:$8 sps:$4 sm:$0xff]  }
 0x2f5   :  { %4879 = vmatprep.subr.bf16.mxu1 %v6281_v15 }
 0x2f6   :  { %4973 = vmatpush1.bf16.msra.mxu0 %v6352_v13 }
 0x2f7   :  { %4975 = vmatprep.subr.bf16.mxu0 %v6353_v14 }
 0x2f8   :  { %4881 = vmatpush1.bf16.msra.mxu1 %v6283_v16 }
 0x2f9   :  { %4883 = vmatprep.subr.bf16.mxu1 %v6284_v17  ;;  %v1102_v17 = vld [vmem:[#allocation10] sm:$0x3] }
 0x2fc   :  { %4885 = vmatpush1.bf16.msra.mxu1 %v6286_v18 }
 0x2fd   :  { %4887 = vmatprep.subr.bf16.mxu1 %v6287_v20  ;;  %v1107_v20 = vrot.slane %v1102_v17, %v7319_v9 }
 0x300   :  { %4889 = vmatpush1.bf16.msra.mxu1 %v6289_v22 }
 0x301   :  { %4891 = vmatprep.subr.bf16.mxu1 %v6290_v24  ;;  %v1111_v24 = vrot.slane %v1102_v17, %v7322_v11  ;;  %v6362_v17 = vld [vmem:[#allocation8 + $0x434] ss:$8 sps:$4 sm:$0xff]  }
 0x304   :  { %4893 = vmatpush1.bf16.msra.mxu1 %v6292_v28 }
 0x305   :  { %4895 = vmatprep.subr.bf16.mxu1 %v6293_v29 }
 0x308   :  { %4897 = vmatpush1.bf16.msra.mxu1 %v6295_v30 }
 0x309   :  { %4899 = vmatprep.subr.bf16.mxu1 %v6296_v31 }
 0x30c   :  { %4901 = vmatpush1.bf16.msra.mxu1 %v6298_v32 }
 0x30d   :  { %4903 = vmatprep.subr.bf16.mxu1 %v6299_v37 }
 0x310   :  { %4905 = vmatpush1.bf16.msra.mxu1 %v6301_v38 }
 0x311   :  { %4907 = vmatprep.subr.bf16.mxu1 %v6302_v40 }
 0x314   :  { %4909 = vmatpush1.bf16.msra.mxu1 %v6304_v42 }
 0x317   :  { %1357 = vmatmul.mubr.f32.vlgmr.msra.gmra.mrb[4].mxu1 %v802_v51 }
 0x318   :  { %1362 = vmatprep.mubr.f32.mxu1 %v809_v52 }
 0x31b   :  { %1363 = vmatmul.mubr.f32.gmra.mrb[6].mxu1 %v808_v55 }
 0x31c   :  { %1368 = vmatprep.mubr.f32.mxu1 %v799_v57 }
 0x31f   :  { %1369 = vmatmul.mubr.f32.gmra.mrb[8].mxu1 %v798_v60 }
 0x320   :  { %1374 = vmatprep.mubr.f32.mxu1 %v813_v61 }
 0x323   :  { %1375 = vmatmul.mubr.f32.gmra.mrb[10].mxu1 %v812_v63  ;;  %v6355_v63 = vld [vmem:[#allocation8 + $0x400] ss:$8 sps:$4 sm:$0xff]  }
 0x324   :  { %2073 = vmatprep.mubr.f32.mxu1 %v7039_v0 }
 0x3ea   :  { %v1358_v15 = vpop.f32.mrb[4].mxu1 }
 0x3eb   :  { %v1360_v16 = vpop.f32.mrb[5].mxu1  ;;  %v5628_v29 = vadd.f32 %v1358_v15, %v1107_v20  ;;  %v6361_v15 = vld [vmem:[#allocation8 + $0x420] ss:$8 sps:$4 sm:$0xff]  }
 0x3ec   :  { %v5629_v31 = vadd.f32 %v1360_v16, %v1111_v24 }
 0x3ed   :  { %v7435_v38 = vmax.f32 %v5628_v29, 0.0  ;;  %v6368_v29 = vld [vmem:[#allocation8 + $0x454] ss:$8 sps:$4 sm:$0xff]  }
 0x3ee   :  { %v1364_v18 = vpop.f32.mrb[6].mxu1  ;;  %v7437_v41 = vmax.f32 %v5629_v31, 0.0  ;;  %v6371_v31 = vld [vmem:[#allocation8 + $0x464] ss:$8 sps:$4 sm:$0xff]  }
 0x3ef   :  { %v1366_v22 = vpop.f32.mrb[7].mxu1  ;;  %v5630_v43 = vadd.f32 %v1364_v18, %v1107_v20  ;;  %v1389_v51 = vrot.slane %v7435_v38, 7 }
 0x3f0   :  { %v5631_v32 = vadd.f32 %v1366_v22, %v1111_v24  ;;  %v1390_v53 = vrot.slane %v7437_v41, 7  ;;  %v6365_v22 = vld [vmem:[#allocation8 + $0x444] ss:$8 sps:$4 sm:$0xff]  }
 0x3f1   :  { %v7451_v55 = vmax.f32 %v5630_v43, 0.0  ;;  %v6382_v43 = vld [vmem:[#allocation8 + $0x490] ss:$8 sps:$4 sm:$0xff]  }
 0x3f2   :  { %v1370_v28 = vpop.f32.mrb[8].mxu1  ;;  %v7441_v48 = vmax.f32 %v5631_v32, 0.0  ;;  %v6373_v32 = vld [vmem:[#allocation8 + $0x460] ss:$8 sps:$4 sm:$0xff]  }
 0x3f3   :  { %v1372_v30 = vpop.f32.mrb[9].mxu1  ;;  %v5632_v44 = vadd.f32 %v1370_v28, %v1107_v20  ;;  %v1391_v2 = vrot.slane %v7451_v55, 7  ;;  %v6367_v28 = vld [vmem:[#allocation8 + $0x440] ss:$8 sps:$4 sm:$0xff]  }
 0x3f4   :  { %v5633_v36 = vadd.f32 %v1372_v30, %v1111_v24  ;;  %v1392_v59 = vrot.slane %v7441_v48, 7  ;;  %v6370_v30 = vld [vmem:[#allocation8 + $0x450] ss:$8 sps:$4 sm:$0xff]  }
 0x3f5   :  { %v7453_v56 = vmax.f32 %v5632_v44, 0.0  ;;  %v1401_v12 = vsel %vm772_vm3, %v1389_v51, %v1391_v2  ;;  %v6383_v44 = vld [vmem:[#allocation8 + $0x4a4] ss:$8 sps:$4 sm:$0xff]  }
 0x3f6   :  { %v1376_v37 = vpop.f32.mrb[10].mxu1  ;;  %v7443_v49 = vmax.f32 %v5633_v36, 0.0  ;;  %v1402_v5 = vsel %vm772_vm3, %v1390_v53, %v1392_v59  ;;  %v6374_v36 = vld [vmem:[#allocation8 + $0x474] ss:$8 sps:$4 sm:$0xff]  }
 0x3f7   :  { %v5634_v39 = vadd.f32 %v1376_v37, %v1107_v20  ;;  %v1378_v40 = vpop.f32.mrb[11].mxu1  ;;  %v1393_v4 = vrot.slane %v7453_v56, 7  ;;  %v6364_v20 = vld [vmem:[#allocation8 + $0x430] ss:$8 sps:$4 sm:$0xff]  }
 0x3f8   :  { %v5635_v42 = vadd.f32 %v1378_v40, %v1111_v24  ;;  %v1394_v60 = vrot.slane %v7443_v49, 7  ;;  %v6376_v37 = vld [vmem:[#allocation8 + $0x470] ss:$8 sps:$4 sm:$0xff]   ;;  %v6379_v40 = vld [vmem:[#allocation8 + $0x480] ss:$8 sps:$4 sm:$0xff]  }
 0x3f9   :  { %v7439_v45 = vmax.f32 %v5634_v39, 0.0  ;;  %v1399_v14 = vsel %vm772_vm3, %v1391_v2, %v1393_v4  ;;  %v6377_v39 = vld [vmem:[#allocation8 + $0x484] ss:$8 sps:$4 sm:$0xff]   ;;  %v6403_v2 = vld [vmem:[#allocation8 + $0x500] ss:$8 sps:$4 sm:$0xff]  }
 0x3fa   :  { %v7445_v50 = vmax.f32 %v5635_v42, 0.0  ;;  %v1400_v7 = vsel %vm772_vm3, %v1392_v59, %v1394_v60  ;;  %v1409_v16 = vmul.f32 %v7365_v47, %v1399_v14  ;;  %v6380_v42 = vld [vmem:[#allocation8 + $0x494] ss:$8 sps:$4 sm:$0xff]   ;;  %v1414_v14 = vrot.slane %v7437_v41, 1 }
 0x3fb   :  { %v1395_v52 = vrot.slane %v7439_v45, 7  ;;  %v1410_v13 = vmul.f32 %v7365_v47, %v1400_v7  ;;  %v6392_v59 = vld [vmem:[#allocation8 + $0x4d4] ss:$8 sps:$4 sm:$0xff]   ;;  %v6407_v7 = vld [vmem:[#allocation8 + $0x524] ss:$8 sps:$4 sm:$0xff]  }
 0x3fc   :  { %v1396_v54 = vrot.slane %v7445_v50, 7 }
 0x3fd   :  { %v1403_v57 = vsel %vm772_vm3, %v1395_v52, %v1389_v51  ;;  %v1397_v24 = vsel %vm772_vm3, %v1393_v4, %v1395_v52  ;;  %v6385_v51 = vld [vmem:[#allocation8 + $0x4a0] ss:$8 sps:$4 sm:$0xff]   ;;  %v6386_v52 = vld [vmem:[#allocation8 + $0x4b4] ss:$8 sps:$4 sm:$0xff]  }
 0x3fe   :  { %v1404_v61 = vsel %vm772_vm3, %v1396_v54, %v1390_v53  ;;  %v1405_v1 = vmul.f32 %v7346_v33, %v1403_v57  ;;  %v1398_v18 = vsel %vm772_vm3, %v1394_v60, %v1396_v54  ;;  %v6388_v53 = vld [vmem:[#allocation8 + $0x4b0] ss:$8 sps:$4 sm:$0xff]   ;;  %v6389_v54 = vld [vmem:[#allocation8 + $0x4c4] ss:$8 sps:$4 sm:$0xff]   ;;  %v6391_v57 = vld [vmem:[#allocation8 + $0x4c0] ss:$8 sps:$4 sm:$0xff]  }
 0x3ff   :  { %v1406_v62 = vmul.f32 %v7346_v33, %v1404_v61  ;;  %v6394_v60 = vld [vmem:[#allocation8 + $0x4d0] ss:$8 sps:$4 sm:$0xff]   ;;  %v6395_v61 = vld [vmem:[#allocation8 + $0x4e4] ss:$8 sps:$4 sm:$0xff]   ;;  %v6404_v4 = vld [vmem:[#allocation8 + $0x514] ss:$8 sps:$4 sm:$0xff]  }
 0x401   :  { %1803 = vmatprep.mubr.f32.mxu0 %v1406_v62  ;;  %v6397_v62 = vld [vmem:[#allocation8 + $0x4e0] ss:$8 sps:$4 sm:$0xff]  }
 0x402   :  { %1804 = vmatmul.mubr.f32.vlgmr.msra.gmra.mrb[12].mxu0 %v1405_v1  ;;  %v6400_v1 = vld [vmem:[#allocation8 + $0x4f0] ss:$8 sps:$4 sm:$0xff]  }
 0x403   :  { %4977 = vmatpush1.bf16.msra.mxu0 %v6355_v63  ;;  %1809 = vmatprep.mubr.f32.mxu0 %v1402_v5  ;;  %v6398_v63 = vld [vmem:[#allocation8 + $0x4f4] ss:$8 sps:$4 sm:$0xff]   ;;  %v6406_v5 = vld [vmem:[#allocation8 + $0x510] ss:$8 sps:$4 sm:$0xff]  }
 0x404   :  { %4979 = vmatprep.subr.bf16.mxu0 %v6356_v3  ;;  %v6401_v3 = vld [vmem:[#allocation8 + $0x504] ss:$8 sps:$4 sm:$0xff]  }
 0x406   :  { %1810 = vmatmul.mubr.f32.gmra.mrb[14].mxu0 %v1401_v12  ;;  %v1416_v12 = vrot.slane %v7441_v48, 1 }
 0x407   :  { %4981 = vmatpush1.bf16.msra.mxu0 %v6358_v8  ;;  %1815 = vmatprep.mubr.f32.mxu0 %v1410_v13  ;;  %v6409_v8 = vld [vmem:[#allocation8 + $0x520] ss:$8 sps:$4 sm:$0xff]   ;;  %v6412_v13 = vld [vmem:[#allocation8 + $0x530] ss:$8 sps:$4 sm:$0xff]  }
 0x408   :  { %4983 = vmatprep.subr.bf16.mxu0 %v6359_v10  ;;  %v6410_v10 = vld [vmem:[#allocation8 + $0x534] ss:$8 sps:$4 sm:$0xff]  }
 0x40a   :  { %1816 = vmatmul.mubr.f32.gmra.mrb[16].mxu0 %v1409_v16  ;;  %v1426_v16 = vsel %vm797_vm5, %v1414_v14, %v1416_v12 }
 0x40b   :  { %4985 = vmatpush1.bf16.msra.mxu0 %v6361_v15  ;;  %1821 = vmatprep.mubr.f32.mxu0 %v1398_v18  ;;  %v6413_v15 = vld [vmem:[#allocation8 + $0x544] ss:$8 sps:$4 sm:$0xff]   ;;  %v6418_v18 = vld [vmem:[#allocation8 + $0x550] ss:$8 sps:$4 sm:$0xff]  }
 0x40c   :  { %4987 = vmatprep.subr.bf16.mxu0 %v6362_v17  ;;  %v6416_v17 = vld [vmem:[#allocation8 + $0x554] ss:$8 sps:$4 sm:$0xff]  }
 0x40e   :  { %1822 = vmatmul.mubr.f32.gmra.mrb[18].mxu0 %v1397_v24  ;;  %v6422_v24 = vld [vmem:[#allocation8 + $0x574] ss:$8 sps:$4 sm:$0xff]  }
 0x40f   :  { %4989 = vmatpush1.bf16.msra.mxu0 %v6364_v20  ;;  %1892 = vmatprep.mubr.f32.mxu0 %v7437_v41  ;;  %v6419_v20 = vld [vmem:[#allocation8 + $0x564] ss:$8 sps:$4 sm:$0xff]  }
 0x410   :  { %4991 = vmatprep.subr.bf16.mxu0 %v6365_v22  ;;  %v6421_v22 = vld [vmem:[#allocation8 + $0x560] ss:$8 sps:$4 sm:$0xff]  }
 0x413   :  { %4993 = vmatpush1.bf16.msra.mxu0 %v6367_v28  ;;  %v6424_v28 = vld [vmem:[#allocation8 + $0x570] ss:$8 sps:$4 sm:$0xff]  }
 0x414   :  { %4995 = vmatprep.subr.bf16.mxu0 %v6368_v29  ;;  %v6425_v29 = vld [vmem:[#allocation8 + $0x584] ss:$8 sps:$4 sm:$0xff]  }
 0x417   :  { %4997 = vmatpush1.bf16.msra.mxu0 %v6370_v30  ;;  %v6427_v30 = vld [vmem:[#allocation8 + $0x580] ss:$8 sps:$4 sm:$0xff]  }
 0x418   :  { %4999 = vmatprep.subr.bf16.mxu0 %v6371_v31  ;;  %v6428_v31 = vld [vmem:[#allocation8 + $0x594] ss:$8 sps:$4 sm:$0xff]  }
 0x41b   :  { %5001 = vmatpush1.bf16.msra.mxu0 %v6373_v32  ;;  %v6430_v32 = vld [vmem:[#allocation8 + $0x590] ss:$8 sps:$4 sm:$0xff]  }
 0x41c   :  { %5003 = vmatprep.subr.bf16.mxu0 %v6374_v36  ;;  %v6431_v36 = vld [vmem:[#allocation8 + $0x5a4] ss:$8 sps:$4 sm:$0xff]  }
 0x41f   :  { %5005 = vmatpush1.bf16.msra.mxu0 %v6376_v37  ;;  %v6433_v37 = vld [vmem:[#allocation8 + $0x5a0] ss:$8 sps:$4 sm:$0xff]  }
 0x420   :  { %5007 = vmatprep.subr.bf16.mxu0 %v6377_v39  ;;  %v6434_v39 = vld [vmem:[#allocation8 + $0x5b4] ss:$8 sps:$4 sm:$0xff]  }
 0x423   :  { %5009 = vmatpush1.bf16.msra.mxu0 %v6379_v40  ;;  %v6436_v40 = vld [vmem:[#allocation8 + $0x5b0] ss:$8 sps:$4 sm:$0xff]  }
 0x424   :  { %5011 = vmatprep.subr.bf16.mxu0 %v6380_v42  ;;  %v6437_v42 = vld [vmem:[#allocation8 + $0x5c4] ss:$8 sps:$4 sm:$0xff]  }
 0x427   :  { %5013 = vmatpush1.bf16.msra.mxu0 %v6382_v43  ;;  %v6439_v43 = vld [vmem:[#allocation8 + $0x5c0] ss:$8 sps:$4 sm:$0xff]  }
 0x428   :  { %5015 = vmatprep.subr.bf16.mxu0 %v6383_v44  ;;  %v6440_v44 = vld [vmem:[#allocation8 + $0x5d4] ss:$8 sps:$4 sm:$0xff]  }
 0x42b   :  { %5017 = vmatpush1.bf16.msra.mxu0 %v6385_v51  ;;  %v6442_v51 = vld [vmem:[#allocation8 + $0x5d0] ss:$8 sps:$4 sm:$0xff]  }
 0x42c   :  { %5019 = vmatprep.subr.bf16.mxu0 %v6386_v52  ;;  %v6443_v52 = vld [vmem:[#allocation8 + $0x5e4] ss:$8 sps:$4 sm:$0xff]  }
 0x42f   :  { %5021 = vmatpush1.bf16.msra.mxu0 %v6388_v53  ;;  %v6445_v53 = vld [vmem:[#allocation8 + $0x5e0] ss:$8 sps:$4 sm:$0xff]  }
 0x430   :  { %5023 = vmatprep.subr.bf16.mxu0 %v6389_v54  ;;  %v6446_v54 = vld [vmem:[#allocation8 + $0x5f4] ss:$8 sps:$4 sm:$0xff]  }
 0x433   :  { %5025 = vmatpush1.bf16.msra.mxu0 %v6391_v57  ;;  %v1418_v57 = vrot.slane %v7443_v49, 1 }
 0x434   :  { %5027 = vmatprep.subr.bf16.mxu0 %v6392_v59  ;;  %v6448_v59 = vld [vmem:[#allocation8 + $0x5f0] ss:$8 sps:$4 sm:$0xff]  }
 0x437   :  { %5029 = vmatpush1.bf16.msra.mxu0 %v6394_v60  ;;  %v1415_v60 = vrot.slane %v7451_v55, 1 }
 0x438   :  { %5031 = vmatprep.subr.bf16.mxu0 %v6395_v61  ;;  %v1417_v61 = vrot.slane %v7453_v56, 1 }
 0x43b   :  { %5033 = vmatpush1.bf16.msra.mxu0 %v6397_v62  ;;  %v1424_v62 = vsel %vm797_vm5, %v1416_v12, %v1418_v57 }
 0x43c   :  { %5035 = vmatprep.subr.bf16.mxu0 %v6398_v63  ;;  %v1413_v63 = vrot.slane %v7435_v38, 1 }
 0x43f   :  { %5037 = vmatpush1.bf16.msra.mxu0 %v6400_v1  ;;  %v1425_v1 = vsel %vm797_vm5, %v1413_v63, %v1415_v60 }
 0x440   :  { %5039 = vmatprep.subr.bf16.mxu0 %v6401_v3  ;;  %v1432_v3 = vmul.f32 %v7402_v46, %v1424_v62  ;;  %v4487_v62 = vld [vmem:[%s8082_s10 + $0x20] sm:$0xff]  }
 0x442   :  { %1893 = vmatmul.mubr.f32.vlgmr.msra.gmra.mrb[12].mxu0 %v7435_v38 }
 0x443   :  { %1898 = vmatprep.mubr.f32.mxu0 %v7441_v48  ;;  %5041 = vmatpush1.bf16.msra.mxu0 %v6403_v2  ;;  %v6415_v48 = vld [vmem:[#allocation8 + $0x540] ss:$8 sps:$4 sm:$0xff]   ;;  %v1420_v2 = vrot.slane %v7445_v50, 1 }
 0x444   :  { %5043 = vmatprep.subr.bf16.mxu0 %v6404_v4 }
 0x445   :  { %v1422_v38 = vsel %vm797_vm5, %v1418_v57, %v1420_v2  ;;  %v1428_v4 = vsel %vm797_vm5, %v1420_v2, %v1414_v14  ;;  %v4485_v57 = vld [vmem:[%s8082_s10 + $0x10] sm:$0xff]   ;;  %v4498_v2 = vld [vmem:[%s8082_s10 + $0x78] sm:$0xff]  }
 0x446   :  { %1899 = vmatmul.mubr.f32.gmra.mrb[14].mxu0 %v7451_v55 }
 0x447   :  { %1904 = vmatprep.mubr.f32.mxu0 %v7443_v49  ;;  %5045 = vmatpush1.bf16.msra.mxu0 %v6406_v5  ;;  %v1423_v49 = vsel %vm797_vm5, %v1415_v60, %v1417_v61  ;;  %v4486_v60 = vld [vmem:[%s8082_s10 + $0x18] sm:$0xff]  }
 0x448   :  { %5047 = vmatprep.subr.bf16.mxu0 %v6407_v7  ;;  %v1431_v55 = vmul.f32 %v7402_v46, %v1423_v49  ;;  %v4489_v49 = vld [vmem:[%s8082_s10 + $0x30] sm:$0xff]  }
 0x44a   :  { %1905 = vmatmul.mubr.f32.gmra.mrb[16].mxu0 %v7453_v56  ;;  %v1419_v56 = vrot.slane %v7439_v45, 1 }
 0x44b   :  { %1910 = vmatprep.mubr.f32.mxu0 %v7445_v50  ;;  %5049 = vmatpush1.bf16.msra.mxu0 %v6409_v8  ;;  %v1436_v50 = vmul.f32 %v7420_v58, %v1428_v4  ;;  %v1727_v8 = vld [vmem:[#allocation10 + $0x2] sm:$0x3]  ;;  %v2151_v4 = vld [vmem:[#allocation11] sm:$0xff] }
 0x44c   :  { %5051 = vmatprep.subr.bf16.mxu0 %v6410_v10  ;;  %v1421_v5 = vsel %vm797_vm5, %v1417_v61, %v1419_v56  ;;  %v1427_v7 = vsel %vm797_vm5, %v1419_v56, %v1413_v63  ;;  %v1736_v12 = vrot.slane %v1727_v8, %v7322_v11  ;;  %v4495_v61 = vld [vmem:[%s8082_s10 + $0x60] sm:$0xff]   ;;  %v4496_v63 = vld [vmem:[%s8082_s10 + $0x68] sm:$0xff]  }
 0x44e   :  { %1911 = vmatmul.mubr.f32.gmra.mrb[18].mxu0 %v7439_v45  ;;  %v1435_v45 = vmul.f32 %v7420_v58, %v1427_v7  ;;  %v7040_v7 = vmov 0.0|0.0  }
 0x44f   :  { %5053 = vmatpush1.bf16.msra.mxu0 %v6412_v13  ;;  %1981 = vmatprep.mubr.f32.mxu0 %v1426_v16  ;;  %v1732_v13 = vrot.slane %v1727_v8, %v7319_v9  ;;  %v2235_v8 = vld [vmem:[%s8080_s8 + $0x8] sm:$0xff] }
 0x450   :  { %5055 = vmatprep.subr.bf16.mxu0 %v6413_v15 }
 0x453   :  { %5057 = vmatpush1.bf16.msra.mxu0 %v6415_v48 }
 0x454   :  { %5059 = vmatprep.subr.bf16.mxu0 %v6416_v17 }
 0x457   :  { %5061 = vmatpush1.bf16.msra.mxu0 %v6418_v18 }
 0x458   :  { %5063 = vmatprep.subr.bf16.mxu0 %v6419_v20 }
 0x45b   :  { %5065 = vmatpush1.bf16.msra.mxu0 %v6421_v22 }
 0x45c   :  { %5067 = vmatprep.subr.bf16.mxu0 %v6422_v24 }
 0x45f   :  { %5069 = vmatpush1.bf16.msra.mxu0 %v6424_v28 }
 0x460   :  { %5071 = vmatprep.subr.bf16.mxu0 %v6425_v29 }
 0x463   :  { %5073 = vmatpush1.bf16.msra.mxu0 %v6427_v30 }
 0x464   :  { %5075 = vmatprep.subr.bf16.mxu0 %v6428_v31 }
 0x467   :  { %5077 = vmatpush1.bf16.msra.mxu0 %v6430_v32 }
 0x468   :  { %5079 = vmatprep.subr.bf16.mxu0 %v6431_v36 }
 0x46b   :  { %5081 = vmatpush1.bf16.msra.mxu0 %v6433_v37 }
 0x46c   :  { %5083 = vmatprep.subr.bf16.mxu0 %v6434_v39  ;;  %v7541_v39 = vld [vmem:[#allocation17] sm:$0x1] }
 0x46f   :  { %5085 = vmatpush1.bf16.msra.mxu0 %v6436_v40 }
 0x470   :  { %5087 = vmatprep.subr.bf16.mxu0 %v6437_v42 }
 0x473   :  { %5089 = vmatpush1.bf16.msra.mxu0 %v6439_v43  ;;  %v4491_v43 = vld [vmem:[%s8082_s10 + $0x40] sm:$0xff]  }
 0x474   :  { %5091 = vmatprep.subr.bf16.mxu0 %v6440_v44  ;;  %v755_v44 = vunpack.c.l.bf16 %v7541_v39 }
 0x477   :  { %5093 = vmatpush1.bf16.msra.mxu0 %v6442_v51  ;;  %v4410_v51 = vld [vmem:[%s8082_s10] sm:$0xff]  }
 0x478   :  { %5095 = vmatprep.subr.bf16.mxu0 %v6443_v52  ;;  %v4492_v52 = vld [vmem:[%s8082_s10 + $0x48] sm:$0xff]  }
 0x47b   :  { %5097 = vmatpush1.bf16.msra.mxu0 %v6445_v53  ;;  %v4484_v53 = vld [vmem:[%s8082_s10 + $0x8] sm:$0xff]  }
 0x47c   :  { %5099 = vmatprep.subr.bf16.mxu0 %v6446_v54  ;;  %v4493_v54 = vld [vmem:[%s8082_s10 + $0x50] sm:$0xff]  }
 0x47f   :  { %5101 = vmatpush1.bf16.msra.mxu0 %v6448_v59  ;;  %v4494_v59 = vld [vmem:[%s8082_s10 + $0x58] sm:$0xff]  }
 0x480   :  { %5145 = vmatprep.subr.bf16.mxu0 %v7040_v7 }
 0x482   :  { %1982 = vmatmul.mubr.f32.vlgmr.msra.gmra.mrb[12].mxu0 %v1425_v1  ;;  %v4488_v1 = vld [vmem:[%s8082_s10 + $0x28] sm:$0xff]  }
 0x483   :  { %1987 = vmatprep.mubr.f32.mxu0 %v1432_v3  ;;  %v4497_v3 = vld [vmem:[%s8082_s10 + $0x70] sm:$0xff]  }
 0x486   :  { %1988 = vmatmul.mubr.f32.gmra.mrb[14].mxu0 %v1431_v55  ;;  %v4490_v55 = vld [vmem:[%s8082_s10 + $0x38] sm:$0xff]  }
 0x487   :  { %1993 = vmatprep.mubr.f32.mxu0 %v1422_v38 }
 0x48a   :  { %1994 = vmatmul.mubr.f32.gmra.mrb[16].mxu0 %v1421_v5  ;;  %v2152_v5 = vld [vmem:[#allocation11 + $0x8] sm:$0xff] }
 0x48b   :  { %1999 = vmatprep.mubr.f32.mxu0 %v1436_v50  ;;  %v5143_v50 = vpack.c.bf16 %v2152_v5, %v2151_v4  ;;  %v6451_v4 = vld [vmem:[#allocation16] ss:$8 sps:$4 sm:$0xff]   ;;  %v4356_v5 = vld [vmem:[#allocation14] ss:$0 sm:$0xff] }
 0x48e   :  { %2000 = vmatmul.mubr.f32.gmra.mrb[18].mxu0 %v1435_v45  ;;  %v2234_v45 = vld [vmem:[%s8080_s8] sm:$0xff] }
 0x48f   :  { %4649 = vmatprep.mubr.msk.f32.mxu0 %vm7041_vm8, %v7039_v0 }
 0x555   :  { %v1983_v10 = vpop.f32.mrb[12].mxu0 }
 0x556   :  { %v1985_v41 = vpop.f32.mrb[13].mxu0  ;;  %v7527_v18 = vadd.f32 %v1983_v10, %v1732_v13  ;;  %v2236_v10 = vld [vmem:[%s8080_s8 + $0x10] sm:$0xff] }
 0x557   :  { %v7523_v48 = vadd.f32 %v1985_v41, %v1736_v12  ;;  %v5146_v41 = vpack.c.bf16 %v2235_v8, %v2234_v45 }
 0x559   :  { %v1989_v14 = vpop.f32.mrb[14].mxu0  ;;  %5147 = vmatpush3.bf16.msra.mxu0 %v5146_v41 }
 0x55a   :  { %v7521_v15 = vadd.f32 %v1989_v14, %v1732_v13  ;;  %v1991_v16 = vpop.f32.mrb[15].mxu0  ;;  %5148 = vmatprep.subr.bf16.mxu0 %v7040_v7  ;;  %v2238_v14 = vld [vmem:[%s8080_s8 + $0x20] sm:$0xff] }
 0x55b   :  { %v7525_v17 = vadd.f32 %v1991_v16, %v1736_v12  ;;  %v2239_v16 = vld [vmem:[%s8080_s8 + $0x28] sm:$0xff] }
 0x55c   :  { %v5104_v24 = vpack.c.bf16 %v7521_v15, %v7527_v18 }
 0x55d   :  { %v5102_v20 = vpack.c.bf16 %v7525_v17, %v7523_v48  ;;  %v1995_v22 = vpop.f32.mrb[16].mxu0 }
 0x55e   :  { %v1997_v28 = vpop.f32.mrb[17].mxu0  ;;  %v7539_v37 = vadd.f32 %v1995_v22, %v1732_v13  ;;  %v2240_v22 = vld [vmem:[%s8080_s8 + $0x30] sm:$0xff] }
 0x55f   :  { %5103 = vmatprep.subr.bf16.mxu1 %v5102_v20  ;;  %v7535_v32 = vadd.f32 %v1997_v28, %v1736_v12  ;;  %v5152_v20 = vpack.c.bf16 %v2239_v16, %v2238_v14  ;;  %v7667_v14 = vld [vmem:[%s8085_s13] sm:$0xff]  }
 0x560   :  { %5105 = vmatpush1.bf16.msra.mxu1 %v5104_v24  ;;  %v2241_v24 = vld [vmem:[%s8080_s8 + $0x38] sm:$0xff] }
 0x561   :  { %v2001_v29 = vpop.f32.mrb[18].mxu0  ;;  %v5155_v28 = vpack.c.bf16 %v2241_v24, %v2240_v22  ;;  %v6452_v22 = vld [vmem:[#allocation8 + $0x604] ss:$8 sps:$4 sm:$0xff]  }
 0x562   :  { %v7533_v30 = vadd.f32 %v2001_v29, %v1732_v13  ;;  %v2003_v31 = vpop.f32.mrb[19].mxu0  ;;  %v2242_v29 = vld [vmem:[%s8080_s8 + $0x40] sm:$0xff] }
 0x563   :  { %v7537_v36 = vadd.f32 %v2003_v31, %v1736_v12  ;;  %v2237_v12 = vld [vmem:[%s8080_s8 + $0x18] sm:$0xff]  ;;  %v2243_v31 = vld [vmem:[%s8080_s8 + $0x48] sm:$0xff] }
 0x564   :  { %v5108_v42 = vpack.c.bf16 %v7533_v30, %v7539_v37  ;;  %v5149_v13 = vpack.c.bf16 %v2237_v12, %v2236_v10 }
 0x565   :  { %v5106_v40 = vpack.c.bf16 %v7537_v36, %v7535_v32 }
 0x566   :  { %5150 = vmatpush3.bf16.msra.mxu0 %v5149_v13 }
 0x567   :  { %5107 = vmatprep.subr.bf16.mxu1 %v5106_v40  ;;  %5151 = vmatprep.subr.bf16.mxu0 %v7040_v7  ;;  %v5158_v40 = vpack.c.bf16 %v2243_v31, %v2242_v29  ;;  %v6455_v29 = vld [vmem:[#allocation8 + $0x614] ss:$8 sps:$4 sm:$0xff]   ;;  %v4476_v31 = vunpack.c.h.bf16 %v7667_v14 }
 0x568   :  { %5109 = vmatpush1.bf16.msra.mxu1 %v5108_v42  ;;  %v2244_v42 = vld [vmem:[%s8080_s8 + $0x50] sm:$0xff] }
 0x569   :  { %5111 = vmatprep.subr.bf16.mxu1 %v4491_v43  ;;  %v2245_v43 = vld [vmem:[%s8080_s8 + $0x58] sm:$0xff] }
 0x56a   :  { %5153 = vmatpush3.bf16.msra.mxu0 %v5152_v20  ;;  %v4475_v20 = vunpack.c.l.bf16 %v7667_v14 }
 0x56b   :  { %4353 = vmatmul.mubr.msk.f32.vlgmr.msra.gmra.mrb[12].mxu1 %vm206_vm0, %v755_v44  ;;  %5154 = vmatprep.subr.bf16.mxu0 %v7040_v7 }
 0x56c   :  { %5113 = vmatpush3.bf16.msra.mxu1 %v4410_v51  ;;  %v5161_v51 = vpack.c.bf16 %v2245_v43, %v2244_v42  ;;  %v6457_v42 = vld [vmem:[#allocation8 + $0x610] ss:$8 sps:$4 sm:$0xff]   ;;  %v6458_v43 = vld [vmem:[#allocation8 + $0x624] ss:$8 sps:$4 sm:$0xff]  }
 0x56d   :  { %5115 = vmatprep.subr.bf16.mxu1 %v4492_v52  ;;  %v2246_v52 = vld [vmem:[%s8080_s8 + $0x60] sm:$0xff] }
 0x56e   :  { %5156 = vmatpush3.bf16.msra.mxu0 %v5155_v28  ;;  %v6454_v28 = vld [vmem:[#allocation8 + $0x600] ss:$8 sps:$4 sm:$0xff]  }
 0x56f   :  { %5157 = vmatprep.subr.bf16.mxu0 %v7040_v7 }
 0x570   :  { %5117 = vmatpush3.bf16.msra.mxu1 %v4484_v53  ;;  %v2247_v53 = vld [vmem:[%s8080_s8 + $0x68] sm:$0xff] }
 0x571   :  { %5119 = vmatprep.subr.bf16.mxu1 %v4493_v54  ;;  %v5164_v54 = vpack.c.bf16 %v2247_v53, %v2246_v52  ;;  %v6460_v52 = vld [vmem:[#allocation8 + $0x620] ss:$8 sps:$4 sm:$0xff]   ;;  %v6461_v53 = vld [vmem:[#allocation8 + $0x634] ss:$8 sps:$4 sm:$0xff]  }
 0x572   :  { %5159 = vmatpush3.bf16.msra.mxu0 %v5158_v40  ;;  %v7680_v40 = vld [vmem:[%s8085_s13 + $0x8] sm:$0xff]  }
 0x573   :  { %5160 = vmatprep.subr.bf16.mxu0 %v7040_v7 }
 0x574   :  { %5121 = vmatpush3.bf16.msra.mxu1 %v4485_v57 }
 0x575   :  { %5123 = vmatprep.subr.bf16.mxu1 %v4494_v59 }
 0x576   :  { %5162 = vmatpush3.bf16.msra.mxu0 %v5161_v51  ;;  %v4479_v51 = vunpack.c.l.bf16 %v7680_v40 }
 0x577   :  { %5163 = vmatprep.subr.bf16.mxu0 %v7040_v7 }
 0x578   :  { %5125 = vmatpush3.bf16.msra.mxu1 %v4486_v60 }
 0x579   :  { %5127 = vmatprep.subr.bf16.mxu1 %v4495_v61 }
 0x57a   :  { %5165 = vmatpush3.bf16.msra.mxu0 %v5164_v54  ;;  %v4480_v54 = vunpack.c.h.bf16 %v7680_v40 }
 0x57b   :  { %5166 = vmatprep.subr.bf16.mxu0 %v7040_v7 }
 0x57c   :  { %5129 = vmatpush3.bf16.msra.mxu1 %v4487_v62  ;;  %v2248_v62 = vld [vmem:[%s8080_s8 + $0x70] sm:$0xff] }
 0x57d   :  { %5131 = vmatprep.subr.bf16.mxu1 %v4496_v63  ;;  %v2249_v63 = vld [vmem:[%s8080_s8 + $0x78] sm:$0xff] }
 0x580   :  { %5133 = vmatpush3.bf16.msra.mxu1 %v4488_v1  ;;  %v5167_v1 = vpack.c.bf16 %v2249_v63, %v2248_v62  ;;  %v6469_v62 = vld [vmem:[#allocation8 + $0x650] ss:$8 sps:$4 sm:$0xff]   ;;  %v6470_v63 = vld [vmem:[#allocation8 + $0x664] ss:$8 sps:$4 sm:$0xff]  }
 0x581   :  { %5135 = vmatprep.subr.bf16.mxu1 %v4497_v3  ;;  %v4354_v3 = vld [vmem:[#allocation13] ss:$0 sm:$0xff] }
 0x582   :  { %5168 = vmatpush3.bf16.msra.mxu0 %v5167_v1  ;;  %v6472_v1 = vld [vmem:[#allocation8 + $0x660] ss:$8 sps:$4 sm:$0xff]  }
 0x584   :  { %5137 = vmatpush3.bf16.msra.mxu1 %v4489_v49 }
 0x585   :  { %5139 = vmatprep.subr.bf16.mxu1 %v4498_v2 }
 0x588   :  { %5141 = vmatpush3.bf16.msra.mxu1 %v4490_v55 }
 0x589   :  { %5142 = vmatprep.subr.bf16.mxu1 %v7040_v7 }
 0x63e   :  { %v2075_v56 = vpop.f32.mrb[12].mxu1 }
 0x63f   :  { %v2077_v38 = vpop.f32.mrb[13].mxu1 }
 0x640   :  { %2144 = vmatprep.mubr.f32.mxu1 %v2077_v38  ;;  %v6449_v38 = vld [vmem:[#allocation16 + $0x4] ss:$8 sps:$4 sm:$0xff]  }
 0x641   :  { %2145 = vmatmul.mubr.f32.vlgmr.msra.gmra.mrb[14].mxu1 %v2075_v56 }
 0x642   :  { %5144 = vmatpush3.bf16.msra.mxu1 %v5143_v50  ;;  %4614 = vmatprep.mubr.msk.f32.mxu1 %vm7041_vm8, %v7039_v0 }
 0x643   :  { %5170 = vmatprep.subr.bf16.mxu1 %v6449_v38  ;;  %v6481_v38 = vld [vmem:[#allocation8 + $0x690] ss:$8 sps:$4 sm:$0xff]  }
 0x714   :  { %v4532_v57 = vpop.f32.mrb[14].mxu1 }
 0x715   :  { %v4533_v59 = vpop.f32.mrb[15].mxu1 }
 0x716   :  { %v4534_v60 = vadd.f32 %v4533_v59, %v4532_v57  ;;  %v6463_v57 = vld [vmem:[#allocation8 + $0x630] ss:$8 sps:$4 sm:$0xff]   ;;  %v6464_v59 = vld [vmem:[#allocation8 + $0x644] ss:$8 sps:$4 sm:$0xff]  }
 0x718   :  { %v2150_v61 = vmul.f32 0.00390625, %v4534_v60  ;;  %v6466_v60 = vld [vmem:[#allocation8 + $0x640] ss:$8 sps:$4 sm:$0xff]  }
 0x71a   :  { %4615 = vmatmul.mubr.msk.f32.vlgmr.msra.gmra.mrb[16].mxu1 %vm384_vm1, %v2150_v61  ;;  %v6467_v61 = vld [vmem:[#allocation8 + $0x654] ss:$8 sps:$4 sm:$0xff]  }
 0x71b   :  { %2400 = vmatprep.mubr.f32.mxu1 %v7039_v0  ;;  %5172 = vmatpush1.bf16.msra.mxu1 %v6451_v4  ;;  %v6482_v4 = vld [vmem:[#allocation8 + $0x6a4] ss:$8 sps:$4 sm:$0xff]  }
 0x7ed   :  { %v2229_v49 = vpop.f32.mrb[16].mxu1 }
 0x7ee   :  { %v2230_v2 = vadd.f32 %v4354_v3, %v2229_v49  ;;  %v4616_v55 = vpop.f32.mrb[17].mxu1  ;;  %v6473_v3 = vld [vmem:[#allocation8 + $0x674] ss:$8 sps:$4 sm:$0xff]   ;;  %v6475_v49 = vld [vmem:[#allocation8 + $0x670] ss:$8 sps:$4 sm:$0xff]  }
 0x7ef   :  { %v6478_v55 = vld [vmem:[#allocation8 + $0x680] ss:$8 sps:$4 sm:$0xff]  }
 0x7f0   :  { %v2233_v56 = vmax.f32 %v2230_v2, 0.0  ;;  %v6476_v2 = vld [vmem:[#allocation8 + $0x684] ss:$8 sps:$4 sm:$0xff]  }
 0x7f2   :  { %4650 = vmatmul.mubr.f32.vlgmr.msra.gmra.mrb[20].mxu0 %v2233_v56  ;;  %v6479_v56 = vld [vmem:[#allocation8 + $0x694] ss:$8 sps:$4 sm:$0xff]  }
 0x8c5   :  { %v2323_v50 = vpop.f32.mrb[20].mxu0 }
 0x8c6   :  { %v2324_v45 = vadd.f32 %v4356_v5, %v2323_v50  ;;  %v4651_v8 = vpop.f32.mrb[21].mxu0  ;;  %v6484_v5 = vld [vmem:[#allocation8 + $0x6a0] ss:$8 sps:$4 sm:$0xff]   ;;  %v6485_v50 = vld [vmem:[#allocation8 + $0x6b4] ss:$8 sps:$4 sm:$0xff]  }
 0x8c7   :  { %v6488_v8 = vld [vmem:[#allocation8 + $0x6c4] ss:$8 sps:$4 sm:$0xff]  }
 0x8c8   :  { %v4357_v10 = vmul.f32 -1.442695, %v2324_v45  ;;  %v6487_v45 = vld [vmem:[#allocation8 + $0x6b0] ss:$8 sps:$4 sm:$0xff]  }
 0x8ca   :  { %6740 = vpow2.f32 %v4357_v10  ;;  %v6490_v10 = vld [vmem:[#allocation8 + $0x6c0] ss:$8 sps:$4 sm:$0xff]  }
 0x8d4   :  { %v6741_v41 = vpop.eup %6740 }
 0x8d5   :  { %v2330_v12 = vadd.f32 1.0, %v6741_v41  ;;  %v6491_v41 = vld [vmem:[#allocation8 + $0x6d4] ss:$8 sps:$4 sm:$0xff]  }
 0x8d7   :  { %6742 = vrcp.f32 %v2330_v12  ;;  %v6493_v12 = vld [vmem:[#allocation8 + $0x6d0] ss:$8 sps:$4 sm:$0xff]  }
 0x8e1   :  { %v6743_v13 = vpop.eup %6742 }
 0x8e2   :  { %4358 = vmatmul.mubr.msk.f32.vlgmr.msra.gmra.mrb[18].mxu1 %vm384_vm1, %v6743_v13  ;;  %v6494_v13 = vld [vmem:[#allocation8 + $0x6e4] ss:$8 sps:$4 sm:$0xff]  }
 0x8e3   :  { %2491 = vmatprep.mubr.f32.mxu1 %v7039_v0 }
 0x9b5   :  { %v2402_v16 = vpop.f32.mrb[18].mxu1 }
 0x9b6   :  { %v2404_v24 = vpop.f32.mrb[19].mxu1 }
 0x9b7   :  { %4359 = vmatprep.subr.msk.mxu1 %vm2420_vm9, %v2404_v24  ;;  %v6499_v24 = vld [vmem:[#allocation8 + $0x6f0] ss:$8 sps:$4 sm:$0xff]  }
 0x9b8   :  { %4360 = vmatpush1.msk.msra.mxu1 %vm2420_vm9, %v2402_v16  ;;  %v6496_v16 = vld [vmem:[#allocation8 + $0x6e0] ss:$8 sps:$4 sm:$0xff]  }
 0x9b9   :  { %4361 = vmatmul.mubr.msk.f32.vlgmr.msra.gmra.mrb[20].mxu1 %vm2407_vm10, %v4475_v20  ;;  %5174 = vmatprep.subr.bf16.mxu1 %v6452_v22  ;;  %v6497_v22 = vld [vmem:[#allocation8 + $0x6f4] ss:$8 sps:$4 sm:$0xff]  }
 0x9ba   :  { %2497 = vmatprep.mubr.f32.mxu1 %v7039_v0  ;;  %5176 = vmatpush1.bf16.msra.mxu1 %v6454_v28  ;;  %v6500_v28 = vld [vmem:[#allocation8 + $0x704] ss:$8 sps:$4 sm:$0xff]  }
 0x9bb   :  { %5178 = vmatprep.subr.bf16.mxu1 %v6455_v29 }
 0x9bd   :  { %4362 = vmatmul.mubr.msk.f32.gmra.mrb[22].mxu1 %vm2407_vm10, %v4476_v31 }
 0x9be   :  { %2503 = vmatprep.mubr.f32.mxu1 %v7039_v0  ;;  %5180 = vmatpush1.bf16.msra.mxu1 %v6457_v42 }
 0x9bf   :  { %5182 = vmatprep.subr.bf16.mxu1 %v6458_v43 }
 0x9c1   :  { %4363 = vmatmul.mubr.msk.f32.gmra.mrb[24].mxu1 %vm2407_vm10, %v4479_v51 }
 0x9c2   :  { %2509 = vmatprep.mubr.f32.mxu1 %v7039_v0  ;;  %5184 = vmatpush1.bf16.msra.mxu1 %v6460_v52 }
 0x9c3   :  { %5186 = vmatprep.subr.bf16.mxu1 %v6461_v53 }
 0x9c5   :  { %4364 = vmatmul.mubr.msk.f32.gmra.mrb[26].mxu1 %vm2407_vm10, %v4480_v54 }
 0x9c6   :  { %5188 = vmatpush1.bf16.msra.mxu1 %v6463_v57 }
 0x9c7   :  { %5190 = vmatprep.subr.bf16.mxu1 %v6464_v59 }
 0x9ca   :  { %5192 = vmatpush1.bf16.msra.mxu1 %v6466_v60 }
 0x9cb   :  { %5194 = vmatprep.subr.bf16.mxu1 %v6467_v61 }
 0x9ce   :  { %5196 = vmatpush1.bf16.msra.mxu1 %v6469_v62 }
 0x9cf   :  { %5198 = vmatprep.subr.bf16.mxu1 %v6470_v63 }
 0x9d2   :  { %5200 = vmatpush1.bf16.msra.mxu1 %v6472_v1 }
 0x9d3   :  { %5202 = vmatprep.subr.bf16.mxu1 %v6473_v3 }
 0x9d6   :  { %5204 = vmatpush1.bf16.msra.mxu1 %v6475_v49 }
 0x9d7   :  { %5206 = vmatprep.subr.bf16.mxu1 %v6476_v2 }
 0x9da   :  { %5208 = vmatpush1.bf16.msra.mxu1 %v6478_v55 }
 0x9db   :  { %5210 = vmatprep.subr.bf16.mxu1 %v6479_v56 }
 0x9de   :  { %5212 = vmatpush1.bf16.msra.mxu1 %v6481_v38 }
 0x9df   :  { %5214 = vmatprep.subr.bf16.mxu1 %v6482_v4 }
 0x9e2   :  { %5216 = vmatpush1.bf16.msra.mxu1 %v6484_v5 }
 0x9e3   :  { %5218 = vmatprep.subr.bf16.mxu1 %v6485_v50 }
 0x9e6   :  { %5220 = vmatpush1.bf16.msra.mxu1 %v6487_v45 }
 0x9e7   :  { %5222 = vmatprep.subr.bf16.mxu1 %v6488_v8 }
 0x9ea   :  { %5224 = vmatpush1.bf16.msra.mxu1 %v6490_v10 }
 0x9eb   :  { %5226 = vmatprep.subr.bf16.mxu1 %v6491_v41 }
 0x9ee   :  { %5228 = vmatpush1.bf16.msra.mxu1 %v6493_v12  ;;  %v6502_v12 = vld [vmem:[#allocation8 + $0x700] ss:$8 sps:$4 sm:$0xff]  }
 0x9ef   :  { %5230 = vmatprep.subr.bf16.mxu1 %v6494_v13 }
 0x9f2   :  { %5232 = vmatpush1.bf16.msra.mxu1 %v6496_v16  ;;  %v6503_v16 = vld [vmem:[#allocation8 + $0x714] ss:$8 sps:$4 sm:$0xff]  }
 0x9f3   :  { %5234 = vmatprep.subr.bf16.mxu1 %v6497_v22 }
 0x9f6   :  { %5236 = vmatpush1.bf16.msra.mxu1 %v6499_v24 }
 0x9f7   :  { %5238 = vmatprep.subr.bf16.mxu1 %v6500_v28 }
 0xa8c   :  { %v2493_v29 = vpop.f32.mrb[20].mxu1 }
 0xa8d   :  { %v2495_v42 = vpop.f32.mrb[21].mxu1  ;;  %v2516_v53 = vmul.f32 %v7527_v18, %v2493_v29 }
 0xa8e   :  { %v2517_v57 = vmul.f32 %v7523_v48, %v2495_v42  ;;  %v6505_v42 = vld [vmem:[#allocation8 + $0x710] ss:$8 sps:$4 sm:$0xff]  }
 0xa8f   :  { %v2524_v63 = vadd.f32 %v2516_v53, %v7327_v19 }
 0xa90   :  { %v2499_v43 = vpop.f32.mrb[22].mxu1  ;;  %v2525_v1 = vadd.f32 %v2517_v57, %v7330_v21 }
 0xa91   :  { %v2501_v52 = vpop.f32.mrb[23].mxu1  ;;  %v2518_v49 = vmul.f32 %v7521_v15, %v2499_v43  ;;  %v7707_v38 = vmax.f32 %v2524_v63, 0.0  ;;  %v6506_v43 = vld [vmem:[#allocation8 + $0x724] ss:$8 sps:$4 sm:$0xff]   ;;  %v6511_v63 = vld [vmem:[#allocation8 + $0x730] ss:$8 sps:$4 sm:$0xff]  }
 0xa92   :  { %v2519_v61 = vmul.f32 %v7525_v17, %v2501_v52 }
 0xa93   :  { %v2526_v15 = vadd.f32 %v2518_v49, %v7348_v34  ;;  %v6596_v49 = vld [vmem:[#allocation8 + $0x904] ss:$8 sps:$4 sm:$0xff]  }
 0xa94   :  { %v2505_v59 = vpop.f32.mrb[24].mxu1  ;;  %v2527_v48 = vadd.f32 %v2519_v61, %v7334_v25  ;;  %v6509_v61 = vld [vmem:[#allocation8 + $0x734] ss:$8 sps:$4 sm:$0xff]   ;;  %5366 = vmatprep.subr.bf16.mxu0 %v6596_v49  ;;  %v6541_v49 = vld [vmem:[#allocation8 + $0x7d0] ss:$8 sps:$4 sm:$0xff]  }
 0xa95   :  { %v2507_v60 = vpop.f32.mrb[25].mxu1  ;;  %v2520_v2 = vmul.f32 %v7539_v37, %v2505_v59  ;;  %v7727_v50 = vmax.f32 %v2526_v15, 0.0  ;;  %v6508_v59 = vld [vmem:[#allocation8 + $0x720] ss:$8 sps:$4 sm:$0xff]  }
 0xa96   :  { %v2521_v62 = vmul.f32 %v7535_v32, %v2507_v60  ;;  %v7710_v32 = vmax.f32 %v2525_v1, 0.0  ;;  %v7717_v4 = vmax.f32 %v2527_v48, 0.0  ;;  %v6512_v1 = vld [vmem:[#allocation8 + $0x744] ss:$8 sps:$4 sm:$0xff]   ;;  %v6515_v48 = vld [vmem:[#allocation8 + $0x754] ss:$8 sps:$4 sm:$0xff]  }
 0xa97   :  { %v2528_v37 = vadd.f32 %v2520_v2, %v7350_v35  ;;  %v2542_v22 = vrot.slane %v7727_v50, 7  ;;  %v6598_v2 = vld [vmem:[#allocation8 + $0x900] ss:$8 sps:$4 sm:$0xff]  }
 0xa98   :  { %v2511_v3 = vpop.f32.mrb[26].mxu1  ;;  %v2529_v56 = vadd.f32 %v2521_v62, %v7336_v26  ;;  %v2541_v5 = vrot.slane %v7710_v32, 7  ;;  %v2543_v8 = vrot.slane %v7717_v4, 7  ;;  %5368 = vmatpush1.bf16.msra.mxu0 %v6598_v2  ;;  %v6604_v15 = vld [vmem:[#allocation8 + $0x920] ss:$8 sps:$4 sm:$0xff]  }
 0xa99   :  { %v2522_v55 = vmul.f32 %v7533_v30, %v2511_v3  ;;  %v2513_v18 = vpop.f32.mrb[27].mxu1  ;;  %v7729_v34 = vmax.f32 %v2528_v37, 0.0  ;;  %v6605_v37 = vld [vmem:[#allocation8 + $0x934] ss:$8 sps:$4 sm:$0xff]   ;;  %v6542_v2 = vld [vmem:[#allocation8 + $0x7e4] ss:$8 sps:$4 sm:$0xff]  }
 0xa9a   :  { %v2523_v17 = vmul.f32 %v7537_v36, %v2513_v18  ;;  %v7719_v25 = vmax.f32 %v2529_v56, 0.0  ;;  %v2540_v36 = vrot.slane %v7707_v38, 7  ;;  %v2553_v28 = vsel %vm772_vm3, %v2541_v5, %v2543_v8  ;;  %v6514_v18 = vld [vmem:[#allocation8 + $0x740] ss:$8 sps:$4 sm:$0xff]   ;;  %v6601_v56 = vld [vmem:[#allocation8 + $0x910] ss:$8 sps:$4 sm:$0xff]  }
 0xa9b   :  { %v2530_v19 = vadd.f32 %v2522_v55, %v7332_v23  ;;  %v2544_v24 = vrot.slane %v7729_v34, 7  ;;  %v6599_v55 = vld [vmem:[#allocation8 + $0x914] ss:$8 sps:$4 sm:$0xff]  }
 0xa9c   :  { %v2531_v21 = vadd.f32 %v2523_v17, %v7338_v27  ;;  %v2545_v10 = vrot.slane %v7719_v25, 7  ;;  %v2552_v52 = vsel %vm772_vm3, %v2540_v36, %v2542_v22  ;;  %5370 = vmatprep.subr.bf16.mxu0 %v6599_v55  ;;  %v6602_v17 = vld [vmem:[#allocation8 + $0x924] ss:$8 sps:$4 sm:$0xff]   ;;  %v6628_v55 = vld [vmem:[#allocation8 + $0x9a0] ss:$8 sps:$4 sm:$0xff]  }
 0xa9d   :  { %v7715_v30 = vmax.f32 %v2530_v19, 0.0  ;;  %v2550_v57 = vsel %vm772_vm3, %v2542_v22, %v2544_v24  ;;  %v6517_v19 = vld [vmem:[#allocation8 + $0x750] ss:$8 sps:$4 sm:$0xff]   ;;  %5372 = vmatpush1.bf16.msra.mxu0 %v6601_v56 }
 0xa9e   :  { %v7721_v26 = vmax.f32 %v2531_v21, 0.0  ;;  %v2551_v29 = vsel %vm772_vm3, %v2543_v8, %v2545_v10  ;;  %v2560_v60 = vmul.f32 %v7365_v47, %v2550_v57  ;;  %v6518_v21 = vld [vmem:[#allocation8 + $0x764] ss:$8 sps:$4 sm:$0xff]   ;;  %5374 = vmatprep.subr.bf16.mxu0 %v6602_v17  ;;  %v6610_v8 = vld [vmem:[#allocation8 + $0x940] ss:$8 sps:$4 sm:$0xff]  }
 0xa9f   :  { %v2546_v23 = vrot.slane %v7715_v30, 7  ;;  %v2561_v53 = vmul.f32 %v7365_v47, %v2551_v29  ;;  %v6529_v22 = vld [vmem:[#allocation8 + $0x790] ss:$8 sps:$4 sm:$0xff]   ;;  %v6617_v29 = vld [vmem:[#allocation8 + $0x974] ss:$8 sps:$4 sm:$0xff]  }
 0xaa0   :  { %v2547_v27 = vrot.slane %v7721_v26, 7  ;;  %v6535_v57 = vld [vmem:[#allocation8 + $0x7b0] ss:$8 sps:$4 sm:$0xff]   ;;  %v6548_v17 = vld [vmem:[#allocation8 + $0x804] ss:$8 sps:$4 sm:$0xff]  }
 0xaa1   :  { %v2554_v35 = vsel %vm772_vm3, %v2546_v23, %v2540_v36  ;;  %v2548_v3 = vsel %vm772_vm3, %v2544_v24, %v2546_v23  ;;  %v6520_v36 = vld [vmem:[#allocation8 + $0x760] ss:$8 sps:$4 sm:$0xff]   ;;  %v6521_v23 = vld [vmem:[#allocation8 + $0x774] ss:$8 sps:$4 sm:$0xff]   ;;  %5376 = vmatpush1.bf16.msra.mxu0 %v6604_v15  ;;  %v6530_v24 = vld [vmem:[#allocation8 + $0x7a4] ss:$8 sps:$4 sm:$0xff]  }
 0xaa2   :  { %v2555_v45 = vsel %vm772_vm3, %v2547_v27, %v2541_v5  ;;  %v2556_v13 = vmul.f32 %v7346_v33, %v2554_v35  ;;  %v2549_v62 = vsel %vm772_vm3, %v2545_v10, %v2547_v27  ;;  %v6607_v5 = vld [vmem:[#allocation8 + $0x930] ss:$8 sps:$4 sm:$0xff]   ;;  %5378 = vmatprep.subr.bf16.mxu0 %v6605_v37  ;;  %v6608_v27 = vld [vmem:[#allocation8 + $0x944] ss:$8 sps:$4 sm:$0xff]   ;;  %v6611_v10 = vld [vmem:[#allocation8 + $0x954] ss:$8 sps:$4 sm:$0xff]  }
 0xaa3   :  { %v2557_v41 = vmul.f32 %v7346_v33, %v2555_v45  ;;  %v6523_v35 = vld [vmem:[#allocation8 + $0x770] ss:$8 sps:$4 sm:$0xff]   ;;  %v6524_v45 = vld [vmem:[#allocation8 + $0x784] ss:$8 sps:$4 sm:$0xff]  }
 0xaa4   :  { %v6547_v56 = vld [vmem:[#allocation8 + $0x7f0] ss:$8 sps:$4 sm:$0xff]   ;;  %v6554_v37 = vld [vmem:[#allocation8 + $0x824] ss:$8 sps:$4 sm:$0xff]  }
 0xaa5   :  { %2954 = vmatprep.mubr.f32.mxu1 %v2557_v41  ;;  %5380 = vmatpush1.bf16.msra.mxu0 %v6607_v5  ;;  %v6526_v41 = vld [vmem:[#allocation8 + $0x780] ss:$8 sps:$4 sm:$0xff]   ;;  %v6553_v15 = vld [vmem:[#allocation8 + $0x810] ss:$8 sps:$4 sm:$0xff]   ;;  %v2567_v5 = vrot.slane %v7717_v4, 1 }
 0xaa6   :  { %2955 = vmatmul.mubr.f32.vlgmr.msra.gmra.mrb[28].mxu1 %v2556_v13  ;;  %5382 = vmatprep.subr.bf16.mxu0 %v6608_v27  ;;  %v6613_v13 = vld [vmem:[#allocation8 + $0x950] ss:$8 sps:$4 sm:$0xff]  }
 0xaa7   :  { %5240 = vmatpush1.bf16.msra.mxu1 %v6502_v12  ;;  %2960 = vmatprep.mubr.f32.mxu1 %v2553_v28  ;;  %v6527_v12 = vld [vmem:[#allocation8 + $0x794] ss:$8 sps:$4 sm:$0xff]   ;;  %v6616_v28 = vld [vmem:[#allocation8 + $0x960] ss:$8 sps:$4 sm:$0xff]   ;;  %v6559_v27 = vld [vmem:[#allocation8 + $0x830] ss:$8 sps:$4 sm:$0xff]  }
 0xaa8   :  { %5242 = vmatprep.subr.bf16.mxu1 %v6503_v16  ;;  %v6614_v16 = vld [vmem:[#allocation8 + $0x964] ss:$8 sps:$4 sm:$0xff]  }
 0xaa9   :  { %5384 = vmatpush1.bf16.msra.mxu0 %v6610_v8 }
 0xaaa   :  { %2961 = vmatmul.mubr.f32.gmra.mrb[30].mxu1 %v2552_v52  ;;  %5386 = vmatprep.subr.bf16.mxu0 %v6611_v10  ;;  %v6619_v52 = vld [vmem:[#allocation8 + $0x970] ss:$8 sps:$4 sm:$0xff]   ;;  %v6562_v10 = vld [vmem:[#allocation8 + $0x840] ss:$8 sps:$4 sm:$0xff]  }
 0xaab   :  { %5244 = vmatpush1.bf16.msra.mxu1 %v6505_v42  ;;  %2966 = vmatprep.mubr.f32.mxu1 %v2561_v53  ;;  %v6532_v42 = vld [vmem:[#allocation8 + $0x7a0] ss:$8 sps:$4 sm:$0xff]   ;;  %v6620_v53 = vld [vmem:[#allocation8 + $0x984] ss:$8 sps:$4 sm:$0xff]  }
 0xaac   :  { %5246 = vmatprep.subr.bf16.mxu1 %v6506_v43  ;;  %v6533_v43 = vld [vmem:[#allocation8 + $0x7b4] ss:$8 sps:$4 sm:$0xff]  }
 0xaad   :  { %5388 = vmatpush1.bf16.msra.mxu0 %v6613_v13  ;;  %v6566_v13 = vld [vmem:[#allocation8 + $0x864] ss:$8 sps:$4 sm:$0xff]  }
 0xaae   :  { %2967 = vmatmul.mubr.f32.gmra.mrb[32].mxu1 %v2560_v60  ;;  %5390 = vmatprep.subr.bf16.mxu0 %v6614_v16  ;;  %v6622_v60 = vld [vmem:[#allocation8 + $0x980] ss:$8 sps:$4 sm:$0xff]  }
 0xaaf   :  { %5248 = vmatpush1.bf16.msra.mxu1 %v6508_v59  ;;  %2972 = vmatprep.mubr.f32.mxu1 %v2549_v62  ;;  %v6536_v59 = vld [vmem:[#allocation8 + $0x7c4] ss:$8 sps:$4 sm:$0xff]   ;;  %v6538_v62 = vld [vmem:[#allocation8 + $0x7c0] ss:$8 sps:$4 sm:$0xff]  }
 0xab0   :  { %5250 = vmatprep.subr.bf16.mxu1 %v6509_v61  ;;  %v6623_v61 = vld [vmem:[#allocation8 + $0x994] ss:$8 sps:$4 sm:$0xff]   ;;  %v6568_v16 = vld [vmem:[#allocation8 + $0x860] ss:$8 sps:$4 sm:$0xff]  }
 0xab1   :  { %5392 = vmatpush1.bf16.msra.mxu0 %v6616_v28  ;;  %v6572_v28 = vld [vmem:[#allocation8 + $0x884] ss:$8 sps:$4 sm:$0xff]  }
 0xab2   :  { %2973 = vmatmul.mubr.f32.gmra.mrb[34].mxu1 %v2548_v3  ;;  %5394 = vmatprep.subr.bf16.mxu0 %v6617_v29  ;;  %v6626_v3 = vld [vmem:[#allocation8 + $0x9a4] ss:$8 sps:$4 sm:$0xff]   ;;  %v6574_v29 = vld [vmem:[#allocation8 + $0x880] ss:$8 sps:$4 sm:$0xff]  }
 0xab3   :  { %5252 = vmatpush1.bf16.msra.mxu1 %v6511_v63  ;;  %3043 = vmatprep.mubr.f32.mxu1 %v7710_v32  ;;  %v6539_v63 = vld [vmem:[#allocation8 + $0x7d4] ss:$8 sps:$4 sm:$0xff]  }
 0xab4   :  { %5254 = vmatprep.subr.bf16.mxu1 %v6512_v1  ;;  %v6625_v1 = vld [vmem:[#allocation8 + $0x990] ss:$8 sps:$4 sm:$0xff]  }
 0xab5   :  { %5396 = vmatpush1.bf16.msra.mxu0 %v6619_v52  ;;  %v6578_v52 = vld [vmem:[#allocation8 + $0x8a4] ss:$8 sps:$4 sm:$0xff]  }
 0xab6   :  { %5398 = vmatprep.subr.bf16.mxu0 %v6620_v53  ;;  %v6580_v53 = vld [vmem:[#allocation8 + $0x8a0] ss:$8 sps:$4 sm:$0xff]  }
 0xab7   :  { %5256 = vmatpush1.bf16.msra.mxu1 %v6514_v18  ;;  %v6544_v18 = vld [vmem:[#allocation8 + $0x7e0] ss:$8 sps:$4 sm:$0xff]  }
 0xab8   :  { %5258 = vmatprep.subr.bf16.mxu1 %v6515_v48  ;;  %v6545_v48 = vld [vmem:[#allocation8 + $0x7f4] ss:$8 sps:$4 sm:$0xff]  }
 0xab9   :  { %5400 = vmatpush1.bf16.msra.mxu0 %v6622_v60  ;;  %v6584_v60 = vld [vmem:[#allocation8 + $0x8c4] ss:$8 sps:$4 sm:$0xff]  }
 0xaba   :  { %5402 = vmatprep.subr.bf16.mxu0 %v6623_v61  ;;  %v6586_v61 = vld [vmem:[#allocation8 + $0x8c0] ss:$8 sps:$4 sm:$0xff]  }
 0xabb   :  { %5260 = vmatpush1.bf16.msra.mxu1 %v6517_v19  ;;  %v6550_v19 = vld [vmem:[#allocation8 + $0x800] ss:$8 sps:$4 sm:$0xff]  }
 0xabc   :  { %5262 = vmatprep.subr.bf16.mxu1 %v6518_v21  ;;  %v6551_v21 = vld [vmem:[#allocation8 + $0x814] ss:$8 sps:$4 sm:$0xff]  }
 0xabd   :  { %5404 = vmatpush1.bf16.msra.mxu0 %v6625_v1  ;;  %v6590_v1 = vld [vmem:[#allocation8 + $0x8e4] ss:$8 sps:$4 sm:$0xff]  }
 0xabe   :  { %5406 = vmatprep.subr.bf16.mxu0 %v6626_v3  ;;  %v6592_v3 = vld [vmem:[#allocation8 + $0x8e0] ss:$8 sps:$4 sm:$0xff]  }
 0xabf   :  { %5264 = vmatpush1.bf16.msra.mxu1 %v6520_v36  ;;  %v6556_v36 = vld [vmem:[#allocation8 + $0x820] ss:$8 sps:$4 sm:$0xff]  }
 0xac0   :  { %5266 = vmatprep.subr.bf16.mxu1 %v6521_v23  ;;  %v6557_v23 = vld [vmem:[#allocation8 + $0x834] ss:$8 sps:$4 sm:$0xff]  }
 0xac1   :  { %5408 = vmatpush1.bf16.msra.mxu0 %v6628_v55  ;;  %v6595_v55 = vld [vmem:[#allocation8 + $0x8f0] ss:$8 sps:$4 sm:$0xff]  }
 0xac3   :  { %5268 = vmatpush1.bf16.msra.mxu1 %v6523_v35  ;;  %v2565_v35 = vrot.slane %v7710_v32, 1 }
 0xac4   :  { %5270 = vmatprep.subr.bf16.mxu1 %v6524_v45  ;;  %v6560_v45 = vld [vmem:[#allocation8 + $0x844] ss:$8 sps:$4 sm:$0xff]  }
 0xac5   :  { %v2577_v8 = vsel %vm797_vm5, %v2565_v35, %v2567_v5 }
 0xac7   :  { %5272 = vmatpush1.bf16.msra.mxu1 %v6526_v41  ;;  %v6563_v41 = vld [vmem:[#allocation8 + $0x854] ss:$8 sps:$4 sm:$0xff]  }
 0xac8   :  { %5274 = vmatprep.subr.bf16.mxu1 %v6527_v12  ;;  %v6565_v12 = vld [vmem:[#allocation8 + $0x850] ss:$8 sps:$4 sm:$0xff]  }
 0xacb   :  { %5276 = vmatpush1.bf16.msra.mxu1 %v6529_v22  ;;  %v6569_v22 = vld [vmem:[#allocation8 + $0x874] ss:$8 sps:$4 sm:$0xff]  }
 0xacc   :  { %5278 = vmatprep.subr.bf16.mxu1 %v6530_v24  ;;  %v6571_v24 = vld [vmem:[#allocation8 + $0x870] ss:$8 sps:$4 sm:$0xff]  }
 0xacf   :  { %5280 = vmatpush1.bf16.msra.mxu1 %v6532_v42  ;;  %v6575_v42 = vld [vmem:[#allocation8 + $0x894] ss:$8 sps:$4 sm:$0xff]  }
 0xad0   :  { %5282 = vmatprep.subr.bf16.mxu1 %v6533_v43  ;;  %v6577_v43 = vld [vmem:[#allocation8 + $0x890] ss:$8 sps:$4 sm:$0xff]  }
 0xad3   :  { %5284 = vmatpush1.bf16.msra.mxu1 %v6535_v57  ;;  %v6581_v57 = vld [vmem:[#allocation8 + $0x8b4] ss:$8 sps:$4 sm:$0xff]  }
 0xad4   :  { %5286 = vmatprep.subr.bf16.mxu1 %v6536_v59  ;;  %v6583_v59 = vld [vmem:[#allocation8 + $0x8b0] ss:$8 sps:$4 sm:$0xff]  }
 0xad7   :  { %5288 = vmatpush1.bf16.msra.mxu1 %v6538_v62  ;;  %v6587_v62 = vld [vmem:[#allocation8 + $0x8d4] ss:$8 sps:$4 sm:$0xff]  }
 0xad8   :  { %5290 = vmatprep.subr.bf16.mxu1 %v6539_v63  ;;  %v6589_v63 = vld [vmem:[#allocation8 + $0x8d0] ss:$8 sps:$4 sm:$0xff]  }
 0xadb   :  { %5292 = vmatpush1.bf16.msra.mxu1 %v6541_v49  ;;  %v6593_v49 = vld [vmem:[#allocation8 + $0x8f4] ss:$8 sps:$4 sm:$0xff]  }
 0xadc   :  { %5294 = vmatprep.subr.bf16.mxu1 %v6542_v2  ;;  %v2569_v2 = vrot.slane %v7719_v25, 1 }
 0xadf   :  { %5296 = vmatpush1.bf16.msra.mxu1 %v6544_v18  ;;  %v2566_v18 = vrot.slane %v7727_v50, 1 }
 0xae0   :  { %5298 = vmatprep.subr.bf16.mxu1 %v6545_v48  ;;  %v2568_v48 = vrot.slane %v7729_v34, 1 }
 0xae3   :  { %5300 = vmatpush1.bf16.msra.mxu1 %v6547_v56  ;;  %v2575_v56 = vsel %vm797_vm5, %v2567_v5, %v2569_v2 }
 0xae4   :  { %5302 = vmatprep.subr.bf16.mxu1 %v6548_v17  ;;  %v2564_v17 = vrot.slane %v7707_v38, 1 }
 0xae6   :  { %3044 = vmatmul.mubr.f32.vlgmr.msra.gmra.mrb[28].mxu1 %v7707_v38 }
 0xae7   :  { %3049 = vmatprep.mubr.f32.mxu1 %v7717_v4  ;;  %5304 = vmatpush1.bf16.msra.mxu1 %v6550_v19  ;;  %v2576_v19 = vsel %vm797_vm5, %v2564_v17, %v2566_v18 }
 0xae8   :  { %5306 = vmatprep.subr.bf16.mxu1 %v6551_v21  ;;  %v2583_v21 = vmul.f32 %v7402_v46, %v2575_v56 }
 0xaea   :  { %3050 = vmatmul.mubr.f32.gmra.mrb[30].mxu1 %v7727_v50 }
 0xaeb   :  { %3055 = vmatprep.mubr.f32.mxu1 %v7719_v25  ;;  %5308 = vmatpush1.bf16.msra.mxu1 %v6553_v15  ;;  %v2574_v15 = vsel %vm797_vm5, %v2566_v18, %v2568_v48 }
 0xaec   :  { %5310 = vmatprep.subr.bf16.mxu1 %v6554_v37  ;;  %v2571_v37 = vrot.slane %v7721_v26, 1 }
 0xaee   :  { %3056 = vmatmul.mubr.f32.gmra.mrb[32].mxu1 %v7729_v34  ;;  %v2573_v5 = vsel %vm797_vm5, %v2569_v2, %v2571_v37 }
 0xaef   :  { %3061 = vmatprep.mubr.f32.mxu1 %v7721_v26  ;;  %5312 = vmatpush1.bf16.msra.mxu1 %v6556_v36  ;;  %v2582_v36 = vmul.f32 %v7402_v46, %v2574_v15 }
 0xaf0   :  { %5314 = vmatprep.subr.bf16.mxu1 %v6557_v23  ;;  %v2570_v23 = vrot.slane %v7715_v30, 1 }
 0xaf2   :  { %3062 = vmatmul.mubr.f32.gmra.mrb[34].mxu1 %v7715_v30 }
 0xaf3   :  { %5316 = vmatpush1.bf16.msra.mxu1 %v6559_v27  ;;  %3132 = vmatprep.mubr.f32.mxu1 %v2577_v8  ;;  %v2579_v27 = vsel %vm797_vm5, %v2571_v37, %v2565_v35  ;;  %v6632_v35 = vld [vmem:[#allocation8 + $0x9c4] ss:$8 sps:$4 sm:$0xff]  }
 0xaf4   :  { %5318 = vmatprep.subr.bf16.mxu1 %v6560_v45  ;;  %v2572_v45 = vsel %vm797_vm5, %v2568_v48, %v2570_v23  ;;  %v2587_v8 = vmul.f32 %v7420_v58, %v2579_v27 }
 0xaf7   :  { %5320 = vmatpush1.bf16.msra.mxu1 %v6562_v10  ;;  %v2578_v10 = vsel %vm797_vm5, %v2570_v23, %v2564_v17 }
 0xaf8   :  { %5322 = vmatprep.subr.bf16.mxu1 %v6563_v41  ;;  %v2586_v41 = vmul.f32 %v7420_v58, %v2578_v10 }
 0xafb   :  { %5324 = vmatpush1.bf16.msra.mxu1 %v6565_v12  ;;  %v6629_v12 = vld [vmem:[#allocation8 + $0x9b4] ss:$8 sps:$4 sm:$0xff]  }
 0xafc   :  { %5326 = vmatprep.subr.bf16.mxu1 %v6566_v13  ;;  %v6631_v13 = vld [vmem:[#allocation8 + $0x9b0] ss:$8 sps:$4 sm:$0xff]   ;;  %5410 = vmatprep.subr.bf16.mxu0 %v6629_v12 }
 0xafd   :  { %5412 = vmatpush1.bf16.msra.mxu0 %v6631_v13 }
 0xafe   :  { %5414 = vmatprep.subr.bf16.mxu0 %v6632_v35 }
 0xaff   :  { %5328 = vmatpush1.bf16.msra.mxu1 %v6568_v16  ;;  %v6634_v16 = vld [vmem:[#allocation8 + $0x9c0] ss:$8 sps:$4 sm:$0xff]  }
 0xb00   :  { %5330 = vmatprep.subr.bf16.mxu1 %v6569_v22  ;;  %v6635_v22 = vld [vmem:[#allocation8 + $0x9d4] ss:$8 sps:$4 sm:$0xff]  }
 0xb01   :  { %5416 = vmatpush1.bf16.msra.mxu0 %v6634_v16 }
 0xb02   :  { %5418 = vmatprep.subr.bf16.mxu0 %v6635_v22 }
 0xb03   :  { %5332 = vmatpush1.bf16.msra.mxu1 %v6571_v24  ;;  %v6637_v24 = vld [vmem:[#allocation8 + $0x9d0] ss:$8 sps:$4 sm:$0xff]  }
 0xb04   :  { %5334 = vmatprep.subr.bf16.mxu1 %v6572_v28  ;;  %v6638_v28 = vld [vmem:[#allocation8 + $0x9e4] ss:$8 sps:$4 sm:$0xff]  }
 0xb05   :  { %5420 = vmatpush1.bf16.msra.mxu0 %v6637_v24 }
 0xb06   :  { %5422 = vmatprep.subr.bf16.mxu0 %v6638_v28 }
 0xb07   :  { %5336 = vmatpush1.bf16.msra.mxu1 %v6574_v29  ;;  %v6640_v29 = vld [vmem:[#allocation8 + $0x9e0] ss:$8 sps:$4 sm:$0xff]  }
 0xb08   :  { %5338 = vmatprep.subr.bf16.mxu1 %v6575_v42  ;;  %v6641_v42 = vld [vmem:[#allocation8 + $0x9f4] ss:$8 sps:$4 sm:$0xff]  }
 0xb09   :  { %5424 = vmatpush1.bf16.msra.mxu0 %v6640_v29 }
 0xb0a   :  { %5426 = vmatprep.subr.bf16.mxu0 %v6641_v42  ;;  %v6646_v42 = vld [vmem:[#allocation8 + $0xa00] ss:$8 sps:$4 sm:$0xff]  }
 0xb0b   :  { %5340 = vmatpush1.bf16.msra.mxu1 %v6577_v43  ;;  %v6643_v43 = vld [vmem:[#allocation8 + $0x9f0] ss:$8 sps:$4 sm:$0xff]  }
 0xb0c   :  { %5342 = vmatprep.subr.bf16.mxu1 %v6578_v52  ;;  %v6644_v52 = vld [vmem:[#allocation8 + $0xa04] ss:$8 sps:$4 sm:$0xff]  }
 0xb0d   :  { %5428 = vmatpush1.bf16.msra.mxu0 %v6643_v43 }
 0xb0e   :  { %5430 = vmatprep.subr.bf16.mxu0 %v6644_v52  ;;  %v6647_v52 = vld [vmem:[#allocation8 + $0xa14] ss:$8 sps:$4 sm:$0xff]  }
 0xb0f   :  { %5344 = vmatpush1.bf16.msra.mxu1 %v6580_v53 }
 0xb10   :  { %5346 = vmatprep.subr.bf16.mxu1 %v6581_v57 }
 0xb13   :  { %5348 = vmatpush1.bf16.msra.mxu1 %v6583_v59  ;;  %v2878_v59 = vld [vmem:[#allocation10 + $0x4] sm:$0x3] }
 0xb14   :  { %5350 = vmatprep.subr.bf16.mxu1 %v6584_v60 }
 0xb17   :  { %5352 = vmatpush1.bf16.msra.mxu1 %v6586_v61  ;;  %v2883_v61 = vrot.slane %v2878_v59, %v7319_v9 }
 0xb18   :  { %5354 = vmatprep.subr.bf16.mxu1 %v6587_v62 }
 0xb1b   :  { %5356 = vmatpush1.bf16.msra.mxu1 %v6589_v63  ;;  %v2887_v63 = vrot.slane %v2878_v59, %v7322_v11 }
 0xb1c   :  { %5358 = vmatprep.subr.bf16.mxu1 %v6590_v1 }
 0xb1f   :  { %5360 = vmatpush1.bf16.msra.mxu1 %v6592_v3 }
 0xb20   :  { %5362 = vmatprep.subr.bf16.mxu1 %v6593_v49 }
 0xb23   :  { %5364 = vmatpush1.bf16.msra.mxu1 %v6595_v55 }
 0xb26   :  { %3133 = vmatmul.mubr.f32.vlgmr.msra.gmra.mrb[28].mxu1 %v2576_v19 }
 0xb27   :  { %3138 = vmatprep.mubr.f32.mxu1 %v2583_v21 }
 0xb2a   :  { %3139 = vmatmul.mubr.f32.gmra.mrb[30].mxu1 %v2582_v36 }
 0xb2b   :  { %3144 = vmatprep.mubr.f32.mxu1 %v2573_v5 }
 0xb2e   :  { %3145 = vmatmul.mubr.f32.gmra.mrb[32].mxu1 %v2572_v45 }
 0xb2f   :  { %3150 = vmatprep.mubr.f32.mxu1 %v2587_v8 }
 0xb32   :  { %3151 = vmatmul.mubr.f32.gmra.mrb[34].mxu1 %v2586_v41 }
 0xb33   :  { %3846 = vmatprep.mubr.f32.mxu1 %v7039_v0 }
 0xbf9   :  { %v3134_v53 = vpop.f32.mrb[28].mxu1 }
 0xbfa   :  { %v3136_v57 = vpop.f32.mrb[29].mxu1  ;;  %v5644_v3 = vadd.f32 %v3134_v53, %v2883_v61 }
 0xbfb   :  { %v5645_v2 = vadd.f32 %v3136_v57, %v2887_v63 }
 0xbfc   :  { %v7798_v56 = vmax.f32 %v5644_v3, 0.0  ;;  %v6652_v3 = vld [vmem:[#allocation8 + $0xa20] ss:$8 sps:$4 sm:$0xff]  }
 0xbfd   :  { %v3140_v60 = vpop.f32.mrb[30].mxu1  ;;  %v7800_v21 = vmax.f32 %v5645_v2, 0.0  ;;  %v6653_v2 = vld [vmem:[#allocation8 + $0xa34] ss:$8 sps:$4 sm:$0xff]  }
 0xbfe   :  { %v3142_v62 = vpop.f32.mrb[31].mxu1  ;;  %v5646_v37 = vadd.f32 %v3140_v60, %v2883_v61  ;;  %v3165_v8 = vrot.slane %v7798_v56, 7 }
 0xbff   :  { %v5647_v55 = vadd.f32 %v3142_v62, %v2887_v63  ;;  %v3166_v41 = vrot.slane %v7800_v21, 7  ;;  %v6650_v62 = vld [vmem:[#allocation8 + $0xa24] ss:$8 sps:$4 sm:$0xff]  }
 0xc00   :  { %v7814_v13 = vmax.f32 %v5646_v37, 0.0  ;;  %v6662_v37 = vld [vmem:[#allocation8 + $0xa64] ss:$8 sps:$4 sm:$0xff]  }
 0xc01   :  { %v3146_v1 = vpop.f32.mrb[32].mxu1  ;;  %v7804_v5 = vmax.f32 %v5647_v55, 0.0 }
 0xc02   :  { %v3148_v49 = vpop.f32.mrb[33].mxu1  ;;  %v5648_v36 = vadd.f32 %v3146_v1, %v2883_v61  ;;  %v3167_v53 = vrot.slane %v7814_v13, 7 }
 0xc03   :  { %v5649_v18 = vadd.f32 %v3148_v49, %v2887_v63  ;;  %v3168_v22 = vrot.slane %v7804_v5, 7 }
 0xc04   :  { %v7816_v35 = vmax.f32 %v5648_v36, 0.0  ;;  %v6664_v36 = vld [vmem:[#allocation8 + $0xa60] ss:$8 sps:$4 sm:$0xff]  }
 0xc05   :  { %v3152_v48 = vpop.f32.mrb[34].mxu1  ;;  %v7806_v27 = vmax.f32 %v5649_v18, 0.0  ;;  %v3178_v59 = vsel %vm772_vm3, %v3166_v41, %v3168_v22  ;;  %v6655_v18 = vld [vmem:[#allocation8 + $0xa30] ss:$8 sps:$4 sm:$0xff]  }
 0xc06   :  { %v5650_v17 = vadd.f32 %v3152_v48, %v2883_v61  ;;  %v3154_v19 = vpop.f32.mrb[35].mxu1  ;;  %v3169_v57 = vrot.slane %v7816_v35, 7  ;;  %v6649_v61 = vld [vmem:[#allocation8 + $0xa10] ss:$8 sps:$4 sm:$0xff]   ;;  %v6656_v48 = vld [vmem:[#allocation8 + $0xa44] ss:$8 sps:$4 sm:$0xff]  }
 0xc07   :  { %v5651_v15 = vadd.f32 %v3154_v19, %v2887_v63  ;;  %v3170_v24 = vrot.slane %v7806_v27, 7  ;;  %v6658_v19 = vld [vmem:[#allocation8 + $0xa40] ss:$8 sps:$4 sm:$0xff]  }
 0xc08   :  { %v7802_v23 = vmax.f32 %v5650_v17, 0.0  ;;  %v3175_v1 = vsel %vm772_vm3, %v3167_v53, %v3169_v57 }
 0xc09   :  { %v7808_v45 = vmax.f32 %v5651_v15, 0.0  ;;  %v3176_v60 = vsel %vm772_vm3, %v3168_v22, %v3170_v24  ;;  %v3185_v49 = vmul.f32 %v7365_v47, %v3175_v1  ;;  %v6661_v15 = vld [vmem:[#allocation8 + $0xa50] ss:$8 sps:$4 sm:$0xff]   ;;  %v6695_v1 = vld [vmem:[#allocation8 + $0xb14] ss:$8 sps:$4 sm:$0xff]  }
 0xc0a   :  { %v3171_v10 = vrot.slane %v7802_v23, 7  ;;  %v3186_v63 = vmul.f32 %v7365_v47, %v3176_v60  ;;  %v6659_v47 = vld [vmem:[#allocation8 + $0xa54] ss:$8 sps:$4 sm:$0xff]   ;;  %v6673_v22 = vld [vmem:[#allocation8 + $0xa90] ss:$8 sps:$4 sm:$0xff]  }
 0xc0b   :  { %v3172_v12 = vrot.slane %v7808_v45, 7  ;;  %v6688_v60 = vld [vmem:[#allocation8 + $0xae0] ss:$8 sps:$4 sm:$0xff]  }
 0xc0c   :  { %v3179_v16 = vsel %vm772_vm3, %v3171_v10, %v3165_v8  ;;  %v3173_v17 = vsel %vm772_vm3, %v3169_v57, %v3171_v10  ;;  %v6670_v10 = vld [vmem:[#allocation8 + $0xa80] ss:$8 sps:$4 sm:$0xff]   ;;  %v6685_v57 = vld [vmem:[#allocation8 + $0xad0] ss:$8 sps:$4 sm:$0xff]  }
 0xc0d   :  { %v3180_v28 = vsel %vm772_vm3, %v3172_v12, %v3166_v41  ;;  %v3181_v43 = vmul.f32 %v7346_v33, %v3179_v16  ;;  %v3174_v55 = vsel %vm772_vm3, %v3170_v24, %v3172_v12  ;;  %v6667_v41 = vld [vmem:[#allocation8 + $0xa70] ss:$8 sps:$4 sm:$0xff]   ;;  %v6668_v12 = vld [vmem:[#allocation8 + $0xa84] ss:$8 sps:$4 sm:$0xff]   ;;  %v6671_v16 = vld [vmem:[#allocation8 + $0xa94] ss:$8 sps:$4 sm:$0xff]  }
 0xc0e   :  { %v3182_v29 = vmul.f32 %v7346_v33, %v3180_v28  ;;  %v3177_v33 = vsel %vm772_vm3, %v3165_v8, %v3167_v53  ;;  %v6665_v8 = vld [vmem:[#allocation8 + $0xa74] ss:$8 sps:$4 sm:$0xff]   ;;  %v6674_v24 = vld [vmem:[#allocation8 + $0xaa4] ss:$8 sps:$4 sm:$0xff]   ;;  %v6676_v28 = vld [vmem:[#allocation8 + $0xaa0] ss:$8 sps:$4 sm:$0xff]  }
 0xc0f   :  { %v6683_v53 = vld [vmem:[#allocation8 + $0xad4] ss:$8 sps:$4 sm:$0xff]  }
 0xc10   :  { %3579 = vmatprep.mubr.f32.mxu0 %v3182_v29  ;;  %v6677_v29 = vld [vmem:[#allocation8 + $0xab4] ss:$8 sps:$4 sm:$0xff]  }
 0xc11   :  { %3580 = vmatmul.mubr.f32.vlgmr.msra.gmra.mrb[22].mxu0 %v3181_v43  ;;  %v6680_v43 = vld [vmem:[#allocation8 + $0xac4] ss:$8 sps:$4 sm:$0xff]  }
 0xc12   :  { %5432 = vmatpush1.bf16.msra.mxu0 %v6646_v42  ;;  %3585 = vmatprep.mubr.f32.mxu0 %v3178_v59  ;;  %v6679_v42 = vld [vmem:[#allocation8 + $0xab0] ss:$8 sps:$4 sm:$0xff]   ;;  %v6686_v59 = vld [vmem:[#allocation8 + $0xae4] ss:$8 sps:$4 sm:$0xff]  }
 0xc13   :  { %5434 = vmatprep.subr.bf16.mxu0 %v6647_v52  ;;  %v6682_v52 = vld [vmem:[#allocation8 + $0xac0] ss:$8 sps:$4 sm:$0xff]  }
 0xc15   :  { %3586 = vmatmul.mubr.f32.gmra.mrb[24].mxu0 %v3177_v33  ;;  %v6692_v33 = vld [vmem:[#allocation8 + $0xb04] ss:$8 sps:$4 sm:$0xff]  }
 0xc16   :  { %5436 = vmatpush1.bf16.msra.mxu0 %v6649_v61  ;;  %3591 = vmatprep.mubr.f32.mxu0 %v3186_v63  ;;  %v6689_v61 = vld [vmem:[#allocation8 + $0xaf4] ss:$8 sps:$4 sm:$0xff]   ;;  %v6694_v63 = vld [vmem:[#allocation8 + $0xb00] ss:$8 sps:$4 sm:$0xff]  }
 0xc17   :  { %5438 = vmatprep.subr.bf16.mxu0 %v6650_v62  ;;  %v6691_v62 = vld [vmem:[#allocation8 + $0xaf0] ss:$8 sps:$4 sm:$0xff]  }
 0xc19   :  { %3592 = vmatmul.mubr.f32.gmra.mrb[26].mxu0 %v3185_v49  ;;  %v6698_v49 = vld [vmem:[#allocation8 + $0xb24] ss:$8 sps:$4 sm:$0xff]  }
 0xc1a   :  { %5440 = vmatpush1.bf16.msra.mxu0 %v6652_v3  ;;  %3597 = vmatprep.mubr.f32.mxu0 %v3174_v55  ;;  %v6697_v3 = vld [vmem:[#allocation8 + $0xb10] ss:$8 sps:$4 sm:$0xff]   ;;  %v6701_v55 = vld [vmem:[#allocation8 + $0xb34] ss:$8 sps:$4 sm:$0xff]  }
 0xc1b   :  { %5442 = vmatprep.subr.bf16.mxu0 %v6653_v2  ;;  %v6700_v2 = vld [vmem:[#allocation8 + $0xb20] ss:$8 sps:$4 sm:$0xff]  }
 0xc1d   :  { %3598 = vmatmul.mubr.f32.gmra.mrb[28].mxu0 %v3173_v17  ;;  %v3190_v17 = vrot.slane %v7800_v21, 1 }
 0xc1e   :  { %5444 = vmatpush1.bf16.msra.mxu0 %v6655_v18  ;;  %3668 = vmatprep.mubr.f32.mxu0 %v7800_v21  ;;  %v3192_v18 = vrot.slane %v7804_v5, 1 }
 0xc1f   :  { %5446 = vmatprep.subr.bf16.mxu0 %v6656_v48  ;;  %v6703_v48 = vld [vmem:[#allocation8 + $0xb30] ss:$8 sps:$4 sm:$0xff]  }
 0xc22   :  { %5448 = vmatpush1.bf16.msra.mxu0 %v6658_v19  ;;  %v6704_v19 = vld [vmem:[#allocation8 + $0xb44] ss:$8 sps:$4 sm:$0xff]  }
 0xc23   :  { %5450 = vmatprep.subr.bf16.mxu0 %v6659_v47  ;;  %v3202_v47 = vsel %vm797_vm5, %v3190_v17, %v3192_v18 }
 0xc26   :  { %5452 = vmatpush1.bf16.msra.mxu0 %v6661_v15  ;;  %v6707_v15 = vld [vmem:[#allocation8 + $0xb54] ss:$8 sps:$4 sm:$0xff]  }
 0xc27   :  { %5454 = vmatprep.subr.bf16.mxu0 %v6662_v37  ;;  %v6709_v37 = vld [vmem:[#allocation8 + $0xb50] ss:$8 sps:$4 sm:$0xff]  }
 0xc2a   :  { %5456 = vmatpush1.bf16.msra.mxu0 %v6664_v36  ;;  %v6710_v36 = vld [vmem:[#allocation8 + $0xb64] ss:$8 sps:$4 sm:$0xff]  }
 0xc2b   :  { %5458 = vmatprep.subr.bf16.mxu0 %v6665_v8  ;;  %v6712_v8 = vld [vmem:[#allocation8 + $0xb60] ss:$8 sps:$4 sm:$0xff]  }
 0xc2e   :  { %5460 = vmatpush1.bf16.msra.mxu0 %v6667_v41  ;;  %v6713_v41 = vld [vmem:[#allocation8 + $0xb74] ss:$8 sps:$4 sm:$0xff]  }
 0xc2f   :  { %5462 = vmatprep.subr.bf16.mxu0 %v6668_v12  ;;  %v6715_v12 = vld [vmem:[#allocation8 + $0xb70] ss:$8 sps:$4 sm:$0xff]  }
 0xc32   :  { %5464 = vmatpush1.bf16.msra.mxu0 %v6670_v10  ;;  %v6716_v10 = vld [vmem:[#allocation8 + $0xb84] ss:$8 sps:$4 sm:$0xff]  }
 0xc33   :  { %5466 = vmatprep.subr.bf16.mxu0 %v6671_v16  ;;  %v6718_v16 = vld [vmem:[#allocation8 + $0xb80] ss:$8 sps:$4 sm:$0xff]  }
 0xc36   :  { %5468 = vmatpush1.bf16.msra.mxu0 %v6673_v22  ;;  %v6719_v22 = vld [vmem:[#allocation8 + $0xb94] ss:$8 sps:$4 sm:$0xff]  }
 0xc37   :  { %5470 = vmatprep.subr.bf16.mxu0 %v6674_v24  ;;  %v6721_v24 = vld [vmem:[#allocation8 + $0xb90] ss:$8 sps:$4 sm:$0xff]  }
 0xc3a   :  { %5472 = vmatpush1.bf16.msra.mxu0 %v6676_v28  ;;  %v6722_v28 = vld [vmem:[#allocation8 + $0xba4] ss:$8 sps:$4 sm:$0xff]  }
 0xc3b   :  { %5474 = vmatprep.subr.bf16.mxu0 %v6677_v29  ;;  %v6724_v29 = vld [vmem:[#allocation8 + $0xba0] ss:$8 sps:$4 sm:$0xff]  }
 0xc3e   :  { %5476 = vmatpush1.bf16.msra.mxu0 %v6679_v42  ;;  %v6725_v42 = vld [vmem:[#allocation8 + $0xbb4] ss:$8 sps:$4 sm:$0xff]  }
 0xc3f   :  { %5478 = vmatprep.subr.bf16.mxu0 %v6680_v43  ;;  %v6727_v43 = vld [vmem:[#allocation8 + $0xbb0] ss:$8 sps:$4 sm:$0xff]  }
 0xc42   :  { %5480 = vmatpush1.bf16.msra.mxu0 %v6682_v52  ;;  %v6728_v52 = vld [vmem:[#allocation8 + $0xbc4] ss:$8 sps:$4 sm:$0xff]  }
 0xc43   :  { %5482 = vmatprep.subr.bf16.mxu0 %v6683_v53  ;;  %v6730_v53 = vld [vmem:[#allocation8 + $0xbc0] ss:$8 sps:$4 sm:$0xff]  }
 0xc46   :  { %5484 = vmatpush1.bf16.msra.mxu0 %v6685_v57  ;;  %v6731_v57 = vld [vmem:[#allocation8 + $0xbd4] ss:$8 sps:$4 sm:$0xff]  }
 0xc47   :  { %5486 = vmatprep.subr.bf16.mxu0 %v6686_v59  ;;  %v6733_v59 = vld [vmem:[#allocation8 + $0xbd0] ss:$8 sps:$4 sm:$0xff]  }
 0xc4a   :  { %5488 = vmatpush1.bf16.msra.mxu0 %v6688_v60  ;;  %v6734_v60 = vld [vmem:[#allocation8 + $0xbe4] ss:$8 sps:$4 sm:$0xff]  }
 0xc4b   :  { %5490 = vmatprep.subr.bf16.mxu0 %v6689_v61  ;;  %v6736_v61 = vld [vmem:[#allocation8 + $0xbe0] ss:$8 sps:$4 sm:$0xff]  }
 0xc4e   :  { %5492 = vmatpush1.bf16.msra.mxu0 %v6691_v62  ;;  %v6737_v62 = vld [vmem:[#allocation8 + $0xbf4] ss:$8 sps:$4 sm:$0xff]  }
 0xc4f   :  { %5494 = vmatprep.subr.bf16.mxu0 %v6692_v33  ;;  %v3194_v33 = vrot.slane %v7806_v27, 1 }
 0xc51   :  { %3669 = vmatmul.mubr.f32.vlgmr.msra.gmra.mrb[22].mxu0 %v7798_v56 }
 0xc52   :  { %3674 = vmatprep.mubr.f32.mxu0 %v7804_v5  ;;  %5496 = vmatpush1.bf16.msra.mxu0 %v6694_v63  ;;  %v6706_v5 = vld [vmem:[#allocation8 + $0xb40] ss:$8 sps:$4 sm:$0xff]   ;;  %v6739_v63 = vld [vmem:[#allocation8 + $0xbf0] ss:$8 sps:$4 sm:$0xff]  }
 0xc53   :  { %5498 = vmatprep.subr.bf16.mxu0 %v6695_v1  ;;  %v3191_v1 = vrot.slane %v7814_v13, 1 }
 0xc55   :  { %3675 = vmatmul.mubr.f32.gmra.mrb[24].mxu0 %v7814_v13 }
 0xc56   :  { %3680 = vmatprep.mubr.f32.mxu0 %v7806_v27  ;;  %5500 = vmatpush1.bf16.msra.mxu0 %v6697_v3  ;;  %v3193_v3 = vrot.slane %v7816_v35, 1 }
 0xc57   :  { %5502 = vmatprep.subr.bf16.mxu0 %v6698_v49  ;;  %v3200_v49 = vsel %vm797_vm5, %v3192_v18, %v3194_v33 }
 0xc58   :  { %v3199_v13 = vsel %vm797_vm5, %v3191_v1, %v3193_v3 }
 0xc59   :  { %3681 = vmatmul.mubr.f32.gmra.mrb[26].mxu0 %v7816_v35  ;;  %v3196_v35 = vrot.slane %v7808_v45, 1  ;;  %v3207_v18 = vmul.f32 %v7402_v46, %v3199_v13 }
 0xc5a   :  { %3686 = vmatprep.mubr.f32.mxu0 %v7808_v45  ;;  %5504 = vmatpush1.bf16.msra.mxu0 %v6700_v2  ;;  %v3189_v2 = vrot.slane %v7798_v56, 1  ;;  %v6749_v56 = vld [vmem:[%s8082_s10] sm:$0xff]  }
 0xc5b   :  { %5506 = vmatprep.subr.bf16.mxu0 %v6701_v55  ;;  %v6748_v55 = vld [vmem:[%s8082_s10 + $0x40] sm:$0xff]   ;;  %v3198_v45 = vsel %vm797_vm5, %v3194_v33, %v3196_v35 }
 0xc5c   :  { %v3201_v27 = vsel %vm797_vm5, %v3189_v2, %v3191_v1 }
 0xc5d   :  { %3687 = vmatmul.mubr.f32.gmra.mrb[28].mxu0 %v7802_v23 }
 0xc5e   :  { %5508 = vmatpush1.bf16.msra.mxu0 %v6703_v48  ;;  %3757 = vmatprep.mubr.f32.mxu0 %v3202_v47  ;;  %v3208_v48 = vmul.f32 %v7402_v46, %v3200_v49  ;;  %v3195_v47 = vrot.slane %v7802_v23, 1  ;;  %v6751_v46 = vld [vmem:[%s8082_s10 + $0x8] sm:$0xff]  }
 0xc5f   :  { %5510 = vmatprep.subr.bf16.mxu0 %v6704_v19  ;;  %v6750_v19 = vld [vmem:[%s8082_s10 + $0x48] sm:$0xff]  }
 0xc60   :  { %v3197_v23 = vsel %vm797_vm5, %v3193_v3, %v3195_v47  ;;  %v3203_v21 = vsel %vm797_vm5, %v3195_v47, %v3189_v2  ;;  %v6765_v47 = vld [vmem:[#allocation16] ss:$8 sps:$4 sm:$0xff]  }
 0xc62   :  { %5512 = vmatpush1.bf16.msra.mxu0 %v6706_v5  ;;  %v3204_v5 = vsel %vm797_vm5, %v3196_v35, %v3190_v17  ;;  %v6753_v17 = vld [vmem:[%s8082_s10 + $0x10] sm:$0xff]  }
 0xc63   :  { %5514 = vmatprep.subr.bf16.mxu0 %v6707_v15  ;;  %v6752_v15 = vld [vmem:[%s8082_s10 + $0x50] sm:$0xff]  }
 0xc66   :  { %5516 = vmatpush1.bf16.msra.mxu0 %v6709_v37  ;;  %v3212_v37 = vmul.f32 %v7420_v58, %v3204_v5  ;;  %v3926_v5 = vld [vmem:[#allocation11 + $0x18] sm:$0xff] }
 0xc67   :  { %5518 = vmatprep.subr.bf16.mxu0 %v6710_v36  ;;  %v3211_v36 = vmul.f32 %v7420_v58, %v3203_v21  ;;  %v6757_v58 = vld [vmem:[%s8082_s10 + $0x20] sm:$0xff]  }
 0xc6a   :  { %5520 = vmatpush1.bf16.msra.mxu0 %v6712_v8  ;;  %v6754_v8 = vld [vmem:[%s8082_s10 + $0x58] sm:$0xff]  }
 0xc6b   :  { %5522 = vmatprep.subr.bf16.mxu0 %v6713_v41  ;;  %v6756_v41 = vld [vmem:[%s8082_s10 + $0x60] sm:$0xff]  }
 0xc6e   :  { %5524 = vmatpush1.bf16.msra.mxu0 %v6715_v12  ;;  %v6758_v12 = vld [vmem:[%s8082_s10 + $0x68] sm:$0xff]  }
 0xc6f   :  { %5526 = vmatprep.subr.bf16.mxu0 %v6716_v10  ;;  %v6759_v10 = vld [vmem:[%s8082_s10 + $0x28] sm:$0xff]  }
 0xc72   :  { %5528 = vmatpush1.bf16.msra.mxu0 %v6718_v16  ;;  %v6760_v16 = vld [vmem:[%s8082_s10 + $0x70] sm:$0xff]  }
 0xc73   :  { %5530 = vmatprep.subr.bf16.mxu0 %v6719_v22  ;;  %v6761_v22 = vld [vmem:[%s8082_s10 + $0x30] sm:$0xff]  }
 0xc76   :  { %5532 = vmatpush1.bf16.msra.mxu0 %v6721_v24  ;;  %v6762_v24 = vld [vmem:[%s8082_s10 + $0x78] sm:$0xff]  }
 0xc77   :  { %5534 = vmatprep.subr.bf16.mxu0 %v6722_v28  ;;  %v6763_v28 = vld [vmem:[%s8082_s10 + $0x38] sm:$0xff]  }
 0xc7a   :  { %5536 = vmatpush1.bf16.msra.mxu0 %v6724_v29  ;;  %v6764_v29 = vld [vmem:[#allocation16 + $0x4] ss:$8 sps:$4 sm:$0xff]  }
 0xc7b   :  { %5538 = vmatprep.subr.bf16.mxu0 %v6725_v42  ;;  %v3503_v42 = vld [vmem:[#allocation10 + $0x6] sm:$0x3] }
 0xc7e   :  { %5540 = vmatpush1.bf16.msra.mxu0 %v6727_v43 }
 0xc7f   :  { %5542 = vmatprep.subr.bf16.mxu0 %v6728_v52 }
 0xc82   :  { %5544 = vmatpush1.bf16.msra.mxu0 %v6730_v53  ;;  %v3512_v53 = vrot.slane %v3503_v42, %v7322_v11 }
 0xc83   :  { %5546 = vmatprep.subr.bf16.mxu0 %v6731_v57  ;;  %v3508_v57 = vrot.slane %v3503_v42, %v7319_v9  ;;  %v4378_v42 = vld [vmem:[%s8080_s8 + $0xd0] sm:$0xff] }
 0xc86   :  { %5548 = vmatpush1.bf16.msra.mxu0 %v6733_v59 }
 0xc87   :  { %5550 = vmatprep.subr.bf16.mxu0 %v6734_v60 }
 0xc8a   :  { %5552 = vmatpush1.bf16.msra.mxu0 %v6736_v61 }
 0xc8b   :  { %5554 = vmatprep.subr.bf16.mxu0 %v6737_v62 }
 0xc8e   :  { %5556 = vmatpush1.bf16.msra.mxu0 %v6739_v63 }
 0xc8f   :  { %5566 = vmatprep.subr.bf16.mxu0 %v6748_v55 }
 0xc91   :  { %3758 = vmatmul.mubr.f32.vlgmr.msra.gmra.mrb[22].mxu0 %v3201_v27 }
 0xc92   :  { %3763 = vmatprep.mubr.f32.mxu0 %v3208_v48  ;;  %5568 = vmatpush3.bf16.msra.mxu0 %v6749_v56 }
 0xc93   :  { %5570 = vmatprep.subr.bf16.mxu0 %v6750_v19 }
 0xc95   :  { %3764 = vmatmul.mubr.f32.gmra.mrb[24].mxu0 %v3207_v18 }
 0xc96   :  { %3769 = vmatprep.mubr.f32.mxu0 %v3198_v45  ;;  %5572 = vmatpush3.bf16.msra.mxu0 %v6751_v46  ;;  %v3925_v45 = vld [vmem:[#allocation11 + $0x10] sm:$0xff] }
 0xc97   :  { %5574 = vmatprep.subr.bf16.mxu0 %v6752_v15  ;;  %v5598_v46 = vpack.c.bf16 %v3926_v5, %v3925_v45  ;;  %v4369_v15 = vld [vmem:[%s8080_s8 + $0x88] sm:$0xff] }
 0xc99   :  { %3770 = vmatmul.mubr.f32.gmra.mrb[26].mxu0 %v3197_v23 }
 0xc9a   :  { %3775 = vmatprep.mubr.f32.mxu0 %v3212_v37  ;;  %5576 = vmatpush3.bf16.msra.mxu0 %v6753_v17 }
 0xc9b   :  { %5578 = vmatprep.subr.bf16.mxu0 %v6754_v8  ;;  %v4371_v8 = vld [vmem:[%s8080_s8 + $0x98] sm:$0xff] }
 0xc9d   :  { %3776 = vmatmul.mubr.f32.gmra.mrb[28].mxu0 %v3211_v36  ;;  %v4370_v36 = vld [vmem:[%s8080_s8 + $0x90] sm:$0xff] }
 0xc9e   :  { %5580 = vmatpush3.bf16.msra.mxu0 %v6755_v6  ;;  %v5604_v6 = vpack.c.bf16 %v4371_v8, %v4370_v36 }
 0xc9f   :  { %5582 = vmatprep.subr.bf16.mxu0 %v6756_v41  ;;  %v4372_v41 = vld [vmem:[%s8080_s8 + $0xa0] sm:$0xff] }
 0xca2   :  { %5584 = vmatpush3.bf16.msra.mxu0 %v6757_v58  ;;  %v4373_v58 = vld [vmem:[%s8080_s8 + $0xa8] sm:$0xff] }
 0xca3   :  { %5586 = vmatprep.subr.bf16.mxu0 %v6758_v12  ;;  %v5607_v12 = vpack.c.bf16 %v4373_v58, %v4372_v41 }
 0xca6   :  { %5588 = vmatpush3.bf16.msra.mxu0 %v6759_v10  ;;  %v4374_v10 = vld [vmem:[%s8080_s8 + $0xb0] sm:$0xff] }
 0xca7   :  { %5590 = vmatprep.subr.bf16.mxu0 %v6760_v16  ;;  %v4375_v16 = vld [vmem:[%s8080_s8 + $0xb8] sm:$0xff] }
 0xcaa   :  { %5592 = vmatpush3.bf16.msra.mxu0 %v6761_v22  ;;  %v5610_v22 = vpack.c.bf16 %v4375_v16, %v4374_v10 }
 0xcab   :  { %5594 = vmatprep.subr.bf16.mxu0 %v6762_v24  ;;  %v4376_v24 = vld [vmem:[%s8080_s8 + $0xc0] sm:$0xff] }
 0xcae   :  { %5596 = vmatpush3.bf16.msra.mxu0 %v6763_v28  ;;  %v4377_v28 = vld [vmem:[%s8080_s8 + $0xc8] sm:$0xff] }
 0xcaf   :  { %5625 = vmatprep.subr.bf16.mxu0 %v6764_v29  ;;  %v5613_v29 = vpack.c.bf16 %v4377_v28, %v4376_v24 }
 0xd64   :  { %v3759_v43 = vpop.f32.mrb[22].mxu0 }
 0xd65   :  { %v3761_v52 = vpop.f32.mrb[23].mxu0  ;;  %v7938_v63 = vadd.f32 %v3759_v43, %v3508_v57  ;;  %v4379_v43 = vld [vmem:[%s8080_s8 + $0xd8] sm:$0xff] }
 0xd66   :  { %v7934_v62 = vadd.f32 %v3761_v52, %v3512_v53  ;;  %v5616_v52 = vpack.c.bf16 %v4379_v43, %v4378_v42 }
 0xd68   :  { %v3765_v59 = vpop.f32.mrb[24].mxu0 }
 0xd69   :  { %v7932_v60 = vadd.f32 %v3765_v59, %v3508_v57  ;;  %v3767_v61 = vpop.f32.mrb[25].mxu0 }
 0xd6a   :  { %v7936_v33 = vadd.f32 %v3767_v61, %v3512_v53  ;;  %v4382_v61 = vld [vmem:[%s8080_s8 + $0xf0] sm:$0xff] }
 0xd6b   :  { %v5559_v49 = vpack.c.bf16 %v7932_v60, %v7938_v63 }
 0xd6c   :  { %v5557_v1 = vpack.c.bf16 %v7936_v33, %v7934_v62  ;;  %v3771_v3 = vpop.f32.mrb[26].mxu0 }
 0xd6d   :  { %v3773_v11 = vpop.f32.mrb[27].mxu0  ;;  %v7950_v13 = vadd.f32 %v3771_v3, %v3508_v57 }
 0xd6e   :  { %5558 = vmatprep.subr.bf16.mxu1 %v5557_v1  ;;  %v7946_v27 = vadd.f32 %v3773_v11, %v3512_v53  ;;  %v4383_v1 = vld [vmem:[%s8080_s8 + $0xf8] sm:$0xff] }
 0xd6f   :  { %5560 = vmatpush1.bf16.msra.mxu1 %v5559_v49  ;;  %v5622_v3 = vpack.c.bf16 %v4383_v1, %v4382_v61  ;;  %v4366_v49 = vld [vmem:[#allocation13 + $0x1] ss:$0 sm:$0xff] }
 0xd70   :  { %v3777_v9 = vpop.f32.mrb[28].mxu0 }
 0xd71   :  { %v7944_v2 = vadd.f32 %v3777_v9, %v3508_v57  ;;  %v3779_v55 = vpop.f32.mrb[29].mxu0  ;;  %v4381_v57 = vld [vmem:[%s8080_s8 + $0xe8] sm:$0xff] }
 0xd72   :  { %v7948_v48 = vadd.f32 %v3779_v55, %v3512_v53  ;;  %v4380_v53 = vld [vmem:[%s8080_s8 + $0xe0] sm:$0xff] }
 0xd73   :  { %v5563_v56 = vpack.c.bf16 %v7944_v2, %v7950_v13  ;;  %v5619_v59 = vpack.c.bf16 %v4381_v57, %v4380_v53 }
 0xd74   :  { %v5561_v35 = vpack.c.bf16 %v7948_v48, %v7946_v27 }
 0xd76   :  { %5562 = vmatprep.subr.bf16.mxu1 %v5561_v35 }
 0xd77   :  { %5564 = vmatpush1.bf16.msra.mxu1 %v5563_v56  ;;  %v4384_v56 = vld [vmem:[#allocation14 + $0x1] ss:$0 sm:$0xff] }
 0xd78   :  { %5597 = vmatprep.subr.bf16.mxu1 %v7040_v7 }
 0xd7a   :  { %4365 = vmatmul.mubr.msk.f32.vlgmr.msra.gmra.mrb[36].mxu1 %vm206_vm0, %v755_v44  ;;  %v4368_v44 = vld [vmem:[%s8080_s8 + $0x80] sm:$0xff]  ;;  %s7042_s8 = smov [#allocation19]  }
 0xd7b   :  { %4656 = vmatprep.mubr.msk.f32.mxu1 %vm7041_vm8, %v7039_v0  ;;  %5599 = vmatpush3.bf16.msra.mxu1 %v5598_v46  ;;  %v5601_v21 = vpack.c.bf16 %v4369_v15, %v4368_v44  ;;  %s4316_s7 = sshll.u32 %s7042_s8, 4  ;;  %s4317_s7 = int_to_ptr.vmem [resolvable:$true] %s4316_s7 }
 0xd7c   :  { %5600 = vmatprep.subr.bf16.mxu1 %v7040_v7  ;;  %s6986_s15 = scalar_lea.vmem %s4317_s7, 1024  ;;  %p6991_p11 = scmp.lt.s32.totalorder %s4317_s7, %s4317_s7 }
 0xd7d   :  { %p6987_p10 = scmp.ne.s32.totalorder %s4317_s7, %s6986_s15  ;;  %p6992_p12 = scmp.lt.s32.totalorder %s6986_s15, %s6986_s15 }
 0xd7f   :  { %p6993_p13 = por %p6992_p12, %p6991_p11 }
 0xd81   :  { %p6994_p0 = pnand %p6993_p13, %p6987_p10 }
 0xe4d   :  { %v3848_v18 = vpop.f32.mrb[36].mxu1 }
 0xe4e   :  { %v3850_v19 = vpop.f32.mrb[37].mxu1 }
 0xe4f   :  { %3917 = vmatprep.mubr.f32.mxu0 %v3850_v19 }
 0xe50   :  { %3918 = vmatmul.mubr.f32.vlgmr.msra.gmra.mrb[30].mxu0 %v3848_v18 }
 0xe51   :  { %5627 = vmatpush1.bf16.msra.mxu0 %v6765_v47  ;;  %4177 = vmatprep.mubr.f32.mxu0 %v7039_v0 }
 0xf23   :  { %v4587_v39 = vpop.f32.mrb[30].mxu0 }
 0xf24   :  { %v4588_v23 = vpop.f32.mrb[31].mxu0 }
 0xf25   :  { %v4589_v37 = vadd.f32 %v4588_v23, %v4587_v39 }
 0xf27   :  { %v3923_v17 = vmul.f32 0.00390625, %v4589_v37 }
 0xf29   :  { %4657 = vmatmul.mubr.msk.f32.vlgmr.msra.gmra.mrb[38].mxu1 %vm384_vm1, %v3923_v17 }
 0xf2a   :  { %5602 = vmatpush3.bf16.msra.mxu1 %v5601_v21  ;;  %4691 = vmatprep.mubr.msk.f32.mxu1 %vm7041_vm8, %v7039_v0 }
 0xf2b   :  { %5603 = vmatprep.subr.bf16.mxu1 %v7040_v7 }
 0xf2e   :  { %5605 = vmatpush3.bf16.msra.mxu1 %v5604_v6 }
 0xf2f   :  { %5606 = vmatprep.subr.bf16.mxu1 %v7040_v7 }
 0xf32   :  { %5608 = vmatpush3.bf16.msra.mxu1 %v5607_v12 }
 0xf33   :  { %5609 = vmatprep.subr.bf16.mxu1 %v7040_v7 }
 0xf36   :  { %5611 = vmatpush3.bf16.msra.mxu1 %v5610_v22 }
 0xf37   :  { %5612 = vmatprep.subr.bf16.mxu1 %v7040_v7 }
 0xf3a   :  { %5614 = vmatpush3.bf16.msra.mxu1 %v5613_v29 }
 0xf3b   :  { %5615 = vmatprep.subr.bf16.mxu1 %v7040_v7 }
 0xf3e   :  { %5617 = vmatpush3.bf16.msra.mxu1 %v5616_v52 }
 0xf3f   :  { %5618 = vmatprep.subr.bf16.mxu1 %v7040_v7 }
 0xf42   :  { %5620 = vmatpush3.bf16.msra.mxu1 %v5619_v59 }
 0xf43   :  { %5621 = vmatprep.subr.bf16.mxu1 %v7040_v7 }
 0xf46   :  { %5623 = vmatpush3.bf16.msra.mxu1 %v5622_v3 }
 0xffc   :  { %v4004_v11 = vpop.f32.mrb[38].mxu1 }
 0xffd   :  { %v4005_v9 = vadd.f32 %v4366_v49, %v4004_v11  ;;  %v4658_v55 = vpop.f32.mrb[39].mxu1 }
 0xfff   :  { %v4008_v35 = vmax.f32 %v4005_v9, 0.0 }
0x1001   :  { %4692 = vmatmul.mubr.f32.vlgmr.msra.gmra.mrb[40].mxu1 %v4008_v35 }
0x10d4   :  { %v4100_v18 = vpop.f32.mrb[40].mxu1 }
0x10d5   :  { %v4101_v19 = vadd.f32 %v4384_v56, %v4100_v18  ;;  %v4693_v7 = vpop.f32.mrb[41].mxu1 }
0x10d7   :  { %v4385_v47 = vmul.f32 -1.442695, %v4101_v19 }
0x10d9   :  { %6744 = vpow2.f32 %v4385_v47 }
0x10e3   :  { %v6745_v45 = vpop.eup %6744 }
0x10e4   :  { %v4107_v5 = vadd.f32 1.0, %v6745_v45 }
0x10e6   :  { %6746 = vrcp.f32 %v4107_v5 }
0x10f0   :  { %v6747_v46 = vpop.eup %6746 }
0x10f1   :  { %4386 = vmatmul.mubr.msk.f32.vlgmr.msra.gmra.mrb[32].mxu0 %vm384_vm1, %v6747_v46 }
0x10f2   :  { %4254 = vmatprep.mubr.f32.mxu0 %v7039_v0 }
0x11c4   :  { %v4179_v39 = vpop.f32.mrb[32].mxu0 }
0x11c5   :  { %v4181_v44 = vpop.f32.mrb[33].mxu0 }
0x11c6   :  { %4387 = vmatprep.subr.msk.mxu0 %vm2420_vm9, %v4181_v44 }
0x11c7   :  { %4388 = vmatpush1.msk.msra.mxu0 %vm2420_vm9, %v4179_v39 }
0x11c8   :  { %4389 = vmatmul.mubr.msk.f32.vlgmr.msra.gmra.mrb[34].mxu0 %vm2407_vm10, %v4475_v20 }
0x11c9   :  { %4260 = vmatprep.mubr.f32.mxu0 %v7039_v0 }
0x11cc   :  { %4390 = vmatmul.mubr.msk.f32.gmra.mrb[36].mxu0 %vm2407_vm10, %v4476_v31 }
0x11cd   :  { %4266 = vmatprep.mubr.f32.mxu0 %v7039_v0 }
0x11d0   :  { %4391 = vmatmul.mubr.msk.f32.gmra.mrb[38].mxu0 %vm2407_vm10, %v4479_v51 }
0x11d1   :  { %4272 = vmatprep.mubr.f32.mxu0 %v7039_v0 }
0x11d4   :  { %4392 = vmatmul.mubr.msk.f32.gmra.mrb[40].mxu0 %vm2407_vm10, %v4480_v54 }
0x129b   :  { %v4256_v15 = vpop.f32.mrb[34].mxu0 }
0x129c   :  { %v4279_v20 = vmul.f32 %v7938_v63, %v4256_v15  ;;  %v4258_v23 = vpop.f32.mrb[35].mxu0 }
0x129d   :  { %v4280_v14 = vmul.f32 %v7934_v62, %v4258_v23 }
0x129e   :  { %v4287_v31 = vadd.f32 %v4279_v20, %v7707_v38 }
0x129f   :  { %v4288_v37 = vadd.f32 %v4280_v14, %v7710_v32  ;;  %v4262_v21 = vpop.f32.mrb[36].mxu0 }
0x12a0   :  { %v4295_v17 = vmax.f32 %v4287_v31, 0.0  ;;  %v4281_v51 = vmul.f32 %v7932_v60, %v4262_v21  ;;  %v4264_v36 = vpop.f32.mrb[37].mxu0 }
0x12a1   :  { %v4296_v0 = vmax.f32 %v4288_v37, 0.0  ;;  %v4282_v40 = vmul.f32 %v7936_v33, %v4264_v36 }
0x12a2   :  { %4303 = vst [vmem:[#allocation19] sm:$0xff] %v4295_v17  ;;  %v4289_v54 = vadd.f32 %v4281_v51, %v7727_v50 }
0x12a3   :  { %4304 = vst [vmem:[#allocation19 + $0x8] sm:$0xff] %v4296_v0  ;;  %v4290_v63 = vadd.f32 %v4282_v40, %v7717_v4  ;;  %v4268_v8 = vpop.f32.mrb[38].mxu0 }
0x12a4   :  { %v4297_v62 = vmax.f32 %v4289_v54, 0.0  ;;  %v4283_v38 = vmul.f32 %v7950_v13, %v4268_v8  ;;  %v4270_v6 = vpop.f32.mrb[39].mxu0 }
0x12a5   :  { %v4298_v32 = vmax.f32 %v4290_v63, 0.0  ;;  %v4284_v41 = vmul.f32 %v7946_v27, %v4270_v6 }
0x12a6   :  { %4305 = vst [vmem:[#allocation19 + $0x10] sm:$0xff] %v4297_v62  ;;  %v4291_v60 = vadd.f32 %v4283_v38, %v7729_v34 }
0x12a7   :  { %4306 = vst [vmem:[#allocation19 + $0x18] sm:$0xff] %v4298_v32  ;;  %v4292_v33 = vadd.f32 %v4284_v41, %v7719_v25  ;;  %v4274_v58 = vpop.f32.mrb[40].mxu0 }
0x12a8   :  { %v4299_v12 = vmax.f32 %v4291_v60, 0.0  ;;  %v4285_v50 = vmul.f32 %v7944_v2, %v4274_v58  ;;  %v4276_v10 = vpop.f32.mrb[41].mxu0 }
0x12a9   :  { %v4300_v4 = vmax.f32 %v4292_v33, 0.0  ;;  %v4286_v16 = vmul.f32 %v7948_v48, %v4276_v10 }
0x12aa   :  { %4307 = vst [vmem:[#allocation19 + $0x20] sm:$0xff] %v4299_v12  ;;  %v4293_v13 = vadd.f32 %v4285_v50, %v7715_v30 }
0x12ab   :  { %4308 = vst [vmem:[#allocation19 + $0x28] sm:$0xff] %v4300_v4  ;;  %v4294_v27 = vadd.f32 %v4286_v16, %v7721_v26 }
0x12ac   :  { %v4301_v34 = vmax.f32 %v4293_v13, 0.0 }
0x12ad   :  { %v4302_v22 = vmax.f32 %v4294_v27, 0.0 }
0x12ae   :  { %4309 = vst [vmem:[#allocation19 + $0x30] sm:$0xff] %v4301_v34 }
0x12af   :  { %4310 = vst [vmem:[#allocation19 + $0x38] sm:$0xff] %v4302_v22 }
0x12b0   :  { %6997 = shalt.err (!%p6994_p0)
}
0x12b1   :  { %s6998_s4 = scalar_lea.hbm %s8086_s14, 1024 }
0x12b2   :  { %p6999_p1 = scmp.ne.s32.totalorder %s8086_s14, %s6998_s4  ;;  %p7002_p2 = scmp.lt.u32.totalorder %s6998_s4, %s8086_s14 }
0x12b4   :  { %p7004_p3 = pnand %p7002_p2, %p6999_p1 }
0x12b6   :  { %7007 = shalt.err (!%p7004_p3)
}
0x12b7   :  { %4322 = dma.vmem_to_hbm [thread:$0]  %s4317_s7, 1024, %s8086_s14, [#allocation4], %s7023_s23, %s7023_s23, %s7024_s24  }
0x12b8   :  { %7020 = dma.done.wait [#allocation4], 1024  }
0x12b9   :  { %7021 = vsyncadd [#allocation4], 4294966272 }
0x12ba   :  { %4326 = vsyncpa [#allocation3], 1 }
0x12bb   :  { %4327 = vsyncpa [#allocation6], 1 }
0x12bc   :  { %4328 = vsyncpa [#allocation9], 1 }
0x12bd   :  { %4329 = vsyncpa [#allocation12], 1 }
0x12be   :  { %4330 = vsyncpa [#allocation15], 1 }
0x12bf   :  { %4331 = vsyncpa [#allocation18], 1 }
0x12c0   :  { %4332 = vsyncpa [#allocation4], 1 }

</bundles_post_ra>
